<compile_context>
chip_gen: v7x
topology: tpu7x:2x2x1
jax: 0.10.0
libtpu: 0.0.40
codegen_flags: <defaults>
</compile_context>

<pallas_src>
import numpy as np
import jax
import jax.numpy as jnp
from jax.experimental import pallas as pl
from jax.experimental.pallas import tpu as pltpu

# ------------------------------ configuration --------------------------------
B, S, NH, DH = 2, 8, 4, 128          # batch, seq, heads, head_dim (lane-aligned)
H = NH * DH                          # 512 hidden (scaled-down BioBERT stand-in)
FF = 2 * H                           # FFN width (stand-in)
R = 8                                # num_relations (module default)
RPAD = 128                           # lane-dense padded logits width
VOCAB = 64
BS = B * S
BF = jnp.bfloat16
F32 = jnp.float32


def _layernorm(x, g, b, eps=1e-12):
    mu = jnp.mean(x, axis=-1, keepdims=True)
    var = jnp.mean((x - mu) ** 2, axis=-1, keepdims=True)
    return (x - mu) * jax.lax.rsqrt(var + eps) * g + b


# ------------------------------- fused kernel ---------------------------------
def fused_kernel(epos_ref,                               # SMEM (4B,) int32 prefetch
                 x_ref, mask_ref,
                 wqkv_ref, bqkv_ref, wo_ref, bo_ref,
                 ln1g_ref, ln1b_ref,
                 w1_ref, b1_ref, w2_ref, b2_ref,
                 ln2g_ref, ln2b_ref,
                 wc1_cls_ref, wc1_e1_ref, wc1_e2_ref, bc1_ref,
                 wc2_ref, bc2_ref,
                 seq_ref, logits_ref):
    b = pl.program_id(0)
    x = x_ref[...]                                       # (S, H) f32, one example

    # ---- fused QKV: ONE (S,H)@(H,3H) bf16 MXU pass ---------------------------
    qkv = jnp.dot(x.astype(BF), wqkv_ref[...],
                  preferred_element_type=F32) + bqkv_ref[...]          # (S, 3H)

    def heads(t):                                        # (S,H) -> (NH,S,DH)
        return t.reshape(S, NH, DH).transpose(1, 0, 2)

    qh = heads(qkv[:, 0:H])
    kh = heads(qkv[:, H:2 * H])
    vh = heads(qkv[:, 2 * H:3 * H])

    # ---- per-example multi-head attention (key mask only, f32 softmax) ------
    key_mask = mask_ref[0]                               # (1, S) f32
    add_mask = jnp.where(key_mask > 0.5, 0.0, -1e9).astype(F32).reshape(1, 1, S)
    scale = 1.0 / float(np.sqrt(DH))
    scores = jnp.einsum('nqd,nkd->nqk', qh.astype(BF), kh.astype(BF),
                        preferred_element_type=F32) * scale            # (NH,S,S)
    scores = scores + add_mask
    m = jnp.max(scores, axis=-1, keepdims=True)
    e = jnp.exp(scores - m)
    p = e * pl.reciprocal(jnp.sum(e, axis=-1, keepdims=True), approx=True)
    ctx = jnp.einsum('nqk,nkd->nqd', p.astype(BF), vh.astype(BF),
                     preferred_element_type=F32)                        # (NH,S,DH)
    ctx = ctx.transpose(1, 0, 2).reshape(S, H)           # head concat -> (S, H)

    # ---- output projection: ONE (S,H)@(H,H) matmul ---------------------------
    attn = jnp.dot(ctx.astype(BF), wo_ref[...],
                   preferred_element_type=F32) + bo_ref[...]
    x1 = _layernorm(x + attn, ln1g_ref[...], ln1b_ref[...])

    # ---- FFN ------------------------------------------------------------------
    hid = jnp.dot(x1.astype(BF), w1_ref[...],
                  preferred_element_type=F32) + b1_ref[...]
    # TODO(synk): PyTorch/HF BERT uses exact erf GELU; the tanh approximation is
    #             used here (matches the in-script reference).
    hid = jax.nn.gelu(hid)
    ffn = jnp.dot(hid.astype(BF), w2_ref[...],
                  preferred_element_type=F32) + b2_ref[...]
    seq = _layernorm(x1 + ffn, ln2g_ref[...], ln2b_ref[...])            # (S, H)
    seq_ref[...] = seq                                    # last_hidden_state tile

    # ---- relation head for this example ---------------------------------------
    # gather CLS / averaged entity rows from the in-register `seq` via tiny
    # selection-row matmuls built from the prefetched positions.
    e1s = epos_ref[4 * b + 0]
    e1e = epos_ref[4 * b + 1]
    e2s = epos_ref[4 * b + 2]
    e2e = epos_ref[4 * b + 3]
    col = jax.lax.broadcasted_iota(jnp.int32, (1, S), 1)
    onehot = lambda pos: (col == pos).astype(F32)        # (1, S)
    cls_emb = jnp.dot(onehot(0), seq, preferred_element_type=F32)             # (1, H)
    e1_emb = jnp.dot(0.5 * (onehot(e1s) + onehot(e1e)), seq,
                     preferred_element_type=F32)
    e2_emb = jnp.dot(0.5 * (onehot(e2s) + onehot(e2e)), seq,
                     preferred_element_type=F32)

    # dropout -> identity (inference); classifier L1 uses split weights so no
    # in-kernel lane concat of [cls|e1|e2] is needed.
    hdn = (jnp.dot(cls_emb.astype(BF), wc1_cls_ref[...], preferred_element_type=F32)
           + jnp.dot(e1_emb.astype(BF), wc1_e1_ref[...], preferred_element_type=F32)
           + jnp.dot(e2_emb.astype(BF), wc1_e2_ref[...], preferred_element_type=F32)
           + bc1_ref[...])
    hdn = jnp.maximum(hdn, 0.0)                          # ReLU
    logits_ref[0] = (jnp.dot(hdn.astype(BF), wc2_ref[...],
                             preferred_element_type=F32) + bc2_ref[...])       # (1, RPAD)


# --------------------------------- wrapper ------------------------------------
def biobert_relation_forward(input_ids, attention_mask, entity1_pos, entity2_pos,
                             word_emb, pos_emb, enc_packed, head_packed):
    # embedding lookup + flattening is cheap glue, done in plain JAX
    x = (word_emb[input_ids] + pos_emb[None, :, :]).reshape(BS, H).astype(F32)
    mask = attention_mask.astype(F32).reshape(B, 1, S)
    # entity positions as a single flat 1-D int32 SMEM prefetch array:
    #   [e1s_0, e1e_0, e2s_0, e2e_0, e1s_1, ...]
    epos = jnp.concatenate([entity1_pos, entity2_pos], axis=1).reshape(-1).astype(jnp.int32)

    def rep(shape):                                      # grid-invariant weight block
        return pl.BlockSpec(shape, lambda b, epos_ref: (0,) * len(shape))

    in_specs = [
        pl.BlockSpec((S, H), lambda b, epos_ref: (b, 0)),        # x (per-example rows)
        pl.BlockSpec((1, 1, S), lambda b, epos_ref: (b, 0, 0)),  # attention mask
        rep((H, 3 * H)), rep((1, 3 * H)),                        # Wqkv (bf16), bqkv
        rep((H, H)), rep((1, H)),                                # Wo (bf16), bo
        rep((1, H)), rep((1, H)),                                # LN1 gamma, beta
        rep((H, FF)), rep((1, FF)),                              # W1 (bf16), b1
        rep((FF, H)), rep((1, H)),                               # W2 (bf16), b2
        rep((1, H)), rep((1, H)),                                # LN2 gamma, beta
        rep((H, H)), rep((H, H)), rep((H, H)), rep((1, H)),      # classifier L1 splits + bias
        rep((H, RPAD)), rep((1, RPAD)),                          # classifier L2 (lane-padded)
    ]
    out_specs = [
        pl.BlockSpec((S, H), lambda b, epos_ref: (b, 0)),        # sequence_output
        pl.BlockSpec((1, 1, RPAD), lambda b, epos_ref: (b, 0, 0)),
    ]

    grid_spec = pltpu.PrefetchScalarGridSpec(
        num_scalar_prefetch=1,
        grid=(B,),
        in_specs=in_specs,
        out_specs=out_specs,
    )

    seq_flat, logits_pad = pl.pallas_call(
        fused_kernel,
        out_shape=(jax.ShapeDtypeStruct((BS, H), F32),
                   jax.ShapeDtypeStruct((B, 1, RPAD), F32)),
        grid_spec=grid_spec,
        compiler_params=pltpu.CompilerParams(dimension_semantics=("parallel",)),
    )(epos, x, mask, *enc_packed, *head_packed)

    return seq_flat.reshape(B, S, H), logits_pad.reshape(B, RPAD)[:, :R]


# --------------------------- deterministic parameters --------------------------
def init_params(key):
    ks = jax.random.split(key, 12)
    std = 0.02
    word_emb = jax.random.normal(ks[0], (VOCAB, H), F32) * std
    pos_emb = jax.random.normal(ks[1], (S, H), F32) * std

    wq = jax.random.normal(ks[2], (H, H), F32) * std
    wk = jax.random.normal(ks[3], (H, H), F32) * std
    wv = jax.random.normal(ks[4], (H, H), F32) * std
    wo = jax.random.normal(ks[5], (H, H), F32) * std
    bq = bk = bv = bo = jnp.zeros((1, H), F32)
    ln1g, ln1b = jnp.ones((1, H), F32), jnp.zeros((1, H), F32)
    w1 = jax.random.normal(ks[6], (H, FF), F32) * std
    b1 = jnp.zeros((1, FF), F32)
    w2 = jax.random.normal(ks[7], (FF, H), F32) * std
    b2 = jnp.zeros((1, H), F32)
    ln2g, ln2b = jnp.ones((1, H), F32), jnp.zeros((1, H), F32)

    hw1 = jax.random.normal(ks[8], (3 * H, H), F32) * std
    hb1 = jax.random.normal(ks[9], (1, H), F32) * std
    hw2 = jax.random.normal(ks[10], (H, R), F32) * std
    hb2 = jax.random.normal(ks[11], (1, R), F32) * std

    enc_raw = (wq, bq, wk, bk, wv, bv, wo, bo, ln1g, ln1b, w1, b1, w2, b2, ln2g, ln2b)
    head_raw = (hw1, hb1, hw2, hb2)

    # ---- kernel-side packing (wrapper cost, paid once) ------------------------
    wqkv = jnp.concatenate([wq, wk, wv], axis=1).astype(BF)            # (H, 3H) bf16
    bqkv = jnp.concatenate([bq, bk, bv], axis=1)                       # (1, 3H) f32
    enc_packed = (wqkv, bqkv, wo.astype(BF), bo, ln1g, ln1b,
                  w1.astype(BF), b1, w2.astype(BF), b2, ln2g, ln2b)

    wc1_cls = hw1[0:H, :].astype(BF)                                   # classifier L1 splits
    wc1_e1 = hw1[H:2 * H, :].astype(BF)
    wc1_e2 = hw1[2 * H:3 * H, :].astype(BF)
    wc2 = jnp.zeros((H, RPAD), F32).at[:, :R].set(hw2).astype(BF)      # lane-dense pad
    bc2 = jnp.zeros((1, RPAD), F32).at[:, :R].set(hb2)
    head_packed = (wc1_cls, wc1_e1, wc1_e2, hb1, wc2, bc2)

    return word_emb, pos_emb, enc_raw, head_raw, enc_packed, head_packed


# -------------------------------- references -----------------------------------
def encoder_reference(x, mask3, enc_raw):
    (wq, bq, wk, bk, wv, bv, wo, bo, ln1g, ln1b, w1, b1, w2, b2, ln2g, ln2b) = enc_raw
    add_mask = (mask3 - 1.0) * 1e9                       # (B, 1, S) over keys
    q = x @ wq + bq
    k = x @ wk + bk
    v = x @ wv + bv
    split = lambda t: t.reshape(B, S, NH, DH).transpose(0, 2, 1, 3)
    qh, kh, vh = split(q), split(k), split(v)
    scores = jnp.einsum('bhqd,bhkd->bhqk', qh, kh) / np.sqrt(DH)
    scores = scores + add_mask[:, :, None, :]
    p = jax.nn.softmax(scores, axis=-1)
    ctx = jnp.einsum('bhqk,bhkd->bhqd', p, vh).transpose(0, 2, 1, 3).reshape(B, S, H)
    attn = ctx @ wo + bo
    x1 = _layernorm(x + attn, ln1g, ln1b)
    ffn = jax.nn.gelu(x1 @ w1 + b1) @ w2 + b2
    return _layernorm(x1 + ffn, ln2g, ln2b)


def head_reference(seq_out, e1_pos, e2_pos, head_raw):
    w1, b1, w2, b2 = head_raw
    idx = jnp.arange(B)
    cls_emb = seq_out[:, 0, :]
    e1 = (seq_out[idx, e1_pos[:, 0], :] + seq_out[idx, e1_pos[:, 1], :]) * 0.5
    e2 = (seq_out[idx, e2_pos[:, 0], :] + seq_out[idx, e2_pos[:, 1], :]) * 0.5
    combined = jnp.concatenate([cls_emb, e1, e2], axis=1)
    h = jnp.maximum(combined @ w1 + b1, 0.0)
    return h @ w2 + b2


# ----------------------------------- main ---------------------------------------
if __name__ == "__main__":
    key = jax.random.PRNGKey(0)
    k_in, k_par = jax.random.split(key)

    input_ids = jax.random.randint(k_in, (B, S), 0, VOCAB, dtype=jnp.int32)
    attention_mask = jnp.array([[1] * S, [1] * (S - 2) + [0, 0]], dtype=jnp.int32)
    entity1_pos = jnp.array([[1, 2], [2, 3]], dtype=jnp.int32)   # [batch, (start, end)]
    entity2_pos = jnp.array([[3, 4], [4, 5]], dtype=jnp.int32)

    (word_emb, pos_emb, enc_raw, head_raw,
     enc_packed, head_packed) = init_params(k_par)

    seq_out, logits = biobert_relation_forward(
        input_ids, attention_mask, entity1_pos, entity2_pos,
        word_emb, pos_emb, enc_packed, head_packed)
    seq_out, logits = jax.block_until_ready((seq_out, logits))

    # pure-JAX f32 reference of the full forward pass
    x3 = word_emb[input_ids] + pos_emb[None, :, :]
    mask3 = attention_mask.astype(F32).reshape(B, 1, S)
    seq_expected = encoder_reference(x3, mask3, enc_raw)
    logits_expected = head_reference(seq_expected, entity1_pos, entity2_pos, head_raw)

    # kernel uses bf16 MXU operands + approx softmax reciprocal -> modest tolerance
    np.testing.assert_allclose(np.asarray(seq_out), np.asarray(seq_expected),
                               rtol=1e-2, atol=1e-2)
    np.testing.assert_allclose(np.asarray(logits), np.asarray(logits_expected),
                               rtol=1e-2, atol=1e-2)

    assert logits.shape == (B, R) and logits.dtype == F32
    print("KERNEL_OK")
</pallas_src>

<mosaic_0001>
module attributes {stable_mosaic.version = 11 : i64} {
  func.func @fused_kernel(%arg0: i32, %arg1: memref<8xi32, #tpu.memory_space<smem>>, %arg2: memref<8x512xf32, #tpu.memory_space<vmem>>, %arg3: memref<1x1x8xf32, #tpu.memory_space<vmem>>, %arg4: memref<512x1536xbf16, #tpu.memory_space<vmem>>, %arg5: memref<1x1536xf32, #tpu.memory_space<vmem>>, %arg6: memref<512x512xbf16, #tpu.memory_space<vmem>>, %arg7: memref<1x512xf32, #tpu.memory_space<vmem>>, %arg8: memref<1x512xf32, #tpu.memory_space<vmem>>, %arg9: memref<1x512xf32, #tpu.memory_space<vmem>>, %arg10: memref<512x1024xbf16, #tpu.memory_space<vmem>>, %arg11: memref<1x1024xf32, #tpu.memory_space<vmem>>, %arg12: memref<1024x512xbf16, #tpu.memory_space<vmem>>, %arg13: memref<1x512xf32, #tpu.memory_space<vmem>>, %arg14: memref<1x512xf32, #tpu.memory_space<vmem>>, %arg15: memref<1x512xf32, #tpu.memory_space<vmem>>, %arg16: memref<512x512xbf16, #tpu.memory_space<vmem>>, %arg17: memref<512x512xbf16, #tpu.memory_space<vmem>>, %arg18: memref<512x512xbf16, #tpu.memory_space<vmem>>, %arg19: memref<1x512xf32, #tpu.memory_space<vmem>>, %arg20: memref<512x128xbf16, #tpu.memory_space<vmem>>, %arg21: memref<1x128xf32, #tpu.memory_space<vmem>>, %arg22: memref<8x512xf32, #tpu.memory_space<vmem>>, %arg23: memref<1x1x128xf32, #tpu.memory_space<vmem>>) attributes {dimension_semantics = [#tpu.dimension_semantics<parallel>], iteration_bounds = array<i64: 2>, scalar_prefetch = 1 : i64, scratch_operands = 0 : i64, tpu.core_type = #tpu.core_type<tc>, window_params = [{transform_indices = @transform_0, window_bounds = array<i64: 8, 512>}, {transform_indices = @transform_1, window_bounds = array<i64: 1, 1, 8>}, {pipeline_mode = #tpu.pipeline_mode<synchronous>, transform_indices = @transform_2, window_bounds = array<i64: 512, 1536>}, {pipeline_mode = #tpu.pipeline_mode<synchronous>, transform_indices = @transform_3, window_bounds = array<i64: 1, 1536>}, {pipeline_mode = #tpu.pipeline_mode<synchronous>, transform_indices = @transform_4, window_bounds = array<i64: 512, 512>}, {pipeline_mode = #tpu.pipeline_mode<synchronous>, transform_indices = @transform_5, window_bounds = array<i64: 1, 512>}, {pipeline_mode = #tpu.pipeline_mode<synchronous>, transform_indices = @transform_6, window_bounds = array<i64: 1, 512>}, {pipeline_mode = #tpu.pipeline_mode<synchronous>, transform_indices = @transform_7, window_bounds = array<i64: 1, 512>}, {pipeline_mode = #tpu.pipeline_mode<synchronous>, transform_indices = @transform_8, window_bounds = array<i64: 512, 1024>}, {pipeline_mode = #tpu.pipeline_mode<synchronous>, transform_indices = @transform_9, window_bounds = array<i64: 1, 1024>}, {pipeline_mode = #tpu.pipeline_mode<synchronous>, transform_indices = @transform_10, window_bounds = array<i64: 1024, 512>}, {pipeline_mode = #tpu.pipeline_mode<synchronous>, transform_indices = @transform_11, window_bounds = array<i64: 1, 512>}, {pipeline_mode = #tpu.pipeline_mode<synchronous>, transform_indices = @transform_12, window_bounds = array<i64: 1, 512>}, {pipeline_mode = #tpu.pipeline_mode<synchronous>, transform_indices = @transform_13, window_bounds = array<i64: 1, 512>}, {pipeline_mode = #tpu.pipeline_mode<synchronous>, transform_indices = @transform_14, window_bounds = array<i64: 512, 512>}, {pipeline_mode = #tpu.pipeline_mode<synchronous>, transform_indices = @transform_15, window_bounds = array<i64: 512, 512>}, {pipeline_mode = #tpu.pipeline_mode<synchronous>, transform_indices = @transform_16, window_bounds = array<i64: 512, 512>}, {pipeline_mode = #tpu.pipeline_mode<synchronous>, transform_indices = @transform_17, window_bounds = array<i64: 1, 512>}, {pipeline_mode = #tpu.pipeline_mode<synchronous>, transform_indices = @transform_18, window_bounds = array<i64: 512, 128>}, {pipeline_mode = #tpu.pipeline_mode<synchronous>, transform_indices = @transform_19, window_bounds = array<i64: 1, 128>}, {transform_indices = @transform_20, window_bounds = array<i64: 8, 512>}, {transform_indices = @transform_21, window_bounds = array<i64: 1, 1, 128>}]} {
    %c0 = arith.constant 0 : index
    %c0_0 = arith.constant 0 : index
    %0 = vector.load %arg2[%c0, %c0_0] : memref<8x512xf32, #tpu.memory_space<vmem>>, vector<8x512xf32>
    %1 = arith.truncf %0 : vector<8x512xf32> to vector<8x512xbf16>
    %c0_1 = arith.constant 0 : index
    %c0_2 = arith.constant 0 : index
    %2 = vector.load %arg4[%c0_1, %c0_2] : memref<512x1536xbf16, #tpu.memory_space<vmem>>, vector<512x1536xbf16>
    %cst = arith.constant dense<0.000000e+00> : vector<8x1536xf32>
    %3 = tpu.matmul %1, %2, %cst {dimension_numbers = #tpu.dot_dimension_numbers<[1], [0], [0], [1], [0, 0, 1, 1], [], []>} : vector<8x512xbf16>, vector<512x1536xbf16>, vector<8x1536xf32> -> vector<8x1536xf32>
    %c0_3 = arith.constant 0 : index
    %c0_4 = arith.constant 0 : index
    %4 = vector.load %arg5[%c0_3, %c0_4] : memref<1x1536xf32, #tpu.memory_space<vmem>>, vector<1x1536xf32>
    %5 = vector.broadcast %4 : vector<1x1536xf32> to vector<8x1536xf32>
    %6 = arith.addf %3, %5 : vector<8x1536xf32>
    %7 = vector.extract_strided_slice %6 {offsets = [0, 0], sizes = [8, 512], strides = [1, 1]} : vector<8x1536xf32> to vector<8x512xf32>
    %8 = vector.shape_cast %7 : vector<8x512xf32> to vector<8x4x128xf32>
    %9 = tpu.transpose %8, [1, 0, 2] : vector<8x4x128xf32> -> vector<4x8x128xf32>
    %10 = vector.extract_strided_slice %6 {offsets = [0, 512], sizes = [8, 512], strides = [1, 1]} : vector<8x1536xf32> to vector<8x512xf32>
    %11 = vector.shape_cast %10 : vector<8x512xf32> to vector<8x4x128xf32>
    %12 = tpu.transpose %11, [1, 0, 2] : vector<8x4x128xf32> -> vector<4x8x128xf32>
    %13 = vector.extract_strided_slice %6 {offsets = [0, 1024], sizes = [8, 512], strides = [1, 1]} : vector<8x1536xf32> to vector<8x512xf32>
    %14 = vector.shape_cast %13 : vector<8x512xf32> to vector<8x4x128xf32>
    %15 = tpu.transpose %14, [1, 0, 2] : vector<8x4x128xf32> -> vector<4x8x128xf32>
    %c0_5 = arith.constant 0 : index
    %c0_6 = arith.constant 0 : index
    %c0_7 = arith.constant 0 : index
    %16 = vector.load %arg3[%c0_5, %c0_6, %c0_7] : memref<1x1x8xf32, #tpu.memory_space<vmem>>, vector<1x1x8xf32>
    %17 = vector.shape_cast %16 : vector<1x1x8xf32> to vector<1x8xf32>
    %cst_8 = arith.constant 5.000000e-01 : f32
    %18 = vector.broadcast %cst_8 : f32 to vector<1x8xf32>
    %19 = arith.cmpf ogt, %17, %18 : vector<1x8xf32>
    %cst_9 = arith.constant 0.000000e+00 : f32
    %cst_10 = arith.constant -1.000000e+09 : f32
    %20 = vector.broadcast %cst_9 : f32 to vector<1x8xf32>
    %21 = vector.broadcast %cst_10 : f32 to vector<1x8xf32>
    %22 = arith.select %19, %20, %21 : vector<1x8xi1>, vector<1x8xf32>
    %23 = vector.shape_cast %22 : vector<1x8xf32> to vector<1x1x8xf32>
    %24 = arith.truncf %9 : vector<4x8x128xf32> to vector<4x8x128xbf16>
    %25 = arith.truncf %12 : vector<4x8x128xf32> to vector<4x8x128xbf16>
    "tpu.trace_start"() <{level = 10 : i32, message = "nqd,nkd->nqk"}> : () -> ()
    %cst_11 = arith.constant dense<0.000000e+00> : vector<4x8x8xf32>
    %26 = tpu.matmul %24, %25, %cst_11 {dimension_numbers = #tpu.dot_dimension_numbers<[2], [2], [1], [1], [0, 0, 0, 1, 1, 1], [0], [0]>} : vector<4x8x128xbf16>, vector<4x8x128xbf16>, vector<4x8x8xf32> -> vector<4x8x8xf32>
    "tpu.trace_stop"() : () -> ()
    %cst_12 = arith.constant 0.0883883461 : f32
    %27 = vector.broadcast %cst_12 : f32 to vector<4x8x8xf32>
    %28 = arith.mulf %26, %27 : vector<4x8x8xf32>
    %29 = vector.broadcast %23 : vector<1x1x8xf32> to vector<4x8x8xf32>
    %30 = arith.addf %28, %29 : vector<4x8x8xf32>
    %cst_13 = arith.constant dense<0xFF800000> : vector<4x8xf32>
    %31 = vector.multi_reduction <maximumf>, %30, %cst_13 [2] : vector<4x8x8xf32> to vector<4x8xf32>
    %32 = vector.shape_cast %31 : vector<4x8xf32> to vector<4x8x1xf32>
    %33 = vector.broadcast %32 : vector<4x8x1xf32> to vector<4x8x8xf32>
    %34 = arith.subf %30, %33 : vector<4x8x8xf32>
    %35 = math.exp %34 : vector<4x8x8xf32>
    %cst_14 = arith.constant dense<0.000000e+00> : vector<4x8xf32>
    %36 = vector.multi_reduction <add>, %35, %cst_14 [2] : vector<4x8x8xf32> to vector<4x8xf32>
    %37 = vector.shape_cast %36 : vector<4x8xf32> to vector<4x8x1xf32>
    %38 = tpu.reciprocal %37 {approx = true} : vector<4x8x1xf32> -> vector<4x8x1xf32>
    %39 = vector.broadcast %38 : vector<4x8x1xf32> to vector<4x8x8xf32>
    %40 = arith.mulf %35, %39 : vector<4x8x8xf32>
    %41 = arith.truncf %40 : vector<4x8x8xf32> to vector<4x8x8xbf16>
    %42 = arith.truncf %15 : vector<4x8x128xf32> to vector<4x8x128xbf16>
    "tpu.trace_start"() <{level = 10 : i32, message = "nqk,nkd->nqd"}> : () -> ()
    %cst_15 = arith.constant dense<0.000000e+00> : vector<4x8x128xf32>
    %43 = tpu.matmul %41, %42, %cst_15 {dimension_numbers = #tpu.dot_dimension_numbers<[2], [1], [1], [2], [0, 0, 0, 1, 1, 2], [0], [0]>} : vector<4x8x8xbf16>, vector<4x8x128xbf16>, vector<4x8x128xf32> -> vector<4x8x128xf32>
    "tpu.trace_stop"() : () -> ()
    %44 = tpu.transpose %43, [1, 0, 2] : vector<4x8x128xf32> -> vector<8x4x128xf32>
    %45 = vector.shape_cast %44 : vector<8x4x128xf32> to vector<8x512xf32>
    %46 = arith.truncf %45 : vector<8x512xf32> to vector<8x512xbf16>
    %c0_16 = arith.constant 0 : index
    %c0_17 = arith.constant 0 : index
    %47 = vector.load %arg6[%c0_16, %c0_17] : memref<512x512xbf16, #tpu.memory_space<vmem>>, vector<512x512xbf16>
    %cst_18 = arith.constant dense<0.000000e+00> : vector<8x512xf32>
    %48 = tpu.matmul %46, %47, %cst_18 {dimension_numbers = #tpu.dot_dimension_numbers<[1], [0], [0], [1], [0, 0, 1, 1], [], []>} : vector<8x512xbf16>, vector<512x512xbf16>, vector<8x512xf32> -> vector<8x512xf32>
    %c0_19 = arith.constant 0 : index
    %c0_20 = arith.constant 0 : index
    %49 = vector.load %arg7[%c0_19, %c0_20] : memref<1x512xf32, #tpu.memory_space<vmem>>, vector<1x512xf32>
    %50 = vector.broadcast %49 : vector<1x512xf32> to vector<8x512xf32>
    %51 = arith.addf %48, %50 : vector<8x512xf32>
    %52 = arith.addf %0, %51 : vector<8x512xf32>
    %c0_21 = arith.constant 0 : index
    %c0_22 = arith.constant 0 : index
    %53 = vector.load %arg8[%c0_21, %c0_22] : memref<1x512xf32, #tpu.memory_space<vmem>>, vector<1x512xf32>
    %c0_23 = arith.constant 0 : index
    %c0_24 = arith.constant 0 : index
    %54 = vector.load %arg9[%c0_23, %c0_24] : memref<1x512xf32, #tpu.memory_space<vmem>>, vector<1x512xf32>
    %cst_25 = arith.constant dense<0.000000e+00> : vector<8xf32>
    %55 = vector.multi_reduction <add>, %52, %cst_25 [1] : vector<8x512xf32> to vector<8xf32>
    %56 = vector.shape_cast %55 : vector<8xf32> to vector<8x1xf32>
    %cst_26 = arith.constant 5.120000e+02 : f32
    %57 = vector.broadcast %cst_26 : f32 to vector<8x1xf32>
    %58 = arith.divf %56, %57 : vector<8x1xf32>
    %59 = vector.broadcast %58 : vector<8x1xf32> to vector<8x512xf32>
    %60 = arith.subf %52, %59 : vector<8x512xf32>
    %61 = arith.mulf %60, %60 : vector<8x512xf32>
    %cst_27 = arith.constant dense<0.000000e+00> : vector<8xf32>
    %62 = vector.multi_reduction <add>, %61, %cst_27 [1] : vector<8x512xf32> to vector<8xf32>
    %63 = vector.shape_cast %62 : vector<8xf32> to vector<8x1xf32>
    %cst_28 = arith.constant 5.120000e+02 : f32
    %64 = vector.broadcast %cst_28 : f32 to vector<8x1xf32>
    %65 = arith.divf %63, %64 : vector<8x1xf32>
    %66 = vector.broadcast %58 : vector<8x1xf32> to vector<8x512xf32>
    %67 = arith.subf %52, %66 : vector<8x512xf32>
    %cst_29 = arith.constant 9.99999996E-13 : f32
    %68 = vector.broadcast %cst_29 : f32 to vector<8x1xf32>
    %69 = arith.addf %65, %68 : vector<8x1xf32>
    %70 = math.rsqrt %69 : vector<8x1xf32>
    %71 = vector.broadcast %70 : vector<8x1xf32> to vector<8x512xf32>
    %72 = arith.mulf %67, %71 : vector<8x512xf32>
    %73 = vector.broadcast %53 : vector<1x512xf32> to vector<8x512xf32>
    %74 = arith.mulf %72, %73 : vector<8x512xf32>
    %75 = vector.broadcast %54 : vector<1x512xf32> to vector<8x512xf32>
    %76 = arith.addf %74, %75 : vector<8x512xf32>
    %77 = arith.truncf %76 : vector<8x512xf32> to vector<8x512xbf16>
    %c0_30 = arith.constant 0 : index
    %c0_31 = arith.constant 0 : index
    %78 = vector.load %arg10[%c0_30, %c0_31] : memref<512x1024xbf16, #tpu.memory_space<vmem>>, vector<512x1024xbf16>
    %cst_32 = arith.constant dense<0.000000e+00> : vector<8x1024xf32>
    %79 = tpu.matmul %77, %78, %cst_32 {dimension_numbers = #tpu.dot_dimension_numbers<[1], [0], [0], [1], [0, 0, 1, 1], [], []>} : vector<8x512xbf16>, vector<512x1024xbf16>, vector<8x1024xf32> -> vector<8x1024xf32>
    %c0_33 = arith.constant 0 : index
    %c0_34 = arith.constant 0 : index
    %80 = vector.load %arg11[%c0_33, %c0_34] : memref<1x1024xf32, #tpu.memory_space<vmem>>, vector<1x1024xf32>
    %81 = vector.broadcast %80 : vector<1x1024xf32> to vector<8x1024xf32>
    %82 = arith.addf %79, %81 : vector<8x1024xf32>
    %83 = arith.mulf %82, %82 : vector<8x1024xf32>
    %84 = arith.mulf %82, %83 : vector<8x1024xf32>
    %cst_35 = arith.constant 4.471500e-02 : f32
    %85 = vector.broadcast %cst_35 : f32 to vector<8x1024xf32>
    %86 = arith.mulf %85, %84 : vector<8x1024xf32>
    %87 = arith.addf %82, %86 : vector<8x1024xf32>
    %cst_36 = arith.constant 0.797884583 : f32
    %88 = vector.broadcast %cst_36 : f32 to vector<8x1024xf32>
    %89 = arith.mulf %88, %87 : vector<8x1024xf32>
    %90 = math.tanh %89 : vector<8x1024xf32>
    %cst_37 = arith.constant 1.000000e+00 : f32
    %91 = vector.broadcast %cst_37 : f32 to vector<8x1024xf32>
    %92 = arith.addf %91, %90 : vector<8x1024xf32>
    %cst_38 = arith.constant 5.000000e-01 : f32
    %93 = vector.broadcast %cst_38 : f32 to vector<8x1024xf32>
    %94 = arith.mulf %93, %92 : vector<8x1024xf32>
    %95 = arith.mulf %82, %94 : vector<8x1024xf32>
    %96 = arith.truncf %95 : vector<8x1024xf32> to vector<8x1024xbf16>
    %c0_39 = arith.constant 0 : index
    %c0_40 = arith.constant 0 : index
    %97 = vector.load %arg12[%c0_39, %c0_40] : memref<1024x512xbf16, #tpu.memory_space<vmem>>, vector<1024x512xbf16>
    %cst_41 = arith.constant dense<0.000000e+00> : vector<8x512xf32>
    %98 = tpu.matmul %96, %97, %cst_41 {dimension_numbers = #tpu.dot_dimension_numbers<[1], [0], [0], [1], [0, 0, 1, 1], [], []>} : vector<8x1024xbf16>, vector<1024x512xbf16>, vector<8x512xf32> -> vector<8x512xf32>
    %c0_42 = arith.constant 0 : index
    %c0_43 = arith.constant 0 : index
    %99 = vector.load %arg13[%c0_42, %c0_43] : memref<1x512xf32, #tpu.memory_space<vmem>>, vector<1x512xf32>
    %100 = vector.broadcast %99 : vector<1x512xf32> to vector<8x512xf32>
    %101 = arith.addf %98, %100 : vector<8x512xf32>
    %102 = arith.addf %76, %101 : vector<8x512xf32>
    %c0_44 = arith.constant 0 : index
    %c0_45 = arith.constant 0 : index
    %103 = vector.load %arg14[%c0_44, %c0_45] : memref<1x512xf32, #tpu.memory_space<vmem>>, vector<1x512xf32>
    %c0_46 = arith.constant 0 : index
    %c0_47 = arith.constant 0 : index
    %104 = vector.load %arg15[%c0_46, %c0_47] : memref<1x512xf32, #tpu.memory_space<vmem>>, vector<1x512xf32>
    %cst_48 = arith.constant dense<0.000000e+00> : vector<8xf32>
    %105 = vector.multi_reduction <add>, %102, %cst_48 [1] : vector<8x512xf32> to vector<8xf32>
    %106 = vector.shape_cast %105 : vector<8xf32> to vector<8x1xf32>
    %cst_49 = arith.constant 5.120000e+02 : f32
    %107 = vector.broadcast %cst_49 : f32 to vector<8x1xf32>
    %108 = arith.divf %106, %107 : vector<8x1xf32>
    %109 = vector.broadcast %108 : vector<8x1xf32> to vector<8x512xf32>
    %110 = arith.subf %102, %109 : vector<8x512xf32>
    %111 = arith.mulf %110, %110 : vector<8x512xf32>
    %cst_50 = arith.constant dense<0.000000e+00> : vector<8xf32>
    %112 = vector.multi_reduction <add>, %111, %cst_50 [1] : vector<8x512xf32> to vector<8xf32>
    %113 = vector.shape_cast %112 : vector<8xf32> to vector<8x1xf32>
    %cst_51 = arith.constant 5.120000e+02 : f32
    %114 = vector.broadcast %cst_51 : f32 to vector<8x1xf32>
    %115 = arith.divf %113, %114 : vector<8x1xf32>
    %116 = vector.broadcast %108 : vector<8x1xf32> to vector<8x512xf32>
    %117 = arith.subf %102, %116 : vector<8x512xf32>
    %cst_52 = arith.constant 9.99999996E-13 : f32
    %118 = vector.broadcast %cst_52 : f32 to vector<8x1xf32>
    %119 = arith.addf %115, %118 : vector<8x1xf32>
    %120 = math.rsqrt %119 : vector<8x1xf32>
    %121 = vector.broadcast %120 : vector<8x1xf32> to vector<8x512xf32>
    %122 = arith.mulf %117, %121 : vector<8x512xf32>
    %123 = vector.broadcast %103 : vector<1x512xf32> to vector<8x512xf32>
    %124 = arith.mulf %122, %123 : vector<8x512xf32>
    %125 = vector.broadcast %104 : vector<1x512xf32> to vector<8x512xf32>
    %126 = arith.addf %124, %125 : vector<8x512xf32>
    %c0_53 = arith.constant 0 : index
    %c0_54 = arith.constant 0 : index
    %127 = vector.load %arg22[%c0_53, %c0_54] : memref<8x512xf32, #tpu.memory_space<vmem>>, vector<8x512xf32>
    tpu.vector_store %arg22[%c0_53, %c0_54], %126 {strides = array<i32>} : memref<8x512xf32, #tpu.memory_space<vmem>>, vector<8x512xf32>,
    %c4_i32 = arith.constant 4 : i32
    %128 = arith.muli %c4_i32, %arg0 : i32
    %c0_i32 = arith.constant 0 : i32
    %129 = arith.addi %128, %c0_i32 : i32
    %130 = arith.index_cast %129 : i32 to index
    %131 = memref.load %arg1[%130] : memref<8xi32, #tpu.memory_space<smem>>
    %c4_i32_55 = arith.constant 4 : i32
    %132 = arith.muli %c4_i32_55, %arg0 : i32
    %c1_i32 = arith.constant 1 : i32
    %133 = arith.addi %132, %c1_i32 : i32
    %134 = arith.index_cast %133 : i32 to index
    %135 = memref.load %arg1[%134] : memref<8xi32, #tpu.memory_space<smem>>
    %c4_i32_56 = arith.constant 4 : i32
    %136 = arith.muli %c4_i32_56, %arg0 : i32
    %c2_i32 = arith.constant 2 : i32
    %137 = arith.addi %136, %c2_i32 : i32
    %138 = arith.index_cast %137 : i32 to index
    %139 = memref.load %arg1[%138] : memref<8xi32, #tpu.memory_space<smem>>
    %c4_i32_57 = arith.constant 4 : i32
    %140 = arith.muli %c4_i32_57, %arg0 : i32
    %c3_i32 = arith.constant 3 : i32
    %141 = arith.addi %140, %c3_i32 : i32
    %142 = arith.index_cast %141 : i32 to index
    %143 = memref.load %arg1[%142] : memref<8xi32, #tpu.memory_space<smem>>
    %144 = tpu.iota {dimensions = array<i32: 1>} : vector<1x8xi32>
    %c0_i32_58 = arith.constant 0 : i32
    %145 = vector.broadcast %c0_i32_58 : i32 to vector<1x8xi32>
    %146 = arith.cmpi eq, %144, %145 : vector<1x8xi32>
    %147 = arith.extui %146 : vector<1x8xi1> to vector<1x8xi32>
    %148 = arith.sitofp %147 : vector<1x8xi32> to vector<1x8xf32>
    %cst_59 = arith.constant dense<0.000000e+00> : vector<1x512xf32>
    %149 = tpu.matmul %148, %126, %cst_59 {dimension_numbers = #tpu.dot_dimension_numbers<[1], [0], [0], [1], [0, 0, 1, 1], [], []>} : vector<1x8xf32>, vector<8x512xf32>, vector<1x512xf32> -> vector<1x512xf32>
    %150 = vector.broadcast %131 : i32 to vector<1x8xi32>
    %151 = arith.cmpi eq, %144, %150 : vector<1x8xi32>
    %152 = arith.extui %151 : vector<1x8xi1> to vector<1x8xi32>
    %153 = arith.sitofp %152 : vector<1x8xi32> to vector<1x8xf32>
    %154 = vector.broadcast %135 : i32 to vector<1x8xi32>
    %155 = arith.cmpi eq, %144, %154 : vector<1x8xi32>
    %156 = arith.extui %155 : vector<1x8xi1> to vector<1x8xi32>
    %157 = arith.sitofp %156 : vector<1x8xi32> to vector<1x8xf32>
    %158 = arith.addf %153, %157 : vector<1x8xf32>
    %cst_60 = arith.constant 5.000000e-01 : f32
    %159 = vector.broadcast %cst_60 : f32 to vector<1x8xf32>
    %160 = arith.mulf %159, %158 : vector<1x8xf32>
    %cst_61 = arith.constant dense<0.000000e+00> : vector<1x512xf32>
    %161 = tpu.matmul %160, %126, %cst_61 {dimension_numbers = #tpu.dot_dimension_numbers<[1], [0], [0], [1], [0, 0, 1, 1], [], []>} : vector<1x8xf32>, vector<8x512xf32>, vector<1x512xf32> -> vector<1x512xf32>
    %162 = vector.broadcast %139 : i32 to vector<1x8xi32>
    %163 = arith.cmpi eq, %144, %162 : vector<1x8xi32>
    %164 = arith.extui %163 : vector<1x8xi1> to vector<1x8xi32>
    %165 = arith.sitofp %164 : vector<1x8xi32> to vector<1x8xf32>
    %166 = vector.broadcast %143 : i32 to vector<1x8xi32>
    %167 = arith.cmpi eq, %144, %166 : vector<1x8xi32>
    %168 = arith.extui %167 : vector<1x8xi1> to vector<1x8xi32>
    %169 = arith.sitofp %168 : vector<1x8xi32> to vector<1x8xf32>
    %170 = arith.addf %165, %169 : vector<1x8xf32>
    %cst_62 = arith.constant 5.000000e-01 : f32
    %171 = vector.broadcast %cst_62 : f32 to vector<1x8xf32>
    %172 = arith.mulf %171, %170 : vector<1x8xf32>
    %cst_63 = arith.constant dense<0.000000e+00> : vector<1x512xf32>
    %173 = tpu.matmul %172, %126, %cst_63 {dimension_numbers = #tpu.dot_dimension_numbers<[1], [0], [0], [1], [0, 0, 1, 1], [], []>} : vector<1x8xf32>, vector<8x512xf32>, vector<1x512xf32> -> vector<1x512xf32>
    %174 = arith.truncf %149 : vector<1x512xf32> to vector<1x512xbf16>
    %c0_64 = arith.constant 0 : index
    %c0_65 = arith.constant 0 : index
    %175 = vector.load %arg16[%c0_64, %c0_65] : memref<512x512xbf16, #tpu.memory_space<vmem>>, vector<512x512xbf16>
    %cst_66 = arith.constant dense<0.000000e+00> : vector<1x512xf32>
    %176 = tpu.matmul %174, %175, %cst_66 {dimension_numbers = #tpu.dot_dimension_numbers<[1], [0], [0], [1], [0, 0, 1, 1], [], []>} : vector<1x512xbf16>, vector<512x512xbf16>, vector<1x512xf32> -> vector<1x512xf32>
    %177 = arith.truncf %161 : vector<1x512xf32> to vector<1x512xbf16>
    %c0_67 = arith.constant 0 : index
    %c0_68 = arith.constant 0 : index
    %178 = vector.load %arg17[%c0_67, %c0_68] : memref<512x512xbf16, #tpu.memory_space<vmem>>, vector<512x512xbf16>
    %cst_69 = arith.constant dense<0.000000e+00> : vector<1x512xf32>
    %179 = tpu.matmul %177, %178, %cst_69 {dimension_numbers = #tpu.dot_dimension_numbers<[1], [0], [0], [1], [0, 0, 1, 1], [], []>} : vector<1x512xbf16>, vector<512x512xbf16>, vector<1x512xf32> -> vector<1x512xf32>
    %180 = arith.addf %176, %179 : vector<1x512xf32>
    %181 = arith.truncf %173 : vector<1x512xf32> to vector<1x512xbf16>
    %c0_70 = arith.constant 0 : index
    %c0_71 = arith.constant 0 : index
    %182 = vector.load %arg18[%c0_70, %c0_71] : memref<512x512xbf16, #tpu.memory_space<vmem>>, vector<512x512xbf16>
    %cst_72 = arith.constant dense<0.000000e+00> : vector<1x512xf32>
    %183 = tpu.matmul %181, %182, %cst_72 {dimension_numbers = #tpu.dot_dimension_numbers<[1], [0], [0], [1], [0, 0, 1, 1], [], []>} : vector<1x512xbf16>, vector<512x512xbf16>, vector<1x512xf32> -> vector<1x512xf32>
    %184 = arith.addf %180, %183 : vector<1x512xf32>
    %c0_73 = arith.constant 0 : index
    %c0_74 = arith.constant 0 : index
    %185 = vector.load %arg19[%c0_73, %c0_74] : memref<1x512xf32, #tpu.memory_space<vmem>>, vector<1x512xf32>
    %186 = arith.addf %184, %185 : vector<1x512xf32>
    %cst_75 = arith.constant 0.000000e+00 : f32
    %187 = vector.broadcast %cst_75 : f32 to vector<1x512xf32>
    %188 = arith.maximumf %186, %187 : vector<1x512xf32>
    %189 = arith.truncf %188 : vector<1x512xf32> to vector<1x512xbf16>
    %c0_76 = arith.constant 0 : index
    %c0_77 = arith.constant 0 : index
    %190 = vector.load %arg20[%c0_76, %c0_77] : memref<512x128xbf16, #tpu.memory_space<vmem>>, vector<512x128xbf16>
    %cst_78 = arith.constant dense<0.000000e+00> : vector<1x128xf32>
    %191 = tpu.matmul %189, %190, %cst_78 {dimension_numbers = #tpu.dot_dimension_numbers<[1], [0], [0], [1], [0, 0, 1, 1], [], []>} : vector<1x512xbf16>, vector<512x128xbf16>, vector<1x128xf32> -> vector<1x128xf32>
    %c0_79 = arith.constant 0 : index
    %c0_80 = arith.constant 0 : index
    %192 = vector.load %arg21[%c0_79, %c0_80] : memref<1x128xf32, #tpu.memory_space<vmem>>, vector<1x128xf32>
    %193 = arith.addf %191, %192 : vector<1x128xf32>
    %c0_81 = arith.constant 0 : index
    %c0_82 = arith.constant 0 : index
    %c0_83 = arith.constant 0 : index
    %194 = vector.load %arg23[%c0_81, %c0_82, %c0_83] : memref<1x1x128xf32, #tpu.memory_space<vmem>>, vector<1x1x128xf32>
    %195 = vector.shape_cast %194 : vector<1x1x128xf32> to vector<1x128xf32>
    %196 = vector.shape_cast %193 : vector<1x128xf32> to vector<1x1x128xf32>
    tpu.vector_store %arg23[%c0_81, %c0_82, %c0_83], %196 {strides = array<i32>} : memref<1x1x128xf32, #tpu.memory_space<vmem>>, vector<1x1x128xf32>,
    return
  }
  func.func @transform_0(%arg0: i32, %arg1: memref<8xi32, #tpu.memory_space<smem>>) -> (i32, i32) {
    %c0_i32 = arith.constant 0 : i32
    %c0_i32_0 = arith.constant 0 : i32
    return %arg0, %c0_i32 : i32, i32
  }
  func.func @transform_1(%arg0: i32, %arg1: memref<8xi32, #tpu.memory_space<smem>>) -> (i32, i32, i32) {
    %c0_i32 = arith.constant 0 : i32
    %c0_i32_0 = arith.constant 0 : i32
    %c0_i32_1 = arith.constant 0 : i32
    return %arg0, %c0_i32, %c0_i32_0 : i32, i32, i32
  }
  func.func @transform_2(%arg0: i32, %arg1: memref<8xi32, #tpu.memory_space<smem>>) -> (i32, i32) {
    %c0_i32 = arith.constant 0 : i32
    %c0_i32_0 = arith.constant 0 : i32
    %c0_i32_1 = arith.constant 0 : i32
    return %c0_i32, %c0_i32_0 : i32, i32
  }
  func.func @transform_3(%arg0: i32, %arg1: memref<8xi32, #tpu.memory_space<smem>>) -> (i32, i32) {
    %c0_i32 = arith.constant 0 : i32
    %c0_i32_0 = arith.constant 0 : i32
    %c0_i32_1 = arith.constant 0 : i32
    return %c0_i32, %c0_i32_0 : i32, i32
  }
  func.func @transform_4(%arg0: i32, %arg1: memref<8xi32, #tpu.memory_space<smem>>) -> (i32, i32) {
    %c0_i32 = arith.constant 0 : i32
    %c0_i32_0 = arith.constant 0 : i32
    %c0_i32_1 = arith.constant 0 : i32
    return %c0_i32, %c0_i32_0 : i32, i32
  }
  func.func @transform_5(%arg0: i32, %arg1: memref<8xi32, #tpu.memory_space<smem>>) -> (i32, i32) {
    %c0_i32 = arith.constant 0 : i32
    %c0_i32_0 = arith.constant 0 : i32
    %c0_i32_1 = arith.constant 0 : i32
    return %c0_i32, %c0_i32_0 : i32, i32
  }
  func.func @transform_6(%arg0: i32, %arg1: memref<8xi32, #tpu.memory_space<smem>>) -> (i32, i32) {
    %c0_i32 = arith.constant 0 : i32
    %c0_i32_0 = arith.constant 0 : i32
    %c0_i32_1 = arith.constant 0 : i32
    return %c0_i32, %c0_i32_0 : i32, i32
  }
  func.func @transform_7(%arg0: i32, %arg1: memref<8xi32, #tpu.memory_space<smem>>) -> (i32, i32) {
    %c0_i32 = arith.constant 0 : i32
    %c0_i32_0 = arith.constant 0 : i32
    %c0_i32_1 = arith.constant 0 : i32
    return %c0_i32, %c0_i32_0 : i32, i32
  }
  func.func @transform_8(%arg0: i32, %arg1: memref<8xi32, #tpu.memory_space<smem>>) -> (i32, i32) {
    %c0_i32 = arith.constant 0 : i32
    %c0_i32_0 = arith.constant 0 : i32
    %c0_i32_1 = arith.constant 0 : i32
    return %c0_i32, %c0_i32_0 : i32, i32
  }
  func.func @transform_9(%arg0: i32, %arg1: memref<8xi32, #tpu.memory_space<smem>>) -> (i32, i32) {
    %c0_i32 = arith.constant 0 : i32
    %c0_i32_0 = arith.constant 0 : i32
    %c0_i32_1 = arith.constant 0 : i32
    return %c0_i32, %c0_i32_0 : i32, i32
  }
  func.func @transform_10(%arg0: i32, %arg1: memref<8xi32, #tpu.memory_space<smem>>) -> (i32, i32) {
    %c0_i32 = arith.constant 0 : i32
    %c0_i32_0 = arith.constant 0 : i32
    %c0_i32_1 = arith.constant 0 : i32
    return %c0_i32, %c0_i32_0 : i32, i32
  }
  func.func @transform_11(%arg0: i32, %arg1: memref<8xi32, #tpu.memory_space<smem>>) -> (i32, i32) {
    %c0_i32 = arith.constant 0 : i32
    %c0_i32_0 = arith.constant 0 : i32
    %c0_i32_1 = arith.constant 0 : i32
    return %c0_i32, %c0_i32_0 : i32, i32
  }
  func.func @transform_12(%arg0: i32, %arg1: memref<8xi32, #tpu.memory_space<smem>>) -> (i32, i32) {
    %c0_i32 = arith.constant 0 : i32
    %c0_i32_0 = arith.constant 0 : i32
    %c0_i32_1 = arith.constant 0 : i32
    return %c0_i32, %c0_i32_0 : i32, i32
  }
  func.func @transform_13(%arg0: i32, %arg1: memref<8xi32, #tpu.memory_space<smem>>) -> (i32, i32) {
    %c0_i32 = arith.constant 0 : i32
    %c0_i32_0 = arith.constant 0 : i32
    %c0_i32_1 = arith.constant 0 : i32
    return %c0_i32, %c0_i32_0 : i32, i32
  }
  func.func @transform_14(%arg0: i32, %arg1: memref<8xi32, #tpu.memory_space<smem>>) -> (i32, i32) {
    %c0_i32 = arith.constant 0 : i32
    %c0_i32_0 = arith.constant 0 : i32
    %c0_i32_1 = arith.constant 0 : i32
    return %c0_i32, %c0_i32_0 : i32, i32
  }
  func.func @transform_15(%arg0: i32, %arg1: memref<8xi32, #tpu.memory_space<smem>>) -> (i32, i32) {
    %c0_i32 = arith.constant 0 : i32
    %c0_i32_0 = arith.constant 0 : i32
    %c0_i32_1 = arith.constant 0 : i32
    return %c0_i32, %c0_i32_0 : i32, i32
  }
  func.func @transform_16(%arg0: i32, %arg1: memref<8xi32, #tpu.memory_space<smem>>) -> (i32, i32) {
    %c0_i32 = arith.constant 0 : i32
    %c0_i32_0 = arith.constant 0 : i32
    %c0_i32_1 = arith.constant 0 : i32
    return %c0_i32, %c0_i32_0 : i32, i32
  }
  func.func @transform_17(%arg0: i32, %arg1: memref<8xi32, #tpu.memory_space<smem>>) -> (i32, i32) {
    %c0_i32 = arith.constant 0 : i32
    %c0_i32_0 = arith.constant 0 : i32
    %c0_i32_1 = arith.constant 0 : i32
    return %c0_i32, %c0_i32_0 : i32, i32
  }
  func.func @transform_18(%arg0: i32, %arg1: memref<8xi32, #tpu.memory_space<smem>>) -> (i32, i32) {
    %c0_i32 = arith.constant 0 : i32
    %c0_i32_0 = arith.constant 0 : i32
    %c0_i32_1 = arith.constant 0 : i32
    return %c0_i32, %c0_i32_0 : i32, i32
  }
  func.func @transform_19(%arg0: i32, %arg1: memref<8xi32, #tpu.memory_space<smem>>) -> (i32, i32) {
    %c0_i32 = arith.constant 0 : i32
    %c0_i32_0 = arith.constant 0 : i32
    %c0_i32_1 = arith.constant 0 : i32
    return %c0_i32, %c0_i32_0 : i32, i32
  }
  func.func @transform_20(%arg0: i32, %arg1: memref<8xi32, #tpu.memory_space<smem>>) -> (i32, i32) {
    %c0_i32 = arith.constant 0 : i32
    %c0_i32_0 = arith.constant 0 : i32
    return %arg0, %c0_i32 : i32, i32
  }
  func.func @transform_21(%arg0: i32, %arg1: memref<8xi32, #tpu.memory_space<smem>>) -> (i32, i32, i32) {
    %c0_i32 = arith.constant 0 : i32
    %c0_i32_0 = arith.constant 0 : i32
    %c0_i32_1 = arith.constant 0 : i32
    return %arg0, %c0_i32, %c0_i32_0 : i32, i32, i32
  }
}

</mosaic_0001>

<bundles_post_ra>
// kernel: tpu_custom_call.1
= control target key start
LH: loop header
LB: loop body
LE: loop exit
PB: predicated region body
PF: predicated region fallthrough
CT: control target
= control target key end

     0   :  { %s19569_s0 = inlined_call_operand.hbm [shape: s32[8], index: 0, kind: input, shape index: {}]   ;;  %s19570_s1 = inlined_call_operand.hbm [shape: f32[16,512], index: 1, kind: input, shape index: {}]   ;;  %s19571_s2 = inlined_call_operand.hbm [shape: f32[2,1,8], index: 2, kind: input, shape index: {}]   ;;  %s19572_s3 = inlined_call_operand.hbm [shape: bf16[512,1536], index: 3, kind: input, shape index: {}]   ;;  %s19573_s4 = inlined_call_operand.hbm [shape: f32[1,1536], index: 4, kind: input, shape index: {}]   ;;  %s19574_s5 = inlined_call_operand.hbm [shape: bf16[512,512], index: 5, kind: input, shape index: {}]   ;;  %s19575_s6 = inlined_call_operand.hbm [shape: f32[1,512], index: 6, kind: input, shape index: {}]   ;;  %s19576_s7 = inlined_call_operand.hbm [shape: f32[1,512], index: 7, kind: input, shape index: {}]   ;;  %s19577_s8 = inlined_call_operand.hbm [shape: f32[1,512], index: 8, kind: input, shape index: {}]   ;;  %s19578_s9 = inlined_call_operand.hbm [shape: bf16[512,1024], index: 9, kind: input, shape index: {}]   ;;  %s19579_s10 = inlined_call_operand.hbm [shape: f32[1,1024], index: 10, kind: input, shape index: {}]   ;;  %s19580_s11 = inlined_call_operand.hbm [shape: bf16[1024,512], index: 11, kind: input, shape index: {}]   ;;  %s19581_s12 = inlined_call_operand.hbm [shape: f32[1,512], index: 12, kind: input, shape index: {}]   ;;  %s19582_s13 = inlined_call_operand.hbm [shape: f32[1,512], index: 13, kind: input, shape index: {}]   ;;  %s19583_s14 = inlined_call_operand.hbm [shape: f32[1,512], index: 14, kind: input, shape index: {}]   ;;  %s19584_s15 = inlined_call_operand.hbm [shape: bf16[512,512], index: 15, kind: input, shape index: {}]   ;;  %s19585_s16 = inlined_call_operand.hbm [shape: bf16[512,512], index: 16, kind: input, shape index: {}]   ;;  %s19586_s17 = inlined_call_operand.hbm [shape: bf16[512,512], index: 17, kind: input, shape index: {}]   ;;  %s19587_s18 = inlined_call_operand.hbm [shape: f32[1,512], index: 18, kind: input, shape index: {}]   ;;  %s19588_s19 = inlined_call_operand.hbm [shape: bf16[512,128], index: 19, kind: input, shape index: {}]   ;;  %s19589_s20 = inlined_call_operand.hbm [shape: f32[1,128], index: 20, kind: input, shape index: {}]   ;;  %s19590_s21 = inlined_call_operand.hbm [shape: f32[16,512], index: 21, kind: output, shape index: {0}]   ;;  %s19591_s22 = inlined_call_operand.hbm [shape: f32[2,1,128], index: 22, kind: output, shape index: {1}]  }
   0x1   :  { %19621 = sst [smem:[#allocation60_spill]] %s19569_s0 }
   0x2   :  { %19622 = sst [smem:[#allocation61_spill]] %s19570_s1  ;;  %s19637_s29 = sld [smem:[#allocation60_spill]] }
   0x3   :  { %19623 = sst [smem:[#allocation62_spill]] %s19571_s2 }
   0x4   :  { %19624 = sst [smem:[#allocation63_spill]] %s19572_s3 }
   0x5   :  { %19625 = sst [smem:[#allocation64_spill]] %s19573_s4 }
   0x6   :  { %19626 = sst [smem:[#allocation65_spill]] %s19574_s5 }
   0x7   :  { %19627 = sst [smem:[#allocation66_spill]] %s19575_s6 }
   0x8   :  { %19628 = sst [smem:[#allocation67_spill]] %s19576_s7 }
   0x9   :  { %19629 = sst [smem:[#allocation68_spill]] %s19577_s8 }
   0xa   :  { %19630 = sst [smem:[#allocation69_spill]] %s19578_s9 }
   0xb   :  { %19631 = sst [smem:[#allocation70_spill]] %s19579_s10 }
   0xc   :  { %19632 = sst [smem:[#allocation71_spill]] %s19580_s11 }
   0xd   :  { %19633 = sst [smem:[#allocation72_spill]] %s19581_s12 }
   0xe   :  { %19634 = sst [smem:[#allocation73_spill]] %s19584_s15  ;;  %s17513_s15 = scalar_lea.hbm %s19637_s29, 16 }
   0xf   :  { %19635 = sst [smem:[#allocation74_spill]] %s19590_s21  ;;  %p17514_p0 = scmp.ne.s32.totalorder %s19637_s29, %s17513_s15 }
  0x10   :  { %19636 = sst [smem:[#allocation75_spill]] %s19591_s22  ;;  %p17517_p1 = scmp.lt.u32.totalorder %s17513_s15, %s19637_s29 }
  0x12   :  { %p17519_p2 = pnand %p17517_p1, %p17514_p0 }
  0x14   :  { %17522 = shalt.err (!%p17519_p2)  }
  0x15   :  { %s18233_s1 = smov [#allocation3]  }
  0x16   :  { %29 = dma.hbm_to_smem %s19637_s29, 16, %s18233_s1, [#allocation2] }
  0x17   :  { %18159 = dma.done.wait [#allocation2], 16 }
  0x18   :  { %18160 = vsyncadd [#allocation2], 4294967280 }
  0x19   :  { %31 = sfence }
  0x1a   :  { %32 = vsyncpa [#allocation5], 0 }
  0x1b   :  { %34 = vsyncpa [#allocation5 + $0x1], 0 }
  0x1c   :  { %35 = vsyncpa [#allocation8], 0 }
  0x1d   :  { %37 = vsyncpa [#allocation8 + $0x1], 0 }
  0x1e   :  { %38 = vsyncpa [#allocation11], 0 }
  0x1f   :  { %39 = vsyncpa [#allocation14], 0 }
  0x20   :  { %40 = vsyncpa [#allocation17], 0 }
  0x21   :  { %41 = vsyncpa [#allocation20], 0 }
  0x22   :  { %42 = vsyncpa [#allocation23], 0 }
  0x23   :  { %43 = vsyncpa [#allocation26], 0 }
  0x24   :  { %44 = vsyncpa [#allocation29], 0 }
  0x25   :  { %45 = vsyncpa [#allocation32], 0 }
  0x26   :  { %46 = vsyncpa [#allocation35], 0 }
  0x27   :  { %47 = vsyncpa [#allocation6], 0 }
  0x28   :  { %49 = vsyncpa [#allocation6 + $0x1], 0 }
  0x29   :  { %50 = vsyncpa [#allocation38], 0 }
  0x2a   :  { %52 = vsyncpa [#allocation38 + $0x1], 0  ;;  %s18396_s15 = smov 0   ;;  %s18398_s6 = smov 0  }
  0x2b   :  { %s18400_s25 = smov 0   ;;  %s18402_s26 = smov 0  }
  0x2c LB: > { %19638 = sst [smem:[#allocation54_spill]] %s18219_s15  ;;  %s18234_s2 = smov [#allocation9]   ;;  %s18231_s26 = sphi %s18402_s26, %s18817_s26   ;;  %s18227_s25 = sphi %s18400_s25, %s19708_s25   ;;  %s18223_s6 = sphi %s18398_s6, %s19707_s6   ;;  %s18219_s15 = sphi %s18396_s15, %s19706_s15  }
  0x2d   : > { %19639 = sst [smem:[#allocation55_spill]] %s18223_s6  ;;  %s557_s27 = sshll.u32 %s18234_s2, 4  ;;  %s18422_s27 = int_to_ptr.vmem [resolvable:$true] %s557_s27 }
  0x2e   : > { %19640 = sst [smem:[#allocation56_spill]] %s18227_s25  ;;  %s18417_s3 = sadd.s32 4294967295, %s18231_s26  }
  0x2f   : > { %19641 = sst [smem:[#allocation57_spill]] %s18231_s26  ;;  %p13776_p3 = scmp.ge.s32.totalorder %s18231_s26, 1 }
  0x30   : > { %19642 = sst [smem:[#allocation58_spill]] %s18417_s3  ;;  %p19610_p4 = scmp.eq.s32.totalorder %s18417_s3, 0 }
  0x31   : > { %p545_p5 = scmp.lt.s32.totalorder %s18231_s26, 3  ;;  %s18235_s29 = smov [#allocation10]  }
  0x32   : > { %s571_s30 = sshll.u32 %s18235_s29, 4  ;;  %s18236_s0 = smov [#allocation13]   ;;  %s18437_s30 = int_to_ptr.vmem [resolvable:$true] %s571_s30 }
  0x33   : > { %p18424_p6 = pnand %p13776_p3, %p545_p5  ;;  %s595_s23 = sshll.u32 %s18236_s0, 4  ;;  %s18439_s23 = int_to_ptr.vmem [resolvable:$true] %s595_s23 }
  0x34   : > { %s19646_s24 = sld [smem:[#allocation63_spill]] }
  0x35   : > { %s19643_s28 = scalar_select %p18424_p6, 1, 0 }
  0x36   : > { %p15541_p8 = pneg %p18424_p6 }
  0x37   : > { %19644 = sst [smem:[#allocation59_spill]] %s19643_s28 }
  0x38   : > { %p18433_p9 = pnand %p15541_p8, %p19610_p4 }
  0x3a   : > { %s17523_s2 = scalar_lea.hbm %s19646_s24, 49152  ;;  %p18449_p11 = pneg %p18433_p9 }
  0x3b   : > { %p17524_p10 = scmp.ne.s32.totalorder %s19646_s24, %s17523_s2  ;;  %p17530_p0 = scmp.lt.u32.totalorder %s17523_s2, %s19646_s24 }
  0x3d   : > { %p17526_p12 = pnand %p18449_p11, %p17524_p10 }
  0x3f   : > { %p17527_p13 = pneg %p17526_p12 }
  0x41   : > { %p17532_p1 = pnand %p17530_p0, %p17527_p13 }
  0x43   : > { %17535 = shalt.err (!%p17532_p1)
}
  0x44   : > { %s17536_s21 = scalar_lea.vmem %s18422_s27, 49152  ;;  %p17544_p8 = scmp.lt.s32.totalorder %s18422_s27, %s18422_s27 }
  0x45   : > { %p17537_p2 = scmp.ne.s32.totalorder %s18422_s27, %s17536_s21  ;;  %p17545_p7 = scmp.lt.s32.totalorder %s17536_s21, %s17536_s21 }
  0x47   : > { %p17539_p3 = pnand %p17537_p2, %p18449_p11  ;;  %p17546_p10 = por %p17545_p7, %p17544_p8 }
  0x49   : > { %p17540_p5 = pneg %p17539_p3 }
  0x4b   : > { %p17547_p12 = pnand %p17546_p10, %p17540_p5 }
  0x4d   : > { %17550 = shalt.err (!%p17547_p12)
}
  0x4e   : > { %s18237_s22 = smov 768   ;;  %s18238_s28 = smov 48  }
  0x4f   : > { %15544 = dma.hbm_to_vmem [thread:$0]  (!%p18433_p9), %s19646_s24, 49152, %s18422_s27, [#allocation8], %s18237_s22, %s18237_s22, %s18238_s28  }
  0x50   : > { %s19648_s3 = sld [smem:[#allocation64_spill]] }
  0x56   : > { %s17551_s15 = scalar_lea.hbm %s19648_s3, 192 }
  0x57   : > { %p17552_p7 = scmp.ne.s32.totalorder %s19648_s3, %s17551_s15  ;;  %p17558_p1 = scmp.lt.u32.totalorder %s17551_s15, %s19648_s3 }
  0x59   : > { %p17554_p13 = pnand %p17552_p7, %p18449_p11 }
  0x5b   : > { %p17555_p0 = pneg %p17554_p13 }
  0x5d   : > { %p17560_p2 = pnand %p17558_p1, %p17555_p0 }
  0x5f   : > { %17563 = shalt.err (!%p17560_p2)
}
  0x60   : > { %s17564_s27 = scalar_lea.vmem %s18437_s30, 192  ;;  %p17572_p10 = scmp.lt.s32.totalorder %s18437_s30, %s18437_s30 }
  0x61   : > { %p17565_p3 = scmp.ne.s32.totalorder %s18437_s30, %s17564_s27  ;;  %p17573_p12 = scmp.lt.s32.totalorder %s17564_s27, %s17564_s27 }
  0x63   : > { %p17567_p5 = pnand %p17565_p3, %p18449_p11  ;;  %p17574_p7 = por %p17573_p12, %p17572_p10 }
  0x65   : > { %p17568_p8 = pneg %p17567_p5 }
  0x67   : > { %p17575_p13 = pnand %p17574_p7, %p17568_p8 }
  0x69   : > { %17578 = shalt.err (!%p17575_p13)
}
  0x6a   : > { %15547 = dma.hbm_to_vmem [thread:$0]  (!%p18433_p9), %s19648_s3, 192, %s18437_s30, [#allocation11]  }
  0x6b   : > { %s19649_s22 = sld [smem:[#allocation66_spill]] }
  0x71   : > { %s17579_s28 = scalar_lea.hbm %s19649_s22, 64 }
  0x72   : > { %p17580_p0 = scmp.ne.s32.totalorder %s19649_s22, %s17579_s28  ;;  %p17586_p3 = scmp.lt.u32.totalorder %s17579_s28, %s19649_s22 }
  0x74   : > { %p17582_p1 = pnand %p17580_p0, %p18449_p11 }
  0x76   : > { %p17583_p2 = pneg %p17582_p1 }
  0x78   : > { %p17588_p5 = pnand %p17586_p3, %p17583_p2 }
  0x7a   : > { %17591 = shalt.err (!%p17588_p5)
}
  0x7b   : > { %s17592_s30 = scalar_lea.vmem %s18439_s23, 64  ;;  %p17600_p7 = scmp.lt.s32.totalorder %s18439_s23, %s18439_s23 }
  0x7c   : > { %p17593_p8 = scmp.ne.s32.totalorder %s18439_s23, %s17592_s30  ;;  %p17601_p13 = scmp.lt.s32.totalorder %s17592_s30, %s17592_s30 }
  0x7e   : > { %p17595_p10 = pnand %p17593_p8, %p18449_p11  ;;  %p17602_p0 = por %p17601_p13, %p17600_p7 }
  0x80   : > { %p17596_p12 = pneg %p17595_p10 }
  0x82   : > { %p17603_p1 = pnand %p17602_p0, %p17596_p12 }
  0x84   : > { %17606 = shalt.err (!%p17603_p1)
}
  0x85   : > { %15553 = dma.hbm_to_vmem [thread:$0]  (!%p18433_p9), %s19649_s22, 64, %s18439_s23, [#allocation14]  }
  0x86   : > { %s18239_s15 = smov [#allocation16]   ;;  %s18240_s25 = smov [#allocation19]  }
  0x87   : > { %s617_s6 = sshll.u32 %s18239_s15, 4  ;;  %s641_s26 = sshll.u32 %s18240_s25, 4  ;;  %s618_s6 = int_to_ptr.vmem [resolvable:$true] %s617_s6  ;;  %s642_s26 = int_to_ptr.vmem [resolvable:$true] %s641_s26 }
  0x88   : > { %s19650_s8 = sld [smem:[#allocation68_spill]] }
  0x8e   : > { %s17607_s5 = scalar_lea.hbm %s19650_s8, 64 }
  0x8f   : > { %p17608_p2 = scmp.ne.s32.totalorder %s19650_s8, %s17607_s5  ;;  %p17614_p8 = scmp.lt.u32.totalorder %s17607_s5, %s19650_s8 }
  0x91   : > { %p17610_p3 = pnand %p17608_p2, %p18449_p11 }
  0x93   : > { %p17611_p5 = pneg %p17610_p3 }
  0x95   : > { %p17616_p10 = pnand %p17614_p8, %p17611_p5 }
  0x97   : > { %17619 = shalt.err (!%p17616_p10)
}
  0x98   : > { %s17620_s23 = scalar_lea.vmem %s618_s6, 64  ;;  %p17628_p0 = scmp.lt.s32.totalorder %s618_s6, %s618_s6 }
  0x99   : > { %p17621_p12 = scmp.ne.s32.totalorder %s618_s6, %s17620_s23  ;;  %p17629_p1 = scmp.lt.s32.totalorder %s17620_s23, %s17620_s23 }
  0x9b   : > { %p17623_p7 = pnand %p17621_p12, %p18449_p11  ;;  %p17630_p4 = por %p17629_p1, %p17628_p0 }
  0x9d   : > { %p17624_p13 = pneg %p17623_p7 }
  0x9f   : > { %p17631_p6 = pnand %p17630_p4, %p17624_p13 }
  0xa1   : > { %17634 = shalt.err (!%p17631_p6)
}
  0xa2   : > { %15559 = dma.hbm_to_vmem [thread:$0]  (!%p18433_p9), %s19650_s8, 64, %s618_s6, [#allocation17]  }
  0xa3   : > { %s19651_s10 = sld [smem:[#allocation70_spill]] }
  0xa9   : > { %s17635_s1 = scalar_lea.hbm %s19651_s10, 128 }
  0xaa   : > { %p17636_p2 = scmp.ne.s32.totalorder %s19651_s10, %s17635_s1  ;;  %p17642_p6 = scmp.lt.u32.totalorder %s17635_s1, %s19651_s10 }
  0xac   : > { %p17638_p3 = pnand %p17636_p2, %p18449_p11 }
  0xae   : > { %p17639_p4 = pneg %p17638_p3 }
  0xb0   : > { %p17644_p5 = pnand %p17642_p6, %p17639_p4 }
  0xb2   : > { %17647 = shalt.err (!%p17644_p5)
}
  0xb3   : > { %s17648_s21 = scalar_lea.vmem %s642_s26, 128  ;;  %p17656_p7 = scmp.lt.s32.totalorder %s642_s26, %s642_s26 }
  0xb4   : > { %p17649_p8 = scmp.ne.s32.totalorder %s642_s26, %s17648_s21  ;;  %p17657_p13 = scmp.lt.s32.totalorder %s17648_s21, %s17648_s21 }
  0xb6   : > { %p17651_p10 = pnand %p17649_p8, %p18449_p11  ;;  %p17658_p0 = por %p17657_p13, %p17656_p7 }
  0xb8   : > { %p17652_p12 = pneg %p17651_p10 }
  0xba   : > { %p17659_p1 = pnand %p17658_p0, %p17652_p12 }
  0xbc   : > { %17662 = shalt.err (!%p17659_p1)
}
  0xbd   : > { %15565 = dma.hbm_to_vmem [thread:$0]  (!%p18433_p9), %s19651_s10, 128, %s642_s26, [#allocation20]  }
  0xbe   : > { %s18241_s27 = smov [#allocation22]   ;;  %s18242_s25 = smov [#allocation25]  }
  0xbf   : > { %s665_s15 = sshll.u32 %s18241_s27, 4  ;;  %s687_s28 = sshll.u32 %s18242_s25, 4  ;;  %s666_s15 = int_to_ptr.vmem [resolvable:$true] %s665_s15  ;;  %s688_s28 = int_to_ptr.vmem [resolvable:$true] %s687_s28 }
  0xc0   : > { %s19652_s12 = sld [smem:[#allocation72_spill]] }
  0xc6   : > { %s17663_s2 = scalar_lea.hbm %s19652_s12, 64 }
  0xc7   : > { %p17664_p2 = scmp.ne.s32.totalorder %s19652_s12, %s17663_s2  ;;  %p17670_p6 = scmp.lt.u32.totalorder %s17663_s2, %s19652_s12 }
  0xc9   : > { %p17666_p3 = pnand %p17664_p2, %p18449_p11 }
  0xcb   : > { %p17667_p4 = pneg %p17666_p3 }
  0xcd   : > { %p17672_p5 = pnand %p17670_p6, %p17667_p4 }
  0xcf   : > { %17675 = shalt.err (!%p17672_p5)
}
  0xd0   : > { %s17676_s26 = scalar_lea.vmem %s666_s15, 64  ;;  %p17684_p7 = scmp.lt.s32.totalorder %s666_s15, %s666_s15 }
  0xd1   : > { %p17677_p8 = scmp.ne.s32.totalorder %s666_s15, %s17676_s26  ;;  %p17685_p13 = scmp.lt.s32.totalorder %s17676_s26, %s17676_s26 }
  0xd3   : > { %p17679_p10 = pnand %p17677_p8, %p18449_p11  ;;  %p17686_p0 = por %p17685_p13, %p17684_p7 }
  0xd5   : > { %p17680_p12 = pneg %p17679_p10 }
  0xd7   : > { %p17687_p1 = pnand %p17686_p0, %p17680_p12 }
  0xd9   : > { %17690 = shalt.err (!%p17687_p1)
}
  0xda   : > { %15571 = dma.hbm_to_vmem [thread:$0]  (!%p18433_p9), %s19652_s12, 64, %s666_s15, [#allocation23]  }
  0xdb   : > { %s17691_s5 = scalar_lea.hbm %s19583_s14, 64 }
  0xdc   : > { %p17692_p2 = scmp.ne.s32.totalorder %s19583_s14, %s17691_s5  ;;  %p17698_p6 = scmp.lt.u32.totalorder %s17691_s5, %s19583_s14 }
  0xde   : > { %p17694_p3 = pnand %p17692_p2, %p18449_p11 }
  0xe0   : > { %p17695_p4 = pneg %p17694_p3 }
  0xe2   : > { %p17700_p5 = pnand %p17698_p6, %p17695_p4 }
  0xe4   : > { %17703 = shalt.err (!%p17700_p5)
}
  0xe5   : > { %s17704_s6 = scalar_lea.vmem %s688_s28, 64  ;;  %p17712_p7 = scmp.lt.s32.totalorder %s688_s28, %s688_s28 }
  0xe6   : > { %p17705_p8 = scmp.ne.s32.totalorder %s688_s28, %s17704_s6  ;;  %p17713_p13 = scmp.lt.s32.totalorder %s17704_s6, %s17704_s6 }
  0xe8   : > { %p17707_p10 = pnand %p17705_p8, %p18449_p11  ;;  %p17714_p0 = por %p17713_p13, %p17712_p7 }
  0xea   : > { %p17708_p12 = pneg %p17707_p10 }
  0xec   : > { %p17715_p1 = pnand %p17714_p0, %p17708_p12 }
  0xee   : > { %17718 = shalt.err (!%p17715_p1)
}
  0xef   : > { %15577 = dma.hbm_to_vmem [thread:$0]  (!%p18433_p9), %s19583_s14, 64, %s688_s28, [#allocation26]  }
  0xf0   : > { %s18243_s23 = smov [#allocation28]   ;;  %s18244_s25 = smov [#allocation31]  }
  0xf1   : > { %s710_s27 = sshll.u32 %s18243_s23, 4  ;;  %s737_s1 = sshll.u32 %s18244_s25, 4  ;;  %s711_s27 = int_to_ptr.vmem [resolvable:$true] %s710_s27  ;;  %s738_s1 = int_to_ptr.vmem [resolvable:$true] %s737_s1 }
  0xf2   : > { %s17719_s0 = scalar_lea.hbm %s19585_s16, 16384 }
  0xf3   : > { %p17720_p2 = scmp.ne.s32.totalorder %s19585_s16, %s17719_s0  ;;  %p17726_p6 = scmp.lt.u32.totalorder %s17719_s0, %s19585_s16 }
  0xf5   : > { %p17722_p3 = pnand %p17720_p2, %p18449_p11 }
  0xf7   : > { %p17723_p4 = pneg %p17722_p3 }
  0xf9   : > { %p17728_p5 = pnand %p17726_p6, %p17723_p4 }
  0xfb   : > { %17731 = shalt.err (!%p17728_p5)
}
  0xfc   : > { %s17732_s28 = scalar_lea.vmem %s711_s27, 16384  ;;  %p17740_p7 = scmp.lt.s32.totalorder %s711_s27, %s711_s27 }
  0xfd   : > { %p17733_p8 = scmp.ne.s32.totalorder %s711_s27, %s17732_s28  ;;  %p17741_p13 = scmp.lt.s32.totalorder %s17732_s28, %s17732_s28 }
  0xff   : > { %p17735_p10 = pnand %p17733_p8, %p18449_p11  ;;  %p17742_p0 = por %p17741_p13, %p17740_p7 }
 0x101   : > { %p17736_p12 = pneg %p17735_p10 }
 0x103   : > { %p17743_p1 = pnand %p17742_p0, %p17736_p12 }
 0x105   : > { %17746 = shalt.err (!%p17743_p1)
}
 0x106   : > { %s19612_s26 = smov 256   ;;  %s19614_s23 = smov 16  }
 0x107   : > { %15583 = dma.hbm_to_vmem [thread:$0]  (!%p18433_p9), %s19585_s16, 16384, %s711_s27, [#allocation29], %s19612_s26, %s19612_s26, %s19614_s23  }
 0x108   : > { %s17747_s30 = scalar_lea.hbm %s19587_s18, 64 }
 0x109   : > { %p17748_p2 = scmp.ne.s32.totalorder %s19587_s18, %s17747_s30  ;;  %p17754_p6 = scmp.lt.u32.totalorder %s17747_s30, %s19587_s18 }
 0x10b   : > { %p17750_p3 = pnand %p17748_p2, %p18449_p11 }
 0x10d   : > { %p17751_p4 = pneg %p17750_p3 }
 0x10f   : > { %p17756_p5 = pnand %p17754_p6, %p17751_p4 }
 0x111   : > { %17759 = shalt.err (!%p17756_p5)
}
 0x112   : > { %s17760_s25 = scalar_lea.vmem %s738_s1, 64  ;;  %p17768_p7 = scmp.lt.s32.totalorder %s738_s1, %s738_s1 }
 0x113   : > { %p17761_p8 = scmp.ne.s32.totalorder %s738_s1, %s17760_s25  ;;  %p17769_p13 = scmp.lt.s32.totalorder %s17760_s25, %s17760_s25 }
 0x115   : > { %p17763_p10 = pnand %p17761_p8, %p18449_p11  ;;  %p17770_p0 = por %p17769_p13, %p17768_p7 }
 0x117   : > { %p17764_p12 = pneg %p17763_p10 }
 0x119   : > { %p17771_p1 = pnand %p17770_p0, %p17764_p12 }
 0x11b   : > { %17774 = shalt.err (!%p17771_p1)
}
 0x11c   : > { %15589 = dma.hbm_to_vmem [thread:$0]  (!%p18433_p9), %s19587_s18, 64, %s738_s1, [#allocation32]  }
 0x11d   : > { %s18247_s2 = smov [#allocation12]   ;;  %s18248_s30 = smov [#allocation15]  }
 0x11e   : > { %s581_s0 = sshll.u32 %s18247_s2, 4  ;;  %s606_s21 = sshll.u32 %s18248_s30, 4  ;;  %s582_s0 = int_to_ptr.vmem [resolvable:$true] %s581_s0  ;;  %s607_s21 = int_to_ptr.vmem [resolvable:$true] %s606_s21 }
 0x11f   : > { %s19653_s28 = sld [smem:[#allocation65_spill]] }
 0x125   : > { %s17775_s26 = scalar_lea.hbm %s19653_s28, 16384 }
 0x126   : > { %p17776_p2 = scmp.ne.s32.totalorder %s19653_s28, %s17775_s26  ;;  %p17782_p6 = scmp.lt.u32.totalorder %s17775_s26, %s19653_s28 }
 0x128   : > { %p17778_p3 = pnand %p17776_p2, %p18449_p11 }
 0x12a   : > { %p17779_p4 = pneg %p17778_p3 }
 0x12c   : > { %p17784_p5 = pnand %p17782_p6, %p17779_p4 }
 0x12e   : > { %17787 = shalt.err (!%p17784_p5)
}
 0x12f   : > { %s17788_s1 = scalar_lea.vmem %s582_s0, 16384  ;;  %p17796_p7 = scmp.lt.s32.totalorder %s582_s0, %s582_s0 }
 0x130   : > { %p17789_p8 = scmp.ne.s32.totalorder %s582_s0, %s17788_s1  ;;  %p17797_p13 = scmp.lt.s32.totalorder %s17788_s1, %s17788_s1 }
 0x132   : > { %p17791_p10 = pnand %p17789_p8, %p18449_p11  ;;  %p17798_p0 = por %p17797_p13, %p17796_p7 }
 0x134   : > { %p17792_p12 = pneg %p17791_p10 }
 0x136   : > { %p17799_p1 = pnand %p17798_p0, %p17792_p12 }
 0x138   : > { %17802 = shalt.err (!%p17799_p1)
}
 0x139   : > { %s19654_s23 = smov 16   ;;  %s19655_s5 = smov 256  }
 0x13a   : > { %15550 = dma.hbm_to_vmem [thread:$0]  (!%p18433_p9), %s19653_s28, 16384, %s582_s0, [#allocation11], %s19655_s5, %s19655_s5, %s19654_s23  }
 0x13b   : > { %s19656_s7 = sld [smem:[#allocation67_spill]] }
 0x141   : > { %s17803_s6 = scalar_lea.hbm %s19656_s7, 64 }
 0x142   : > { %p17804_p2 = scmp.ne.s32.totalorder %s19656_s7, %s17803_s6  ;;  %p17810_p6 = scmp.lt.u32.totalorder %s17803_s6, %s19656_s7 }
 0x144   : > { %p17806_p3 = pnand %p17804_p2, %p18449_p11 }
 0x146   : > { %p17807_p4 = pneg %p17806_p3 }
 0x148   : > { %p17812_p5 = pnand %p17810_p6, %p17807_p4 }
 0x14a   : > { %17815 = shalt.err (!%p17812_p5)
}
 0x14b   : > { %s17816_s3 = scalar_lea.vmem %s607_s21, 64  ;;  %p17824_p7 = scmp.lt.s32.totalorder %s607_s21, %s607_s21 }
 0x14c   : > { %p17817_p8 = scmp.ne.s32.totalorder %s607_s21, %s17816_s3  ;;  %p17825_p13 = scmp.lt.s32.totalorder %s17816_s3, %s17816_s3 }
 0x14e   : > { %p17819_p10 = pnand %p17817_p8, %p18449_p11  ;;  %p17826_p0 = por %p17825_p13, %p17824_p7 }
 0x150   : > { %p17820_p12 = pneg %p17819_p10 }
 0x152   : > { %p17827_p1 = pnand %p17826_p0, %p17820_p12 }
 0x154   : > { %17830 = shalt.err (!%p17827_p1)
}
 0x155   : > { %15556 = dma.hbm_to_vmem [thread:$0]  (!%p18433_p9), %s19656_s7, 64, %s607_s21, [#allocation14]  }
 0x156   : > { %s18249_s2 = smov [#allocation18]   ;;  %s19657_s9 = sld [smem:[#allocation69_spill]] }
 0x157   : > { %s627_s30 = sshll.u32 %s18249_s2, 4  ;;  %s628_s30 = int_to_ptr.vmem [resolvable:$true] %s627_s30 }
 0x15c   : > { %s17831_s25 = scalar_lea.hbm %s19657_s9, 32768 }
 0x15d   : > { %p17832_p2 = scmp.ne.s32.totalorder %s19657_s9, %s17831_s25  ;;  %p17838_p6 = scmp.lt.u32.totalorder %s17831_s25, %s19657_s9 }
 0x15f   : > { %p17834_p3 = pnand %p17832_p2, %p18449_p11 }
 0x161   : > { %p17835_p4 = pneg %p17834_p3 }
 0x163   : > { %p17840_p5 = pnand %p17838_p6, %p17835_p4 }
 0x165   : > { %17843 = shalt.err (!%p17840_p5)
}
 0x166   : > { %s17844_s21 = scalar_lea.vmem %s628_s30, 32768  ;;  %p17852_p7 = scmp.lt.s32.totalorder %s628_s30, %s628_s30 }
 0x167   : > { %p17845_p8 = scmp.ne.s32.totalorder %s628_s30, %s17844_s21  ;;  %p17853_p13 = scmp.lt.s32.totalorder %s17844_s21, %s17844_s21 }
 0x169   : > { %p17847_p10 = pnand %p17845_p8, %p18449_p11  ;;  %p17854_p0 = por %p17853_p13, %p17852_p7 }
 0x16b   : > { %p17848_p12 = pneg %p17847_p10 }
 0x16d   : > { %p17855_p1 = pnand %p17854_p0, %p17848_p12 }
 0x16f   : > { %17858 = shalt.err (!%p17855_p1)
}
 0x170   : > { %s18250_s0 = smov 512   ;;  %s18251_s26 = smov 32  }
 0x171   : > { %15562 = dma.hbm_to_vmem [thread:$0]  (!%p18433_p9), %s19657_s9, 32768, %s628_s30, [#allocation17], %s18250_s0, %s18250_s0, %s18251_s26  }
 0x172   : > { %s18252_s6 = smov [#allocation21]   ;;  %s18253_s25 = smov [#allocation24]  }
 0x173   : > { %s651_s15 = sshll.u32 %s18252_s6, 4  ;;  %s676_s27 = sshll.u32 %s18253_s25, 4  ;;  %s652_s15 = int_to_ptr.vmem [resolvable:$true] %s651_s15  ;;  %s18684_s27 = int_to_ptr.vmem [resolvable:$true] %s676_s27 }
 0x174   : > { %s19658_s11 = sld [smem:[#allocation71_spill]] }
 0x17a   : > { %s17859_s21 = scalar_lea.hbm %s19658_s11, 32768 }
 0x17b   : > { %p17860_p2 = scmp.ne.s32.totalorder %s19658_s11, %s17859_s21  ;;  %p17866_p6 = scmp.lt.u32.totalorder %s17859_s21, %s19658_s11 }
 0x17d   : > { %p17862_p3 = pnand %p17860_p2, %p18449_p11 }
 0x17f   : > { %p17863_p4 = pneg %p17862_p3 }
 0x181   : > { %p17868_p5 = pnand %p17866_p6, %p17863_p4 }
 0x183   : > { %17871 = shalt.err (!%p17868_p5)
}
 0x184   : > { %s17872_s0 = scalar_lea.vmem %s652_s15, 32768  ;;  %p17880_p7 = scmp.lt.s32.totalorder %s652_s15, %s652_s15 }
 0x185   : > { %p17873_p8 = scmp.ne.s32.totalorder %s652_s15, %s17872_s0  ;;  %p17881_p13 = scmp.lt.s32.totalorder %s17872_s0, %s17872_s0 }
 0x187   : > { %p17875_p10 = pnand %p17873_p8, %p18449_p11  ;;  %p17882_p0 = por %p17881_p13, %p17880_p7 }
 0x189   : > { %p17876_p12 = pneg %p17875_p10 }
 0x18b   : > { %p17883_p1 = pnand %p17882_p0, %p17876_p12 }
 0x18d   : > { %17886 = shalt.err (!%p17883_p1)
}
 0x18e   : > { %15568 = dma.hbm_to_vmem [thread:$0]  (!%p18433_p9), %s19658_s11, 32768, %s652_s15, [#allocation20], %s19655_s5, %s19655_s5, %s19654_s23  }
 0x18f   : > { %s17887_s6 = scalar_lea.hbm %s19582_s13, 64 }
 0x190   : > { %p17888_p2 = scmp.ne.s32.totalorder %s19582_s13, %s17887_s6  ;;  %p17894_p6 = scmp.lt.u32.totalorder %s17887_s6, %s19582_s13 }
 0x192   : > { %p17890_p3 = pnand %p17888_p2, %p18449_p11 }
 0x194   : > { %p17891_p4 = pneg %p17890_p3 }
 0x196   : > { %p17896_p5 = pnand %p17894_p6, %p17891_p4 }
 0x198   : > { %17899 = shalt.err (!%p17896_p5)
}
 0x199   : > { %s17900_s15 = scalar_lea.vmem %s18684_s27, 64  ;;  %p17908_p7 = scmp.lt.s32.totalorder %s18684_s27, %s18684_s27 }
 0x19a   : > { %p17901_p8 = scmp.ne.s32.totalorder %s18684_s27, %s17900_s15  ;;  %p17909_p13 = scmp.lt.s32.totalorder %s17900_s15, %s17900_s15 }
 0x19c   : > { %p17903_p10 = pnand %p17901_p8, %p18449_p11  ;;  %p17910_p0 = por %p17909_p13, %p17908_p7 }
 0x19e   : > { %p17904_p12 = pneg %p17903_p10 }
 0x1a0   : > { %p17911_p1 = pnand %p17910_p0, %p17904_p12 }
 0x1a2   : > { %17914 = shalt.err (!%p17911_p1)
}
 0x1a3   : > { %15574 = dma.hbm_to_vmem [thread:$0]  (!%p18433_p9), %s19582_s13, 64, %s18684_s27, [#allocation23]  }
 0x1a4   : > { %s18254_s0 = smov [#allocation27]   ;;  %s18255_s10 = smov [#allocation30]  }
 0x1a5   : > { %s697_s7 = sshll.u32 %s18254_s0, 4  ;;  %s723_s26 = sshll.u32 %s18255_s10, 4  ;;  %s698_s7 = int_to_ptr.vmem [resolvable:$true] %s697_s7  ;;  %s18730_s26 = int_to_ptr.vmem [resolvable:$true] %s723_s26 }
 0x1a6   : > { %s19659_s25 = sld [smem:[#allocation73_spill]] }
 0x1ac   : > { %s19660_s1 = smov %s19659_s25  ;;  %s17915_s3 = scalar_lea.hbm %s19659_s25, 16384 }
 0x1ad   : > { %p17916_p2 = scmp.ne.s32.totalorder %s19660_s1, %s17915_s3  ;;  %p17922_p6 = scmp.lt.u32.totalorder %s17915_s3, %s19660_s1 }
 0x1af   : > { %p17918_p3 = pnand %p17916_p2, %p18449_p11 }
 0x1b1   : > { %p17919_p4 = pneg %p17918_p3 }
 0x1b3   : > { %p17924_p5 = pnand %p17922_p6, %p17919_p4 }
 0x1b5   : > { %17927 = shalt.err (!%p17924_p5)
}
 0x1b6   : > { %s17928_s30 = scalar_lea.vmem %s698_s7, 16384  ;;  %p17936_p7 = scmp.lt.s32.totalorder %s698_s7, %s698_s7 }
 0x1b7   : > { %p17929_p8 = scmp.ne.s32.totalorder %s698_s7, %s17928_s30  ;;  %p17937_p13 = scmp.lt.s32.totalorder %s17928_s30, %s17928_s30 }
 0x1b9   : > { %p17931_p10 = pnand %p17929_p8, %p18449_p11  ;;  %p17938_p0 = por %p17937_p13, %p17936_p7 }
 0x1bb   : > { %p17932_p12 = pneg %p17931_p10 }
 0x1bd   : > { %p17939_p1 = pnand %p17938_p0, %p17932_p12 }
 0x1bf   : > { %17942 = shalt.err (!%p17939_p1)
}
 0x1c0   : > { %15580 = dma.hbm_to_vmem [thread:$0]  (!%p18433_p9), %s19660_s1, 16384, %s698_s7, [#allocation26], %s19655_s5, %s19655_s5, %s19654_s23  }
 0x1c1   : > { %s17943_s25 = scalar_lea.hbm %s19586_s17, 16384 }
 0x1c2   : > { %p17944_p2 = scmp.ne.s32.totalorder %s19586_s17, %s17943_s25  ;;  %p17950_p6 = scmp.lt.u32.totalorder %s17943_s25, %s19586_s17 }
 0x1c4   : > { %p17946_p3 = pnand %p17944_p2, %p18449_p11 }
 0x1c6   : > { %p17947_p4 = pneg %p17946_p3 }
 0x1c8   : > { %p17952_p5 = pnand %p17950_p6, %p17947_p4 }
 0x1ca   : > { %17955 = shalt.err (!%p17952_p5)
}
 0x1cb   : > { %s17956_s7 = scalar_lea.vmem %s18730_s26, 16384  ;;  %p17964_p7 = scmp.lt.s32.totalorder %s18730_s26, %s18730_s26 }
 0x1cc   : > { %p17957_p8 = scmp.ne.s32.totalorder %s18730_s26, %s17956_s7  ;;  %p17965_p13 = scmp.lt.s32.totalorder %s17956_s7, %s17956_s7 }
 0x1ce   : > { %p17959_p10 = pnand %p17957_p8, %p18449_p11  ;;  %p17966_p0 = por %p17965_p13, %p17964_p7 }
 0x1d0   : > { %p17960_p12 = pneg %p17959_p10 }
 0x1d2   : > { %p17967_p1 = pnand %p17966_p0, %p17960_p12 }
 0x1d4   : > { %17970 = shalt.err (!%p17967_p1)
}
 0x1d5   : > { %15586 = dma.hbm_to_vmem [thread:$0]  (!%p18433_p9), %s19586_s17, 16384, %s18730_s26, [#allocation29], %s19655_s5, %s19655_s5, %s19654_s23  }
 0x1d6   : > { %s18256_s0 = smov [#allocation33]   ;;  %s17971_s25 = scalar_lea.hbm %s19588_s19, 4096 }
 0x1d7   : > { %s747_s10 = sshll.u32 %s18256_s0, 4  ;;  %p17972_p2 = scmp.ne.s32.totalorder %s19588_s19, %s17971_s25  ;;  %s748_s10 = int_to_ptr.vmem [resolvable:$true] %s747_s10 }
 0x1d8   : > { %p17978_p6 = scmp.lt.u32.totalorder %s17971_s25, %s19588_s19 }
 0x1d9   : > { %p17974_p3 = pnand %p17972_p2, %p18449_p11 }
 0x1db   : > { %p17975_p4 = pneg %p17974_p3 }
 0x1dd   : > { %p17980_p5 = pnand %p17978_p6, %p17975_p4 }
 0x1df   : > { %17983 = shalt.err (!%p17980_p5)
}
 0x1e0   : > { %s17984_s23 = scalar_lea.vmem %s748_s10, 4096  ;;  %p17992_p7 = scmp.lt.s32.totalorder %s748_s10, %s748_s10 }
 0x1e1   : > { %p17985_p8 = scmp.ne.s32.totalorder %s748_s10, %s17984_s23  ;;  %p17993_p13 = scmp.lt.s32.totalorder %s17984_s23, %s17984_s23 }
 0x1e3   : > { %p17987_p10 = pnand %p17985_p8, %p18449_p11  ;;  %p17994_p0 = por %p17993_p13, %p17992_p7 }
 0x1e5   : > { %p17988_p12 = pneg %p17987_p10 }
 0x1e7   : > { %p17995_p1 = pnand %p17994_p0, %p17988_p12 }
 0x1e9   : > { %17998 = shalt.err (!%p17995_p1)
}
 0x1ea   : > { %s18257_s5 = smov 64   ;;  %s18258_s26 = smov 4  }
 0x1eb   : > { %15592 = dma.hbm_to_vmem [thread:$0]  (!%p18433_p9), %s19588_s19, 4096, %s748_s10, [#allocation32], %s18257_s5, %s18257_s5, %s18258_s26  }
 0x1ec   : > { %s18259_s30 = smov [#allocation34]   ;;  %s17999_s25 = scalar_lea.hbm %s19589_s20, 16 }
 0x1ed   : > { %s761_s0 = sshll.u32 %s18259_s30, 4  ;;  %p18000_p2 = scmp.ne.s32.totalorder %s19589_s20, %s17999_s25  ;;  %s762_s0 = int_to_ptr.vmem [resolvable:$true] %s761_s0 }
 0x1ee   : > { %p18006_p6 = scmp.lt.u32.totalorder %s17999_s25, %s19589_s20 }
 0x1ef   : > { %p18002_p3 = pnand %p18000_p2, %p18449_p11 }
 0x1f1   : > { %p18003_p4 = pneg %p18002_p3 }
 0x1f3   : > { %p18008_p5 = pnand %p18006_p6, %p18003_p4 }
 0x1f5   : > { %18011 = shalt.err (!%p18008_p5)
}
 0x1f6   : > { %s18012_s10 = scalar_lea.vmem %s762_s0, 16  ;;  %s18019_s23 = scalar_lea.vmem %s762_s0, 32 }
 0x1f7   : > { %p18013_p8 = scmp.ne.s32.totalorder %s762_s0, %s18012_s10  ;;  %p18020_p7 = scmp.lt.s32.totalorder %s762_s0, %s762_s0 }
 0x1f8   : > { %p18021_p13 = scmp.lt.s32.totalorder %s18019_s23, %s18012_s10 }
 0x1f9   : > { %p18015_p10 = pnand %p18013_p8, %p18449_p11 }
 0x1fa   : > { %p18022_p0 = por %p18021_p13, %p18020_p7 }
 0x1fb   : > { %p18016_p12 = pneg %p18015_p10 }
 0x1fd   : > { %p18023_p1 = pnand %p18022_p0, %p18016_p12 }
 0x1ff   : > { %18026 = shalt.err (!%p18023_p1)
}
 0x200   : > { %s19661_s7 = sld [smem:[#allocation57_spill]]  ;;  %s19662_s27 = sld [smem:[#allocation56_spill]] }
 0x201   : > { %s19663_s30 = sld [smem:[#allocation55_spill]]  ;;  %s19664_s29 = sld [smem:[#allocation54_spill]] }
 0x202   : > { %s19665_s2 = sld [smem:[#allocation58_spill]] }
 0x203   : > { %15595 = dma.hbm_to_vmem [thread:$0]  (!%p18433_p9), %s19589_s20, 16, %s762_s0, [#allocation35]  }
 0x206   : > { %s13775_s6 = sadd.s32 4294967294, %s19661_s7   ;;  %s18817_s26 = sadd.s32 1, %s19661_s7  }
 0x207   : > { %s62_s4 = ssub.s32 %s19661_s7, %s18817_s26  ;;  %s65_s25 = sadd.s32 1, %s19662_s27 }
 0x208   : > { %p63_p11 = scmp.eq.s32.totalorder %s62_s4, 0  ;;  %p72_p2 = scmp.ne.s32.totalorder %s19662_s27, %s19663_s30 }
 0x209   : > { %p73_p3 = scmp.eq.s32.totalorder %s19661_s7, 0  ;;  %p78_p4 = scmp.ne.s32.totalorder %s19663_s30, %s19664_s29 }
 0x20a   : > { %s18828_s3 = scalar_select %p63_p11, %s19662_s27, %s65_s25  }
 0x20b   : > { %p18830_p6 = por %p73_p3, %p72_p2  ;;  %p19667_p5 = scmp.eq.s32.totalorder %s19665_s2, 0 }
 0x20c   : > { %p506_p8 = scmp.eq.s32.totalorder %s19665_s2, 1  ;;  %p512_p10 = scmp.eq.s32.totalorder %s13775_s6, 1 }
 0x20d   : > { %p18836_p9 = por %p19667_p5, %p78_p4  ;;  %p15628_p12 = scmp.lt.s32.totalorder %s19661_s7, 2 }
 0x20e   : > { %s18843_s15 = sand.u32 1, %s19662_s27   ;;  %p18845_p7 = por %p506_p8, %p72_p2 }
 0x20f   : > { %s19668_s0 = scalar_select %p18836_p9, 1, 0 }
 0x210   : > { %s19669_s8 = scalar_select %p18845_p7, 1, 0 }
 0x211   : > { %p18849_p13 = por %p512_p10, %p78_p4  ;;  %s13796_s23 = sshll.u32 %s18843_s15, 5 }
 0x212   : > { %s15291_s5 = sshll.u32 %s19661_s7, 9  ;;  %s19671_s4 = sld [smem:[#allocation61_spill]] }
 0x213   : > { %s19670_s10 = scalar_select %p18849_p13, 1, 0 }
 0x214   : > { %s776_s27 = scalar_lea.vmem [#allocation4], %s13796_s23  ;;  %p18864_p0 = pnand %p15628_p12, %p18830_p6 }
 0x215   : > { %s784_s6 = sshll.u32 %s776_s27, 4  ;;  %s773_s9 = scalar_lea.sflag [#allocation5], %s18843_s15  ;;  %s18860_s6 = int_to_ptr.vmem [resolvable:$true] %s784_s6 }
 0x216   : > { %p18029_p11 = pneg %p18864_p0 }
 0x218   : > { %s18858_s2 = scalar_lea.hbm %s19671_s4, %s15291_s5  ;;  %s18032_s21 = scalar_lea.hbm %s19671_s4, 1024 }
 0x219   : > { %s18027_s30 = scalar_lea.hbm %s18858_s2, 512  ;;  %p18033_p4 = scmp.lt.u32.totalorder %s18858_s2, %s19671_s4 }
 0x21a   : > { %p18028_p1 = scmp.ne.s32.totalorder %s18858_s2, %s18027_s30  ;;  %p18034_p6 = scmp.lt.u32.totalorder %s18032_s21, %s18027_s30 }
 0x21b   : > { %p18036_p8 = scmp.lt.u32.totalorder %s18027_s30, %s18858_s2 }
 0x21c   : > { %p18030_p2 = pnand %p18029_p11, %p18028_p1  ;;  %p18035_p5 = por %p18034_p6, %p18033_p4 }
 0x21e   : > { %p18031_p3 = pneg %p18030_p2  ;;  %p18037_p10 = por %p18036_p8, %p18035_p5 }
 0x220   : > { %p18038_p12 = pnand %p18037_p10, %p18031_p3 }
 0x222   : > { %18041 = shalt.err (!%p18038_p12)
}
 0x223   : > { %s18042_s1 = scalar_lea.vmem %s18860_s6, 512  ;;  %s18260_s23 = smov [#allocation4]  }
 0x224   : > { %p18043_p1 = scmp.ne.s32.totalorder %s18860_s6, %s18042_s1  ;;  %s18047_s5 = sshll.u32 %s18260_s23, 4  ;;  %s18048_s5 = int_to_ptr.vmem [resolvable:$false] %s18047_s5 }
 0x225   : > { %s18049_s29 = scalar_lea.vmem %s18048_s5, 1024  ;;  %p18050_p7 = scmp.lt.s32.totalorder %s18860_s6, %s18048_s5 }
 0x226   : > { %p18045_p2 = pnand %p18043_p1, %p18029_p11  ;;  %p18051_p4 = scmp.lt.s32.totalorder %s18049_s29, %s18042_s1 }
 0x228   : > { %p18046_p13 = pneg %p18045_p2  ;;  %p18052_p6 = por %p18051_p4, %p18050_p7 }
 0x22a   : > { %p18053_p5 = pnand %p18052_p6, %p18046_p13 }
 0x22c   : > { %18056 = shalt.err (!%p18053_p5)
}
 0x22d   : > { %15599 = dma.hbm_to_vmem [thread:$0]  (!%p18864_p0), %s18858_s2, 512, %s18860_s6, %s773_s9  }
 0x22e   : > { %s13799_s30 = sshll.u32 %s19661_s7, 4  ;;  %s794_s21 = scalar_lea.vmem [#allocation7], %s18843_s15 }
 0x22f   : > { %s801_s27 = sshll.u32 %s794_s21, 4  ;;  %s19673_s11 = sld [smem:[#allocation62_spill]]  ;;  %s802_s27 = int_to_ptr.vmem [resolvable:$true] %s801_s27 }
 0x230   : > { %s19674_s1 = sand.u32 1, %s19661_s7  }
 0x231   : > { %s792_s29 = scalar_lea.sflag [#allocation8], %s19674_s1 }
 0x235   : > { %s18900_s5 = scalar_lea.hbm %s19673_s11, %s13799_s30  ;;  %s18062_s2 = scalar_lea.hbm %s19673_s11, 32 }
 0x236   : > { %s18057_s12 = scalar_lea.hbm %s18900_s5, 16  ;;  %p18063_p8 = scmp.lt.u32.totalorder %s18900_s5, %s19673_s11 }
 0x237   : > { %p18058_p7 = scmp.ne.s32.totalorder %s18900_s5, %s18057_s12  ;;  %p18064_p10 = scmp.lt.u32.totalorder %s18062_s2, %s18057_s12 }
 0x238   : > { %p18066_p1 = scmp.lt.u32.totalorder %s18057_s12, %s18900_s5 }
 0x239   : > { %p18060_p13 = pnand %p18058_p7, %p18029_p11  ;;  %p18065_p12 = por %p18064_p10, %p18063_p8 }
 0x23b   : > { %p18061_p3 = pneg %p18060_p13  ;;  %p18067_p2 = por %p18066_p1, %p18065_p12 }
 0x23d   : > { %p18068_p4 = pnand %p18067_p2, %p18061_p3 }
 0x23f   : > { %18071 = shalt.err (!%p18068_p4)
}
 0x240   : > { %s18072_s7 = scalar_lea.vmem %s802_s27, 16  ;;  %s18261_s30 = smov [#allocation7]  }
 0x241   : > { %p18073_p6 = scmp.ne.s32.totalorder %s802_s27, %s18072_s7  ;;  %s18077_s21 = sshll.u32 %s18261_s30, 4  ;;  %s18078_s21 = int_to_ptr.vmem [resolvable:$false] %s18077_s21 }
 0x242   : > { %s18079_s23 = scalar_lea.vmem %s18078_s21, 32  ;;  %p18080_p13 = scmp.lt.s32.totalorder %s802_s27, %s18078_s21 }
 0x243   : > { %p18075_p5 = pnand %p18073_p6, %p18029_p11  ;;  %p18081_p9 = scmp.lt.s32.totalorder %s18079_s23, %s18072_s7 }
 0x245   : > { %p18076_p7 = pneg %p18075_p5  ;;  %p18082_p8 = por %p18081_p9, %p18080_p13 }
 0x247   : > { %p18083_p10 = pnand %p18082_p8, %p18076_p7 }
 0x249   : > { %18086 = shalt.err (!%p18083_p10)
}
 0x24a   : > { %15602 = dma.hbm_to_vmem [thread:$0]  (!%p18864_p0), %s18900_s5, 16, %s802_s27, %s792_s29  }
 0x24b   : > { %s19675_s12 = sld [smem:[#allocation59_spill]] }
 0x251   : > { %p19676_p3 = scmp.ne.s32.totalorder %s19675_s12, 0 }
 0x252   : > { %s19677_s1 = sld [smem:[#allocation55_spill]] (!%p19676_p3)  ;;  %p19678_p9 = scmp.ne.s32.totalorder (!%p19676_p3), %s19668_s0, 0 }
 0x253   : > { %810 = sbr.rel (%p19676_p3) target bundleno = 4629 (0x1215), region = 100 }
 0x258   : > { %s18926_s9 = sand.u32 (!%p19676_p3), 1, %s19677_s1  }
 0x259   : > { %s13801_s15 = sshll.u32 (!%p19676_p3), %s18926_s9, 5  ;;  %s813_s2 = scalar_lea.sflag (!%p19676_p3), [#allocation5], %s18926_s9 }
 0x25a   : > { %s18932_s4 = scalar_lea.vmem [#allocation4], %s13801_s15 }
 0x25b   : > { %18162 = dma.done.wait (%p19678_p9), %s813_s2, 512  }
 0x25c   : > { %18164 = vsyncadd (%p19678_p9), %s813_s2, 4294966784  ;;  %s19679_s25 = sld [smem:[#allocation58_spill]]  ;;  %s824_s29 = scalar_lea.vmem [#allocation7], %s18926_s9 }
 0x262   : > { %s821_s27 = sand.u32 1, %s19679_s25  }
 0x263   : > { %s822_s5 = scalar_lea.sflag [#allocation8], %s821_s27 }
 0x264   : > { %18166 = dma.done.wait (%p19678_p9), %s822_s5, 16  }
 0x265   : > { %18168 = vsyncadd (%p19678_p9), %s822_s5, 4294967280  ;;  %p19680_p0 = scmp.eq.s32.totalorder %s19679_s25, 0 }
 0x267   : > { %18170 = dma.done.wait (%p19680_p0), [#allocation8], 49152   ;;  %p19681_p11 = pmov %p19680_p0 }
 0x268   : > { %p19682_p12 = pmov %p19680_p0 }
 0x269   : > { %18172 = vsyncadd (%p19681_p11), [#allocation8], 4294918144 }
 0x26a   : > { %18174 = dma.done.wait (%p19682_p12), [#allocation11], 16576   ;;  %p19683_p1 = pmov %p19680_p0 }
 0x26b   : > { %p19684_p2 = pmov %p19680_p0 }
 0x26c   : > { %18176 = vsyncadd (%p19683_p1), [#allocation11], 4294950720 }
 0x26d   : > { %18178 = dma.done.wait (%p19684_p2), [#allocation14], 128   ;;  %p19685_p4 = pmov %p19680_p0 }
 0x26e   : > { %p19686_p6 = pmov %p19680_p0 }
 0x26f   : > { %18180 = vsyncadd (%p19685_p4), [#allocation14], 4294967168 }
 0x270   : > { %18182 = dma.done.wait (%p19686_p6), [#allocation17], 32832   ;;  %p19687_p5 = pmov %p19680_p0 }
 0x271   : > { %p19688_p7 = pmov %p19680_p0 }
 0x272   : > { %18184 = vsyncadd (%p19687_p5), [#allocation17], 4294934464 }
 0x273   : > { %18186 = dma.done.wait (%p19688_p7), [#allocation20], 32896   ;;  %p19689_p13 = pmov %p19680_p0 }
 0x274   : > { %p19690_p8 = pmov %p19680_p0 }
 0x275   : > { %18188 = vsyncadd (%p19689_p13), [#allocation20], 4294934400 }
 0x276   : > { %18190 = dma.done.wait (%p19690_p8), [#allocation23], 128   ;;  %p19691_p10 = pmov %p19680_p0 }
 0x277   : > { %p19692_p3 = pmov %p19680_p0 }
 0x278   : > { %18192 = vsyncadd (%p19691_p10), [#allocation23], 4294967168 }
 0x279   : > { %18194 = dma.done.wait (%p19692_p3), [#allocation26], 16448   ;;  %p19693_p9 = pmov %p19680_p0 }
 0x27b   : > { %18196 = vsyncadd (%p19693_p9), [#allocation26], 4294950848 }
 0x27c   : > { %18198 = dma.done.wait (%p19680_p0), [#allocation29], 32768   ;;  %p19694_p11 = pmov %p19680_p0 }
 0x27d   : > { %p19695_p12 = pmov %p19680_p0 }
 0x27e   : > { %18200 = vsyncadd (%p19694_p11), [#allocation29], 4294934528 }
 0x27f   : > { %18202 = dma.done.wait (%p19695_p12), [#allocation32], 4160   ;;  %p19696_p1 = pmov %p19680_p0 }
 0x280   : > { %p19697_p2 = pmov %p19680_p0 }
 0x281   : > { %18204 = vsyncadd (%p19696_p1), [#allocation32], 4294963136 }
 0x282   : > { %18206 = dma.done.wait (%p19697_p2), [#allocation35], 16   ;;  %p19698_p4 = pmov %p19680_p0 }
 0x283   : > { %v15712_v0 = vld [vmem:[#allocation9 + $0x4] ss:$48 sps:$4 sm:$0xff]   ;;  %v15714_v1 = vld [vmem:[#allocation9 + $0xc] ss:$48 sps:$4 sm:$0xff]   ;;  %v15716_v2 = vld [vmem:[#allocation9] ss:$48 sps:$4 sm:$0xff]  }
 0x284   : > { %18208 = vsyncadd (%p19698_p4), [#allocation35], 4294967280  ;;  %3340 = vmatprep.subr.bf16.mxu0 %v15712_v0  ;;  %v15717_v3 = vld [vmem:[#allocation9 + $0x8] ss:$48 sps:$4 sm:$0xff]   ;;  %3422 = vmatprep.subr.bf16.mxu1 %v15714_v1  ;;  %v15718_v4 = vld [vmem:[#allocation9 + $0x64] ss:$48 sps:$4 sm:$0xff]  }
 0x285   : > { %3341 = vmatpush1.bf16.msra.mxu0 %v15716_v2  ;;  %3423 = vmatpush1.bf16.msra.mxu1 %v15717_v3  ;;  %v15720_v5 = vld [vmem:[#allocation9 + $0x6c] ss:$48 sps:$4 sm:$0xff]   ;;  %v15722_v6 = vld [vmem:[#allocation9 + $0x60] ss:$48 sps:$4 sm:$0xff]   ;;  %v15723_v7 = vld [vmem:[#allocation9 + $0x68] ss:$48 sps:$4 sm:$0xff]  }
 0x286   : > { %3342 = vmatprep.subr.bf16.mxu0 %v15718_v4  ;;  %3424 = vmatprep.subr.bf16.mxu1 %v15720_v5  ;;  %v15724_v8 = vld [vmem:[#allocation9 + $0xc4] ss:$48 sps:$4 sm:$0xff]   ;;  %v15726_v9 = vld [vmem:[#allocation9 + $0xcc] ss:$48 sps:$4 sm:$0xff]   ;;  %v15728_v10 = vld [vmem:[#allocation9 + $0xc0] ss:$48 sps:$4 sm:$0xff]  }
 0x287   : > { %v15729_v11 = vld [vmem:[#allocation9 + $0xc8] ss:$48 sps:$4 sm:$0xff]   ;;  %v15730_v12 = vld [vmem:[#allocation9 + $0x124] ss:$48 sps:$4 sm:$0xff]   ;;  %v15732_v13 = vld [vmem:[#allocation9 + $0x12c] ss:$48 sps:$4 sm:$0xff]  }
 0x288   : > { %v15734_v14 = vld [vmem:[#allocation9 + $0x120] ss:$48 sps:$4 sm:$0xff]   ;;  %v15735_v15 = vld [vmem:[#allocation9 + $0x128] ss:$48 sps:$4 sm:$0xff]   ;;  %v15736_v16 = vld [vmem:[#allocation9 + $0x184] ss:$48 sps:$4 sm:$0xff]  }
 0x289   : > { %3343 = vmatpush1.bf16.msra.mxu0 %v15722_v6  ;;  %3425 = vmatpush1.bf16.msra.mxu1 %v15723_v7  ;;  %v15738_v17 = vld [vmem:[#allocation9 + $0x18c] ss:$48 sps:$4 sm:$0xff]   ;;  %v15740_v18 = vld [vmem:[#allocation9 + $0x180] ss:$48 sps:$4 sm:$0xff]   ;;  %v15741_v19 = vld [vmem:[#allocation9 + $0x188] ss:$48 sps:$4 sm:$0xff]  }
 0x28a   : > { %3344 = vmatprep.subr.bf16.mxu0 %v15724_v8  ;;  %3426 = vmatprep.subr.bf16.mxu1 %v15726_v9  ;;  %v15742_v20 = vld [vmem:[#allocation9 + $0x1e4] ss:$48 sps:$4 sm:$0xff]   ;;  %v15744_v21 = vld [vmem:[#allocation9 + $0x1ec] ss:$48 sps:$4 sm:$0xff]   ;;  %v15746_v22 = vld [vmem:[#allocation9 + $0x1e0] ss:$48 sps:$4 sm:$0xff]  }
 0x28b   : > { %v15747_v23 = vld [vmem:[#allocation9 + $0x1e8] ss:$48 sps:$4 sm:$0xff]   ;;  %v15748_v24 = vld [vmem:[#allocation9 + $0x244] ss:$48 sps:$4 sm:$0xff]   ;;  %v15750_v25 = vld [vmem:[#allocation9 + $0x24c] ss:$48 sps:$4 sm:$0xff]  }
 0x28c   : > { %v15752_v26 = vld [vmem:[#allocation9 + $0x240] ss:$48 sps:$4 sm:$0xff]   ;;  %v15753_v27 = vld [vmem:[#allocation9 + $0x248] ss:$48 sps:$4 sm:$0xff]   ;;  %v15754_v28 = vld [vmem:[#allocation9 + $0x2a4] ss:$48 sps:$4 sm:$0xff]  }
 0x28d   : > { %3345 = vmatpush1.bf16.msra.mxu0 %v15728_v10  ;;  %3427 = vmatpush1.bf16.msra.mxu1 %v15729_v11  ;;  %v15756_v29 = vld [vmem:[#allocation9 + $0x2ac] ss:$48 sps:$4 sm:$0xff]   ;;  %v15758_v30 = vld [vmem:[#allocation9 + $0x2a0] ss:$48 sps:$4 sm:$0xff]   ;;  %v15759_v31 = vld [vmem:[#allocation9 + $0x2a8] ss:$48 sps:$4 sm:$0xff]  }
 0x28e   : > { %3346 = vmatprep.subr.bf16.mxu0 %v15730_v12  ;;  %3428 = vmatprep.subr.bf16.mxu1 %v15732_v13  ;;  %v15760_v32 = vld [vmem:[#allocation9 + $0x304] ss:$48 sps:$4 sm:$0xff]   ;;  %v15762_v33 = vld [vmem:[#allocation9 + $0x30c] ss:$48 sps:$4 sm:$0xff]   ;;  %v15764_v34 = vld [vmem:[#allocation9 + $0x300] ss:$48 sps:$4 sm:$0xff]  }
 0x28f   : > { %v15765_v35 = vld [vmem:[#allocation9 + $0x308] ss:$48 sps:$4 sm:$0xff]   ;;  %v15766_v36 = vld [vmem:[#allocation9 + $0x364] ss:$48 sps:$4 sm:$0xff]   ;;  %v15768_v37 = vld [vmem:[#allocation9 + $0x36c] ss:$48 sps:$4 sm:$0xff]  }
 0x290   : > { %v15770_v38 = vld [vmem:[#allocation9 + $0x360] ss:$48 sps:$4 sm:$0xff]   ;;  %v15771_v39 = vld [vmem:[#allocation9 + $0x368] ss:$48 sps:$4 sm:$0xff]   ;;  %v15772_v40 = vld [vmem:[#allocation9 + $0x3c4] ss:$48 sps:$4 sm:$0xff]  }
 0x291   : > { %3347 = vmatpush1.bf16.msra.mxu0 %v15734_v14  ;;  %3429 = vmatpush1.bf16.msra.mxu1 %v15735_v15  ;;  %v15774_v41 = vld [vmem:[#allocation9 + $0x3cc] ss:$48 sps:$4 sm:$0xff]   ;;  %v15776_v42 = vld [vmem:[#allocation9 + $0x3c0] ss:$48 sps:$4 sm:$0xff]   ;;  %v15777_v43 = vld [vmem:[#allocation9 + $0x3c8] ss:$48 sps:$4 sm:$0xff]  }
 0x292   : > { %3348 = vmatprep.subr.bf16.mxu0 %v15736_v16  ;;  %3430 = vmatprep.subr.bf16.mxu1 %v15738_v17  ;;  %v15778_v44 = vld [vmem:[#allocation9 + $0x424] ss:$48 sps:$4 sm:$0xff]   ;;  %v15780_v45 = vld [vmem:[#allocation9 + $0x42c] ss:$48 sps:$4 sm:$0xff]   ;;  %v15782_v47 = vld [vmem:[#allocation9 + $0x420] ss:$48 sps:$4 sm:$0xff]  }
 0x293   : > { %v965_v46 = vld [vmem:[%s18932_s4 + $0x8] sm:$0xff]  ;;  %v15788_v52 = vld [vmem:[#allocation9 + $0x480] ss:$48 sps:$4 sm:$0xff]   ;;  %vm18265_vm0 = vmmov 0   ;;  %vm4481_vm1 = vcmask 1043456   ;;  %vm4425_vm3 = vcmask 64512  }
 0x294   : > { %v18985_v48 = vpack.c.bf16 %v965_v46, %v965_v46  ;;  %v15783_v49 = vld [vmem:[#allocation9 + $0x428] ss:$48 sps:$4 sm:$0xff]   ;;  %v15784_v50 = vld [vmem:[#allocation9 + $0x484] ss:$48 sps:$4 sm:$0xff]   ;;  %v15786_v51 = vld [vmem:[#allocation9 + $0x48c] ss:$48 sps:$4 sm:$0xff]  }
 0x295   : > { %3349 = vmatpush1.bf16.msra.mxu0 %v15740_v18  ;;  %3431 = vmatpush1.bf16.msra.mxu1 %v15741_v19  ;;  %v15789_v53 = vld [vmem:[#allocation9 + $0x488] ss:$48 sps:$4 sm:$0xff]   ;;  %v15790_v54 = vld [vmem:[#allocation9 + $0x4e4] ss:$48 sps:$4 sm:$0xff]   ;;  %v15792_v55 = vld [vmem:[#allocation9 + $0x4ec] ss:$48 sps:$4 sm:$0xff]  }
 0x296   : > { %3350 = vmatprep.subr.bf16.mxu0 %v15742_v20  ;;  %3432 = vmatprep.subr.bf16.mxu1 %v15744_v21  ;;  %v15794_v56 = vld [vmem:[#allocation9 + $0x4e0] ss:$48 sps:$4 sm:$0xff]   ;;  %v15795_v57 = vld [vmem:[#allocation9 + $0x4e8] ss:$48 sps:$4 sm:$0xff]   ;;  %v15796_v58 = vld [vmem:[#allocation9 + $0x544] ss:$48 sps:$4 sm:$0xff]  }
 0x297   : > { %3372 = vmatprep.mubr.bf16.mxu0 %v18985_v48  ;;  %3454 = vmatprep.mubr.bf16.mxu1 %v18985_v48  ;;  %v15798_v59 = vld [vmem:[#allocation9 + $0x54c] ss:$48 sps:$4 sm:$0xff]   ;;  %v15800_v60 = vld [vmem:[#allocation9 + $0x540] ss:$48 sps:$4 sm:$0xff]   ;;  %v15801_v61 = vld [vmem:[#allocation9 + $0x548] ss:$48 sps:$4 sm:$0xff]  }
 0x298   : > { %v15802_v62 = vld [vmem:[#allocation9 + $0x5a4] ss:$48 sps:$4 sm:$0xff]   ;;  %v15804_v63 = vld [vmem:[#allocation9 + $0x5ac] ss:$48 sps:$4 sm:$0xff]   ;;  %v15806_v0 = vld [vmem:[#allocation9 + $0x5a0] ss:$48 sps:$4 sm:$0xff]  }
 0x299   : > { %3351 = vmatpush1.bf16.msra.mxu0 %v15746_v22  ;;  %3433 = vmatpush1.bf16.msra.mxu1 %v15747_v23  ;;  %v15807_v1 = vld [vmem:[#allocation9 + $0x5a8] ss:$48 sps:$4 sm:$0xff]   ;;  %v964_v2 = vld [vmem:[%s18932_s4] sm:$0xff]  ;;  %s14857_s0 = sshll.u32 %s19679_s25, 2  ;;  %s19385_s2 = scalar_lea.vmem [#allocation36], %s13801_s15 }
 0x29a   : > { %3352 = vmatprep.subr.bf16.mxu0 %v15748_v24  ;;  %3434 = vmatprep.subr.bf16.mxu1 %v15750_v25  ;;  %v15810_v3 = vld [vmem:[#allocation9 + $0x604] ss:$48 sps:$4 sm:$0xff]   ;;  %v15813_v4 = vld [vmem:[#allocation9 + $0x60c] ss:$48 sps:$4 sm:$0xff]   ;;  %v18990_v5 = vpack.c.bf16 %v964_v2, %v964_v2  ;;  %v15808_v6 = vld [vmem:[#allocation9 + $0x600] ss:$48 sps:$4 sm:$0xff]  }
 0x29b   : > { %v15811_v7 = vld [vmem:[#allocation9 + $0x608] ss:$48 sps:$4 sm:$0xff]   ;;  %v15816_v8 = vld [vmem:[#allocation9 + $0x664] ss:$48 sps:$4 sm:$0xff]   ;;  %v15819_v9 = vld [vmem:[#allocation9 + $0x66c] ss:$48 sps:$4 sm:$0xff]  }
 0x29c   : > { %v15814_v10 = vld [vmem:[#allocation9 + $0x660] ss:$48 sps:$4 sm:$0xff]   ;;  %v15817_v11 = vld [vmem:[#allocation9 + $0x668] ss:$48 sps:$4 sm:$0xff]   ;;  %v15822_v12 = vld [vmem:[#allocation9 + $0x6c4] ss:$48 sps:$4 sm:$0xff]  }
 0x29d   : > { %3353 = vmatpush1.bf16.msra.mxu0 %v15752_v26  ;;  %3435 = vmatpush1.bf16.msra.mxu1 %v15753_v27  ;;  %v15825_v13 = vld [vmem:[#allocation9 + $0x6cc] ss:$48 sps:$4 sm:$0xff]   ;;  %v15820_v14 = vld [vmem:[#allocation9 + $0x6c0] ss:$48 sps:$4 sm:$0xff]   ;;  %v15823_v15 = vld [vmem:[#allocation9 + $0x6c8] ss:$48 sps:$4 sm:$0xff]  }
 0x29e   : > { %3354 = vmatprep.subr.bf16.mxu0 %v15754_v28  ;;  %3436 = vmatprep.subr.bf16.mxu1 %v15756_v29  ;;  %v15828_v16 = vld [vmem:[#allocation9 + $0x724] ss:$48 sps:$4 sm:$0xff]   ;;  %v15831_v17 = vld [vmem:[#allocation9 + $0x72c] ss:$48 sps:$4 sm:$0xff]   ;;  %v15826_v18 = vld [vmem:[#allocation9 + $0x720] ss:$48 sps:$4 sm:$0xff]  }
 0x29f   : > { %v15829_v19 = vld [vmem:[#allocation9 + $0x728] ss:$48 sps:$4 sm:$0xff]   ;;  %v15834_v20 = vld [vmem:[#allocation9 + $0x784] ss:$48 sps:$4 sm:$0xff]   ;;  %v15837_v21 = vld [vmem:[#allocation9 + $0x78c] ss:$48 sps:$4 sm:$0xff]  }
 0x2a0   : > { %v15832_v22 = vld [vmem:[#allocation9 + $0x780] ss:$48 sps:$4 sm:$0xff]   ;;  %v15835_v23 = vld [vmem:[#allocation9 + $0x788] ss:$48 sps:$4 sm:$0xff]   ;;  %v15840_v24 = vld [vmem:[#allocation9 + $0x7e4] ss:$48 sps:$4 sm:$0xff]  }
 0x2a1   : > { %3355 = vmatpush1.bf16.msra.mxu0 %v15758_v30  ;;  %3437 = vmatpush1.bf16.msra.mxu1 %v15759_v31  ;;  %v15843_v25 = vld [vmem:[#allocation9 + $0x7ec] ss:$48 sps:$4 sm:$0xff]   ;;  %v15838_v26 = vld [vmem:[#allocation9 + $0x7e0] ss:$48 sps:$4 sm:$0xff]   ;;  %v15841_v27 = vld [vmem:[#allocation9 + $0x7e8] ss:$48 sps:$4 sm:$0xff]  }
 0x2a2   : > { %3356 = vmatprep.subr.bf16.mxu0 %v15760_v32  ;;  %3438 = vmatprep.subr.bf16.mxu1 %v15762_v33  ;;  %v15846_v28 = vld [vmem:[#allocation9 + $0x844] ss:$48 sps:$4 sm:$0xff]   ;;  %v15849_v29 = vld [vmem:[#allocation9 + $0x84c] ss:$48 sps:$4 sm:$0xff]   ;;  %v15844_v31 = vld [vmem:[#allocation9 + $0x840] ss:$48 sps:$4 sm:$0xff]  }
 0x2a3   : > { %v967_v30 = vld [vmem:[%s18932_s4 + $0x18] sm:$0xff]  ;;  %s9804_s6 = sadd.s32 1, %s14857_s0  ;;  %s9803_s7 = sld [smem:[#allocation3 + %s14857_s0]] }
 0x2a4   : > { %v15847_v32 = vld [vmem:[#allocation9 + $0x848] ss:$48 sps:$4 sm:$0xff]   ;;  %v18995_v33 = vpack.c.bf16 %v967_v30, %v967_v30  ;;  %v15870_v46 = vld [vmem:[#allocation9 + $0x9c4] ss:$48 sps:$4 sm:$0xff]   ;;  %s9805_s30 = sld [smem:[#allocation3 + %s9804_s6]]  ;;  %s9806_s21 = sadd.s32 2, %s14857_s0 }
 0x2a5   : > { %3357 = vmatpush1.bf16.msra.mxu0 %v15764_v34  ;;  %3439 = vmatpush1.bf16.msra.mxu1 %v15765_v35  ;;  %v15852_v34 = vld [vmem:[#allocation9 + $0x8a4] ss:$48 sps:$4 sm:$0xff]   ;;  %v15855_v35 = vld [vmem:[#allocation9 + $0x8ac] ss:$48 sps:$4 sm:$0xff]   ;;  %v15895_v2 = vld [vmem:[#allocation9 + $0xb48] ss:$48 sps:$4 sm:$0xff]  }
 0x2a6   : > { %3358 = vmatprep.subr.bf16.mxu0 %v15766_v36  ;;  %3440 = vmatprep.subr.bf16.mxu1 %v15768_v37  ;;  %v15850_v36 = vld [vmem:[#allocation9 + $0x8a0] ss:$48 sps:$4 sm:$0xff]   ;;  %v15853_v37 = vld [vmem:[#allocation9 + $0x8a8] ss:$48 sps:$4 sm:$0xff]   ;;  %v15936_v30 = vld [vmem:[#allocation9 + $0x1f4] ss:$48 sps:$4 sm:$0xff]  }
 0x2a7   : > { %s9808_s23 = sadd.s32 3, %s14857_s0  ;;  %s19363_s12 = sld [smem:[#allocation3 + %s9806_s21]] }
 0x2a8   : > { %s19365_s1 = sld [smem:[#allocation3 + %s9808_s23]]  ;;  %s15292_s15 = sshll.u32 %s19679_s25, 9 }
 0x2a9   : > { %3359 = vmatpush1.bf16.msra.mxu0 %v15770_v38  ;;  %3441 = vmatpush1.bf16.msra.mxu1 %v15771_v39  ;;  %v15858_v38 = vld [vmem:[#allocation9 + $0x904] ss:$48 sps:$4 sm:$0xff]   ;;  %v15861_v39 = vld [vmem:[#allocation9 + $0x90c] ss:$48 sps:$4 sm:$0xff]   ;;  %s19699_s5 = sld [smem:[#allocation74_spill]]  ;;  %s13473_s0 = sshll.u32 %s19385_s2, 4  ;;  %s13474_s0 = int_to_ptr.vmem [resolvable:$true] %s13473_s0 }
 0x2aa   : > { %3360 = vmatprep.subr.bf16.mxu0 %v15772_v40  ;;  %3442 = vmatprep.subr.bf16.mxu1 %v15774_v41  ;;  %v15856_v40 = vld [vmem:[#allocation9 + $0x900] ss:$48 sps:$4 sm:$0xff]   ;;  %v15859_v41 = vld [vmem:[#allocation9 + $0x908] ss:$48 sps:$4 sm:$0xff]   ;;  %s13455_s6 = scalar_lea.sflag [#allocation6], %s18926_s9  ;;  %p19700_p5 = scmp.ne.s32.totalorder %s19669_s8, 0 }
 0x2ad   : > { %3361 = vmatpush1.bf16.msra.mxu0 %v15776_v42  ;;  %3443 = vmatpush1.bf16.msra.mxu1 %v15777_v43  ;;  %v15864_v42 = vld [vmem:[#allocation9 + $0x964] ss:$48 sps:$4 sm:$0xff]   ;;  %v15867_v43 = vld [vmem:[#allocation9 + $0x96c] ss:$48 sps:$4 sm:$0xff]  }
 0x2ae   : > { %3362 = vmatprep.subr.bf16.mxu0 %v15778_v44  ;;  %3444 = vmatprep.subr.bf16.mxu1 %v15780_v45  ;;  %v15862_v44 = vld [vmem:[#allocation9 + $0x960] ss:$48 sps:$4 sm:$0xff]   ;;  %v15865_v45 = vld [vmem:[#allocation9 + $0x968] ss:$48 sps:$4 sm:$0xff]  }
 0x2b1   : > { %3363 = vmatpush1.bf16.msra.mxu0 %v15782_v47  ;;  %3445 = vmatpush1.bf16.msra.mxu1 %v15783_v49  ;;  %v15873_v47 = vld [vmem:[#allocation9 + $0x9cc] ss:$48 sps:$4 sm:$0xff]   ;;  %v15868_v49 = vld [vmem:[#allocation9 + $0x9c0] ss:$48 sps:$4 sm:$0xff]  }
 0x2b2   : > { %3364 = vmatprep.subr.bf16.mxu0 %v15784_v50  ;;  %3446 = vmatprep.subr.bf16.mxu1 %v15786_v51  ;;  %v15871_v50 = vld [vmem:[#allocation9 + $0x9c8] ss:$48 sps:$4 sm:$0xff]   ;;  %v15876_v51 = vld [vmem:[#allocation9 + $0xa24] ss:$48 sps:$4 sm:$0xff]  }
 0x2b5   : > { %3365 = vmatpush1.bf16.msra.mxu0 %v15788_v52  ;;  %3447 = vmatpush1.bf16.msra.mxu1 %v15789_v53  ;;  %v15879_v52 = vld [vmem:[#allocation9 + $0xa2c] ss:$48 sps:$4 sm:$0xff]   ;;  %v15874_v53 = vld [vmem:[#allocation9 + $0xa20] ss:$48 sps:$4 sm:$0xff]  }
 0x2b6   : > { %3366 = vmatprep.subr.bf16.mxu0 %v15790_v54  ;;  %3448 = vmatprep.subr.bf16.mxu1 %v15792_v55  ;;  %v15877_v54 = vld [vmem:[#allocation9 + $0xa28] ss:$48 sps:$4 sm:$0xff]   ;;  %v15882_v55 = vld [vmem:[#allocation9 + $0xa84] ss:$48 sps:$4 sm:$0xff]  }
 0x2b9   : > { %3367 = vmatpush1.bf16.msra.mxu0 %v15794_v56  ;;  %3449 = vmatpush1.bf16.msra.mxu1 %v15795_v57  ;;  %v15885_v56 = vld [vmem:[#allocation9 + $0xa8c] ss:$48 sps:$4 sm:$0xff]   ;;  %v15880_v57 = vld [vmem:[#allocation9 + $0xa80] ss:$48 sps:$4 sm:$0xff]  }
 0x2ba   : > { %3368 = vmatprep.subr.bf16.mxu0 %v15796_v58  ;;  %3450 = vmatprep.subr.bf16.mxu1 %v15798_v59  ;;  %v15883_v58 = vld [vmem:[#allocation9 + $0xa88] ss:$48 sps:$4 sm:$0xff]   ;;  %v15888_v59 = vld [vmem:[#allocation9 + $0xae4] ss:$48 sps:$4 sm:$0xff]  }
 0x2bd   : > { %3369 = vmatpush1.bf16.msra.mxu0 %v15800_v60  ;;  %3451 = vmatpush1.bf16.msra.mxu1 %v15801_v61  ;;  %v15891_v60 = vld [vmem:[#allocation9 + $0xaec] ss:$48 sps:$4 sm:$0xff]   ;;  %v15886_v61 = vld [vmem:[#allocation9 + $0xae0] ss:$48 sps:$4 sm:$0xff]  }
 0x2be   : > { %3370 = vmatprep.subr.bf16.mxu0 %v15802_v62  ;;  %3452 = vmatprep.subr.bf16.mxu1 %v15804_v63  ;;  %v15889_v62 = vld [vmem:[#allocation9 + $0xae8] ss:$48 sps:$4 sm:$0xff]   ;;  %v15894_v63 = vld [vmem:[#allocation9 + $0xb44] ss:$48 sps:$4 sm:$0xff]  }
 0x2c1   : > { %3371 = vmatpush1.bf16.msra.mxu0 %v15806_v0  ;;  %3453 = vmatpush1.bf16.msra.mxu1 %v15807_v1  ;;  %v15897_v0 = vld [vmem:[#allocation9 + $0xb4c] ss:$48 sps:$4 sm:$0xff]   ;;  %v15892_v1 = vld [vmem:[#allocation9 + $0xb40] ss:$48 sps:$4 sm:$0xff]  }
 0x2c2   : > { %3381 = vmatprep.subr.bf16.mxu0 %v15810_v3  ;;  %3463 = vmatprep.subr.bf16.mxu1 %v15813_v4  ;;  %v15900_v3 = vld [vmem:[#allocation9 + $0xba4] ss:$48 sps:$4 sm:$0xff]   ;;  %v15903_v4 = vld [vmem:[#allocation9 + $0xbac] ss:$48 sps:$4 sm:$0xff]  }
 0x2c4   : > { %3373 = vmatmul.mubr.bf16.vlgmr.msra.gmra.mrb[0].mxu0 %v18990_v5  ;;  %3455 = vmatmul.mubr.bf16.vlgmr.msra.gmra.mrb[0].mxu1 %v18990_v5 }
 0x2c5   : > { %3382 = vmatpush1.bf16.msra.mxu0 %v15808_v6  ;;  %3464 = vmatpush1.bf16.msra.mxu1 %v15811_v7  ;;  %v15898_v6 = vld [vmem:[#allocation9 + $0xba0] ss:$48 sps:$4 sm:$0xff]   ;;  %v15901_v7 = vld [vmem:[#allocation9 + $0xba8] ss:$48 sps:$4 sm:$0xff]  }
 0x2c6   : > { %3383 = vmatprep.subr.bf16.mxu0 %v15816_v8  ;;  %3465 = vmatprep.subr.bf16.mxu1 %v15819_v9  ;;  %v966_v8 = vld [vmem:[%s18932_s4 + $0x10] sm:$0xff] }
 0x2c7   : > { %3413 = vmatprep.mubr.bf16.mxu0 %v18995_v33  ;;  %3495 = vmatprep.mubr.bf16.mxu1 %v18995_v33  ;;  %v15906_v9 = vld [vmem:[#allocation9 + $0x14] ss:$48 sps:$4 sm:$0xff]  }
 0x2c9   : > { %3384 = vmatpush1.bf16.msra.mxu0 %v15814_v10  ;;  %3466 = vmatpush1.bf16.msra.mxu1 %v15817_v11  ;;  %v15909_v10 = vld [vmem:[#allocation9 + $0x1c] ss:$48 sps:$4 sm:$0xff]   ;;  %v19000_v11 = vpack.c.bf16 %v966_v8, %v966_v8  ;;  %v15991_v8 = vld [vmem:[#allocation9 + $0x558] ss:$48 sps:$4 sm:$0xff]  }
 0x2ca   : > { %3385 = vmatprep.subr.bf16.mxu0 %v15822_v12  ;;  %3467 = vmatprep.subr.bf16.mxu1 %v15825_v13  ;;  %v15904_v12 = vld [vmem:[#allocation9 + $0x10] ss:$48 sps:$4 sm:$0xff]   ;;  %v15907_v13 = vld [vmem:[#allocation9 + $0x18] ss:$48 sps:$4 sm:$0xff]  }
 0x2cd   : > { %3386 = vmatpush1.bf16.msra.mxu0 %v15820_v14  ;;  %3468 = vmatpush1.bf16.msra.mxu1 %v15823_v15  ;;  %v15912_v14 = vld [vmem:[#allocation9 + $0x74] ss:$48 sps:$4 sm:$0xff]   ;;  %v15915_v15 = vld [vmem:[#allocation9 + $0x7c] ss:$48 sps:$4 sm:$0xff]  }
 0x2ce   : > { %3387 = vmatprep.subr.bf16.mxu0 %v15828_v16  ;;  %3469 = vmatprep.subr.bf16.mxu1 %v15831_v17  ;;  %v15910_v16 = vld [vmem:[#allocation9 + $0x70] ss:$48 sps:$4 sm:$0xff]   ;;  %v15913_v17 = vld [vmem:[#allocation9 + $0x78] ss:$48 sps:$4 sm:$0xff]  }
 0x2d1   : > { %3388 = vmatpush1.bf16.msra.mxu0 %v15826_v18  ;;  %3470 = vmatpush1.bf16.msra.mxu1 %v15829_v19  ;;  %v15918_v18 = vld [vmem:[#allocation9 + $0xd4] ss:$48 sps:$4 sm:$0xff]   ;;  %v15921_v19 = vld [vmem:[#allocation9 + $0xdc] ss:$48 sps:$4 sm:$0xff]  }
 0x2d2   : > { %3389 = vmatprep.subr.bf16.mxu0 %v15834_v20  ;;  %3471 = vmatprep.subr.bf16.mxu1 %v15837_v21  ;;  %v15916_v20 = vld [vmem:[#allocation9 + $0xd0] ss:$48 sps:$4 sm:$0xff]   ;;  %v15919_v21 = vld [vmem:[#allocation9 + $0xd8] ss:$48 sps:$4 sm:$0xff]  }
 0x2d5   : > { %3390 = vmatpush1.bf16.msra.mxu0 %v15832_v22  ;;  %3472 = vmatpush1.bf16.msra.mxu1 %v15835_v23  ;;  %v15924_v22 = vld [vmem:[#allocation9 + $0x134] ss:$48 sps:$4 sm:$0xff]   ;;  %v15927_v23 = vld [vmem:[#allocation9 + $0x13c] ss:$48 sps:$4 sm:$0xff]  }
 0x2d6   : > { %3391 = vmatprep.subr.bf16.mxu0 %v15840_v24  ;;  %3473 = vmatprep.subr.bf16.mxu1 %v15843_v25  ;;  %v15922_v24 = vld [vmem:[#allocation9 + $0x130] ss:$48 sps:$4 sm:$0xff]   ;;  %v15925_v25 = vld [vmem:[#allocation9 + $0x138] ss:$48 sps:$4 sm:$0xff]  }
 0x2d9   : > { %3392 = vmatpush1.bf16.msra.mxu0 %v15838_v26  ;;  %3474 = vmatpush1.bf16.msra.mxu1 %v15841_v27  ;;  %v15930_v26 = vld [vmem:[#allocation9 + $0x194] ss:$48 sps:$4 sm:$0xff]   ;;  %v15933_v27 = vld [vmem:[#allocation9 + $0x19c] ss:$48 sps:$4 sm:$0xff]  }
 0x2da   : > { %3393 = vmatprep.subr.bf16.mxu0 %v15846_v28  ;;  %3475 = vmatprep.subr.bf16.mxu1 %v15849_v29  ;;  %v15928_v28 = vld [vmem:[#allocation9 + $0x190] ss:$48 sps:$4 sm:$0xff]   ;;  %v15931_v29 = vld [vmem:[#allocation9 + $0x198] ss:$48 sps:$4 sm:$0xff]  }
 0x2dd   : > { %3394 = vmatpush1.bf16.msra.mxu0 %v15844_v31  ;;  %3476 = vmatpush1.bf16.msra.mxu1 %v15847_v32  ;;  %v15939_v31 = vld [vmem:[#allocation9 + $0x1fc] ss:$48 sps:$4 sm:$0xff]   ;;  %v15934_v32 = vld [vmem:[#allocation9 + $0x1f0] ss:$48 sps:$4 sm:$0xff]  }
 0x2de   : > { %3395 = vmatprep.subr.bf16.mxu0 %v15852_v34  ;;  %3477 = vmatprep.subr.bf16.mxu1 %v15855_v35  ;;  %v15937_v34 = vld [vmem:[#allocation9 + $0x1f8] ss:$48 sps:$4 sm:$0xff]   ;;  %v15942_v35 = vld [vmem:[#allocation9 + $0x254] ss:$48 sps:$4 sm:$0xff]  }
 0x2e1   : > { %3396 = vmatpush1.bf16.msra.mxu0 %v15850_v36  ;;  %3478 = vmatpush1.bf16.msra.mxu1 %v15853_v37  ;;  %v15945_v36 = vld [vmem:[#allocation9 + $0x25c] ss:$48 sps:$4 sm:$0xff]   ;;  %v15940_v37 = vld [vmem:[#allocation9 + $0x250] ss:$48 sps:$4 sm:$0xff]  }
 0x2e2   : > { %3397 = vmatprep.subr.bf16.mxu0 %v15858_v38  ;;  %3479 = vmatprep.subr.bf16.mxu1 %v15861_v39  ;;  %v15943_v38 = vld [vmem:[#allocation9 + $0x258] ss:$48 sps:$4 sm:$0xff]   ;;  %v15948_v39 = vld [vmem:[#allocation9 + $0x2b4] ss:$48 sps:$4 sm:$0xff]  }
 0x2e5   : > { %3398 = vmatpush1.bf16.msra.mxu0 %v15856_v40  ;;  %3480 = vmatpush1.bf16.msra.mxu1 %v15859_v41  ;;  %v15951_v40 = vld [vmem:[#allocation9 + $0x2bc] ss:$48 sps:$4 sm:$0xff]   ;;  %v15946_v41 = vld [vmem:[#allocation9 + $0x2b0] ss:$48 sps:$4 sm:$0xff]  }
 0x2e6   : > { %3399 = vmatprep.subr.bf16.mxu0 %v15864_v42  ;;  %3481 = vmatprep.subr.bf16.mxu1 %v15867_v43  ;;  %v15949_v42 = vld [vmem:[#allocation9 + $0x2b8] ss:$48 sps:$4 sm:$0xff]   ;;  %v15954_v43 = vld [vmem:[#allocation9 + $0x314] ss:$48 sps:$4 sm:$0xff]  }
 0x2e9   : > { %3400 = vmatpush1.bf16.msra.mxu0 %v15862_v44  ;;  %3482 = vmatpush1.bf16.msra.mxu1 %v15865_v45  ;;  %v15957_v44 = vld [vmem:[#allocation9 + $0x31c] ss:$48 sps:$4 sm:$0xff]   ;;  %v15952_v45 = vld [vmem:[#allocation9 + $0x310] ss:$48 sps:$4 sm:$0xff]  }
 0x2ea   : > { %3401 = vmatprep.subr.bf16.mxu0 %v15870_v46  ;;  %3483 = vmatprep.subr.bf16.mxu1 %v15873_v47  ;;  %v15955_v46 = vld [vmem:[#allocation9 + $0x318] ss:$48 sps:$4 sm:$0xff]   ;;  %v15960_v47 = vld [vmem:[#allocation9 + $0x374] ss:$48 sps:$4 sm:$0xff]  }
 0x2ed   : > { %3402 = vmatpush1.bf16.msra.mxu0 %v15868_v49  ;;  %3484 = vmatpush1.bf16.msra.mxu1 %v15871_v50  ;;  %v15963_v49 = vld [vmem:[#allocation9 + $0x37c] ss:$48 sps:$4 sm:$0xff]   ;;  %v15958_v50 = vld [vmem:[#allocation9 + $0x370] ss:$48 sps:$4 sm:$0xff]  }
 0x2ee   : > { %3403 = vmatprep.subr.bf16.mxu0 %v15876_v51  ;;  %3485 = vmatprep.subr.bf16.mxu1 %v15879_v52  ;;  %v15961_v51 = vld [vmem:[#allocation9 + $0x378] ss:$48 sps:$4 sm:$0xff]   ;;  %v15966_v52 = vld [vmem:[#allocation9 + $0x3d4] ss:$48 sps:$4 sm:$0xff]  }
 0x2f1   : > { %3404 = vmatpush1.bf16.msra.mxu0 %v15874_v53  ;;  %3486 = vmatpush1.bf16.msra.mxu1 %v15877_v54  ;;  %v15969_v53 = vld [vmem:[#allocation9 + $0x3dc] ss:$48 sps:$4 sm:$0xff]   ;;  %v15964_v54 = vld [vmem:[#allocation9 + $0x3d0] ss:$48 sps:$4 sm:$0xff]  }
 0x2f2   : > { %3405 = vmatprep.subr.bf16.mxu0 %v15882_v55  ;;  %3487 = vmatprep.subr.bf16.mxu1 %v15885_v56  ;;  %v15967_v55 = vld [vmem:[#allocation9 + $0x3d8] ss:$48 sps:$4 sm:$0xff]   ;;  %v15972_v56 = vld [vmem:[#allocation9 + $0x434] ss:$48 sps:$4 sm:$0xff]  }
 0x2f5   : > { %3406 = vmatpush1.bf16.msra.mxu0 %v15880_v57  ;;  %3488 = vmatpush1.bf16.msra.mxu1 %v15883_v58  ;;  %v15975_v57 = vld [vmem:[#allocation9 + $0x43c] ss:$48 sps:$4 sm:$0xff]   ;;  %v15970_v58 = vld [vmem:[#allocation9 + $0x430] ss:$48 sps:$4 sm:$0xff]  }
 0x2f6   : > { %3407 = vmatprep.subr.bf16.mxu0 %v15888_v59  ;;  %3489 = vmatprep.subr.bf16.mxu1 %v15891_v60  ;;  %v15973_v59 = vld [vmem:[#allocation9 + $0x438] ss:$48 sps:$4 sm:$0xff]   ;;  %v15978_v60 = vld [vmem:[#allocation9 + $0x494] ss:$48 sps:$4 sm:$0xff]  }
 0x2f9   : > { %3408 = vmatpush1.bf16.msra.mxu0 %v15886_v61  ;;  %3490 = vmatpush1.bf16.msra.mxu1 %v15889_v62  ;;  %v15981_v61 = vld [vmem:[#allocation9 + $0x49c] ss:$48 sps:$4 sm:$0xff]   ;;  %v15976_v62 = vld [vmem:[#allocation9 + $0x490] ss:$48 sps:$4 sm:$0xff]  }
 0x2fa   : > { %3409 = vmatprep.subr.bf16.mxu0 %v15894_v63  ;;  %3491 = vmatprep.subr.bf16.mxu1 %v15897_v0  ;;  %v15979_v63 = vld [vmem:[#allocation9 + $0x498] ss:$48 sps:$4 sm:$0xff]   ;;  %v15984_v0 = vld [vmem:[#allocation9 + $0x4f4] ss:$48 sps:$4 sm:$0xff]  }
 0x2fd   : > { %3410 = vmatpush1.bf16.msra.mxu0 %v15892_v1  ;;  %3492 = vmatpush1.bf16.msra.mxu1 %v15895_v2  ;;  %v15987_v1 = vld [vmem:[#allocation9 + $0x4fc] ss:$48 sps:$4 sm:$0xff]   ;;  %v15982_v2 = vld [vmem:[#allocation9 + $0x4f0] ss:$48 sps:$4 sm:$0xff]  }
 0x2fe   : > { %3411 = vmatprep.subr.bf16.mxu0 %v15900_v3  ;;  %3493 = vmatprep.subr.bf16.mxu1 %v15903_v4  ;;  %v15985_v3 = vld [vmem:[#allocation9 + $0x4f8] ss:$48 sps:$4 sm:$0xff]   ;;  %v15990_v4 = vld [vmem:[#allocation9 + $0x554] ss:$48 sps:$4 sm:$0xff]  }
 0x301   : > { %3412 = vmatpush1.bf16.msra.mxu0 %v15898_v6  ;;  %3494 = vmatpush1.bf16.msra.mxu1 %v15901_v7  ;;  %v15993_v6 = vld [vmem:[#allocation9 + $0x55c] ss:$48 sps:$4 sm:$0xff]   ;;  %v15988_v7 = vld [vmem:[#allocation9 + $0x550] ss:$48 sps:$4 sm:$0xff]  }
 0x302   : > { %3504 = vmatprep.subr.bf16.mxu0 %v15906_v9  ;;  %3586 = vmatprep.subr.bf16.mxu1 %v15909_v10  ;;  %v15996_v9 = vld [vmem:[#allocation9 + $0x5b4] ss:$48 sps:$4 sm:$0xff]   ;;  %v15999_v10 = vld [vmem:[#allocation9 + $0x5bc] ss:$48 sps:$4 sm:$0xff]  }
 0x304   : > { %3414 = vmatmul.mubr.bf16.vlgmr.msra.gmra.mrb[0].mxu0 %v19000_v11  ;;  %3496 = vmatmul.mubr.bf16.vlgmr.msra.gmra.mrb[0].mxu1 %v19000_v11 }
 0x305   : > { %3505 = vmatpush1.bf16.msra.mxu0 %v15904_v12  ;;  %3587 = vmatpush1.bf16.msra.mxu1 %v15907_v13  ;;  %v15994_v12 = vld [vmem:[#allocation9 + $0x5b0] ss:$48 sps:$4 sm:$0xff]   ;;  %v15997_v13 = vld [vmem:[#allocation9 + $0x5b8] ss:$48 sps:$4 sm:$0xff]  }
 0x306   : > { %3506 = vmatprep.subr.bf16.mxu0 %v15912_v14  ;;  %3588 = vmatprep.subr.bf16.mxu1 %v15915_v15  ;;  %v16002_v14 = vld [vmem:[#allocation9 + $0x614] ss:$48 sps:$4 sm:$0xff]   ;;  %v16005_v15 = vld [vmem:[#allocation9 + $0x61c] ss:$48 sps:$4 sm:$0xff]  }
 0x307   : > { %3536 = vmatprep.mubr.bf16.mxu0 %v18985_v48  ;;  %3618 = vmatprep.mubr.bf16.mxu1 %v18985_v48 }
 0x309   : > { %3507 = vmatpush1.bf16.msra.mxu0 %v15910_v16  ;;  %3589 = vmatpush1.bf16.msra.mxu1 %v15913_v17  ;;  %v16000_v16 = vld [vmem:[#allocation9 + $0x610] ss:$48 sps:$4 sm:$0xff]   ;;  %v16003_v17 = vld [vmem:[#allocation9 + $0x618] ss:$48 sps:$4 sm:$0xff]  }
 0x30a   : > { %3508 = vmatprep.subr.bf16.mxu0 %v15918_v18  ;;  %3590 = vmatprep.subr.bf16.mxu1 %v15921_v19  ;;  %v16008_v18 = vld [vmem:[#allocation9 + $0x674] ss:$48 sps:$4 sm:$0xff]   ;;  %v16011_v19 = vld [vmem:[#allocation9 + $0x67c] ss:$48 sps:$4 sm:$0xff]  }
 0x30d   : > { %3509 = vmatpush1.bf16.msra.mxu0 %v15916_v20  ;;  %3591 = vmatpush1.bf16.msra.mxu1 %v15919_v21  ;;  %v16006_v20 = vld [vmem:[#allocation9 + $0x670] ss:$48 sps:$4 sm:$0xff]   ;;  %v16009_v21 = vld [vmem:[#allocation9 + $0x678] ss:$48 sps:$4 sm:$0xff]  }
 0x30e   : > { %3510 = vmatprep.subr.bf16.mxu0 %v15924_v22  ;;  %3592 = vmatprep.subr.bf16.mxu1 %v15927_v23  ;;  %v16014_v22 = vld [vmem:[#allocation9 + $0x6d4] ss:$48 sps:$4 sm:$0xff]   ;;  %v16017_v23 = vld [vmem:[#allocation9 + $0x6dc] ss:$48 sps:$4 sm:$0xff]  }
 0x311   : > { %3511 = vmatpush1.bf16.msra.mxu0 %v15922_v24  ;;  %3593 = vmatpush1.bf16.msra.mxu1 %v15925_v25  ;;  %v16012_v24 = vld [vmem:[#allocation9 + $0x6d0] ss:$48 sps:$4 sm:$0xff]   ;;  %v16015_v25 = vld [vmem:[#allocation9 + $0x6d8] ss:$48 sps:$4 sm:$0xff]  }
 0x312   : > { %3512 = vmatprep.subr.bf16.mxu0 %v15930_v26  ;;  %3594 = vmatprep.subr.bf16.mxu1 %v15933_v27  ;;  %v16020_v26 = vld [vmem:[#allocation9 + $0x734] ss:$48 sps:$4 sm:$0xff]   ;;  %v16023_v27 = vld [vmem:[#allocation9 + $0x73c] ss:$48 sps:$4 sm:$0xff]  }
 0x315   : > { %3513 = vmatpush1.bf16.msra.mxu0 %v15928_v28  ;;  %3595 = vmatpush1.bf16.msra.mxu1 %v15931_v29  ;;  %v16018_v28 = vld [vmem:[#allocation9 + $0x730] ss:$48 sps:$4 sm:$0xff]   ;;  %v16021_v29 = vld [vmem:[#allocation9 + $0x738] ss:$48 sps:$4 sm:$0xff]  }
 0x316   : > { %3514 = vmatprep.subr.bf16.mxu0 %v15936_v30  ;;  %3596 = vmatprep.subr.bf16.mxu1 %v15939_v31  ;;  %v16026_v30 = vld [vmem:[#allocation9 + $0x794] ss:$48 sps:$4 sm:$0xff]   ;;  %v16029_v31 = vld [vmem:[#allocation9 + $0x79c] ss:$48 sps:$4 sm:$0xff]  }
 0x319   : > { %3515 = vmatpush1.bf16.msra.mxu0 %v15934_v32  ;;  %3597 = vmatpush1.bf16.msra.mxu1 %v15937_v34  ;;  %v16024_v32 = vld [vmem:[#allocation9 + $0x790] ss:$48 sps:$4 sm:$0xff]   ;;  %v16027_v34 = vld [vmem:[#allocation9 + $0x798] ss:$48 sps:$4 sm:$0xff]  }
 0x31a   : > { %3516 = vmatprep.subr.bf16.mxu0 %v15942_v35  ;;  %3598 = vmatprep.subr.bf16.mxu1 %v15945_v36  ;;  %v16032_v35 = vld [vmem:[#allocation9 + $0x7f4] ss:$48 sps:$4 sm:$0xff]   ;;  %v16035_v36 = vld [vmem:[#allocation9 + $0x7fc] ss:$48 sps:$4 sm:$0xff]  }
 0x31d   : > { %3517 = vmatpush1.bf16.msra.mxu0 %v15940_v37  ;;  %3599 = vmatpush1.bf16.msra.mxu1 %v15943_v38  ;;  %v16030_v37 = vld [vmem:[#allocation9 + $0x7f0] ss:$48 sps:$4 sm:$0xff]   ;;  %v16033_v38 = vld [vmem:[#allocation9 + $0x7f8] ss:$48 sps:$4 sm:$0xff]  }
 0x31e   : > { %3518 = vmatprep.subr.bf16.mxu0 %v15948_v39  ;;  %3600 = vmatprep.subr.bf16.mxu1 %v15951_v40  ;;  %v16038_v39 = vld [vmem:[#allocation9 + $0x854] ss:$48 sps:$4 sm:$0xff]   ;;  %v16041_v40 = vld [vmem:[#allocation9 + $0x85c] ss:$48 sps:$4 sm:$0xff]  }
 0x321   : > { %3519 = vmatpush1.bf16.msra.mxu0 %v15946_v41  ;;  %3601 = vmatpush1.bf16.msra.mxu1 %v15949_v42  ;;  %v16036_v41 = vld [vmem:[#allocation9 + $0x850] ss:$48 sps:$4 sm:$0xff]   ;;  %v16039_v42 = vld [vmem:[#allocation9 + $0x858] ss:$48 sps:$4 sm:$0xff]  }
 0x322   : > { %3520 = vmatprep.subr.bf16.mxu0 %v15954_v43  ;;  %3602 = vmatprep.subr.bf16.mxu1 %v15957_v44  ;;  %v16044_v43 = vld [vmem:[#allocation9 + $0x8b4] ss:$48 sps:$4 sm:$0xff]   ;;  %v16047_v44 = vld [vmem:[#allocation9 + $0x8bc] ss:$48 sps:$4 sm:$0xff]  }
 0x325   : > { %3521 = vmatpush1.bf16.msra.mxu0 %v15952_v45  ;;  %3603 = vmatpush1.bf16.msra.mxu1 %v15955_v46  ;;  %v16042_v45 = vld [vmem:[#allocation9 + $0x8b0] ss:$48 sps:$4 sm:$0xff]   ;;  %v16045_v46 = vld [vmem:[#allocation9 + $0x8b8] ss:$48 sps:$4 sm:$0xff]  }
 0x326   : > { %3522 = vmatprep.subr.bf16.mxu0 %v15960_v47  ;;  %3604 = vmatprep.subr.bf16.mxu1 %v15963_v49  ;;  %v16050_v47 = vld [vmem:[#allocation9 + $0x914] ss:$48 sps:$4 sm:$0xff]   ;;  %v16053_v49 = vld [vmem:[#allocation9 + $0x91c] ss:$48 sps:$4 sm:$0xff]  }
 0x329   : > { %3523 = vmatpush1.bf16.msra.mxu0 %v15958_v50  ;;  %3605 = vmatpush1.bf16.msra.mxu1 %v15961_v51  ;;  %v16048_v50 = vld [vmem:[#allocation9 + $0x910] ss:$48 sps:$4 sm:$0xff]   ;;  %v16051_v51 = vld [vmem:[#allocation9 + $0x918] ss:$48 sps:$4 sm:$0xff]  }
 0x32a   : > { %3524 = vmatprep.subr.bf16.mxu0 %v15966_v52  ;;  %3606 = vmatprep.subr.bf16.mxu1 %v15969_v53  ;;  %v16056_v52 = vld [vmem:[#allocation9 + $0x974] ss:$48 sps:$4 sm:$0xff]   ;;  %v16059_v53 = vld [vmem:[#allocation9 + $0x97c] ss:$48 sps:$4 sm:$0xff]  }
 0x32d   : > { %3525 = vmatpush1.bf16.msra.mxu0 %v15964_v54  ;;  %3607 = vmatpush1.bf16.msra.mxu1 %v15967_v55  ;;  %v16054_v54 = vld [vmem:[#allocation9 + $0x970] ss:$48 sps:$4 sm:$0xff]   ;;  %v16057_v55 = vld [vmem:[#allocation9 + $0x978] ss:$48 sps:$4 sm:$0xff]  }
 0x32e   : > { %3526 = vmatprep.subr.bf16.mxu0 %v15972_v56  ;;  %3608 = vmatprep.subr.bf16.mxu1 %v15975_v57  ;;  %v16062_v56 = vld [vmem:[#allocation9 + $0x9d4] ss:$48 sps:$4 sm:$0xff]   ;;  %v16065_v57 = vld [vmem:[#allocation9 + $0x9dc] ss:$48 sps:$4 sm:$0xff]  }
 0x331   : > { %3527 = vmatpush1.bf16.msra.mxu0 %v15970_v58  ;;  %3609 = vmatpush1.bf16.msra.mxu1 %v15973_v59  ;;  %v16060_v58 = vld [vmem:[#allocation9 + $0x9d0] ss:$48 sps:$4 sm:$0xff]   ;;  %v16063_v59 = vld [vmem:[#allocation9 + $0x9d8] ss:$48 sps:$4 sm:$0xff]  }
 0x332   : > { %3528 = vmatprep.subr.bf16.mxu0 %v15978_v60  ;;  %3610 = vmatprep.subr.bf16.mxu1 %v15981_v61  ;;  %v16068_v60 = vld [vmem:[#allocation9 + $0xa34] ss:$48 sps:$4 sm:$0xff]   ;;  %v16071_v61 = vld [vmem:[#allocation9 + $0xa3c] ss:$48 sps:$4 sm:$0xff]  }
 0x335   : > { %3529 = vmatpush1.bf16.msra.mxu0 %v15976_v62  ;;  %3611 = vmatpush1.bf16.msra.mxu1 %v15979_v63  ;;  %v16066_v62 = vld [vmem:[#allocation9 + $0xa30] ss:$48 sps:$4 sm:$0xff]   ;;  %v16069_v63 = vld [vmem:[#allocation9 + $0xa38] ss:$48 sps:$4 sm:$0xff]  }
 0x336   : > { %3530 = vmatprep.subr.bf16.mxu0 %v15984_v0  ;;  %3612 = vmatprep.subr.bf16.mxu1 %v15987_v1  ;;  %v16074_v0 = vld [vmem:[#allocation9 + $0xa94] ss:$48 sps:$4 sm:$0xff]   ;;  %v16077_v1 = vld [vmem:[#allocation9 + $0xa9c] ss:$48 sps:$4 sm:$0xff]  }
 0x339   : > { %3531 = vmatpush1.bf16.msra.mxu0 %v15982_v2  ;;  %3613 = vmatpush1.bf16.msra.mxu1 %v15985_v3  ;;  %v16072_v2 = vld [vmem:[#allocation9 + $0xa90] ss:$48 sps:$4 sm:$0xff]   ;;  %v16075_v3 = vld [vmem:[#allocation9 + $0xa98] ss:$48 sps:$4 sm:$0xff]  }
 0x33a   : > { %3532 = vmatprep.subr.bf16.mxu0 %v15990_v4  ;;  %3614 = vmatprep.subr.bf16.mxu1 %v15993_v6  ;;  %v16080_v4 = vld [vmem:[#allocation9 + $0xaf4] ss:$48 sps:$4 sm:$0xff]   ;;  %v16083_v6 = vld [vmem:[#allocation9 + $0xafc] ss:$48 sps:$4 sm:$0xff]  }
 0x33d   : > { %3533 = vmatpush1.bf16.msra.mxu0 %v15988_v7  ;;  %3615 = vmatpush1.bf16.msra.mxu1 %v15991_v8  ;;  %v16078_v7 = vld [vmem:[#allocation9 + $0xaf0] ss:$48 sps:$4 sm:$0xff]   ;;  %v16081_v8 = vld [vmem:[#allocation9 + $0xaf8] ss:$48 sps:$4 sm:$0xff]  }
 0x33e   : > { %3534 = vmatprep.subr.bf16.mxu0 %v15996_v9  ;;  %3616 = vmatprep.subr.bf16.mxu1 %v15999_v10  ;;  %v16086_v9 = vld [vmem:[#allocation9 + $0xb54] ss:$48 sps:$4 sm:$0xff]   ;;  %v16089_v10 = vld [vmem:[#allocation9 + $0xb5c] ss:$48 sps:$4 sm:$0xff]  }
 0x341   : > { %3535 = vmatpush1.bf16.msra.mxu0 %v15994_v12  ;;  %3617 = vmatpush1.bf16.msra.mxu1 %v15997_v13  ;;  %v16084_v12 = vld [vmem:[#allocation9 + $0xb50] ss:$48 sps:$4 sm:$0xff]   ;;  %v16087_v13 = vld [vmem:[#allocation9 + $0xb58] ss:$48 sps:$4 sm:$0xff]  }
 0x342   : > { %3545 = vmatprep.subr.bf16.mxu0 %v16002_v14  ;;  %3627 = vmatprep.subr.bf16.mxu1 %v16005_v15  ;;  %v16092_v14 = vld [vmem:[#allocation9 + $0xbb4] ss:$48 sps:$4 sm:$0xff]   ;;  %v16095_v15 = vld [vmem:[#allocation9 + $0xbbc] ss:$48 sps:$4 sm:$0xff]  }
 0x344   : > { %3537 = vmatmul.mubr.bf16.vlgmr.msra.gmra.mrb[4].mxu0 %v18990_v5  ;;  %3619 = vmatmul.mubr.bf16.vlgmr.msra.gmra.mrb[4].mxu1 %v18990_v5 }
 0x345   : > { %3546 = vmatpush1.bf16.msra.mxu0 %v16000_v16  ;;  %3628 = vmatpush1.bf16.msra.mxu1 %v16003_v17  ;;  %v16090_v16 = vld [vmem:[#allocation9 + $0xbb0] ss:$48 sps:$4 sm:$0xff]   ;;  %v16093_v17 = vld [vmem:[#allocation9 + $0xbb8] ss:$48 sps:$4 sm:$0xff]  }
 0x346   : > { %3547 = vmatprep.subr.bf16.mxu0 %v16008_v18  ;;  %3629 = vmatprep.subr.bf16.mxu1 %v16011_v19  ;;  %v16098_v18 = vld [vmem:[#allocation9 + $0x24] ss:$48 sps:$4 sm:$0xff]   ;;  %v16101_v19 = vld [vmem:[#allocation9 + $0x2c] ss:$48 sps:$4 sm:$0xff]  }
 0x347   : > { %3577 = vmatprep.mubr.bf16.mxu0 %v18995_v33  ;;  %3659 = vmatprep.mubr.bf16.mxu1 %v18995_v33 }
 0x349   : > { %3548 = vmatpush1.bf16.msra.mxu0 %v16006_v20  ;;  %3630 = vmatpush1.bf16.msra.mxu1 %v16009_v21  ;;  %v16096_v20 = vld [vmem:[#allocation9 + $0x20] ss:$48 sps:$4 sm:$0xff]   ;;  %v16099_v21 = vld [vmem:[#allocation9 + $0x28] ss:$48 sps:$4 sm:$0xff]  }
 0x34a   : > { %3549 = vmatprep.subr.bf16.mxu0 %v16014_v22  ;;  %3631 = vmatprep.subr.bf16.mxu1 %v16017_v23  ;;  %v16104_v22 = vld [vmem:[#allocation9 + $0x84] ss:$48 sps:$4 sm:$0xff]   ;;  %v16107_v23 = vld [vmem:[#allocation9 + $0x8c] ss:$48 sps:$4 sm:$0xff]  }
 0x34d   : > { %3550 = vmatpush1.bf16.msra.mxu0 %v16012_v24  ;;  %3632 = vmatpush1.bf16.msra.mxu1 %v16015_v25  ;;  %v16102_v24 = vld [vmem:[#allocation9 + $0x80] ss:$48 sps:$4 sm:$0xff]   ;;  %v16105_v25 = vld [vmem:[#allocation9 + $0x88] ss:$48 sps:$4 sm:$0xff]  }
 0x34e   : > { %3551 = vmatprep.subr.bf16.mxu0 %v16020_v26  ;;  %3633 = vmatprep.subr.bf16.mxu1 %v16023_v27  ;;  %v16110_v26 = vld [vmem:[#allocation9 + $0xe4] ss:$48 sps:$4 sm:$0xff]   ;;  %v16113_v27 = vld [vmem:[#allocation9 + $0xec] ss:$48 sps:$4 sm:$0xff]  }
 0x351   : > { %3552 = vmatpush1.bf16.msra.mxu0 %v16018_v28  ;;  %3634 = vmatpush1.bf16.msra.mxu1 %v16021_v29  ;;  %v16108_v28 = vld [vmem:[#allocation9 + $0xe0] ss:$48 sps:$4 sm:$0xff]   ;;  %v16111_v29 = vld [vmem:[#allocation9 + $0xe8] ss:$48 sps:$4 sm:$0xff]  }
 0x352   : > { %3553 = vmatprep.subr.bf16.mxu0 %v16026_v30  ;;  %3635 = vmatprep.subr.bf16.mxu1 %v16029_v31  ;;  %v16116_v30 = vld [vmem:[#allocation9 + $0x144] ss:$48 sps:$4 sm:$0xff]   ;;  %v16119_v31 = vld [vmem:[#allocation9 + $0x14c] ss:$48 sps:$4 sm:$0xff]  }
 0x355   : > { %3554 = vmatpush1.bf16.msra.mxu0 %v16024_v32  ;;  %3636 = vmatpush1.bf16.msra.mxu1 %v16027_v34  ;;  %v16114_v32 = vld [vmem:[#allocation9 + $0x140] ss:$48 sps:$4 sm:$0xff]   ;;  %v16117_v34 = vld [vmem:[#allocation9 + $0x148] ss:$48 sps:$4 sm:$0xff]  }
 0x356   : > { %3555 = vmatprep.subr.bf16.mxu0 %v16032_v35  ;;  %3637 = vmatprep.subr.bf16.mxu1 %v16035_v36  ;;  %v16122_v35 = vld [vmem:[#allocation9 + $0x1a4] ss:$48 sps:$4 sm:$0xff]   ;;  %v16125_v36 = vld [vmem:[#allocation9 + $0x1ac] ss:$48 sps:$4 sm:$0xff]  }
 0x359   : > { %3556 = vmatpush1.bf16.msra.mxu0 %v16030_v37  ;;  %3638 = vmatpush1.bf16.msra.mxu1 %v16033_v38  ;;  %v16120_v37 = vld [vmem:[#allocation9 + $0x1a0] ss:$48 sps:$4 sm:$0xff]   ;;  %v16123_v38 = vld [vmem:[#allocation9 + $0x1a8] ss:$48 sps:$4 sm:$0xff]  }
 0x35a   : > { %3557 = vmatprep.subr.bf16.mxu0 %v16038_v39  ;;  %3639 = vmatprep.subr.bf16.mxu1 %v16041_v40  ;;  %v16128_v39 = vld [vmem:[#allocation9 + $0x204] ss:$48 sps:$4 sm:$0xff]   ;;  %v16131_v40 = vld [vmem:[#allocation9 + $0x20c] ss:$48 sps:$4 sm:$0xff]  }
 0x35d   : > { %3558 = vmatpush1.bf16.msra.mxu0 %v16036_v41  ;;  %3640 = vmatpush1.bf16.msra.mxu1 %v16039_v42  ;;  %v16129_v41 = vld [vmem:[#allocation9 + $0x208] ss:$48 sps:$4 sm:$0xff]   ;;  %v16134_v42 = vld [vmem:[#allocation9 + $0x264] ss:$48 sps:$4 sm:$0xff]  }
 0x35e   : > { %3559 = vmatprep.subr.bf16.mxu0 %v16044_v43  ;;  %3641 = vmatprep.subr.bf16.mxu1 %v16047_v44  ;;  %v16137_v43 = vld [vmem:[#allocation9 + $0x26c] ss:$48 sps:$4 sm:$0xff]   ;;  %v16132_v44 = vld [vmem:[#allocation9 + $0x260] ss:$48 sps:$4 sm:$0xff]  }
 0x361   : > { %3560 = vmatpush1.bf16.msra.mxu0 %v16042_v45  ;;  %3642 = vmatpush1.bf16.msra.mxu1 %v16045_v46  ;;  %v16135_v45 = vld [vmem:[#allocation9 + $0x268] ss:$48 sps:$4 sm:$0xff]   ;;  %v16140_v46 = vld [vmem:[#allocation9 + $0x2c4] ss:$48 sps:$4 sm:$0xff]  }
 0x362   : > { %3561 = vmatprep.subr.bf16.mxu0 %v16050_v47  ;;  %3643 = vmatprep.subr.bf16.mxu1 %v16053_v49  ;;  %v16143_v47 = vld [vmem:[#allocation9 + $0x2cc] ss:$48 sps:$4 sm:$0xff]   ;;  %v16138_v49 = vld [vmem:[#allocation9 + $0x2c0] ss:$48 sps:$4 sm:$0xff]  }
 0x365   : > { %3562 = vmatpush1.bf16.msra.mxu0 %v16048_v50  ;;  %3644 = vmatpush1.bf16.msra.mxu1 %v16051_v51  ;;  %v16141_v50 = vld [vmem:[#allocation9 + $0x2c8] ss:$48 sps:$4 sm:$0xff]   ;;  %v16146_v51 = vld [vmem:[#allocation9 + $0x324] ss:$48 sps:$4 sm:$0xff]  }
 0x366   : > { %3563 = vmatprep.subr.bf16.mxu0 %v16056_v52  ;;  %3645 = vmatprep.subr.bf16.mxu1 %v16059_v53  ;;  %v16149_v52 = vld [vmem:[#allocation9 + $0x32c] ss:$48 sps:$4 sm:$0xff]   ;;  %v16144_v53 = vld [vmem:[#allocation9 + $0x320] ss:$48 sps:$4 sm:$0xff]  }
 0x369   : > { %3564 = vmatpush1.bf16.msra.mxu0 %v16054_v54  ;;  %3646 = vmatpush1.bf16.msra.mxu1 %v16057_v55  ;;  %v16147_v54 = vld [vmem:[#allocation9 + $0x328] ss:$48 sps:$4 sm:$0xff]   ;;  %v16152_v55 = vld [vmem:[#allocation9 + $0x384] ss:$48 sps:$4 sm:$0xff]  }
 0x36a   : > { %3565 = vmatprep.subr.bf16.mxu0 %v16062_v56  ;;  %3647 = vmatprep.subr.bf16.mxu1 %v16065_v57  ;;  %v16155_v56 = vld [vmem:[#allocation9 + $0x38c] ss:$48 sps:$4 sm:$0xff]   ;;  %v16150_v57 = vld [vmem:[#allocation9 + $0x380] ss:$48 sps:$4 sm:$0xff]  }
 0x36d   : > { %3566 = vmatpush1.bf16.msra.mxu0 %v16060_v58  ;;  %3648 = vmatpush1.bf16.msra.mxu1 %v16063_v59  ;;  %v16153_v58 = vld [vmem:[#allocation9 + $0x388] ss:$48 sps:$4 sm:$0xff]   ;;  %v16158_v59 = vld [vmem:[#allocation9 + $0x3e4] ss:$48 sps:$4 sm:$0xff]  }
 0x36e   : > { %3567 = vmatprep.subr.bf16.mxu0 %v16068_v60  ;;  %3649 = vmatprep.subr.bf16.mxu1 %v16071_v61  ;;  %v16161_v60 = vld [vmem:[#allocation9 + $0x3ec] ss:$48 sps:$4 sm:$0xff]   ;;  %v16156_v61 = vld [vmem:[#allocation9 + $0x3e0] ss:$48 sps:$4 sm:$0xff]  }
 0x371   : > { %3568 = vmatpush1.bf16.msra.mxu0 %v16066_v62  ;;  %3650 = vmatpush1.bf16.msra.mxu1 %v16069_v63  ;;  %v16159_v62 = vld [vmem:[#allocation9 + $0x3e8] ss:$48 sps:$4 sm:$0xff]   ;;  %v16164_v63 = vld [vmem:[#allocation9 + $0x444] ss:$48 sps:$4 sm:$0xff]  }
 0x372   : > { %3569 = vmatprep.subr.bf16.mxu0 %v16074_v0  ;;  %3651 = vmatprep.subr.bf16.mxu1 %v16077_v1  ;;  %v16167_v0 = vld [vmem:[#allocation9 + $0x44c] ss:$48 sps:$4 sm:$0xff]   ;;  %v16162_v1 = vld [vmem:[#allocation9 + $0x440] ss:$48 sps:$4 sm:$0xff]  }
 0x375   : > { %3570 = vmatpush1.bf16.msra.mxu0 %v16072_v2  ;;  %3652 = vmatpush1.bf16.msra.mxu1 %v16075_v3  ;;  %v16165_v2 = vld [vmem:[#allocation9 + $0x448] ss:$48 sps:$4 sm:$0xff]   ;;  %v16170_v3 = vld [vmem:[#allocation9 + $0x4a4] ss:$48 sps:$4 sm:$0xff]  }
 0x376   : > { %3571 = vmatprep.subr.bf16.mxu0 %v16080_v4  ;;  %3653 = vmatprep.subr.bf16.mxu1 %v16083_v6  ;;  %v16173_v4 = vld [vmem:[#allocation9 + $0x4ac] ss:$48 sps:$4 sm:$0xff]   ;;  %v16168_v6 = vld [vmem:[#allocation9 + $0x4a0] ss:$48 sps:$4 sm:$0xff]  }
 0x379   : > { %3572 = vmatpush1.bf16.msra.mxu0 %v16078_v7  ;;  %3654 = vmatpush1.bf16.msra.mxu1 %v16081_v8  ;;  %v16171_v7 = vld [vmem:[#allocation9 + $0x4a8] ss:$48 sps:$4 sm:$0xff]   ;;  %v16176_v8 = vld [vmem:[#allocation9 + $0x504] ss:$48 sps:$4 sm:$0xff]  }
 0x37a   : > { %3573 = vmatprep.subr.bf16.mxu0 %v16086_v9  ;;  %3655 = vmatprep.subr.bf16.mxu1 %v16089_v10  ;;  %v16179_v9 = vld [vmem:[#allocation9 + $0x50c] ss:$48 sps:$4 sm:$0xff]   ;;  %v16174_v10 = vld [vmem:[#allocation9 + $0x500] ss:$48 sps:$4 sm:$0xff]  }
 0x37d   : > { %3574 = vmatpush1.bf16.msra.mxu0 %v16084_v12  ;;  %3656 = vmatpush1.bf16.msra.mxu1 %v16087_v13  ;;  %v16177_v12 = vld [vmem:[#allocation9 + $0x508] ss:$48 sps:$4 sm:$0xff]   ;;  %v16182_v13 = vld [vmem:[#allocation9 + $0x564] ss:$48 sps:$4 sm:$0xff]  }
 0x37e   : > { %3575 = vmatprep.subr.bf16.mxu0 %v16092_v14  ;;  %3657 = vmatprep.subr.bf16.mxu1 %v16095_v15  ;;  %v16185_v14 = vld [vmem:[#allocation9 + $0x56c] ss:$48 sps:$4 sm:$0xff]   ;;  %v16180_v15 = vld [vmem:[#allocation9 + $0x560] ss:$48 sps:$4 sm:$0xff]  }
 0x381   : > { %3576 = vmatpush1.bf16.msra.mxu0 %v16090_v16  ;;  %3658 = vmatpush1.bf16.msra.mxu1 %v16093_v17  ;;  %v16183_v16 = vld [vmem:[#allocation9 + $0x568] ss:$48 sps:$4 sm:$0xff]   ;;  %v16188_v17 = vld [vmem:[#allocation9 + $0x5c4] ss:$48 sps:$4 sm:$0xff]  }
 0x382   : > { %3668 = vmatprep.subr.bf16.mxu0 %v16098_v18  ;;  %3750 = vmatprep.subr.bf16.mxu1 %v16101_v19  ;;  %v16191_v18 = vld [vmem:[#allocation9 + $0x5cc] ss:$48 sps:$4 sm:$0xff]   ;;  %v16186_v19 = vld [vmem:[#allocation9 + $0x5c0] ss:$48 sps:$4 sm:$0xff]  }
 0x384   : > { %3578 = vmatmul.mubr.bf16.vlgmr.msra.gmra.mrb[4].mxu0 %v19000_v11  ;;  %3660 = vmatmul.mubr.bf16.vlgmr.msra.gmra.mrb[4].mxu1 %v19000_v11 }
 0x385   : > { %3669 = vmatpush1.bf16.msra.mxu0 %v16096_v20  ;;  %3751 = vmatpush1.bf16.msra.mxu1 %v16099_v21  ;;  %v16189_v20 = vld [vmem:[#allocation9 + $0x5c8] ss:$48 sps:$4 sm:$0xff]   ;;  %v16194_v21 = vld [vmem:[#allocation9 + $0x624] ss:$48 sps:$4 sm:$0xff]  }
 0x386   : > { %3670 = vmatprep.subr.bf16.mxu0 %v16104_v22  ;;  %3752 = vmatprep.subr.bf16.mxu1 %v16107_v23  ;;  %v16197_v22 = vld [vmem:[#allocation9 + $0x62c] ss:$48 sps:$4 sm:$0xff]   ;;  %v16192_v23 = vld [vmem:[#allocation9 + $0x620] ss:$48 sps:$4 sm:$0xff]  }
 0x387   : > { %3700 = vmatprep.mubr.bf16.mxu0 %v18985_v48  ;;  %3782 = vmatprep.mubr.bf16.mxu1 %v18985_v48  ;;  %v16126_v48 = vld [vmem:[#allocation9 + $0x200] ss:$48 sps:$4 sm:$0xff]  }
 0x389   : > { %3671 = vmatpush1.bf16.msra.mxu0 %v16102_v24  ;;  %3753 = vmatpush1.bf16.msra.mxu1 %v16105_v25  ;;  %v16195_v24 = vld [vmem:[#allocation9 + $0x628] ss:$48 sps:$4 sm:$0xff]   ;;  %v16200_v25 = vld [vmem:[#allocation9 + $0x684] ss:$48 sps:$4 sm:$0xff]  }
 0x38a   : > { %3672 = vmatprep.subr.bf16.mxu0 %v16110_v26  ;;  %3754 = vmatprep.subr.bf16.mxu1 %v16113_v27  ;;  %v16203_v26 = vld [vmem:[#allocation9 + $0x68c] ss:$48 sps:$4 sm:$0xff]   ;;  %v16198_v27 = vld [vmem:[#allocation9 + $0x680] ss:$48 sps:$4 sm:$0xff]  }
 0x38d   : > { %3673 = vmatpush1.bf16.msra.mxu0 %v16108_v28  ;;  %3755 = vmatpush1.bf16.msra.mxu1 %v16111_v29  ;;  %v16201_v28 = vld [vmem:[#allocation9 + $0x688] ss:$48 sps:$4 sm:$0xff]   ;;  %v16206_v29 = vld [vmem:[#allocation9 + $0x6e4] ss:$48 sps:$4 sm:$0xff]  }
 0x38e   : > { %3674 = vmatprep.subr.bf16.mxu0 %v16116_v30  ;;  %3756 = vmatprep.subr.bf16.mxu1 %v16119_v31  ;;  %v16209_v30 = vld [vmem:[#allocation9 + $0x6ec] ss:$48 sps:$4 sm:$0xff]   ;;  %v16204_v31 = vld [vmem:[#allocation9 + $0x6e0] ss:$48 sps:$4 sm:$0xff]  }
 0x391   : > { %3675 = vmatpush1.bf16.msra.mxu0 %v16114_v32  ;;  %3757 = vmatpush1.bf16.msra.mxu1 %v16117_v34  ;;  %v16207_v32 = vld [vmem:[#allocation9 + $0x6e8] ss:$48 sps:$4 sm:$0xff]   ;;  %v1360_v34 = vlaneseq }
 0x392   : > { %3676 = vmatprep.subr.bf16.mxu0 %v16122_v35  ;;  %3758 = vmatprep.subr.bf16.mxu1 %v16125_v36  ;;  %v16212_v35 = vld [vmem:[#allocation9 + $0x744] ss:$48 sps:$4 sm:$0xff]   ;;  %v16215_v36 = vld [vmem:[#allocation9 + $0x74c] ss:$48 sps:$4 sm:$0xff]  }
 0x395   : > { %3677 = vmatpush1.bf16.msra.mxu0 %v16120_v37  ;;  %3759 = vmatpush1.bf16.msra.mxu1 %v16123_v38  ;;  %v16213_v37 = vld [vmem:[#allocation9 + $0x748] ss:$48 sps:$4 sm:$0xff]   ;;  %v19019_v38 = vshrl.u32 %v1360_v34, 7 }
 0x396   : > { %3678 = vmatprep.subr.bf16.mxu0 %v16128_v39  ;;  %3760 = vmatprep.subr.bf16.mxu1 %v16131_v40  ;;  %v16218_v39 = vld [vmem:[#allocation9 + $0x7a4] ss:$48 sps:$4 sm:$0xff]   ;;  %v16221_v40 = vld [vmem:[#allocation9 + $0x7ac] ss:$48 sps:$4 sm:$0xff]  }
 0x399   : > { %3679 = vmatpush1.bf16.msra.mxu0 %v16126_v48  ;;  %3761 = vmatpush1.bf16.msra.mxu1 %v16129_v41  ;;  %v1356_v48 = vld [vmem:[#allocation10] sm:$0xff]  ;;  %v16219_v41 = vld [vmem:[#allocation9 + $0x7a8] ss:$48 sps:$4 sm:$0xff]  }
 0x39a   : > { %3680 = vmatprep.subr.bf16.mxu0 %v16134_v42  ;;  %3762 = vmatprep.subr.bf16.mxu1 %v16137_v43  ;;  %v19022_v42 = vsub.s32 0, %v19019_v38  ;;  %v18262_v43 = vmov 1983009808  }
 0x39d   : > { %3681 = vmatpush1.bf16.msra.mxu0 %v16132_v44  ;;  %3763 = vmatpush1.bf16.msra.mxu1 %v16135_v45  ;;  %v3835_v44 = vunpack.c.l.s4 %v18262_v43  ;;  %v19025_v45 = vsub.s32 2, %v19019_v38  ;;  %v16251_v43 = vld [vmem:[#allocation9 + $0x98c] ss:$48 sps:$4 sm:$0xff]  }
 0x39e   : > { %3682 = vmatprep.subr.bf16.mxu0 %v16140_v46  ;;  %3764 = vmatprep.subr.bf16.mxu1 %v16143_v47  ;;  %v16224_v46 = vld [vmem:[#allocation9 + $0x804] ss:$48 sps:$4 sm:$0xff]   ;;  %v16227_v47 = vld [vmem:[#allocation9 + $0x80c] ss:$48 sps:$4 sm:$0xff]  }
 0x3a1   : > { %3683 = vmatpush1.bf16.msra.mxu0 %v16138_v49  ;;  %3765 = vmatpush1.bf16.msra.mxu1 %v16141_v50  ;;  %v19028_v49 = vsub.s32 1, %v19019_v38  ;;  %v19031_v50 = vsub.s32 3, %v19019_v38 }
 0x3a2   : > { %3684 = vmatprep.subr.bf16.mxu0 %v16146_v51  ;;  %3766 = vmatprep.subr.bf16.mxu1 %v16149_v52  ;;  %v16222_v51 = vld [vmem:[#allocation9 + $0x800] ss:$48 sps:$4 sm:$0xff]   ;;  %v16225_v52 = vld [vmem:[#allocation9 + $0x808] ss:$48 sps:$4 sm:$0xff]  }
 0x3a5   : > { %3685 = vmatpush1.bf16.msra.mxu0 %v16144_v53  ;;  %3767 = vmatpush1.bf16.msra.mxu1 %v16147_v54  ;;  %v1363_v53 = vrot.slane %v1356_v48, %v19022_v42  ;;  %v3836_v54 = vunpack.c.0.s8 %v3835_v44 }
 0x3a6   : > { %3686 = vmatprep.subr.bf16.mxu0 %v16152_v55  ;;  %3768 = vmatprep.subr.bf16.mxu1 %v16155_v56  ;;  %v1371_v55 = vrot.slane %v1356_v48, %v19025_v45  ;;  %v16230_v56 = vld [vmem:[#allocation9 + $0x864] ss:$48 sps:$4 sm:$0xff]  }
 0x3a9   : > { %3687 = vmatpush1.bf16.msra.mxu0 %v16150_v57  ;;  %3769 = vmatpush1.bf16.msra.mxu1 %v16153_v58  ;;  %v16233_v57 = vld [vmem:[#allocation9 + $0x86c] ss:$48 sps:$4 sm:$0xff]   ;;  %v18263_v58 = vmov 1934713408  }
 0x3aa   : > { %3688 = vmatprep.subr.bf16.mxu0 %v16158_v59  ;;  %3770 = vmatprep.subr.bf16.mxu1 %v16161_v60  ;;  %v3867_v59 = vunpack.c.l.s4 %v18263_v58  ;;  %v1367_v60 = vrot.slane %v1356_v48, %v19028_v49 }
 0x3ad   : > { %3689 = vmatpush1.bf16.msra.mxu0 %v16156_v61  ;;  %3771 = vmatpush1.bf16.msra.mxu1 %v16159_v62  ;;  %v1375_v61 = vrot.slane %v1356_v48, %v19031_v50 }
 0x3ae   : > { %3690 = vmatprep.subr.bf16.mxu0 %v16164_v63  ;;  %3772 = vmatprep.subr.bf16.mxu1 %v16167_v0  ;;  %v16228_v0 = vld [vmem:[#allocation9 + $0x860] ss:$48 sps:$4 sm:$0xff]  }
 0x3b1   : > { %3691 = vmatpush1.bf16.msra.mxu0 %v16162_v1  ;;  %3773 = vmatpush1.bf16.msra.mxu1 %v16165_v2  ;;  %v16231_v1 = vld [vmem:[#allocation9 + $0x868] ss:$48 sps:$4 sm:$0xff]  }
 0x3b2   : > { %3692 = vmatprep.subr.bf16.mxu0 %v16170_v3  ;;  %3774 = vmatprep.subr.bf16.mxu1 %v16173_v4  ;;  %v19038_v3 = vsub.s32 %v3836_v54, %v19019_v38  ;;  %v16254_v54 = vld [vmem:[#allocation9 + $0x9e4] ss:$48 sps:$4 sm:$0xff]  }
 0x3b5   : > { %3693 = vmatpush1.bf16.msra.mxu0 %v16168_v6  ;;  %3775 = vmatpush1.bf16.msra.mxu1 %v16171_v7 }
 0x3b6   : > { %3694 = vmatprep.subr.bf16.mxu0 %v16176_v8  ;;  %3776 = vmatprep.subr.bf16.mxu1 %v16179_v9  ;;  %v16236_v8 = vld [vmem:[#allocation9 + $0x8c4] ss:$48 sps:$4 sm:$0xff]   ;;  %v16239_v9 = vld [vmem:[#allocation9 + $0x8cc] ss:$48 sps:$4 sm:$0xff]  }
 0x3b9   : > { %3695 = vmatpush1.bf16.msra.mxu0 %v16174_v10  ;;  %3777 = vmatpush1.bf16.msra.mxu1 %v16177_v12  ;;  %v3868_v10 = vunpack.c.0.s8 %v3867_v59  ;;  %v16257_v59 = vld [vmem:[#allocation9 + $0x9ec] ss:$48 sps:$4 sm:$0xff]  }
 0x3ba   : > { %3696 = vmatprep.subr.bf16.mxu0 %v16182_v13  ;;  %3778 = vmatprep.subr.bf16.mxu1 %v16185_v14 }
 0x3bd   : > { %3697 = vmatpush1.bf16.msra.mxu0 %v16180_v15  ;;  %3779 = vmatpush1.bf16.msra.mxu1 %v16183_v16 }
 0x3be   : > { %3698 = vmatprep.subr.bf16.mxu0 %v16188_v17  ;;  %3780 = vmatprep.subr.bf16.mxu1 %v16191_v18 }
 0x3c1   : > { %3699 = vmatpush1.bf16.msra.mxu0 %v16186_v19  ;;  %3781 = vmatpush1.bf16.msra.mxu1 %v16189_v20 }
 0x3c2   : > { %3709 = vmatprep.subr.bf16.mxu0 %v16194_v21  ;;  %3791 = vmatprep.subr.bf16.mxu1 %v16197_v22  ;;  %v16234_v22 = vld [vmem:[#allocation9 + $0x8c0] ss:$48 sps:$4 sm:$0xff]  }
 0x3c4   : > { %3701 = vmatmul.mubr.bf16.vlgmr.msra.gmra.mrb[8].mxu0 %v18990_v5  ;;  %3783 = vmatmul.mubr.bf16.vlgmr.msra.gmra.mrb[8].mxu1 %v18990_v5  ;;  %v16210_v5 = vld [vmem:[#allocation9 + $0x740] ss:$48 sps:$4 sm:$0xff]  }
 0x3c5   : > { %3710 = vmatpush1.bf16.msra.mxu0 %v16192_v23  ;;  %3792 = vmatpush1.bf16.msra.mxu1 %v16195_v24 }
 0x3c6   : > { %3711 = vmatprep.subr.bf16.mxu0 %v16200_v25  ;;  %3793 = vmatprep.subr.bf16.mxu1 %v16203_v26  ;;  %v16237_v25 = vld [vmem:[#allocation9 + $0x8c8] ss:$48 sps:$4 sm:$0xff]   ;;  %v16242_v26 = vld [vmem:[#allocation9 + $0x924] ss:$48 sps:$4 sm:$0xff]  }
 0x3c7   : > { %3741 = vmatprep.mubr.bf16.mxu0 %v18995_v33  ;;  %3823 = vmatprep.mubr.bf16.mxu1 %v18995_v33  ;;  %v16216_v33 = vld [vmem:[#allocation9 + $0x7a0] ss:$48 sps:$4 sm:$0xff]  }
 0x3c9   : > { %3712 = vmatpush1.bf16.msra.mxu0 %v16198_v27  ;;  %3794 = vmatpush1.bf16.msra.mxu1 %v16201_v28  ;;  %v19043_v27 = vsub.s32 %v3868_v10, %v19019_v38  ;;  %v16258_v10 = vld [vmem:[#allocation9 + $0xa40] ss:$48 sps:$4 sm:$0xff]  }
 0x3ca   : > { %3713 = vmatprep.subr.bf16.mxu0 %v16206_v29  ;;  %3795 = vmatprep.subr.bf16.mxu1 %v16209_v30  ;;  %v16245_v30 = vld [vmem:[#allocation9 + $0x92c] ss:$48 sps:$4 sm:$0xff]  }
 0x3cd   : > { %3714 = vmatpush1.bf16.msra.mxu0 %v16204_v31  ;;  %3796 = vmatpush1.bf16.msra.mxu1 %v16207_v32 }
 0x3ce   : > { %3715 = vmatprep.subr.bf16.mxu0 %v16212_v35  ;;  %3797 = vmatprep.subr.bf16.mxu1 %v16215_v36 }
 0x3d1   : > { %3716 = vmatpush1.bf16.msra.mxu0 %v16210_v5  ;;  %3798 = vmatpush1.bf16.msra.mxu1 %v16213_v37  ;;  %v16240_v5 = vld [vmem:[#allocation9 + $0x920] ss:$48 sps:$4 sm:$0xff]   ;;  %v16243_v37 = vld [vmem:[#allocation9 + $0x928] ss:$48 sps:$4 sm:$0xff]  }
 0x3d2   : > { %3717 = vmatprep.subr.bf16.mxu0 %v16218_v39  ;;  %3799 = vmatprep.subr.bf16.mxu1 %v16221_v40  ;;  %v16248_v39 = vld [vmem:[#allocation9 + $0x984] ss:$48 sps:$4 sm:$0xff]  }
 0x3d5   : > { %3718 = vmatpush1.bf16.msra.mxu0 %v16216_v33  ;;  %3800 = vmatpush1.bf16.msra.mxu1 %v16219_v41 }
 0x3d6   : > { %3719 = vmatprep.subr.bf16.mxu0 %v16224_v46  ;;  %3801 = vmatprep.subr.bf16.mxu1 %v16227_v47 }
 0x3d7   : > { %v3415_v62 = vpop.f32.mrb[0].mxu0  ;;  %v3497_v63 = vpop.f32.mrb[0].mxu1 }
 0x3d8   : > { %v15401_v2 = vadd.f32 %v3415_v62, %v1363_v53  ;;  %v15403_v4 = vadd.f32 %v3497_v63, %v1371_v55  ;;  %v3417_v6 = vpop.f32.mrb[1].mxu0  ;;  %v3499_v7 = vpop.f32.mrb[1].mxu1  ;;  %v16249_v53 = vld [vmem:[#allocation9 + $0x988] ss:$48 sps:$4 sm:$0xff]  }
 0x3d9   : > { %v15402_v12 = vadd.f32 %v3417_v6, %v1367_v60  ;;  %v15404_v13 = vadd.f32 %v3499_v7, %v1375_v61  ;;  %v3419_v14 = vpop.f32.mrb[2].mxu0  ;;  %v3501_v15 = vpop.f32.mrb[2].mxu1  ;;  %3720 = vmatpush1.bf16.msra.mxu0 %v16222_v51  ;;  %3802 = vmatpush1.bf16.msra.mxu1 %v16225_v52  ;;  %v16246_v52 = vld [vmem:[#allocation9 + $0x980] ss:$48 sps:$4 sm:$0xff]  }
 0x3da   : > { %v3832_v16 = vcombine.low %v15401_v2, %v15403_v4  ;;  %v3833_v17 = vcombine.high %v15401_v2, %v15403_v4  ;;  %v3420_v18 = vpop.f32.mrb[3].mxu0  ;;  %v3502_v19 = vpop.f32.mrb[3].mxu1  ;;  %3721 = vmatprep.subr.bf16.mxu0 %v16230_v56  ;;  %3803 = vmatprep.subr.bf16.mxu1 %v16233_v57  ;;  %v16252_v60 = vld [vmem:[#allocation9 + $0x9e0] ss:$48 sps:$4 sm:$0xff]   ;;  %v16260_v2 = vld [vmem:[#allocation9 + $0xa44] ss:$48 sps:$4 sm:$0xff]  }
 0x3db   : > { %v3848_v20 = vcombine.low %v15402_v12, %v15404_v13  ;;  %v3849_v21 = vcombine.high %v15402_v12, %v15404_v13  ;;  %v16263_v4 = vld [vmem:[#allocation9 + $0xa4c] ss:$48 sps:$4 sm:$0xff]   ;;  %v16264_v19 = vld [vmem:[#allocation9 + $0xaa0] ss:$48 sps:$4 sm:$0xff]  }
 0x3dc   : > { %v3840_v23 = vrot.slane %v3832_v16, %v19038_v3  ;;  %v3847_v24 = vrot.slane %v3833_v17, %v19038_v3  ;;  %v16261_v16 = vld [vmem:[#allocation9 + $0xa48] ss:$48 sps:$4 sm:$0xff]   ;;  %v16266_v17 = vld [vmem:[#allocation9 + $0xaa4] ss:$48 sps:$4 sm:$0xff]   ;;  %v16269_v18 = vld [vmem:[#allocation9 + $0xaac] ss:$48 sps:$4 sm:$0xff]  }
 0x3dd   : > { %v3856_v28 = vrot.slane %v3848_v20, %v19038_v3  ;;  %v3863_v29 = vrot.slane %v3849_v21, %v19038_v3  ;;  %3722 = vmatpush1.bf16.msra.mxu0 %v16228_v0  ;;  %3804 = vmatpush1.bf16.msra.mxu1 %v16231_v1  ;;  %v16255_v1 = vld [vmem:[#allocation9 + $0x9e8] ss:$48 sps:$4 sm:$0xff]   ;;  %v16272_v21 = vld [vmem:[#allocation9 + $0xb04] ss:$48 sps:$4 sm:$0xff]  }
 0x3de   : > { %3723 = vmatprep.subr.bf16.mxu0 %v16236_v8  ;;  %3805 = vmatprep.subr.bf16.mxu1 %v16239_v9  ;;  %v16267_v20 = vld [vmem:[#allocation9 + $0xaa8] ss:$48 sps:$4 sm:$0xff]  }
 0x3df   : > { %v3864_v31 = vcombine.low %v3840_v23, %v3856_v28  ;;  %v3865_v32 = vcombine.high %v3840_v23, %v3856_v28  ;;  %v3880_v35 = vcombine.low %v3847_v24, %v3863_v29  ;;  %v3881_v36 = vcombine.high %v3847_v24, %v3863_v29  ;;  %v16270_v23 = vld [vmem:[#allocation9 + $0xb00] ss:$48 sps:$4 sm:$0xff]   ;;  %v16273_v24 = vld [vmem:[#allocation9 + $0xb08] ss:$48 sps:$4 sm:$0xff]  }
 0x3e0   : > { %v16276_v28 = vld [vmem:[#allocation9 + $0xb60] ss:$48 sps:$4 sm:$0xff]   ;;  %v16279_v29 = vld [vmem:[#allocation9 + $0xb68] ss:$48 sps:$4 sm:$0xff]  }
 0x3e1   : > { %v3872_v40 = vrot.slane %v3864_v31, %v19043_v27  ;;  %v3879_v48 = vrot.slane %v3865_v32, %v19043_v27  ;;  %v3888_v33 = vrot.slane %v3880_v35, %v19043_v27  ;;  %v3895_v41 = vrot.slane %v3881_v36, %v19043_v27  ;;  %3724 = vmatpush1.bf16.msra.mxu0 %v16234_v22  ;;  %v16275_v22 = vld [vmem:[#allocation9 + $0xb0c] ss:$48 sps:$4 sm:$0xff]   ;;  %v16282_v32 = vld [vmem:[#allocation9 + $0xbc0] ss:$48 sps:$4 sm:$0xff]   ;;  %v16285_v35 = vld [vmem:[#allocation9 + $0xbc8] ss:$48 sps:$4 sm:$0xff]  }
 0x3e2   : > { %3806 = vmatpush1.bf16.msra.mxu1 %v16237_v25  ;;  %3725 = vmatprep.subr.bf16.mxu0 %v16242_v26  ;;  %v16278_v25 = vld [vmem:[#allocation9 + $0xb64] ss:$48 sps:$4 sm:$0xff]   ;;  %v16281_v26 = vld [vmem:[#allocation9 + $0xb6c] ss:$48 sps:$4 sm:$0xff]   ;;  %v18264_v36 = vmov 0.0  }
 0x3e3   : > { %v3900_v44 = vcombine.low %v3872_v40, %v3879_v48  ;;  %v14205_v46 = vcombine.high %v3872_v40, %v3879_v48  ;;  %v3916_v47 = vcombine.low %v3888_v33, %v3895_v41  ;;  %v14206_v51 = vcombine.high %v3888_v33, %v3895_v41  ;;  %3807 = vmatprep.subr.bf16.mxu1 %v16245_v30  ;;  %v16284_v30 = vld [vmem:[#allocation9 + $0xbc4] ss:$48 sps:$4 sm:$0xff]   ;;  %v16287_v31 = vld [vmem:[#allocation9 + $0xbcc] ss:$48 sps:$4 sm:$0xff]  }
 0x3e4   : > { %v1390_v40 = vsub.s32 7, %v19019_v38  ;;  %v17508_v48 = vld [vmem:[#allocation10] sm:$0xff] }
 0x3e5   : > { %v3907_v55 = vrot.slane %v3900_v44, %v19038_v3  ;;  %v3915_v56 = vrot.slane %v14205_v46, %v19038_v3  ;;  %v3923_v57 = vrot.slane %v3916_v47, %v19038_v3  ;;  %v3931_v58 = vrot.slane %v14206_v51, %v19038_v3  ;;  %3726 = vmatpush1.bf16.msra.mxu0 %v16240_v5 }
 0x3e6   : > { %3808 = vmatpush1.bf16.msra.mxu1 %v16243_v37  ;;  %3727 = vmatprep.subr.bf16.mxu0 %v16248_v39  ;;  %v1378_v5 = vsub.s32 4, %v19019_v38  ;;  %v1386_v37 = vsub.s32 6, %v19019_v38  ;;  %v1382_v39 = vsub.s32 5, %v19019_v38 }
 0x3e7   : > { %3809 = vmatprep.subr.bf16.mxu1 %v16251_v43  ;;  %v3932_v61 = vcombine.low %v3907_v55, %v3915_v56  ;;  %v3948_v62 = vcombine.low %v3923_v57, %v3931_v58  ;;  %v3933_v63 = vcombine.high %v3907_v55, %v3915_v56  ;;  %v3949_v0 = vcombine.high %v3923_v57, %v3931_v58 }
 0x3e8   : > { %v1379_v33 = vrot.slane %v17508_v48, %v1378_v5  ;;  %v1383_v41 = vrot.slane %v17508_v48, %v1382_v39  ;;  %v1391_v43 = vrot.slane %v17508_v48, %v1390_v40 }
 0x3e9   : > { %3728 = vmatpush1.bf16.msra.mxu0 %v16246_v52  ;;  %v3940_v6 = vrot.slane %v3932_v61, %v19043_v27  ;;  %v3956_v7 = vrot.slane %v3948_v62, %v19043_v27  ;;  %v3947_v8 = vrot.slane %v3933_v63, %v19043_v27  ;;  %v3963_v9 = vrot.slane %v3949_v0, %v19043_v27 }
 0x3ea   : > { %3810 = vmatpush1.bf16.msra.mxu1 %v16249_v53  ;;  %3729 = vmatprep.subr.bf16.mxu0 %v16254_v54 }
 0x3eb   : > { %3811 = vmatprep.subr.bf16.mxu1 %v16257_v59  ;;  %v19059_v12 = vcombine.low %v3940_v6, %v3956_v7  ;;  %v19061_v13 = vcombine.high %v3940_v6, %v3956_v7  ;;  %v19063_v14 = vcombine.low %v3947_v8, %v3963_v9  ;;  %v19065_v15 = vcombine.high %v3947_v8, %v3963_v9 }
 0x3ed   : > { %3730 = vmatpush1.bf16.msra.mxu0 %v16252_v60 }
 0x3ee   : > { %3812 = vmatpush1.bf16.msra.mxu1 %v16255_v1  ;;  %3731 = vmatprep.subr.bf16.mxu0 %v16260_v2 }
 0x3ef   : > { %3813 = vmatprep.subr.bf16.mxu1 %v16263_v4 }
 0x3f1   : > { %3732 = vmatpush1.bf16.msra.mxu0 %v16258_v10 }
 0x3f2   : > { %3814 = vmatpush1.bf16.msra.mxu1 %v16261_v16  ;;  %3733 = vmatprep.subr.bf16.mxu0 %v16266_v17 }
 0x3f3   : > { %3815 = vmatprep.subr.bf16.mxu1 %v16269_v18 }
 0x3f5   : > { %3734 = vmatpush1.bf16.msra.mxu0 %v16264_v19 }
 0x3f6   : > { %3816 = vmatpush1.bf16.msra.mxu1 %v16267_v20  ;;  %3735 = vmatprep.subr.bf16.mxu0 %v16272_v21 }
 0x3f7   : > { %3817 = vmatprep.subr.bf16.mxu1 %v16275_v22 }
 0x3f9   : > { %3736 = vmatpush1.bf16.msra.mxu0 %v16270_v23 }
 0x3fa   : > { %3818 = vmatpush1.bf16.msra.mxu1 %v16273_v24  ;;  %3737 = vmatprep.subr.bf16.mxu0 %v16278_v25 }
 0x3fb   : > { %3819 = vmatprep.subr.bf16.mxu1 %v16281_v26 }
 0x3fd   : > { %3738 = vmatpush1.bf16.msra.mxu0 %v16276_v28 }
 0x3fe   : > { %3820 = vmatpush1.bf16.msra.mxu1 %v16279_v29  ;;  %3739 = vmatprep.subr.bf16.mxu0 %v16284_v30 }
 0x3ff   : > { %3821 = vmatprep.subr.bf16.mxu1 %v16287_v31 }
 0x401   : > { %3740 = vmatpush1.bf16.msra.mxu0 %v16282_v32 }
 0x402   : > { %3822 = vmatpush1.bf16.msra.mxu1 %v16285_v35  ;;  %15353 = vmatprep.subr.bf16.mxu0 %v18264_v36 }
 0x403   : > { %15359 = vmatprep.subr.bf16.mxu1 %v18264_v36 }
 0x404   : > { %3742 = vmatmul.mubr.bf16.vlgmr.msra.gmra.mrb[8].mxu0 %v19000_v11 }
 0x405   : > { %3824 = vmatmul.mubr.bf16.vlgmr.msra.gmra.mrb[8].mxu1 %v19000_v11  ;;  %15355 = vmatprep.mubr.msk.bf16.mxu0 %vm18265_vm0, %v18264_v36  ;;  %v1387_v11 = vrot.slane %v17508_v48, %v1386_v37 }
 0x406   : > { %15361 = vmatprep.mubr.msk.bf16.mxu1 %vm18265_vm0, %v18264_v36 }
 0x457   : > { %v3579_v44 = vpop.f32.mrb[4].mxu0  ;;  %v3661_v46 = vpop.f32.mrb[4].mxu1 }
 0x458   : > { %v15405_v47 = vadd.f32 %v3579_v44, %v1379_v33  ;;  %v15407_v51 = vadd.f32 %v3661_v46, %v1387_v11  ;;  %v3581_v52 = vpop.f32.mrb[5].mxu0  ;;  %v3663_v53 = vpop.f32.mrb[5].mxu1 }
 0x459   : > { %v15406_v54 = vadd.f32 %v3581_v52, %v1383_v41  ;;  %v15408_v55 = vadd.f32 %v3663_v53, %v1391_v43  ;;  %v3583_v56 = vpop.f32.mrb[6].mxu0  ;;  %v3665_v57 = vpop.f32.mrb[6].mxu1  ;;  %v4244_v52 = vpack.c.bf16 %v19061_v13, %v19061_v13  ;;  %v4246_v13 = vpack.c.bf16 %v19065_v15, %v19065_v15 }
 0x45a   : > { %v3968_v58 = vcombine.low %v15405_v47, %v15407_v51  ;;  %v3969_v59 = vcombine.high %v15405_v47, %v15407_v51  ;;  %v3584_v60 = vpop.f32.mrb[7].mxu0  ;;  %v3666_v61 = vpop.f32.mrb[7].mxu1  ;;  %v4243_v51 = vpack.c.bf16 %v19059_v12, %v19059_v12  ;;  %v4245_v12 = vpack.c.bf16 %v19063_v14, %v19063_v14 }
 0x45b   : > { %v3984_v62 = vcombine.low %v15406_v54, %v15408_v55  ;;  %v3985_v63 = vcombine.high %v15406_v54, %v15408_v55  ;;  %v1357_v55 = vld [vmem:[#allocation10 + $0x8] sm:$0xf] }
 0x45c   : > { %v3976_v0 = vrot.slane %v3968_v58, %v19038_v3  ;;  %v3983_v1 = vrot.slane %v3969_v59, %v19038_v3  ;;  %v1395_v56 = vrot.slane %v1357_v55, %v19022_v42  ;;  %v1399_v57 = vrot.slane %v1357_v55, %v19028_v49 }
 0x45d   : > { %v3992_v2 = vrot.slane %v3984_v62, %v19038_v3  ;;  %v3999_v4 = vrot.slane %v3985_v63, %v19038_v3  ;;  %v1403_v58 = vrot.slane %v1357_v55, %v19025_v45  ;;  %v1407_v14 = vrot.slane %v1357_v55, %v19031_v50 }
 0x45f   : > { %v4000_v6 = vcombine.low %v3976_v0, %v3992_v2  ;;  %v4001_v7 = vcombine.high %v3976_v0, %v3992_v2  ;;  %v4016_v8 = vcombine.low %v3983_v1, %v3999_v4  ;;  %v4017_v9 = vcombine.high %v3983_v1, %v3999_v4 }
 0x461   : > { %v4008_v10 = vrot.slane %v4000_v6, %v19043_v27  ;;  %v4015_v16 = vrot.slane %v4001_v7, %v19043_v27  ;;  %v4024_v17 = vrot.slane %v4016_v8, %v19043_v27  ;;  %v4031_v18 = vrot.slane %v4017_v9, %v19043_v27 }
 0x463   : > { %v4036_v19 = vcombine.low %v4008_v10, %v4015_v16  ;;  %v14207_v20 = vcombine.high %v4008_v10, %v4015_v16  ;;  %v4052_v21 = vcombine.low %v4024_v17, %v4031_v18  ;;  %v14208_v22 = vcombine.high %v4024_v17, %v4031_v18 }
 0x465   : > { %v4043_v23 = vrot.slane %v4036_v19, %v19038_v3  ;;  %v4051_v24 = vrot.slane %v14207_v20, %v19038_v3  ;;  %v4059_v25 = vrot.slane %v4052_v21, %v19038_v3  ;;  %v4067_v26 = vrot.slane %v14208_v22, %v19038_v3 }
 0x467   : > { %v4068_v28 = vcombine.low %v4043_v23, %v4051_v24  ;;  %v4084_v29 = vcombine.low %v4059_v25, %v4067_v26  ;;  %v4069_v30 = vcombine.high %v4043_v23, %v4051_v24  ;;  %v4085_v31 = vcombine.high %v4059_v25, %v4067_v26 }
 0x469   : > { %v4076_v32 = vrot.slane %v4068_v28, %v19043_v27  ;;  %v4092_v35 = vrot.slane %v4084_v29, %v19043_v27  ;;  %v4083_v48 = vrot.slane %v4069_v30, %v19043_v27  ;;  %v4099_v33 = vrot.slane %v4085_v31, %v19043_v27 }
 0x46b   : > { %v4100_v11 = vcombine.low %v4076_v32, %v4092_v35  ;;  %v4101_v41 = vcombine.high %v4076_v32, %v4092_v35  ;;  %v4102_v43 = vcombine.low %v4083_v48, %v4099_v33  ;;  %v4103_v44 = vcombine.high %v4083_v48, %v4099_v33 }
 0x46d   : > { %v4247_v46 = vpack.c.bf16 %v4100_v11, %v4100_v11  ;;  %v4248_v47 = vpack.c.bf16 %v4101_v41, %v4101_v41  ;;  %v4249_v53 = vpack.c.bf16 %v4102_v43, %v4102_v43  ;;  %v4250_v54 = vpack.c.bf16 %v4103_v44, %v4103_v44 }
 0x46f   : > { %15354 = vmatpush3.bf16.xpose.msra.mxu0 %v4247_v46  ;;  %15360 = vmatpush3.bf16.xpose.msra.mxu1 %v4248_v47 }
 0x470   : > { %15365 = vmatprep.subr.bf16.mxu0 %v18264_v36  ;;  %15371 = vmatprep.subr.bf16.mxu1 %v18264_v36 }
 0x476   : > { %15356 = vmatmul.mubr.bf16.vlgmr.msra.gmra.mrb[12].mxu0 %v4243_v51  ;;  %15362 = vmatmul.mubr.bf16.vlgmr.msra.gmra.mrb[12].mxu1 %v4244_v52 }
 0x477   : > { %15366 = vmatpush3.bf16.xpose.msra.mxu0 %v4249_v53  ;;  %15372 = vmatpush3.bf16.xpose.msra.mxu1 %v4250_v54 }
 0x478   : > { %15367 = vmatprep.mubr.msk.bf16.mxu0 %vm18265_vm0, %v18264_v36  ;;  %15373 = vmatprep.mubr.msk.bf16.mxu1 %vm18265_vm0, %v18264_v36 }
 0x479   : > { %15377 = vmatprep.subr.bf16.mxu0 %v18264_v36  ;;  %15383 = vmatprep.subr.bf16.mxu1 %v18264_v36 }
 0x47e   : > { %15368 = vmatmul.mubr.bf16.vlgmr.msra.gmra.mrb[16].mxu0 %v4245_v12  ;;  %15374 = vmatmul.mubr.bf16.vlgmr.msra.gmra.mrb[16].mxu1 %v4246_v13 }
 0x47f   : > { %15379 = vmatprep.mubr.msk.bf16.mxu0 %vm18265_vm0, %v18264_v36  ;;  %15385 = vmatprep.mubr.msk.bf16.mxu1 %vm18265_vm0, %v18264_v36 }
 0x4d7   : > { %v3743_v59 = vpop.f32.mrb[8].mxu0 }
 0x4d8   : > { %v15409_v60 = vadd.f32 %v3743_v59, %v1395_v56  ;;  %v3745_v15 = vpop.f32.mrb[9].mxu0  ;;  %v3825_v61 = vpop.f32.mrb[8].mxu1 }
 0x4d9   : > { %v15410_v62 = vadd.f32 %v3745_v15, %v1399_v57  ;;  %v3747_v63 = vpop.f32.mrb[10].mxu0  ;;  %v15411_v0 = vadd.f32 %v3825_v61, %v1403_v58  ;;  %v3827_v1 = vpop.f32.mrb[9].mxu1 }
 0x4da   : > { %v3748_v2 = vpop.f32.mrb[11].mxu0  ;;  %v15412_v4 = vadd.f32 %v3827_v1, %v1407_v14  ;;  %v3829_v6 = vpop.f32.mrb[10].mxu1  ;;  %v4240_v63 = vld [vmem:[%s824_s29] sm:$0x1]  ;;  %s19499_s29 = scalar_lea.hbm %s19699_s5, %s15292_s15 }
 0x4db   : > { %v4104_v7 = vcombine.low %v15409_v60, %v15411_v0  ;;  %v4105_v8 = vcombine.high %v15409_v60, %v15411_v0  ;;  %v3830_v9 = vpop.f32.mrb[11].mxu1  ;;  %vm4241_vm2 = vcmp.gt.f32.partialorder %v4240_v63, 0.5  ;;  %v18266_v0 = vmov -1e+09  }
 0x4dc   : > { %v4120_v10 = vcombine.low %v15410_v62, %v15412_v4  ;;  %v4121_v16 = vcombine.high %v15410_v62, %v15412_v4  ;;  %v4242_v1 = vsel %vm4241_vm2, 0.0, %v18266_v0 }
 0x4dd   : > { %v4112_v17 = vrot.slane %v4104_v7, %v19038_v3  ;;  %v4119_v18 = vrot.slane %v4105_v8, %v19038_v3  ;;  %v4419_v2 = vrot.slane %v4242_v1, %v19022_v42 }
 0x4de   : > { %v4128_v19 = vrot.slane %v4120_v10, %v19038_v3  ;;  %v4135_v20 = vrot.slane %v4121_v16, %v19038_v3 }
 0x4e0   : > { %v4136_v21 = vcombine.low %v4112_v17, %v4128_v19  ;;  %v4137_v22 = vcombine.high %v4112_v17, %v4128_v19  ;;  %v4152_v23 = vcombine.low %v4119_v18, %v4135_v20  ;;  %v4153_v24 = vcombine.high %v4119_v18, %v4135_v20 }
 0x4e2   : > { %v4144_v25 = vrot.slane %v4136_v21, %v19043_v27  ;;  %v4151_v26 = vrot.slane %v4137_v22, %v19043_v27  ;;  %v4160_v28 = vrot.slane %v4152_v23, %v19043_v27  ;;  %v4167_v29 = vrot.slane %v4153_v24, %v19043_v27 }
 0x4e4   : > { %v4172_v30 = vcombine.low %v4144_v25, %v4151_v26  ;;  %v14209_v31 = vcombine.high %v4144_v25, %v4151_v26  ;;  %v4188_v32 = vcombine.low %v4160_v28, %v4167_v29  ;;  %v14210_v35 = vcombine.high %v4160_v28, %v4167_v29 }
 0x4e6   : > { %v4179_v48 = vrot.slane %v4172_v30, %v19038_v3  ;;  %v4187_v33 = vrot.slane %v14209_v31, %v19038_v3  ;;  %v4195_v11 = vrot.slane %v4188_v32, %v19038_v3  ;;  %v4203_v41 = vrot.slane %v14210_v35, %v19038_v3 }
 0x4e8   : > { %v4204_v43 = vcombine.low %v4179_v48, %v4187_v33  ;;  %v4220_v44 = vcombine.low %v4195_v11, %v4203_v41  ;;  %v4205_v46 = vcombine.high %v4179_v48, %v4187_v33  ;;  %v4221_v47 = vcombine.high %v4195_v11, %v4203_v41 }
 0x4ea   : > { %v4212_v51 = vrot.slane %v4204_v43, %v19043_v27  ;;  %v4228_v52 = vrot.slane %v4220_v44, %v19043_v27  ;;  %v4219_v53 = vrot.slane %v4205_v46, %v19043_v27  ;;  %v4235_v54 = vrot.slane %v4221_v47, %v19043_v27 }
 0x4ec   : > { %v4236_v12 = vcombine.low %v4212_v51, %v4228_v52  ;;  %v4237_v13 = vcombine.high %v4212_v51, %v4228_v52  ;;  %v4238_v55 = vcombine.low %v4219_v53, %v4235_v54  ;;  %v4239_v56 = vcombine.high %v4219_v53, %v4235_v54 }
 0x4ee   : > { %v4474_v57 = vpack.c.bf16 %v4236_v12, %v4236_v12  ;;  %v4475_v58 = vpack.c.bf16 %v4237_v13, %v4237_v13  ;;  %v4476_v14 = vpack.c.bf16 %v4238_v55, %v4238_v55  ;;  %v4477_v59 = vpack.c.bf16 %v4239_v56, %v4239_v56 }
 0x4f0   : > { %v4483_v60 = vsel %vm4481_vm1, %v4474_v57, 0  ;;  %v4529_v15 = vsel %vm4481_vm1, %v4475_v58, 0  ;;  %v19143_v61 = vsel %vm4481_vm1, %v4476_v14, 0  ;;  %v19145_v62 = vsel %vm4481_vm1, %v4477_v59, 0 }
 0x4f1   : > { %15378 = vmatpush3.bf16.msra.mxu0 %v4483_v60  ;;  %15384 = vmatpush3.bf16.msra.mxu1 %v4529_v15 }
 0x4f2   : > { %15389 = vmatprep.subr.bf16.mxu0 %v18264_v36  ;;  %15395 = vmatprep.subr.bf16.mxu1 %v18264_v36 }
 0x549   : > { %v4285_v4 = vpop.f32.mrb[12].mxu0  ;;  %v4325_v6 = vpop.f32.mrb[12].mxu1 }
 0x54a   : > { %v4411_v7 = vmul.f32 0.088388346, %v4285_v4  ;;  %v4412_v8 = vmul.f32 0.088388346, %v4325_v6  ;;  %v15357_v9 = vpop.f32.mrb[13].mxu0  ;;  %v15363_v10 = vpop.f32.mrb[13].mxu1 }
 0x54b   : > { %v4288_v16 = vpop.f32.mrb[14].mxu0  ;;  %v4328_v17 = vpop.f32.mrb[14].mxu1 }
 0x54c   : > { %v15358_v18 = vpop.f32.mrb[15].mxu0  ;;  %v15364_v19 = vpop.f32.mrb[15].mxu1  ;;  %v4421_v20 = vadd.f32 %v4419_v2, %v4411_v7  ;;  %v4422_v21 = vadd.f32 %v4419_v2, %v4412_v8  ;;  %v16290_v16 = vld [vmem:[#allocation12 + $0x4] ss:$16 sps:$4 sm:$0xff]  }
 0x54e   : > { %v4426_v22 = vsel %vm4425_vm3, %v4421_v20, -inf  ;;  %v4429_v25 = vsel %vm4425_vm3, %v4422_v21, -inf }
 0x54f   : > { %4427 = vmax.xlane.f32.xlu0 %v4426_v22 }
 0x551   : > { %v4365_v23 = vpop.f32.mrb[16].mxu0  ;;  %v4405_v24 = vpop.f32.mrb[16].mxu1 }
 0x552   : > { %v4413_v26 = vmul.f32 0.088388346, %v4365_v23  ;;  %v4414_v28 = vmul.f32 0.088388346, %v4405_v24  ;;  %v15369_v29 = vpop.f32.mrb[17].mxu0  ;;  %v15375_v30 = vpop.f32.mrb[17].mxu1 }
 0x553   : > { %v4408_v31 = vpop.f32.mrb[18].mxu1  ;;  %4430 = vmax.xlane.f32.xlu0 %v4429_v25  ;;  %v4368_v32 = vpop.f32.mrb[18].mxu0  ;;  %v16288_v23 = vld [vmem:[#allocation12] ss:$16 sps:$4 sm:$0xff]   ;;  %v16296_v25 = vld [vmem:[#allocation12 + $0x24] ss:$16 sps:$4 sm:$0xff]  }
 0x554   : > { %v15370_v35 = vpop.f32.mrb[19].mxu0  ;;  %v15376_v48 = vpop.f32.mrb[19].mxu1  ;;  %v4423_v33 = vadd.f32 %v4419_v2, %v4413_v26  ;;  %v4424_v41 = vadd.f32 %v4419_v2, %v4414_v28  ;;  %v16291_v28 = vld [vmem:[#allocation12 + $0x200] ss:$16 sps:$4 sm:$0xff]   ;;  %v16299_v31 = vld [vmem:[#allocation12 + $0x224] ss:$16 sps:$4 sm:$0xff]  }
 0x555   : > { %v16294_v29 = vld [vmem:[#allocation12 + $0x20] ss:$16 sps:$4 sm:$0xff]   ;;  %v16302_v32 = vld [vmem:[#allocation12 + $0x44] ss:$16 sps:$4 sm:$0xff]  }
 0x556   : > { %v4432_v11 = vsel %vm4425_vm3, %v4423_v33, -inf  ;;  %v4435_v43 = vsel %vm4425_vm3, %v4424_v41, -inf  ;;  %v16300_v35 = vld [vmem:[#allocation12 + $0x40] ss:$16 sps:$4 sm:$0xff]   ;;  %v16305_v48 = vld [vmem:[#allocation12 + $0x244] ss:$16 sps:$4 sm:$0xff]  }
 0x557   : > { %4433 = vmax.xlane.f32.xlu1 %v4432_v11  ;;  %v16303_v11 = vld [vmem:[#allocation12 + $0x240] ss:$16 sps:$4 sm:$0xff]  }
 0x55b   : > { %4436 = vmax.xlane.f32.xlu1 %v4435_v43  ;;  %v16311_v43 = vld [vmem:[#allocation12 + $0x264] ss:$16 sps:$4 sm:$0xff]  }
 0x5dc   : > { %v4428_v44 = vpop.xlane.xlu0 %4427 }
 0x5dd   : > { %v4438_v46 = vsub.f32 %v4421_v20, %v4428_v44  ;;  %v16293_v20 = vld [vmem:[#allocation12 + $0x204] ss:$16 sps:$4 sm:$0xff]  }
 0x5de   : > { %v16314_v44 = vld [vmem:[#allocation12 + $0x84] ss:$16 sps:$4 sm:$0xff]  }
 0x5df   : > { %v4442_v47 = vmul.f32 1.442695, %v4438_v46  ;;  %v16309_v46 = vld [vmem:[#allocation12 + $0x260] ss:$16 sps:$4 sm:$0xff]  }
 0x5e0   : > { %v4431_v51 = vpop.xlane.xlu0 %4430 }
 0x5e1   : > { %17472 = vpow2.f32 %v4442_v47  ;;  %v4439_v52 = vsub.f32 %v4422_v21, %v4431_v51  ;;  %v16312_v47 = vld [vmem:[#allocation12 + $0x80] ss:$16 sps:$4 sm:$0xff]   ;;  %v16317_v51 = vld [vmem:[#allocation12 + $0x284] ss:$16 sps:$4 sm:$0xff]  }
 0x5e3   : > { %v4444_v53 = vmul.f32 1.442695, %v4439_v52  ;;  %v16320_v52 = vld [vmem:[#allocation12 + $0xa4] ss:$16 sps:$4 sm:$0xff]  }
 0x5e4   : > { %v4434_v54 = vpop.xlane.xlu1 %4433 }
 0x5e5   : > { %17474 = vpow2.f32 %v4444_v53  ;;  %v4440_v12 = vsub.f32 %v4423_v33, %v4434_v54  ;;  %v16308_v33 = vld [vmem:[#allocation12 + $0x64] ss:$16 sps:$4 sm:$0xff]   ;;  %v16315_v53 = vld [vmem:[#allocation12 + $0x280] ss:$16 sps:$4 sm:$0xff]  }
 0x5e6   : > { %v16318_v54 = vld [vmem:[#allocation12 + $0xa0] ss:$16 sps:$4 sm:$0xff]  }
 0x5e7   : > { %v4446_v13 = vmul.f32 1.442695, %v4440_v12  ;;  %v16323_v12 = vld [vmem:[#allocation12 + $0x2a4] ss:$16 sps:$4 sm:$0xff]  }
 0x5e8   : > { %v4437_v55 = vpop.xlane.xlu1 %4436 }
 0x5e9   : > { %17476 = vpow2.f32 %v4446_v13  ;;  %v4441_v56 = vsub.f32 %v4424_v41, %v4437_v55  ;;  %v16306_v41 = vld [vmem:[#allocation12 + $0x60] ss:$16 sps:$4 sm:$0xff]   ;;  %v16326_v13 = vld [vmem:[#allocation12 + $0xc4] ss:$16 sps:$4 sm:$0xff]  }
 0x5ea   : > { %v16321_v55 = vld [vmem:[#allocation12 + $0x2a0] ss:$16 sps:$4 sm:$0xff]  }
 0x5eb   : > { %v17473_v57 = vpop.eup %17472  ;;  %v4448_v58 = vmul.f32 1.442695, %v4441_v56  ;;  %v16324_v56 = vld [vmem:[#allocation12 + $0xc0] ss:$16 sps:$4 sm:$0xff]  }
 0x5ec   : > { %v4450_v14 = vsel %vm4425_vm3, %v17473_v57, 0.0 }
 0x5ed   : > { %17478 = vpow2.f32 %v4448_v58  ;;  %4451 = vadd.xlane.f32.xlu0 %v4450_v14  ;;  %v16332_v58 = vld [vmem:[#allocation12 + $0xe4] ss:$16 sps:$4 sm:$0xff]   ;;  %v16327_v14 = vld [vmem:[#allocation12 + $0x2c0] ss:$16 sps:$4 sm:$0xff]  }
 0x5ef   : > { %v17475_v59 = vpop.eup %17474 }
 0x5f0   : > { %v4453_v60 = vsel %vm4425_vm3, %v17475_v59, 0.0 }
 0x5f1   : > { %4454 = vadd.xlane.f32.xlu1 %v4453_v60  ;;  %v16335_v60 = vld [vmem:[#allocation12 + $0x2e4] ss:$16 sps:$4 sm:$0xff]  }
 0x5f3   : > { %v17477_v15 = vpop.eup %17476 }
 0x5f4   : > { %v4456_v63 = vsel %vm4425_vm3, %v17477_v15, 0.0 }
 0x5f5   : > { %4457 = vadd.xlane.f32.xlu0 %v4456_v63  ;;  %v16338_v63 = vld [vmem:[#allocation12 + $0x104] ss:$16 sps:$4 sm:$0xff]  }
 0x5f7   : > { %v17479_v0 = vpop.eup %17478 }
 0x5f8   : > { %v4459_v1 = vsel %vm4425_vm3, %v17479_v0, 0.0 }
 0x5f9   : > { %4460 = vadd.xlane.f32.xlu1 %v4459_v1  ;;  %v16336_v1 = vld [vmem:[#allocation12 + $0x100] ss:$16 sps:$4 sm:$0xff]  }
 0x67a   : > { %v4452_v2 = vpop.xlane.xlu0 %4451 }
 0x67b   : > { %17480 = vrcp.f32 %v4452_v2  ;;  %v16339_v2 = vld [vmem:[#allocation12 + $0x300] ss:$16 sps:$4 sm:$0xff]  }
 0x67e   : > { %v4455_v4 = vpop.xlane.xlu1 %4454 }
 0x67f   : > { %17482 = vrcp.f32 %v4455_v4  ;;  %v16344_v4 = vld [vmem:[#allocation12 + $0x124] ss:$16 sps:$4 sm:$0xff]  }
 0x682   : > { %v4458_v6 = vpop.xlane.xlu0 %4457 }
 0x683   : > { %17484 = vrcp.f32 %v4458_v6  ;;  %v16347_v6 = vld [vmem:[#allocation12 + $0x324] ss:$16 sps:$4 sm:$0xff]  }
 0x685   : > { %v17481_v7 = vpop.eup %17480 }
 0x686   : > { %v4466_v8 = vmul.f32 %v17481_v7, %v17473_v57  ;;  %v4461_v9 = vpop.xlane.xlu1 %4460  ;;  %v16329_v57 = vld [vmem:[#allocation12 + $0x2c4] ss:$16 sps:$4 sm:$0xff]   ;;  %v16342_v7 = vld [vmem:[#allocation12 + $0x120] ss:$16 sps:$4 sm:$0xff]  }
 0x687   : > { %17486 = vrcp.f32 %v4461_v9  ;;  %v16350_v9 = vld [vmem:[#allocation12 + $0x144] ss:$16 sps:$4 sm:$0xff]  }
 0x688   : > { %v4470_v10 = vpack.c.bf16 %v4466_v8, %v4466_v8  ;;  %v16345_v8 = vld [vmem:[#allocation12 + $0x320] ss:$16 sps:$4 sm:$0xff]  }
 0x689   : > { %v17483_v17 = vpop.eup %17482 }
 0x68a   : > { %v4467_v18 = vmul.f32 %v17483_v17, %v17475_v59  ;;  %15380 = vmatmul.mubr.msk.bf16.vlgmr.msra.gmra.mrb[20].mxu0 %vm4425_vm3, %v4470_v10  ;;  %v16330_v59 = vld [vmem:[#allocation12 + $0xe0] ss:$16 sps:$4 sm:$0xff]   ;;  %v16353_v10 = vld [vmem:[#allocation12 + $0x344] ss:$16 sps:$4 sm:$0xff]  }
 0x68b   : > { %15390 = vmatpush3.bf16.msra.mxu0 %v19143_v61  ;;  %15391 = vmatprep.mubr.msk.bf16.mxu0 %vm18265_vm0, %v18264_v36  ;;  %v16351_v17 = vld [vmem:[#allocation12 + $0x340] ss:$16 sps:$4 sm:$0xff]  }
 0x68c   : > { %v4471_v19 = vpack.c.bf16 %v4467_v18, %v4467_v18  ;;  %5593 = vmatprep.subr.bf16.mxu0 %v16290_v16  ;;  %v16348_v16 = vld [vmem:[#allocation12 + $0x140] ss:$16 sps:$4 sm:$0xff]   ;;  %v16356_v18 = vld [vmem:[#allocation12 + $0x164] ss:$16 sps:$4 sm:$0xff]  }
 0x68d   : > { %v17485_v21 = vpop.eup %17484 }
 0x68e   : > { %v4468_v22 = vmul.f32 %v17485_v21, %v17477_v15  ;;  %15386 = vmatmul.mubr.msk.bf16.vlgmr.msra.gmra.mrb[20].mxu1 %vm4425_vm3, %v4471_v19  ;;  %v16333_v15 = vld [vmem:[#allocation12 + $0x2e0] ss:$16 sps:$4 sm:$0xff]   ;;  %v16359_v19 = vld [vmem:[#allocation12 + $0x364] ss:$16 sps:$4 sm:$0xff]  }
 0x68f   : > { %15396 = vmatpush3.bf16.msra.mxu1 %v19145_v62  ;;  %15397 = vmatprep.mubr.msk.bf16.mxu1 %vm18265_vm0, %v18264_v36  ;;  %v16297_v62 = vld [vmem:[#allocation12 + $0x220] ss:$16 sps:$4 sm:$0xff]  }
 0x690   : > { %v4472_v24 = vpack.c.bf16 %v4468_v22, %v4468_v22  ;;  %5634 = vmatprep.subr.bf16.mxu1 %v16293_v20  ;;  %v16354_v20 = vld [vmem:[#allocation12 + $0x160] ss:$16 sps:$4 sm:$0xff]   ;;  %v16362_v22 = vld [vmem:[#allocation12 + $0x184] ss:$16 sps:$4 sm:$0xff]  }
 0x691   : > { %v17487_v61 = vpop.eup %17486  ;;  %v16357_v21 = vld [vmem:[#allocation12 + $0x360] ss:$16 sps:$4 sm:$0xff]  }
 0x692   : > { %v4469_v26 = vmul.f32 %v17487_v61, %v17479_v0  ;;  %15392 = vmatmul.mubr.msk.bf16.vlgmr.msra.gmra.mrb[24].mxu0 %vm4425_vm3, %v4472_v24  ;;  %v16341_v0 = vld [vmem:[#allocation12 + $0x304] ss:$16 sps:$4 sm:$0xff]   ;;  %v16360_v24 = vld [vmem:[#allocation12 + $0x180] ss:$16 sps:$4 sm:$0xff]  }
 0x693   : > { %5594 = vmatpush1.bf16.msra.mxu0 %v16288_v23  ;;  %v16365_v23 = vld [vmem:[#allocation12 + $0x384] ss:$16 sps:$4 sm:$0xff]  }
 0x694   : > { %v4473_v30 = vpack.c.bf16 %v4469_v26, %v4469_v26  ;;  %5595 = vmatprep.subr.bf16.mxu0 %v16296_v25  ;;  %v16363_v25 = vld [vmem:[#allocation12 + $0x380] ss:$16 sps:$4 sm:$0xff]   ;;  %v16368_v61 = vld [vmem:[#allocation12 + $0x1a4] ss:$16 sps:$4 sm:$0xff]  }
 0x695   : > { %v16371_v26 = vld [vmem:[#allocation12 + $0x3a4] ss:$16 sps:$4 sm:$0xff]  }
 0x696   : > { %15398 = vmatmul.mubr.msk.bf16.vlgmr.msra.gmra.mrb[24].mxu1 %vm4425_vm3, %v4473_v30  ;;  %v16374_v30 = vld [vmem:[#allocation12 + $0x1c4] ss:$16 sps:$4 sm:$0xff]  }
 0x697   : > { %5635 = vmatpush1.bf16.msra.mxu1 %v16291_v28  ;;  %5596 = vmatpush1.bf16.msra.mxu0 %v16294_v29  ;;  %v16366_v28 = vld [vmem:[#allocation12 + $0x1a0] ss:$16 sps:$4 sm:$0xff]  }
 0x698   : > { %5636 = vmatprep.subr.bf16.mxu1 %v16299_v31  ;;  %5597 = vmatprep.subr.bf16.mxu0 %v16302_v32  ;;  %v16369_v29 = vld [vmem:[#allocation12 + $0x3a0] ss:$16 sps:$4 sm:$0xff]   ;;  %v16377_v31 = vld [vmem:[#allocation12 + $0x3c4] ss:$16 sps:$4 sm:$0xff]  }
 0x699   : > { %v16372_v32 = vld [vmem:[#allocation12 + $0x1c0] ss:$16 sps:$4 sm:$0xff]  }
 0x69b   : > { %5637 = vmatpush1.bf16.msra.mxu1 %v16297_v62  ;;  %5598 = vmatpush1.bf16.msra.mxu0 %v16300_v35  ;;  %v16375_v62 = vld [vmem:[#allocation12 + $0x3c0] ss:$16 sps:$4 sm:$0xff]   ;;  %v16380_v35 = vld [vmem:[#allocation12 + $0x1e4] ss:$16 sps:$4 sm:$0xff]  }
 0x69c   : > { %5638 = vmatprep.subr.bf16.mxu1 %v16305_v48  ;;  %5599 = vmatprep.subr.bf16.mxu0 %v16308_v33  ;;  %v16383_v48 = vld [vmem:[#allocation12 + $0x3e4] ss:$16 sps:$4 sm:$0xff]   ;;  %v16378_v33 = vld [vmem:[#allocation12 + $0x1e0] ss:$16 sps:$4 sm:$0xff]  }
 0x69f   : > { %5639 = vmatpush1.bf16.msra.mxu1 %v16303_v11  ;;  %5600 = vmatpush1.bf16.msra.mxu0 %v16306_v41  ;;  %v16381_v11 = vld [vmem:[#allocation12 + $0x3e0] ss:$16 sps:$4 sm:$0xff]   ;;  %v16386_v41 = vld [vmem:[#allocation12 + $0xc] ss:$16 sps:$4 sm:$0xff]  }
 0x6a0   : > { %5640 = vmatprep.subr.bf16.mxu1 %v16311_v43  ;;  %5601 = vmatprep.subr.bf16.mxu0 %v16314_v44  ;;  %v16389_v43 = vld [vmem:[#allocation12 + $0x20c] ss:$16 sps:$4 sm:$0xff]  }
 0x6a3   : > { %5641 = vmatpush1.bf16.msra.mxu1 %v16309_v46  ;;  %5602 = vmatpush1.bf16.msra.mxu0 %v16312_v47 }
 0x6a4   : > { %5642 = vmatprep.subr.bf16.mxu1 %v16317_v51  ;;  %5603 = vmatprep.subr.bf16.mxu0 %v16320_v52 }
 0x6a7   : > { %5643 = vmatpush1.bf16.msra.mxu1 %v16315_v53  ;;  %5604 = vmatpush1.bf16.msra.mxu0 %v16318_v54 }
 0x6a8   : > { %5644 = vmatprep.subr.bf16.mxu1 %v16323_v12  ;;  %5605 = vmatprep.subr.bf16.mxu0 %v16326_v13 }
 0x6ab   : > { %5645 = vmatpush1.bf16.msra.mxu1 %v16321_v55  ;;  %5606 = vmatpush1.bf16.msra.mxu0 %v16324_v56 }
 0x6ac   : > { %5646 = vmatprep.subr.bf16.mxu1 %v16329_v57  ;;  %5607 = vmatprep.subr.bf16.mxu0 %v16332_v58 }
 0x6af   : > { %5647 = vmatpush1.bf16.msra.mxu1 %v16327_v14  ;;  %5608 = vmatpush1.bf16.msra.mxu0 %v16330_v59 }
 0x6b0   : > { %5648 = vmatprep.subr.bf16.mxu1 %v16335_v60  ;;  %5609 = vmatprep.subr.bf16.mxu0 %v16338_v63 }
 0x6b3   : > { %5649 = vmatpush1.bf16.msra.mxu1 %v16333_v15  ;;  %5610 = vmatpush1.bf16.msra.mxu0 %v16336_v1 }
 0x6b4   : > { %5650 = vmatprep.subr.bf16.mxu1 %v16341_v0  ;;  %5611 = vmatprep.subr.bf16.mxu0 %v16344_v4 }
 0x6b7   : > { %5651 = vmatpush1.bf16.msra.mxu1 %v16339_v2  ;;  %5612 = vmatpush1.bf16.msra.mxu0 %v16342_v7 }
 0x6b8   : > { %5652 = vmatprep.subr.bf16.mxu1 %v16347_v6  ;;  %5613 = vmatprep.subr.bf16.mxu0 %v16350_v9 }
 0x6bb   : > { %5653 = vmatpush1.bf16.msra.mxu1 %v16345_v8  ;;  %5614 = vmatpush1.bf16.msra.mxu0 %v16348_v16 }
 0x6bc   : > { %5654 = vmatprep.subr.bf16.mxu1 %v16353_v10  ;;  %5615 = vmatprep.subr.bf16.mxu0 %v16356_v18 }
 0x6bf   : > { %5655 = vmatpush1.bf16.msra.mxu1 %v16351_v17  ;;  %5616 = vmatpush1.bf16.msra.mxu0 %v16354_v20 }
 0x6c0   : > { %5656 = vmatprep.subr.bf16.mxu1 %v16359_v19  ;;  %5617 = vmatprep.subr.bf16.mxu0 %v16362_v22 }
 0x6c3   : > { %5657 = vmatpush1.bf16.msra.mxu1 %v16357_v21  ;;  %5618 = vmatpush1.bf16.msra.mxu0 %v16360_v24 }
 0x6c4   : > { %5658 = vmatprep.subr.bf16.mxu1 %v16365_v23  ;;  %5619 = vmatprep.subr.bf16.mxu0 %v16368_v61 }
 0x6c7   : > { %5659 = vmatpush1.bf16.msra.mxu1 %v16363_v25  ;;  %5620 = vmatpush1.bf16.msra.mxu0 %v16366_v28 }
 0x6c8   : > { %5660 = vmatprep.subr.bf16.mxu1 %v16371_v26  ;;  %5621 = vmatprep.subr.bf16.mxu0 %v16374_v30 }
 0x6cb   : > { %5661 = vmatpush1.bf16.msra.mxu1 %v16369_v29  ;;  %5622 = vmatpush1.bf16.msra.mxu0 %v16372_v32 }
 0x6cc   : > { %5662 = vmatprep.subr.bf16.mxu1 %v16377_v31  ;;  %5623 = vmatprep.subr.bf16.mxu0 %v16380_v35 }
 0x6cf   : > { %5663 = vmatpush1.bf16.msra.mxu1 %v16375_v62  ;;  %5624 = vmatpush1.bf16.msra.mxu0 %v16378_v33 }
 0x6d0   : > { %5664 = vmatprep.subr.bf16.mxu1 %v16383_v48  ;;  %5675 = vmatprep.subr.bf16.mxu0 %v16386_v41 }
 0x6d3   : > { %5665 = vmatpush1.bf16.msra.mxu1 %v16381_v11 }
 0x6d4   : > { %5716 = vmatprep.subr.bf16.mxu1 %v16389_v43 }
 0x75d   : > { %v4519_v44 = vpop.f32.mrb[20].mxu0 }
 0x75e   : > { %v15381_v46 = vpop.f32.mrb[21].mxu0 }
 0x75f   : > { %v4522_v47 = vpop.f32.mrb[22].mxu0 }
 0x760   : > { %v15382_v51 = vpop.f32.mrb[23].mxu0 }
 0x761   : > { %v4565_v52 = vpop.f32.mrb[20].mxu1  ;;  %v16384_v51 = vld [vmem:[#allocation12 + $0x8] ss:$16 sps:$4 sm:$0xff]  }
 0x762   : > { %v15387_v53 = vpop.f32.mrb[21].mxu1 }
 0x763   : > { %v4568_v54 = vpop.f32.mrb[22].mxu1 }
 0x764   : > { %v15388_v12 = vpop.f32.mrb[23].mxu1  ;;  %v16392_v54 = vld [vmem:[#allocation12 + $0x2c] ss:$16 sps:$4 sm:$0xff]  }
 0x765   : > { %v4611_v13 = vpop.f32.mrb[24].mxu0  ;;  %v16395_v12 = vld [vmem:[#allocation12 + $0x22c] ss:$16 sps:$4 sm:$0xff]  }
 0x766   : > { %v4663_v55 = vcombine.low %v4519_v44, %v4611_v13  ;;  %v4664_v56 = vcombine.high %v4519_v44, %v4611_v13  ;;  %v15393_v57 = vpop.f32.mrb[25].mxu0  ;;  %v16393_v13 = vld [vmem:[#allocation12 + $0x228] ss:$16 sps:$4 sm:$0xff]  }
 0x767   : > { %v4614_v58 = vpop.f32.mrb[26].mxu0  ;;  %v16396_v57 = vld [vmem:[#allocation12 + $0x48] ss:$16 sps:$4 sm:$0xff]  }
 0x768   : > { %v15394_v14 = vpop.f32.mrb[27].mxu0  ;;  %v4671_v1 = vrot.slane %v4663_v55, %v19038_v3  ;;  %v4678_v2 = vrot.slane %v4664_v56, %v19038_v3  ;;  %v16398_v55 = vld [vmem:[#allocation12 + $0x4c] ss:$16 sps:$4 sm:$0xff]   ;;  %v16399_v58 = vld [vmem:[#allocation12 + $0x248] ss:$16 sps:$4 sm:$0xff]  }
 0x769   : > { %v4657_v59 = vpop.f32.mrb[24].mxu1  ;;  %v16401_v56 = vld [vmem:[#allocation12 + $0x24c] ss:$16 sps:$4 sm:$0xff]  }
 0x76a   : > { %v4679_v60 = vcombine.low %v4565_v52, %v4657_v59  ;;  %v4680_v15 = vcombine.high %v4565_v52, %v4657_v59  ;;  %v15399_v63 = vpop.f32.mrb[25].mxu1  ;;  %v16404_v14 = vld [vmem:[#allocation12 + $0x6c] ss:$16 sps:$4 sm:$0xff]  }
 0x76b   : > { %v4660_v0 = vpop.f32.mrb[26].mxu1  ;;  %v16407_v59 = vld [vmem:[#allocation12 + $0x26c] ss:$16 sps:$4 sm:$0xff]  }
 0x76c   : > { %v4687_v4 = vrot.slane %v4679_v60, %v19038_v3  ;;  %v4694_v6 = vrot.slane %v4680_v15, %v19038_v3  ;;  %v15400_v7 = vpop.f32.mrb[27].mxu1  ;;  %v16402_v60 = vld [vmem:[#allocation12 + $0x68] ss:$16 sps:$4 sm:$0xff]   ;;  %v16410_v63 = vld [vmem:[#allocation12 + $0x8c] ss:$16 sps:$4 sm:$0xff]  }
 0x76d   : > { %v16405_v15 = vld [vmem:[#allocation12 + $0x268] ss:$16 sps:$4 sm:$0xff]   ;;  %v16413_v0 = vld [vmem:[#allocation12 + $0x28c] ss:$16 sps:$4 sm:$0xff]  }
 0x76e   : > { %v4695_v8 = vcombine.low %v4671_v1, %v4687_v4  ;;  %v4696_v9 = vcombine.high %v4671_v1, %v4687_v4  ;;  %v4711_v10 = vcombine.low %v4678_v2, %v4694_v6  ;;  %v4712_v16 = vcombine.high %v4678_v2, %v4694_v6  ;;  %v16408_v1 = vld [vmem:[#allocation12 + $0x88] ss:$16 sps:$4 sm:$0xff]   ;;  %v16416_v4 = vld [vmem:[#allocation12 + $0xac] ss:$16 sps:$4 sm:$0xff]  }
 0x76f   : > { %v16411_v2 = vld [vmem:[#allocation12 + $0x288] ss:$16 sps:$4 sm:$0xff]   ;;  %v16419_v6 = vld [vmem:[#allocation12 + $0x2ac] ss:$16 sps:$4 sm:$0xff]  }
 0x770   : > { %v4703_v17 = vrot.slane %v4695_v8, %v19043_v27  ;;  %v4710_v18 = vrot.slane %v4696_v9, %v19043_v27  ;;  %v4719_v19 = vrot.slane %v4711_v10, %v19043_v27  ;;  %v4726_v20 = vrot.slane %v4712_v16, %v19043_v27  ;;  %v16414_v7 = vld [vmem:[#allocation12 + $0xa8] ss:$16 sps:$4 sm:$0xff]   ;;  %v16422_v9 = vld [vmem:[#allocation12 + $0xcc] ss:$16 sps:$4 sm:$0xff]  }
 0x771   : > { %v16417_v8 = vld [vmem:[#allocation12 + $0x2a8] ss:$16 sps:$4 sm:$0xff]   ;;  %v16425_v10 = vld [vmem:[#allocation12 + $0x2cc] ss:$16 sps:$4 sm:$0xff]  }
 0x772   : > { %v4731_v21 = vcombine.low %v4703_v17, %v4710_v18  ;;  %v14215_v22 = vcombine.high %v4703_v17, %v4710_v18  ;;  %v4747_v23 = vcombine.low %v4719_v19, %v4726_v20  ;;  %v14216_v24 = vcombine.high %v4719_v19, %v4726_v20  ;;  %v16420_v16 = vld [vmem:[#allocation12 + $0xc8] ss:$16 sps:$4 sm:$0xff]   ;;  %v16428_v18 = vld [vmem:[#allocation12 + $0xec] ss:$16 sps:$4 sm:$0xff]  }
 0x773   : > { %v16423_v17 = vld [vmem:[#allocation12 + $0x2c8] ss:$16 sps:$4 sm:$0xff]   ;;  %v16431_v19 = vld [vmem:[#allocation12 + $0x2ec] ss:$16 sps:$4 sm:$0xff]  }
 0x774   : > { %v4738_v25 = vrot.slane %v4731_v21, %v19038_v3  ;;  %v4746_v61 = vrot.slane %v14215_v22, %v19038_v3  ;;  %v4754_v26 = vrot.slane %v4747_v23, %v19038_v3  ;;  %v4762_v28 = vrot.slane %v14216_v24, %v19038_v3  ;;  %v16387_v3 = vld [vmem:[#allocation12 + $0x208] ss:$16 sps:$4 sm:$0xff]   ;;  %v16434_v22 = vld [vmem:[#allocation12 + $0x10c] ss:$16 sps:$4 sm:$0xff]  }
 0x775   : > { %v16426_v20 = vld [vmem:[#allocation12 + $0xe8] ss:$16 sps:$4 sm:$0xff]   ;;  %v16437_v23 = vld [vmem:[#allocation12 + $0x30c] ss:$16 sps:$4 sm:$0xff]  }
 0x776   : > { %v4763_v29 = vcombine.low %v4738_v25, %v4746_v61  ;;  %v4779_v30 = vcombine.low %v4754_v26, %v4762_v28  ;;  %v4764_v31 = vcombine.high %v4738_v25, %v4746_v61  ;;  %v4780_v32 = vcombine.high %v4754_v26, %v4762_v28  ;;  %v16429_v21 = vld [vmem:[#allocation12 + $0x2e8] ss:$16 sps:$4 sm:$0xff]   ;;  %v16440_v61 = vld [vmem:[#allocation12 + $0x12c] ss:$16 sps:$4 sm:$0xff]  }
 0x777   : > { %v16432_v24 = vld [vmem:[#allocation12 + $0x108] ss:$16 sps:$4 sm:$0xff]   ;;  %v16443_v26 = vld [vmem:[#allocation12 + $0x32c] ss:$16 sps:$4 sm:$0xff]  }
 0x778   : > { %v4771_v62 = vrot.slane %v4763_v29, %v19043_v27  ;;  %v4787_v35 = vrot.slane %v4779_v30, %v19043_v27  ;;  %v4778_v48 = vrot.slane %v4764_v31, %v19043_v27  ;;  %v4794_v33 = vrot.slane %v4780_v32, %v19043_v27  ;;  %v16390_v27 = vld [vmem:[#allocation12 + $0x28] ss:$16 sps:$4 sm:$0xff]   ;;  %v16446_v30 = vld [vmem:[#allocation12 + $0x14c] ss:$16 sps:$4 sm:$0xff]  }
 0x779   : > { %v16435_v25 = vld [vmem:[#allocation12 + $0x308] ss:$16 sps:$4 sm:$0xff]   ;;  %v16449_v31 = vld [vmem:[#allocation12 + $0x34c] ss:$16 sps:$4 sm:$0xff]  }
 0x77a   : > { %v4796_v11 = vcombine.high %v4771_v62, %v4787_v35  ;;  %v4798_v41 = vcombine.high %v4778_v48, %v4794_v33  ;;  %v4795_v43 = vcombine.low %v4771_v62, %v4787_v35  ;;  %v4797_v44 = vcombine.low %v4778_v48, %v4794_v33  ;;  %v16438_v28 = vld [vmem:[#allocation12 + $0x128] ss:$16 sps:$4 sm:$0xff]   ;;  %v16452_v35 = vld [vmem:[#allocation12 + $0x16c] ss:$16 sps:$4 sm:$0xff]  }
 0x77b   : > { %v16441_v29 = vld [vmem:[#allocation12 + $0x328] ss:$16 sps:$4 sm:$0xff]   ;;  %v16455_v48 = vld [vmem:[#allocation12 + $0x36c] ss:$16 sps:$4 sm:$0xff]  }
 0x77c   : > { %v4800_v46 = vpack.c.bf16 %v4796_v11, %v4796_v11  ;;  %v4802_v47 = vpack.c.bf16 %v4798_v41, %v4798_v41  ;;  %v19186_v52 = vpack.c.bf16 %v4795_v43, %v4795_v43  ;;  %v19188_v53 = vpack.c.bf16 %v4797_v44, %v4797_v44  ;;  %v16444_v32 = vld [vmem:[#allocation12 + $0x148] ss:$16 sps:$4 sm:$0xff]   ;;  %v16458_v41 = vld [vmem:[#allocation12 + $0x18c] ss:$16 sps:$4 sm:$0xff]  }
 0x77d   : > { %v16447_v62 = vld [vmem:[#allocation12 + $0x348] ss:$16 sps:$4 sm:$0xff]   ;;  %v16461_v43 = vld [vmem:[#allocation12 + $0x38c] ss:$16 sps:$4 sm:$0xff]  }
 0x77e   : > { %5625 = vmatprep.mubr.bf16.mxu0 %v4800_v46  ;;  %5666 = vmatprep.mubr.bf16.mxu1 %v4802_v47  ;;  %v16450_v33 = vld [vmem:[#allocation12 + $0x168] ss:$16 sps:$4 sm:$0xff]  }
 0x77f   : > { %5626 = vmatmul.mubr.bf16.vlgmr.msra.gmra.mrb[28].mxu0 %v19186_v52  ;;  %5667 = vmatmul.mubr.bf16.vlgmr.msra.gmra.mrb[28].mxu1 %v19188_v53  ;;  %v16453_v11 = vld [vmem:[#allocation12 + $0x368] ss:$16 sps:$4 sm:$0xff]  }
 0x780   : > { %5676 = vmatpush1.bf16.msra.mxu0 %v16384_v51  ;;  %5717 = vmatpush1.bf16.msra.mxu1 %v16387_v3  ;;  %v16456_v44 = vld [vmem:[#allocation12 + $0x188] ss:$16 sps:$4 sm:$0xff]   ;;  %v16467_v51 = vld [vmem:[#allocation12 + $0x3ac] ss:$16 sps:$4 sm:$0xff]  }
 0x781   : > { %5707 = vmatprep.mubr.bf16.mxu0 %v4800_v46  ;;  %5748 = vmatprep.mubr.bf16.mxu1 %v4802_v47  ;;  %v16459_v46 = vld [vmem:[#allocation12 + $0x388] ss:$16 sps:$4 sm:$0xff]   ;;  %v16464_v47 = vld [vmem:[#allocation12 + $0x1ac] ss:$16 sps:$4 sm:$0xff]  }
 0x782   : > { %5677 = vmatprep.subr.bf16.mxu0 %v16392_v54  ;;  %5718 = vmatprep.subr.bf16.mxu1 %v16395_v12  ;;  %v16462_v3 = vld [vmem:[#allocation12 + $0x1a8] ss:$16 sps:$4 sm:$0xff]   ;;  %v16470_v12 = vld [vmem:[#allocation12 + $0x1cc] ss:$16 sps:$4 sm:$0xff]  }
 0x783   : > { %v16465_v54 = vld [vmem:[#allocation12 + $0x3a8] ss:$16 sps:$4 sm:$0xff]  }
 0x784   : > { %5678 = vmatpush1.bf16.msra.mxu0 %v16390_v27  ;;  %5719 = vmatpush1.bf16.msra.mxu1 %v16393_v13  ;;  %v16473_v27 = vld [vmem:[#allocation12 + $0x3cc] ss:$16 sps:$4 sm:$0xff]   ;;  %v16468_v13 = vld [vmem:[#allocation12 + $0x1c8] ss:$16 sps:$4 sm:$0xff]  }
 0x785   : > { %5679 = vmatprep.subr.bf16.mxu0 %v16398_v55  ;;  %5720 = vmatprep.subr.bf16.mxu1 %v16401_v56  ;;  %v16471_v55 = vld [vmem:[#allocation12 + $0x3c8] ss:$16 sps:$4 sm:$0xff]   ;;  %v16476_v56 = vld [vmem:[#allocation12 + $0x1ec] ss:$16 sps:$4 sm:$0xff]  }
 0x788   : > { %5680 = vmatpush1.bf16.msra.mxu0 %v16396_v57  ;;  %5721 = vmatpush1.bf16.msra.mxu1 %v16399_v58  ;;  %v16479_v57 = vld [vmem:[#allocation12 + $0x3ec] ss:$16 sps:$4 sm:$0xff]   ;;  %v16474_v58 = vld [vmem:[#allocation12 + $0x1e8] ss:$16 sps:$4 sm:$0xff]  }
 0x789   : > { %5681 = vmatprep.subr.bf16.mxu0 %v16404_v14  ;;  %5722 = vmatprep.subr.bf16.mxu1 %v16407_v59  ;;  %v16477_v14 = vld [vmem:[#allocation12 + $0x3e8] ss:$16 sps:$4 sm:$0xff]   ;;  %v4931_v59 = vld [vmem:[#allocation13] sm:$0xf] }
 0x78c   : > { %5682 = vmatpush1.bf16.msra.mxu0 %v16402_v60  ;;  %5723 = vmatpush1.bf16.msra.mxu1 %v16405_v15  ;;  %v4936_v60 = vrot.slane %v4931_v59, %v19022_v42  ;;  %v4940_v15 = vrot.slane %v4931_v59, %v19028_v49 }
 0x78d   : > { %5683 = vmatprep.subr.bf16.mxu0 %v16410_v63  ;;  %5724 = vmatprep.subr.bf16.mxu1 %v16413_v0 }
 0x790   : > { %5684 = vmatpush1.bf16.msra.mxu0 %v16408_v1  ;;  %5725 = vmatpush1.bf16.msra.mxu1 %v16411_v2 }
 0x791   : > { %5685 = vmatprep.subr.bf16.mxu0 %v16416_v4  ;;  %5726 = vmatprep.subr.bf16.mxu1 %v16419_v6 }
 0x794   : > { %5686 = vmatpush1.bf16.msra.mxu0 %v16414_v7  ;;  %5727 = vmatpush1.bf16.msra.mxu1 %v16417_v8 }
 0x795   : > { %5687 = vmatprep.subr.bf16.mxu0 %v16422_v9  ;;  %5728 = vmatprep.subr.bf16.mxu1 %v16425_v10 }
 0x798   : > { %5688 = vmatpush1.bf16.msra.mxu0 %v16420_v16  ;;  %5729 = vmatpush1.bf16.msra.mxu1 %v16423_v17  ;;  %v4948_v17 = vrot.slane %v4931_v59, %v19031_v50 }
 0x799   : > { %5689 = vmatprep.subr.bf16.mxu0 %v16428_v18  ;;  %5730 = vmatprep.subr.bf16.mxu1 %v16431_v19 }
 0x79c   : > { %5690 = vmatpush1.bf16.msra.mxu0 %v16426_v20  ;;  %5731 = vmatpush1.bf16.msra.mxu1 %v16429_v21  ;;  %v17509_v20 = vld [vmem:[%s18932_s4] sm:$0xff] }
 0x79d   : > { %5691 = vmatprep.subr.bf16.mxu0 %v16434_v22  ;;  %5732 = vmatprep.subr.bf16.mxu1 %v16437_v23  ;;  %v17510_v22 = vld [vmem:[%s18932_s4 + $0x8] sm:$0xff] }
 0x7a0   : > { %5692 = vmatpush1.bf16.msra.mxu0 %v16432_v24  ;;  %5733 = vmatpush1.bf16.msra.mxu1 %v16435_v25 }
 0x7a1   : > { %5693 = vmatprep.subr.bf16.mxu0 %v16440_v61  ;;  %5734 = vmatprep.subr.bf16.mxu1 %v16443_v26 }
 0x7a4   : > { %5694 = vmatpush1.bf16.msra.mxu0 %v16438_v28  ;;  %5735 = vmatpush1.bf16.msra.mxu1 %v16441_v29 }
 0x7a5   : > { %5695 = vmatprep.subr.bf16.mxu0 %v16446_v30  ;;  %5736 = vmatprep.subr.bf16.mxu1 %v16449_v31 }
 0x7a8   : > { %5696 = vmatpush1.bf16.msra.mxu0 %v16444_v32  ;;  %5737 = vmatpush1.bf16.msra.mxu1 %v16447_v62 }
 0x7a9   : > { %5697 = vmatprep.subr.bf16.mxu0 %v16452_v35  ;;  %5738 = vmatprep.subr.bf16.mxu1 %v16455_v48  ;;  %v17511_v48 = vld [vmem:[%s18932_s4 + $0x10] sm:$0xff] }
 0x7ac   : > { %5698 = vmatpush1.bf16.msra.mxu0 %v16450_v33  ;;  %5739 = vmatpush1.bf16.msra.mxu1 %v16453_v11  ;;  %v17512_v11 = vld [vmem:[%s18932_s4 + $0x18] sm:$0xff] }
 0x7ad   : > { %5699 = vmatprep.subr.bf16.mxu0 %v16458_v41  ;;  %5740 = vmatprep.subr.bf16.mxu1 %v16461_v43 }
 0x7b0   : > { %5700 = vmatpush1.bf16.msra.mxu0 %v16456_v44  ;;  %5741 = vmatpush1.bf16.msra.mxu1 %v16459_v46  ;;  %v5844_v46 = vld [vmem:[#allocation18] sm:$0xff] }
 0x7b1   : > { %5701 = vmatprep.subr.bf16.mxu0 %v16464_v47  ;;  %5742 = vmatprep.subr.bf16.mxu1 %v16467_v51  ;;  %v5848_v47 = vld [vmem:[#allocation18 + $0x20] sm:$0xff]  ;;  %v5845_v51 = vld [vmem:[#allocation18 + $0x8] sm:$0xff] }
 0x7b4   : > { %5702 = vmatpush1.bf16.msra.mxu0 %v16462_v3  ;;  %5743 = vmatpush1.bf16.msra.mxu1 %v16465_v54  ;;  %v14345_v3 = vcombine.low %v5844_v46, %v5848_v47  ;;  %v14346_v54 = vcombine.high %v5844_v46, %v5848_v47  ;;  %v5897_v46 = vld [vmem:[#allocation18 + $0x1a8] sm:$0xff] }
 0x7b5   : > { %5703 = vmatprep.subr.bf16.mxu0 %v16470_v12  ;;  %5744 = vmatprep.subr.bf16.mxu1 %v16473_v27  ;;  %v5849_v12 = vld [vmem:[#allocation18 + $0x28] sm:$0xff]  ;;  %v5852_v27 = vld [vmem:[#allocation18 + $0x40] sm:$0xff] }
 0x7b8   : > { %5704 = vmatpush1.bf16.msra.mxu0 %v16468_v13  ;;  %5745 = vmatpush1.bf16.msra.mxu1 %v16471_v55  ;;  %v5856_v13 = vld [vmem:[#allocation18 + $0x60] sm:$0xff]  ;;  %v14347_v55 = vcombine.low %v5845_v51, %v5849_v12 }
 0x7b9   : > { %5705 = vmatprep.subr.bf16.mxu0 %v16476_v56  ;;  %5746 = vmatprep.subr.bf16.mxu1 %v16479_v57  ;;  %v14348_v56 = vcombine.high %v5845_v51, %v5849_v12  ;;  %v14354_v57 = vcombine.high %v5852_v27, %v5856_v13  ;;  %v5900_v12 = vld [vmem:[#allocation18 + $0x1c0] sm:$0xff] }
 0x7bc   : > { %5706 = vmatpush1.bf16.msra.mxu0 %v16474_v58  ;;  %5747 = vmatpush1.bf16.msra.mxu1 %v16477_v14  ;;  %v5853_v58 = vld [vmem:[#allocation18 + $0x48] sm:$0xff] }
 0x7bd   : > { %v5857_v14 = vld [vmem:[#allocation18 + $0x68] sm:$0xff]  ;;  %7422 = vmatprep.subr.bf16.mxu0 %v14346_v54  ;;  %7504 = vmatprep.subr.bf16.mxu1 %v14348_v56 }
 0x7bf   : > { %5708 = vmatmul.mubr.bf16.vlgmr.msra.gmra.mrb[32].mxu0 %v19186_v52  ;;  %5749 = vmatmul.mubr.bf16.vlgmr.msra.gmra.mrb[32].mxu1 %v19188_v53  ;;  %v4944_v53 = vrot.slane %v4931_v59, %v19025_v45  ;;  %v5860_v59 = vld [vmem:[#allocation18 + $0x80] sm:$0xff] }
 0x7c0   : > { %7423 = vmatpush1.bf16.msra.mxu0 %v14345_v3  ;;  %7505 = vmatpush1.bf16.msra.mxu1 %v14347_v55  ;;  %v5905_v55 = vld [vmem:[#allocation18 + $0x1e8] sm:$0xff] }
 0x7c1   : > { %7424 = vmatprep.subr.bf16.mxu0 %v14354_v57 }
 0x852   : > { %v5627_v63 = vpop.f32.mrb[28].mxu0  ;;  %v5668_v0 = vpop.f32.mrb[28].mxu1 }
 0x853   : > { %v5628_v1 = vadd.f32 %v5627_v63, %v4936_v60  ;;  %v5629_v2 = vpop.f32.mrb[29].mxu0  ;;  %v5670_v4 = vpop.f32.mrb[29].mxu1  ;;  %v14356_v60 = vcombine.high %v5853_v58, %v5857_v14  ;;  %v5861_v63 = vld [vmem:[#allocation18 + $0x88] sm:$0xff] }
 0x854   : > { %v5630_v6 = vadd.f32 %v5629_v2, %v4940_v15  ;;  %v5631_v7 = vpop.f32.mrb[30].mxu0  ;;  %v5672_v8 = vpop.f32.mrb[30].mxu1  ;;  %v5864_v15 = vld [vmem:[#allocation18 + $0xa0] sm:$0xff]  ;;  %v14355_v2 = vcombine.low %v5853_v58, %v5857_v14 }
 0x855   : > { %v5669_v9 = vadd.f32 %v5668_v0, %v5628_v1  ;;  %v5632_v10 = vpop.f32.mrb[31].mxu0  ;;  %v5673_v52 = vpop.f32.mrb[31].mxu1  ;;  %v5865_v0 = vld [vmem:[#allocation18 + $0xa8] sm:$0xff]  ;;  %v14353_v1 = vcombine.low %v5852_v27, %v5856_v13  ;;  %7506 = vmatprep.subr.bf16.mxu1 %v14356_v60  ;;  %v5868_v7 = vld [vmem:[#allocation18 + $0xc0] sm:$0xff] }
 0x856   : > { %v5671_v16 = vadd.f32 %v5670_v4, %v5630_v6  ;;  %v14362_v4 = vcombine.high %v5860_v59, %v5864_v15  ;;  %v14364_v6 = vcombine.high %v5861_v63, %v5865_v0  ;;  %v5872_v8 = vld [vmem:[#allocation18 + $0xe0] sm:$0xff]  ;;  %v5873_v10 = vld [vmem:[#allocation18 + $0xe8] sm:$0xff]  ;;  %v14361_v52 = vcombine.low %v5860_v59, %v5864_v15  ;;  %7507 = vmatpush1.bf16.msra.mxu1 %v14355_v2 }
 0x857   : > { %v19199_v21 = vadd.f32 %v17509_v20, %v5669_v9  ;;  %v5869_v9 = vld [vmem:[#allocation18 + $0xc8] sm:$0xff]  ;;  %7425 = vmatpush1.bf16.msra.mxu0 %v14353_v1  ;;  %v5904_v27 = vld [vmem:[#allocation18 + $0x1e0] sm:$0xff] }
 0x858   : > { %v19202_v23 = vadd.f32 %v17510_v22, %v5671_v16  ;;  %7426 = vmatprep.subr.bf16.mxu0 %v14362_v4  ;;  %v14363_v16 = vcombine.low %v5861_v63, %v5865_v0  ;;  %7508 = vmatprep.subr.bf16.mxu1 %v14364_v6  ;;  %v5877_v20 = vld [vmem:[#allocation18 + $0x108] sm:$0xff]  ;;  %v14402_v58 = vcombine.high %v5900_v12, %v5904_v27  ;;  %v5908_v59 = vld [vmem:[#allocation18 + $0x200] sm:$0xff] }
 0x859   : > { %v5881_v22 = vld [vmem:[#allocation18 + $0x128] sm:$0xff]  ;;  %v5912_v60 = vld [vmem:[#allocation18 + $0x220] sm:$0xff]  ;;  %v14401_v0 = vcombine.low %v5900_v12, %v5904_v27 }
 0x85a   : > { %v5763_v35 = vadd.f32 %v19202_v23, %v19199_v21  ;;  %7509 = vmatpush1.bf16.msra.mxu1 %v14363_v16  ;;  %v5901_v13 = vld [vmem:[#allocation18 + $0x1c8] sm:$0xff]  ;;  %v14410_v2 = vcombine.high %v5908_v59, %v5912_v60  ;;  %v5916_v6 = vld [vmem:[#allocation18 + $0x240] sm:$0xff] }
 0x85b   : > { %7427 = vmatpush1.bf16.msra.mxu0 %v14361_v52  ;;  %v14404_v14 = vcombine.high %v5901_v13, %v5905_v55  ;;  %v5909_v15 = vld [vmem:[#allocation18 + $0x208] sm:$0xff]  ;;  %v14403_v1 = vcombine.low %v5901_v13, %v5905_v55  ;;  %v5940_v13 = vld [vmem:[#allocation18 + $0x300] sm:$0xff] }
 0x85c   : > { %v5913_v63 = vld [vmem:[#allocation18 + $0x228] sm:$0xff]  ;;  %v5944_v55 = vld [vmem:[#allocation18 + $0x320] sm:$0xff] }
 0x85d   : > { %v14412_v4 = vcombine.high %v5909_v15, %v5913_v63  ;;  %v14411_v52 = vcombine.low %v5909_v15, %v5913_v63 }
 0x892   : > { %v5709_v18 = vpop.f32.mrb[32].mxu0  ;;  %v5750_v19 = vpop.f32.mrb[32].mxu1 }
 0x893   : > { %v5710_v24 = vadd.f32 %v5709_v18, %v4944_v53  ;;  %v5711_v25 = vpop.f32.mrb[33].mxu0  ;;  %v5752_v61 = vpop.f32.mrb[33].mxu1  ;;  %v14370_v53 = vcombine.high %v5868_v7, %v5872_v8  ;;  %v5876_v18 = vld [vmem:[#allocation18 + $0x100] sm:$0xff] }
 0x894   : > { %v5712_v26 = vadd.f32 %v5711_v25, %v4948_v17  ;;  %v5713_v28 = vpop.f32.mrb[34].mxu0  ;;  %v5754_v29 = vpop.f32.mrb[34].mxu1  ;;  %v14372_v17 = vcombine.high %v5869_v9, %v5873_v10  ;;  %v14371_v25 = vcombine.low %v5869_v9, %v5873_v10  ;;  %v5921_v9 = vld [vmem:[#allocation18 + $0x268] sm:$0xff]  ;;  %v14409_v10 = vcombine.low %v5908_v59, %v5912_v60  ;;  %v5948_v59 = vld [vmem:[#allocation18 + $0x340] sm:$0xff] }
 0x895   : > { %v5751_v30 = vadd.f32 %v5750_v19, %v5710_v24  ;;  %v5714_v31 = vpop.f32.mrb[35].mxu0  ;;  %v5755_v32 = vpop.f32.mrb[35].mxu1  ;;  %v5880_v19 = vld [vmem:[#allocation18 + $0x120] sm:$0xff]  ;;  %v14369_v24 = vcombine.low %v5868_v7, %v5872_v8  ;;  %7428 = vmatprep.subr.bf16.mxu0 %v14370_v53  ;;  %v5917_v8 = vld [vmem:[#allocation18 + $0x248] sm:$0xff] }
 0x896   : > { %v5753_v62 = vadd.f32 %v5752_v61, %v5712_v26  ;;  %v14378_v61 = vcombine.high %v5876_v18, %v5880_v19  ;;  %7510 = vmatprep.subr.bf16.mxu1 %v14372_v17  ;;  %v14380_v26 = vcombine.high %v5877_v20, %v5881_v22  ;;  %v5884_v28 = vld [vmem:[#allocation18 + $0x140] sm:$0xff]  ;;  %v5889_v31 = vld [vmem:[#allocation18 + $0x168] sm:$0xff]  ;;  %v14377_v32 = vcombine.low %v5876_v18, %v5880_v19 }
 0x897   : > { %v19207_v33 = vadd.f32 %v17511_v48, %v5751_v30  ;;  %v5888_v29 = vld [vmem:[#allocation18 + $0x160] sm:$0xff]  ;;  %v5885_v30 = vld [vmem:[#allocation18 + $0x148] sm:$0xff]  ;;  %7429 = vmatpush1.bf16.msra.mxu0 %v14369_v24  ;;  %7511 = vmatpush1.bf16.msra.mxu1 %v14371_v25  ;;  %v14420_v53 = vcombine.high %v5917_v8, %v5921_v9  ;;  %v14419_v24 = vcombine.low %v5917_v8, %v5921_v9 }
 0x898   : > { %v19210_v41 = vadd.f32 %v17512_v11, %v5753_v62  ;;  %7430 = vmatprep.subr.bf16.mxu0 %v14378_v61  ;;  %v14379_v62 = vcombine.low %v5877_v20, %v5881_v22  ;;  %7512 = vmatprep.subr.bf16.mxu1 %v14380_v26  ;;  %v14388_v48 = vcombine.high %v5885_v30, %v5889_v31  ;;  %v5892_v11 = vld [vmem:[#allocation18 + $0x180] sm:$0xff]  ;;  %v5925_v19 = vld [vmem:[#allocation18 + $0x288] sm:$0xff] }
 0x899   : > { %v5764_v43 = vadd.f32 %v5763_v35, %v19207_v33  ;;  %v14386_v35 = vcombine.high %v5884_v28, %v5888_v29  ;;  %v14385_v47 = vcombine.low %v5884_v28, %v5888_v29  ;;  %v14387_v51 = vcombine.low %v5885_v30, %v5889_v31  ;;  %v5920_v7 = vld [vmem:[#allocation18 + $0x260] sm:$0xff]  ;;  %v5929_v20 = vld [vmem:[#allocation18 + $0x2a8] sm:$0xff] }
 0x89a   : > { %v14418_v16 = vcombine.high %v5916_v6, %v5920_v7  ;;  %v5924_v17 = vld [vmem:[#allocation18 + $0x280] sm:$0xff]  ;;  %v14417_v22 = vcombine.low %v5916_v6, %v5920_v7  ;;  %v14428_v61 = vcombine.high %v5925_v19, %v5929_v20  ;;  %v14427_v28 = vcombine.low %v5925_v19, %v5929_v20  ;;  %v5957_v8 = vld [vmem:[#allocation18 + $0x388] sm:$0xff] }
 0x89b   : > { %v5765_v44 = vadd.f32 %v5764_v43, %v19210_v41  ;;  %v5896_v43 = vld [vmem:[#allocation18 + $0x1a0] sm:$0xff]  ;;  %7431 = vmatpush1.bf16.msra.mxu0 %v14377_v32  ;;  %7513 = vmatpush1.bf16.msra.mxu1 %v14379_v62  ;;  %v5961_v9 = vld [vmem:[#allocation18 + $0x3a8] sm:$0xff] }
 0x89c   : > { %7432 = vmatprep.subr.bf16.mxu0 %v14386_v35  ;;  %v14394_v3 = vcombine.high %v5892_v11, %v5896_v43  ;;  %7514 = vmatprep.subr.bf16.mxu1 %v14388_v48  ;;  %v14393_v56 = vcombine.low %v5892_v11, %v5896_v43  ;;  %v5928_v18 = vld [vmem:[#allocation18 + $0x2a0] sm:$0xff]  ;;  %v5965_v19 = vld [vmem:[#allocation18 + $0x3c8] sm:$0xff] }
 0x89d   : > { %5766 = vadd.xlane.f32.xlu0 %v5765_v44  ;;  %v5893_v44 = vld [vmem:[#allocation18 + $0x188] sm:$0xff]  ;;  %v14426_v25 = vcombine.high %v5924_v17, %v5928_v18  ;;  %v14425_v26 = vcombine.low %v5924_v17, %v5928_v18  ;;  %v5952_v60 = vld [vmem:[#allocation18 + $0x360] sm:$0xff] }
 0x89e   : > { %v14396_v54 = vcombine.high %v5893_v44, %v5897_v46  ;;  %v14395_v57 = vcombine.low %v5893_v44, %v5897_v46  ;;  %v5960_v7 = vld [vmem:[#allocation18 + $0x3a0] sm:$0xff]  ;;  %v5969_v20 = vld [vmem:[#allocation18 + $0x3e8] sm:$0xff] }
 0x89f   : > { %7433 = vmatpush1.bf16.msra.mxu0 %v14385_v47  ;;  %7515 = vmatpush1.bf16.msra.mxu1 %v14387_v51  ;;  %v5936_v47 = vld [vmem:[#allocation18 + $0x2e0] sm:$0xff] }
 0x8a0   : > { %7434 = vmatprep.subr.bf16.mxu0 %v14394_v3  ;;  %7516 = vmatprep.subr.bf16.mxu1 %v14396_v54  ;;  %v5937_v3 = vld [vmem:[#allocation18 + $0x2e8] sm:$0xff]  ;;  %v5964_v17 = vld [vmem:[#allocation18 + $0x3c0] sm:$0xff] }
 0x8a1   : > { %v5968_v18 = vld [vmem:[#allocation18 + $0x3e0] sm:$0xff] }
 0x8a3   : > { %7435 = vmatpush1.bf16.msra.mxu0 %v14393_v56  ;;  %7517 = vmatpush1.bf16.msra.mxu1 %v14395_v57  ;;  %v5941_v56 = vld [vmem:[#allocation18 + $0x308] sm:$0xff]  ;;  %v14441_v57 = vcombine.low %v5940_v13, %v5944_v55 }
 0x8a4   : > { %7436 = vmatprep.subr.bf16.mxu0 %v14402_v58  ;;  %7518 = vmatprep.subr.bf16.mxu1 %v14404_v14  ;;  %v14442_v58 = vcombine.high %v5940_v13, %v5944_v55  ;;  %v5945_v14 = vld [vmem:[#allocation18 + $0x328] sm:$0xff] }
 0x8a5   : > { %v14443_v15 = vcombine.low %v5941_v56, %v5945_v14  ;;  %v14444_v63 = vcombine.high %v5941_v56, %v5945_v14 }
 0x8a7   : > { %7437 = vmatpush1.bf16.msra.mxu0 %v14401_v0  ;;  %7519 = vmatpush1.bf16.msra.mxu1 %v14403_v1  ;;  %v14450_v0 = vcombine.high %v5948_v59, %v5952_v60  ;;  %v5949_v1 = vld [vmem:[#allocation18 + $0x348] sm:$0xff] }
 0x8a8   : > { %7438 = vmatprep.subr.bf16.mxu0 %v14410_v2  ;;  %7520 = vmatprep.subr.bf16.mxu1 %v14412_v4  ;;  %v5953_v2 = vld [vmem:[#allocation18 + $0x368] sm:$0xff]  ;;  %v5956_v4 = vld [vmem:[#allocation18 + $0x380] sm:$0xff] }
 0x8a9   : > { %v14452_v6 = vcombine.high %v5949_v1, %v5953_v2 }
 0x8ab   : > { %7439 = vmatpush1.bf16.msra.mxu0 %v14409_v10  ;;  %7521 = vmatpush1.bf16.msra.mxu1 %v14411_v52  ;;  %v14449_v10 = vcombine.low %v5948_v59, %v5952_v60  ;;  %v14451_v52 = vcombine.low %v5949_v1, %v5953_v2 }
 0x8ac   : > { %7440 = vmatprep.subr.bf16.mxu0 %v14418_v16  ;;  %7522 = vmatprep.subr.bf16.mxu1 %v14420_v53  ;;  %v14458_v16 = vcombine.high %v5956_v4, %v5960_v7  ;;  %v14460_v53 = vcombine.high %v5957_v8, %v5961_v9 }
 0x8af   : > { %7441 = vmatpush1.bf16.msra.mxu0 %v14417_v22  ;;  %7523 = vmatpush1.bf16.msra.mxu1 %v14419_v24  ;;  %v14457_v22 = vcombine.low %v5956_v4, %v5960_v7  ;;  %v14459_v24 = vcombine.low %v5957_v8, %v5961_v9  ;;  %v5980_v7 = vld [vmem:[#allocation18 + $0x440] sm:$0xff]  ;;  %v5981_v9 = vld [vmem:[#allocation18 + $0x448] sm:$0xff] }
 0x8b0   : > { %7442 = vmatprep.subr.bf16.mxu0 %v14426_v25  ;;  %7524 = vmatprep.subr.bf16.mxu1 %v14428_v61  ;;  %v14466_v25 = vcombine.high %v5964_v17, %v5968_v18  ;;  %v14468_v61 = vcombine.high %v5965_v19, %v5969_v20 }
 0x8b3   : > { %7443 = vmatpush1.bf16.msra.mxu0 %v14425_v26  ;;  %7525 = vmatpush1.bf16.msra.mxu1 %v14427_v28  ;;  %v14465_v26 = vcombine.low %v5964_v17, %v5968_v18  ;;  %v14467_v28 = vcombine.low %v5965_v19, %v5969_v20  ;;  %v5992_v17 = vld [vmem:[#allocation18 + $0x4a0] sm:$0xff]  ;;  %v5989_v18 = vld [vmem:[#allocation18 + $0x488] sm:$0xff] }
 0x8b4   : > { %v5993_v19 = vld [vmem:[#allocation18 + $0x4a8] sm:$0xff] }
 0x92a   : > { %v5767_v29 = vpop.xlane.xlu0 %5766 }
 0x92b   : > { %v5769_v30 = vmul.f32 0.001953125, %v5767_v29  ;;  %v5972_v29 = vld [vmem:[#allocation18 + $0x400] sm:$0xff] }
 0x92d   : > { %v19215_v31 = vsub.f32 %v19199_v21, %v5769_v30  ;;  %v19218_v32 = vsub.f32 %v19202_v23, %v5769_v30  ;;  %v19221_v62 = vsub.f32 %v19207_v33, %v5769_v30  ;;  %v19224_v35 = vsub.f32 %v19210_v41, %v5769_v30  ;;  %v5932_v33 = vld [vmem:[#allocation18 + $0x2c0] sm:$0xff]  ;;  %v5933_v41 = vld [vmem:[#allocation18 + $0x2c8] sm:$0xff] }
 0x92e   : > { %v14434_v51 = vcombine.high %v5932_v33, %v5936_v47  ;;  %v14433_v54 = vcombine.low %v5932_v33, %v5936_v47  ;;  %v14435_v12 = vcombine.low %v5933_v41, %v5937_v3  ;;  %v14436_v27 = vcombine.high %v5933_v41, %v5937_v3  ;;  %v5976_v30 = vld [vmem:[#allocation18 + $0x420] sm:$0xff]  ;;  %v5761_v41 = vld [vmem:[#allocation15] sm:$0xf] }
 0x92f   : > { %v5774_v48 = vmul.f32 %v19215_v31, %v19215_v31  ;;  %v5775_v11 = vmul.f32 %v19218_v32, %v19218_v32  ;;  %v5776_v43 = vmul.f32 %v19221_v62, %v19221_v62  ;;  %v5777_v23 = vmul.f32 %v19224_v35, %v19224_v35 }
 0x930   : > { %7444 = vmatprep.subr.bf16.mxu0 %v14434_v51  ;;  %7526 = vmatprep.subr.bf16.mxu1 %v14436_v27  ;;  %v5762_v51 = vld [vmem:[#allocation16] sm:$0xf]  ;;  %v5798_v3 = vrot.slane %v5761_v41, %v19028_v49  ;;  %v5802_v27 = vrot.slane %v5761_v41, %v19025_v45 }
 0x931   : > { %v5778_v21 = vadd.f32 %v5775_v11, %v5774_v48  ;;  %7445 = vmatpush1.bf16.msra.mxu0 %v14433_v54  ;;  %7527 = vmatpush1.bf16.msra.mxu1 %v14435_v12  ;;  %v5973_v48 = vld [vmem:[#allocation18 + $0x408] sm:$0xff]  ;;  %v14474_v11 = vcombine.high %v5972_v29, %v5976_v30  ;;  %v5794_v54 = vrot.slane %v5761_v41, %v19022_v42 }
 0x932   : > { %7446 = vmatprep.subr.bf16.mxu0 %v14442_v58  ;;  %7528 = vmatprep.subr.bf16.mxu1 %v14444_v63  ;;  %v5806_v12 = vrot.slane %v5761_v41, %v19031_v50  ;;  %v5823_v55 = vrot.slane %v5762_v51, %v19028_v49  ;;  %v5819_v56 = vrot.slane %v5762_v51, %v19022_v42 }
 0x933   : > { %v5779_v44 = vadd.f32 %v5778_v21, %v5776_v43  ;;  %v5977_v43 = vld [vmem:[#allocation18 + $0x428] sm:$0xff]  ;;  %v14473_v21 = vcombine.low %v5972_v29, %v5976_v30 }
 0x934   : > { %v5997_v29 = vld [vmem:[#allocation18 + $0x4c8] sm:$0xff] }
 0x935   : > { %v5780_v46 = vadd.f32 %v5779_v44, %v5777_v23  ;;  %7447 = vmatpush1.bf16.msra.mxu0 %v14441_v57  ;;  %7529 = vmatpush1.bf16.msra.mxu1 %v14443_v15  ;;  %v14475_v23 = vcombine.low %v5973_v48, %v5977_v43  ;;  %v14476_v44 = vcombine.high %v5973_v48, %v5977_v43  ;;  %v6001_v30 = vld [vmem:[#allocation18 + $0x4e8] sm:$0xff] }
 0x936   : > { %7448 = vmatprep.subr.bf16.mxu0 %v14450_v0  ;;  %7530 = vmatprep.subr.bf16.mxu1 %v14452_v6  ;;  %v5827_v57 = vrot.slane %v5762_v51, %v19025_v45  ;;  %v5831_v15 = vrot.slane %v5762_v51, %v19031_v50  ;;  %v14499_v41 = vcombine.low %v5997_v29, %v6001_v30 }
 0x937   : > { %5781 = vadd.xlane.f32.xlu1 %v5780_v46 }
 0x939   : > { %7449 = vmatpush1.bf16.msra.mxu0 %v14449_v10  ;;  %7531 = vmatpush1.bf16.msra.mxu1 %v14451_v52  ;;  %v5988_v52 = vld [vmem:[#allocation18 + $0x480] sm:$0xff] }
 0x93a   : > { %7450 = vmatprep.subr.bf16.mxu0 %v14458_v16  ;;  %7532 = vmatprep.subr.bf16.mxu1 %v14460_v53  ;;  %v14489_v48 = vcombine.low %v5988_v52, %v5992_v17 }
 0x93d   : > { %7451 = vmatpush1.bf16.msra.mxu0 %v14457_v22  ;;  %7533 = vmatpush1.bf16.msra.mxu1 %v14459_v24 }
 0x93e   : > { %7452 = vmatprep.subr.bf16.mxu0 %v14466_v25  ;;  %7534 = vmatprep.subr.bf16.mxu1 %v14468_v61  ;;  %v14490_v25 = vcombine.high %v5988_v52, %v5992_v17  ;;  %v14492_v61 = vcombine.high %v5989_v18, %v5993_v19 }
 0x941   : > { %7453 = vmatpush1.bf16.msra.mxu0 %v14465_v26  ;;  %7535 = vmatpush1.bf16.msra.mxu1 %v14467_v28  ;;  %v5996_v26 = vld [vmem:[#allocation18 + $0x4c0] sm:$0xff] }
 0x942   : > { %7463 = vmatprep.subr.bf16.mxu0 %v14474_v11  ;;  %7545 = vmatprep.subr.bf16.mxu1 %v14476_v44  ;;  %v6000_v28 = vld [vmem:[#allocation18 + $0x4e0] sm:$0xff]  ;;  %v14491_v11 = vcombine.low %v5989_v18, %v5993_v19 }
 0x943   : > { %v14498_v43 = vcombine.high %v5996_v26, %v6000_v28  ;;  %v6008_v44 = vld [vmem:[#allocation18 + $0x520] sm:$0xff] }
 0x944   : > { %v6036_v18 = vld [vmem:[#allocation18 + $0x600] sm:$0xff] }
 0x945   : > { %v6040_v19 = vld [vmem:[#allocation18 + $0x620] sm:$0xff] }
 0x9c4   : > { %v5782_v46 = vpop.xlane.xlu1 %5781 }
 0x9c5   : > { %v5783_v33 = vmul.f32 0.001953125, %v5782_v46  ;;  %v6005_v46 = vld [vmem:[#allocation18 + $0x508] sm:$0xff] }
 0x9c7   : > { %v5784_v47 = vadd.f32 1e-12, %v5783_v33  ;;  %v6009_v33 = vld [vmem:[#allocation18 + $0x528] sm:$0xff] }
 0x9c9   : > { %17488 = vrsqrt.f32 %v5784_v47  ;;  %v14497_v47 = vcombine.low %v5996_v26, %v6000_v28  ;;  %v14538_v26 = vcombine.high %v6036_v18, %v6040_v19 }
 0x9d3   : > { %v17489_v13 = vpop.eup %17488 }
 0x9d4   : > { %v5787_v58 = vmul.f32 %v17489_v13, %v19218_v32  ;;  %v5786_v14 = vmul.f32 %v17489_v13, %v19215_v31  ;;  %v5789_v59 = vmul.f32 %v17489_v13, %v19224_v35  ;;  %v5788_v60 = vmul.f32 %v17489_v13, %v19221_v62  ;;  %v5984_v31 = vld [vmem:[#allocation18 + $0x460] sm:$0xff]  ;;  %v5985_v35 = vld [vmem:[#allocation18 + $0x468] sm:$0xff] }
 0x9d5   : > { %v14482_v16 = vcombine.high %v5980_v7, %v5984_v31  ;;  %v14484_v53 = vcombine.high %v5981_v9, %v5985_v35  ;;  %v14481_v22 = vcombine.low %v5980_v7, %v5984_v31  ;;  %v14483_v24 = vcombine.low %v5981_v9, %v5985_v35  ;;  %v6017_v13 = vld [vmem:[#allocation18 + $0x568] sm:$0xff]  ;;  %v6028_v7 = vld [vmem:[#allocation18 + $0x5c0] sm:$0xff] }
 0x9d6   : > { %v5812_v63 = vmul.f32 %v5798_v3, %v5787_v58  ;;  %v5811_v0 = vmul.f32 %v5794_v54, %v5786_v14  ;;  %v5814_v1 = vmul.f32 %v5806_v12, %v5789_v59  ;;  %v5813_v2 = vmul.f32 %v5802_v27, %v5788_v60  ;;  %v6012_v54 = vld [vmem:[#allocation18 + $0x540] sm:$0xff]  ;;  %v6013_v27 = vld [vmem:[#allocation18 + $0x548] sm:$0xff] }
 0x9d7   : > { %v14508_v3 = vcombine.high %v6005_v46, %v6009_v33  ;;  %v6016_v12 = vld [vmem:[#allocation18 + $0x560] sm:$0xff]  ;;  %v14516_v58 = vcombine.high %v6013_v27, %v6017_v13  ;;  %v6021_v60 = vld [vmem:[#allocation18 + $0x588] sm:$0xff] }
 0x9d8   : > { %v19246_v4 = vadd.f32 %v5823_v55, %v5812_v63  ;;  %v19248_v6 = vadd.f32 %v5819_v56, %v5811_v0  ;;  %v19250_v8 = vadd.f32 %v5827_v57, %v5813_v2  ;;  %v19252_v32 = vadd.f32 %v5831_v15, %v5814_v1  ;;  %v6020_v14 = vld [vmem:[#allocation18 + $0x580] sm:$0xff]  ;;  %v6025_v15 = vld [vmem:[#allocation18 + $0x5a8] sm:$0xff] }
 0x9d9   : > { %v14507_v56 = vcombine.low %v6005_v46, %v6009_v33  ;;  %v14514_v57 = vcombine.high %v6012_v54, %v6016_v12  ;;  %v6024_v59 = vld [vmem:[#allocation18 + $0x5a0] sm:$0xff]  ;;  %v14513_v63 = vcombine.low %v6012_v54, %v6016_v12  ;;  %v14515_v0 = vcombine.low %v6013_v27, %v6017_v13  ;;  %v6029_v9 = vld [vmem:[#allocation18 + $0x5c8] sm:$0xff] }
 0x9da   : > { %v19256_v62 = vpack.c.bf16 %v19246_v4, %v19246_v4  ;;  %v19260_v10 = vpack.c.bf16 %v19248_v6, %v19248_v6  ;;  %v19268_v20 = vpack.c.bf16 %v19252_v32, %v19252_v32  ;;  %v14522_v1 = vcombine.high %v6020_v14, %v6024_v59  ;;  %v6032_v31 = vld [vmem:[#allocation18 + $0x5e0] sm:$0xff]  ;;  %v6033_v35 = vld [vmem:[#allocation18 + $0x5e8] sm:$0xff] }
 0x9db   : > { %v14524_v2 = vcombine.high %v6021_v60, %v6025_v15  ;;  %v14521_v52 = vcombine.low %v6020_v14, %v6024_v59  ;;  %v14532_v17 = vcombine.high %v6029_v9, %v6033_v35  ;;  %v6052_v46 = vld [vmem:[#allocation18 + $0x680] sm:$0xff] }
 0x9dc   : > { %7454 = vmatprep.mubr.bf16.mxu0 %v19256_v62  ;;  %7536 = vmatprep.mubr.bf16.mxu1 %v19256_v62  ;;  %v6056_v33 = vld [vmem:[#allocation18 + $0x6a0] sm:$0xff] }
 0x9dd   : > { %7455 = vmatmul.mubr.bf16.vlgmr.msra.gmra.mrb[36].mxu0 %v19260_v10  ;;  %7537 = vmatmul.mubr.bf16.vlgmr.msra.gmra.mrb[36].mxu1 %v19260_v10  ;;  %v14554_v54 = vcombine.high %v6052_v46, %v6056_v33  ;;  %v6060_v27 = vld [vmem:[#allocation18 + $0x6c0] sm:$0xff] }
 0x9de   : > { %7464 = vmatpush1.bf16.msra.mxu0 %v14473_v21  ;;  %7546 = vmatpush1.bf16.msra.mxu1 %v14475_v23  ;;  %v14500_v21 = vcombine.high %v5997_v29, %v6001_v30  ;;  %v6004_v23 = vld [vmem:[#allocation18 + $0x500] sm:$0xff] }
 0x9df   : > { %7495 = vmatprep.mubr.bf16.mxu0 %v19268_v20  ;;  %7577 = vmatprep.mubr.bf16.mxu1 %v19268_v20  ;;  %v14506_v51 = vcombine.high %v6004_v23, %v6008_v44  ;;  %v14505_v55 = vcombine.low %v6004_v23, %v6008_v44  ;;  %v6044_v29 = vld [vmem:[#allocation18 + $0x640] sm:$0xff] }
 0x9e0   : > { %7465 = vmatprep.subr.bf16.mxu0 %v14482_v16  ;;  %7547 = vmatprep.subr.bf16.mxu1 %v14484_v53  ;;  %v14523_v16 = vcombine.low %v6021_v60, %v6025_v15  ;;  %v14530_v53 = vcombine.high %v6028_v7, %v6032_v31  ;;  %v6048_v30 = vld [vmem:[#allocation18 + $0x660] sm:$0xff] }
 0x9e1   : > { %v14546_v23 = vcombine.high %v6044_v29, %v6048_v30  ;;  %v6064_v13 = vld [vmem:[#allocation18 + $0x6e0] sm:$0xff] }
 0x9e2   : > { %7466 = vmatpush1.bf16.msra.mxu0 %v14481_v22  ;;  %7548 = vmatpush1.bf16.msra.mxu1 %v14483_v24  ;;  %v6037_v22 = vld [vmem:[#allocation18 + $0x608] sm:$0xff]  ;;  %v14562_v14 = vcombine.high %v6060_v27, %v6064_v13  ;;  %v6068_v60 = vld [vmem:[#allocation18 + $0x700] sm:$0xff] }
 0x9e3   : > { %7467 = vmatprep.subr.bf16.mxu0 %v14490_v25  ;;  %7549 = vmatprep.subr.bf16.mxu1 %v14492_v61  ;;  %v6041_v24 = vld [vmem:[#allocation18 + $0x628] sm:$0xff]  ;;  %v14529_v25 = vcombine.low %v6028_v7, %v6032_v31  ;;  %v14531_v61 = vcombine.low %v6029_v9, %v6033_v35  ;;  %v6072_v15 = vld [vmem:[#allocation18 + $0x720] sm:$0xff] }
 0x9e4   : > { %v14540_v28 = vcombine.high %v6037_v22, %v6041_v24  ;;  %v14570_v7 = vcombine.high %v6068_v60, %v6072_v15  ;;  %v6076_v9 = vld [vmem:[#allocation18 + $0x740] sm:$0xff] }
 0x9e5   : > { %v6080_v35 = vld [vmem:[#allocation18 + $0x760] sm:$0xff] }
 0x9e6   : > { %7468 = vmatpush1.bf16.msra.mxu0 %v14489_v48  ;;  %7550 = vmatpush1.bf16.msra.mxu1 %v14491_v11  ;;  %v6045_v48 = vld [vmem:[#allocation18 + $0x648] sm:$0xff] }
 0x9e7   : > { %7469 = vmatprep.subr.bf16.mxu0 %v14498_v43  ;;  %7551 = vmatprep.subr.bf16.mxu1 %v14500_v21  ;;  %v6049_v11 = vld [vmem:[#allocation18 + $0x668] sm:$0xff]  ;;  %v14537_v43 = vcombine.low %v6036_v18, %v6040_v19  ;;  %v14539_v21 = vcombine.low %v6037_v22, %v6041_v24  ;;  %v14578_v18 = vcombine.high %v6076_v9, %v6080_v35  ;;  %v6084_v22 = vld [vmem:[#allocation18 + $0x780] sm:$0xff] }
 0x9e8   : > { %v14548_v44 = vcombine.high %v6045_v48, %v6049_v11  ;;  %v6088_v24 = vld [vmem:[#allocation18 + $0x7a0] sm:$0xff] }
 0x9ea   : > { %7470 = vmatpush1.bf16.msra.mxu0 %v14497_v47  ;;  %7552 = vmatpush1.bf16.msra.mxu1 %v14499_v41  ;;  %v6053_v47 = vld [vmem:[#allocation18 + $0x688] sm:$0xff] }
 0x9eb   : > { %7471 = vmatprep.subr.bf16.mxu0 %v14506_v51  ;;  %7553 = vmatprep.subr.bf16.mxu1 %v14508_v3  ;;  %v6057_v41 = vld [vmem:[#allocation18 + $0x6a8] sm:$0xff]  ;;  %v14545_v51 = vcombine.low %v6044_v29, %v6048_v30  ;;  %v14547_v3 = vcombine.low %v6045_v48, %v6049_v11  ;;  %v14586_v29 = vcombine.high %v6084_v22, %v6088_v24  ;;  %v6092_v48 = vld [vmem:[#allocation18 + $0x7c0] sm:$0xff] }
 0x9ec   : > { %v14556_v12 = vcombine.high %v6053_v47, %v6057_v41  ;;  %v6096_v11 = vld [vmem:[#allocation18 + $0x7e0] sm:$0xff] }
 0x9ee   : > { %7472 = vmatpush1.bf16.msra.mxu0 %v14505_v55  ;;  %7554 = vmatpush1.bf16.msra.mxu1 %v14507_v56  ;;  %v6061_v55 = vld [vmem:[#allocation18 + $0x6c8] sm:$0xff] }
 0x9ef   : > { %7473 = vmatprep.subr.bf16.mxu0 %v14514_v57  ;;  %7555 = vmatprep.subr.bf16.mxu1 %v14516_v58  ;;  %v6065_v56 = vld [vmem:[#allocation18 + $0x6e8] sm:$0xff]  ;;  %v14553_v57 = vcombine.low %v6052_v46, %v6056_v33  ;;  %v14555_v58 = vcombine.low %v6053_v47, %v6057_v41  ;;  %v14594_v46 = vcombine.high %v6092_v48, %v6096_v11  ;;  %v5846_v47 = vld [vmem:[#allocation18 + $0x10] sm:$0xff] }
 0x9f0   : > { %v14564_v59 = vcombine.high %v6061_v55, %v6065_v56  ;;  %v5850_v41 = vld [vmem:[#allocation18 + $0x30] sm:$0xff] }
 0x9f2   : > { %7474 = vmatpush1.bf16.msra.mxu0 %v14513_v63  ;;  %7556 = vmatpush1.bf16.msra.mxu1 %v14515_v0  ;;  %v6069_v63 = vld [vmem:[#allocation18 + $0x708] sm:$0xff] }
 0x9f3   : > { %7475 = vmatprep.subr.bf16.mxu0 %v14522_v1  ;;  %7557 = vmatprep.subr.bf16.mxu1 %v14524_v2  ;;  %v6073_v0 = vld [vmem:[#allocation18 + $0x728] sm:$0xff]  ;;  %v14561_v1 = vcombine.low %v6060_v27, %v6064_v13  ;;  %v14563_v2 = vcombine.low %v6061_v55, %v6065_v56  ;;  %v14350_v27 = vcombine.high %v5846_v47, %v5850_v41  ;;  %v5854_v55 = vld [vmem:[#allocation18 + $0x50] sm:$0xff] }
 0x9f4   : > { %v14572_v31 = vcombine.high %v6069_v63, %v6073_v0  ;;  %v5858_v56 = vld [vmem:[#allocation18 + $0x70] sm:$0xff] }
 0x9f6   : > { %7476 = vmatpush1.bf16.msra.mxu0 %v14521_v52  ;;  %7558 = vmatpush1.bf16.msra.mxu1 %v14523_v16  ;;  %v6077_v52 = vld [vmem:[#allocation18 + $0x748] sm:$0xff] }
 0x9f7   : > { %7477 = vmatprep.subr.bf16.mxu0 %v14530_v53  ;;  %7559 = vmatprep.subr.bf16.mxu1 %v14532_v17  ;;  %v6081_v16 = vld [vmem:[#allocation18 + $0x768] sm:$0xff]  ;;  %v14569_v53 = vcombine.low %v6068_v60, %v6072_v15  ;;  %v14571_v17 = vcombine.low %v6069_v63, %v6073_v0  ;;  %v14358_v15 = vcombine.high %v5854_v55, %v5858_v56  ;;  %v5862_v0 = vld [vmem:[#allocation18 + $0x90] sm:$0xff] }
 0x9f8   : > { %v14580_v19 = vcombine.high %v6077_v52, %v6081_v16 }
 0x9fa   : > { %7478 = vmatpush1.bf16.msra.mxu0 %v14529_v25  ;;  %7560 = vmatpush1.bf16.msra.mxu1 %v14531_v61  ;;  %v6085_v25 = vld [vmem:[#allocation18 + $0x788] sm:$0xff] }
 0x9fb   : > { %7479 = vmatprep.subr.bf16.mxu0 %v14538_v26  ;;  %7561 = vmatprep.subr.bf16.mxu1 %v14540_v28  ;;  %v6089_v61 = vld [vmem:[#allocation18 + $0x7a8] sm:$0xff]  ;;  %v14577_v26 = vcombine.low %v6076_v9, %v6080_v35  ;;  %v14579_v28 = vcombine.low %v6077_v52, %v6081_v16  ;;  %v5870_v16 = vld [vmem:[#allocation18 + $0xd0] sm:$0xff] }
 0x9fc   : > { %v14588_v30 = vcombine.high %v6085_v25, %v6089_v61 }
 0x9fe   : > { %7480 = vmatpush1.bf16.msra.mxu0 %v14537_v43  ;;  %7562 = vmatpush1.bf16.msra.mxu1 %v14539_v21  ;;  %v6093_v43 = vld [vmem:[#allocation18 + $0x7c8] sm:$0xff] }
 0x9ff   : > { %7481 = vmatprep.subr.bf16.mxu0 %v14546_v23  ;;  %7563 = vmatprep.subr.bf16.mxu1 %v14548_v44  ;;  %v6097_v21 = vld [vmem:[#allocation18 + $0x7e8] sm:$0xff]  ;;  %v14585_v23 = vcombine.low %v6084_v22, %v6088_v24  ;;  %v14587_v44 = vcombine.low %v6085_v25, %v6089_v61  ;;  %v5878_v61 = vld [vmem:[#allocation18 + $0x110] sm:$0xff] }
 0xa00   : > { %v14596_v33 = vcombine.high %v6093_v43, %v6097_v21 }
 0xa02   : > { %7482 = vmatpush1.bf16.msra.mxu0 %v14545_v51  ;;  %7564 = vmatpush1.bf16.msra.mxu1 %v14547_v3  ;;  %v5847_v51 = vld [vmem:[#allocation18 + $0x18] sm:$0xff] }
 0xa03   : > { %7483 = vmatprep.subr.bf16.mxu0 %v14554_v54  ;;  %7565 = vmatprep.subr.bf16.mxu1 %v14556_v12  ;;  %v5851_v3 = vld [vmem:[#allocation18 + $0x38] sm:$0xff]  ;;  %v14593_v54 = vcombine.low %v6092_v48, %v6096_v11  ;;  %v14595_v12 = vcombine.low %v6093_v43, %v6097_v21  ;;  %v5886_v43 = vld [vmem:[#allocation18 + $0x150] sm:$0xff] }
 0xa04   : > { %v14352_v13 = vcombine.high %v5847_v51, %v5851_v3  ;;  %v14351_v60 = vcombine.low %v5847_v51, %v5851_v3  ;;  %v5890_v21 = vld [vmem:[#allocation18 + $0x170] sm:$0xff] }
 0xa05   : > { %v5894_v51 = vld [vmem:[#allocation18 + $0x190] sm:$0xff] }
 0xa06   : > { %7484 = vmatpush1.bf16.msra.mxu0 %v14553_v57  ;;  %7566 = vmatpush1.bf16.msra.mxu1 %v14555_v58  ;;  %v5855_v57 = vld [vmem:[#allocation18 + $0x58] sm:$0xff]  ;;  %v5898_v3 = vld [vmem:[#allocation18 + $0x1b0] sm:$0xff] }
 0xa07   : > { %7485 = vmatprep.subr.bf16.mxu0 %v14562_v14  ;;  %7567 = vmatprep.subr.bf16.mxu1 %v14564_v59  ;;  %v5859_v58 = vld [vmem:[#allocation18 + $0x78] sm:$0xff]  ;;  %v14349_v14 = vcombine.low %v5846_v47, %v5850_v41  ;;  %v19274_v59 = vpack.c.bf16 %v19250_v8, %v19250_v8  ;;  %v14390_v47 = vcombine.high %v5886_v43, %v5890_v21 }
 0xa08   : > { %v14360_v63 = vcombine.high %v5855_v57, %v5859_v58  ;;  %v14359_v9 = vcombine.low %v5855_v57, %v5859_v58  ;;  %v5902_v57 = vld [vmem:[#allocation18 + $0x1d0] sm:$0xff] }
 0xa09   : > { %v5906_v58 = vld [vmem:[#allocation18 + $0x1f0] sm:$0xff] }
 0xa0a   : > { %7486 = vmatpush1.bf16.msra.mxu0 %v14561_v1  ;;  %7568 = vmatpush1.bf16.msra.mxu1 %v14563_v2  ;;  %v5866_v1 = vld [vmem:[#allocation18 + $0xb0] sm:$0xff]  ;;  %v5863_v2 = vld [vmem:[#allocation18 + $0x98] sm:$0xff] }
 0xa0b   : > { %7487 = vmatprep.subr.bf16.mxu0 %v14570_v7  ;;  %7569 = vmatprep.subr.bf16.mxu1 %v14572_v31  ;;  %v5867_v7 = vld [vmem:[#allocation18 + $0xb8] sm:$0xff]  ;;  %v14357_v31 = vcombine.low %v5854_v55, %v5858_v56  ;;  %v14366_v35 = vcombine.high %v5862_v0, %v5866_v1  ;;  %v14398_v55 = vcombine.high %v5894_v51, %v5898_v3 }
 0xa0c   : > { %v14368_v52 = vcombine.high %v5863_v2, %v5867_v7  ;;  %v14367_v22 = vcombine.low %v5863_v2, %v5867_v7  ;;  %v5910_v2 = vld [vmem:[#allocation18 + $0x210] sm:$0xff] }
 0xa0d   : > { %v5914_v7 = vld [vmem:[#allocation18 + $0x230] sm:$0xff] }
 0xa0e   : > { %7488 = vmatpush1.bf16.msra.mxu0 %v14569_v53  ;;  %7570 = vmatpush1.bf16.msra.mxu1 %v14571_v17  ;;  %v5874_v53 = vld [vmem:[#allocation18 + $0xf0] sm:$0xff]  ;;  %v5871_v17 = vld [vmem:[#allocation18 + $0xd8] sm:$0xff] }
 0xa0f   : > { %7489 = vmatprep.subr.bf16.mxu0 %v14578_v18  ;;  %7571 = vmatprep.subr.bf16.mxu1 %v14580_v19  ;;  %v5875_v18 = vld [vmem:[#allocation18 + $0xf8] sm:$0xff]  ;;  %v14365_v19 = vcombine.low %v5862_v0, %v5866_v1  ;;  %v14374_v24 = vcombine.high %v5870_v16, %v5874_v53  ;;  %v14406_v0 = vcombine.high %v5902_v57, %v5906_v58 }
 0xa10   : > { %v14376_v25 = vcombine.high %v5871_v17, %v5875_v18 }
 0xa12   : > { %7490 = vmatpush1.bf16.msra.mxu0 %v14577_v26  ;;  %7572 = vmatpush1.bf16.msra.mxu1 %v14579_v28  ;;  %v5882_v26 = vld [vmem:[#allocation18 + $0x130] sm:$0xff]  ;;  %v5883_v28 = vld [vmem:[#allocation18 + $0x138] sm:$0xff] }
 0xa13   : > { %7491 = vmatprep.subr.bf16.mxu0 %v14586_v29  ;;  %7573 = vmatprep.subr.bf16.mxu1 %v14588_v30  ;;  %v14373_v29 = vcombine.low %v5870_v16, %v5874_v53  ;;  %v14375_v30 = vcombine.low %v5871_v17, %v5875_v18  ;;  %v14382_v48 = vcombine.high %v5878_v61, %v5882_v26  ;;  %v5918_v17 = vld [vmem:[#allocation18 + $0x250] sm:$0xff] }
 0xa14   : > { %v14414_v16 = vcombine.high %v5910_v2, %v5914_v7  ;;  %v5922_v18 = vld [vmem:[#allocation18 + $0x270] sm:$0xff] }
 0xa16   : > { %7492 = vmatpush1.bf16.msra.mxu0 %v14585_v23  ;;  %7574 = vmatpush1.bf16.msra.mxu1 %v14587_v44  ;;  %v5887_v23 = vld [vmem:[#allocation18 + $0x158] sm:$0xff] }
 0xa17   : > { %7493 = vmatprep.subr.bf16.mxu0 %v14594_v46  ;;  %7575 = vmatprep.subr.bf16.mxu1 %v14596_v33  ;;  %v5891_v44 = vld [vmem:[#allocation18 + $0x178] sm:$0xff]  ;;  %v14381_v46 = vcombine.low %v5878_v61, %v5882_v26  ;;  %v14422_v61 = vcombine.high %v5918_v17, %v5922_v18 }
 0xa18   : > { %v14392_v41 = vcombine.high %v5887_v23, %v5891_v44 }
 0xa1a   : > { %7494 = vmatpush1.bf16.msra.mxu0 %v14593_v54  ;;  %7576 = vmatpush1.bf16.msra.mxu1 %v14595_v12  ;;  %v5895_v54 = vld [vmem:[#allocation18 + $0x198] sm:$0xff] }
 0xa1b   : > { %7586 = vmatprep.subr.bf16.mxu0 %v14350_v27  ;;  %7668 = vmatprep.subr.bf16.mxu1 %v14352_v13  ;;  %v5899_v12 = vld [vmem:[#allocation18 + $0x1b8] sm:$0xff]  ;;  %v14389_v27 = vcombine.low %v5886_v43, %v5890_v21  ;;  %v14391_v13 = vcombine.low %v5887_v23, %v5891_v44  ;;  %v5934_v23 = vld [vmem:[#allocation18 + $0x2d0] sm:$0xff] }
 0xa1c   : > { %v14400_v56 = vcombine.high %v5895_v54, %v5899_v12  ;;  %v5938_v44 = vld [vmem:[#allocation18 + $0x2f0] sm:$0xff] }
 0xa1d   : > { %7496 = vmatmul.mubr.bf16.vlgmr.msra.gmra.mrb[36].mxu0 %v19274_v59  ;;  %7578 = vmatmul.mubr.bf16.vlgmr.msra.gmra.mrb[36].mxu1 %v19274_v59 }
 0xa1e   : > { %7587 = vmatpush1.bf16.msra.mxu0 %v14349_v14  ;;  %7618 = vmatprep.mubr.bf16.mxu0 %v19256_v62  ;;  %v5903_v14 = vld [vmem:[#allocation18 + $0x1d8] sm:$0xff] }
 0xa1f   : > { %7669 = vmatpush1.bf16.msra.mxu1 %v14351_v60  ;;  %7700 = vmatprep.mubr.bf16.mxu1 %v19256_v62  ;;  %v5879_v62 = vld [vmem:[#allocation18 + $0x118] sm:$0xff] }
 0xa20   : > { %7588 = vmatprep.subr.bf16.mxu0 %v14358_v15  ;;  %7670 = vmatprep.subr.bf16.mxu1 %v14360_v63  ;;  %v14384_v11 = vcombine.high %v5879_v62, %v5883_v28  ;;  %v14383_v33 = vcombine.low %v5879_v62, %v5883_v28  ;;  %v5907_v60 = vld [vmem:[#allocation18 + $0x1f8] sm:$0xff]  ;;  %v14397_v15 = vcombine.low %v5894_v51, %v5898_v3  ;;  %v5926_v62 = vld [vmem:[#allocation18 + $0x290] sm:$0xff] }
 0xa21   : > { %v14399_v63 = vcombine.low %v5895_v54, %v5899_v12  ;;  %v14408_v1 = vcombine.high %v5903_v14, %v5907_v60  ;;  %v5930_v28 = vld [vmem:[#allocation18 + $0x2b0] sm:$0xff]  ;;  %v14438_v51 = vcombine.high %v5934_v23, %v5938_v44 }
 0xa22   : > { %7589 = vmatpush1.bf16.msra.mxu0 %v14357_v31  ;;  %v5911_v31 = vld [vmem:[#allocation18 + $0x218] sm:$0xff]  ;;  %v14430_v43 = vcombine.high %v5926_v62, %v5930_v28  ;;  %v5942_v54 = vld [vmem:[#allocation18 + $0x310] sm:$0xff] }
 0xa23   : > { %7671 = vmatpush1.bf16.msra.mxu1 %v14359_v9  ;;  %7590 = vmatprep.subr.bf16.mxu0 %v14366_v35  ;;  %v5915_v9 = vld [vmem:[#allocation18 + $0x238] sm:$0xff]  ;;  %v14405_v35 = vcombine.low %v5902_v57, %v5906_v58  ;;  %v5946_v12 = vld [vmem:[#allocation18 + $0x330] sm:$0xff] }
 0xa24   : > { %7672 = vmatprep.subr.bf16.mxu1 %v14368_v52  ;;  %v14407_v52 = vcombine.low %v5903_v14, %v5907_v60  ;;  %v14416_v53 = vcombine.high %v5911_v31, %v5915_v9  ;;  %v14446_v57 = vcombine.high %v5942_v54, %v5946_v12  ;;  %v5950_v14 = vld [vmem:[#allocation18 + $0x350] sm:$0xff] }
 0xa25   : > { %v5954_v60 = vld [vmem:[#allocation18 + $0x370] sm:$0xff] }
 0xa26   : > { %7591 = vmatpush1.bf16.msra.mxu0 %v14365_v19  ;;  %v5919_v19 = vld [vmem:[#allocation18 + $0x258] sm:$0xff] }
 0xa27   : > { %7673 = vmatpush1.bf16.msra.mxu1 %v14367_v22  ;;  %7592 = vmatprep.subr.bf16.mxu0 %v14374_v24  ;;  %v5923_v22 = vld [vmem:[#allocation18 + $0x278] sm:$0xff]  ;;  %v14413_v24 = vcombine.low %v5910_v2, %v5914_v7  ;;  %v14454_v2 = vcombine.high %v5950_v14, %v5954_v60 }
 0xa28   : > { %7674 = vmatprep.subr.bf16.mxu1 %v14376_v25  ;;  %v14415_v25 = vcombine.low %v5911_v31, %v5915_v9  ;;  %v14424_v26 = vcombine.high %v5919_v19, %v5923_v22  ;;  %v5958_v31 = vld [vmem:[#allocation18 + $0x390] sm:$0xff] }
 0xa29   : > { %v5962_v9 = vld [vmem:[#allocation18 + $0x3b0] sm:$0xff] }
 0xa2a   : > { %7593 = vmatpush1.bf16.msra.mxu0 %v14373_v29  ;;  %v5927_v29 = vld [vmem:[#allocation18 + $0x298] sm:$0xff] }
 0xa2b   : > { %7675 = vmatpush1.bf16.msra.mxu1 %v14375_v30  ;;  %7594 = vmatprep.subr.bf16.mxu0 %v14382_v48  ;;  %v5931_v30 = vld [vmem:[#allocation18 + $0x2b8] sm:$0xff]  ;;  %v14421_v48 = vcombine.low %v5918_v17, %v5922_v18  ;;  %v14462_v17 = vcombine.high %v5958_v31, %v5962_v9 }
 0xa2c   : > { %7676 = vmatprep.subr.bf16.mxu1 %v14384_v11  ;;  %v14423_v11 = vcombine.low %v5919_v19, %v5923_v22  ;;  %v14432_v21 = vcombine.high %v5927_v29, %v5931_v30  ;;  %v5966_v19 = vld [vmem:[#allocation18 + $0x3d0] sm:$0xff] }
 0xa2d   : > { %v5970_v22 = vld [vmem:[#allocation18 + $0x3f0] sm:$0xff] }
 0xa2e   : > { %7595 = vmatpush1.bf16.msra.mxu0 %v14381_v46  ;;  %v5935_v46 = vld [vmem:[#allocation18 + $0x2d8] sm:$0xff] }
 0xa2f   : > { %7677 = vmatpush1.bf16.msra.mxu1 %v14383_v33  ;;  %7596 = vmatprep.subr.bf16.mxu0 %v14390_v47  ;;  %v5939_v33 = vld [vmem:[#allocation18 + $0x2f8] sm:$0xff]  ;;  %v14429_v47 = vcombine.low %v5926_v62, %v5930_v28  ;;  %v14470_v62 = vcombine.high %v5966_v19, %v5970_v22 }
 0xa30   : > { %7678 = vmatprep.subr.bf16.mxu1 %v14392_v41  ;;  %v14431_v41 = vcombine.low %v5927_v29, %v5931_v30  ;;  %v14440_v3 = vcombine.high %v5935_v46, %v5939_v33  ;;  %v5974_v29 = vld [vmem:[#allocation18 + $0x410] sm:$0xff] }
 0xa31   : > { %v5978_v30 = vld [vmem:[#allocation18 + $0x430] sm:$0xff] }
 0xa32   : > { %7597 = vmatpush1.bf16.msra.mxu0 %v14389_v27  ;;  %v5943_v27 = vld [vmem:[#allocation18 + $0x318] sm:$0xff] }
 0xa33   : > { %7679 = vmatpush1.bf16.msra.mxu1 %v14391_v13  ;;  %7598 = vmatprep.subr.bf16.mxu0 %v14398_v55  ;;  %v5947_v13 = vld [vmem:[#allocation18 + $0x338] sm:$0xff]  ;;  %v14437_v55 = vcombine.low %v5934_v23, %v5938_v44  ;;  %v14478_v23 = vcombine.high %v5974_v29, %v5978_v30 }
 0xa34   : > { %7680 = vmatprep.subr.bf16.mxu1 %v14400_v56  ;;  %v14439_v56 = vcombine.low %v5935_v46, %v5939_v33  ;;  %v14448_v58 = vcombine.high %v5943_v27, %v5947_v13  ;;  %v5982_v46 = vld [vmem:[#allocation18 + $0x450] sm:$0xff] }
 0xa35   : > { %v5986_v33 = vld [vmem:[#allocation18 + $0x470] sm:$0xff] }
 0xa36   : > { %7599 = vmatpush1.bf16.msra.mxu0 %v14397_v15  ;;  %v5951_v15 = vld [vmem:[#allocation18 + $0x358] sm:$0xff] }
 0xa37   : > { %7681 = vmatpush1.bf16.msra.mxu1 %v14399_v63  ;;  %7600 = vmatprep.subr.bf16.mxu0 %v14406_v0  ;;  %v5955_v63 = vld [vmem:[#allocation18 + $0x378] sm:$0xff]  ;;  %v14445_v0 = vcombine.low %v5942_v54, %v5946_v12  ;;  %v14486_v54 = vcombine.high %v5982_v46, %v5986_v33  ;;  %v5990_v12 = vld [vmem:[#allocation18 + $0x490] sm:$0xff] }
 0xa38   : > { %7682 = vmatprep.subr.bf16.mxu1 %v14408_v1  ;;  %v14447_v1 = vcombine.low %v5943_v27, %v5947_v13  ;;  %v14456_v7 = vcombine.high %v5951_v15, %v5955_v63  ;;  %v5994_v27 = vld [vmem:[#allocation18 + $0x4b0] sm:$0xff] }
 0xa3a   : > { %7601 = vmatpush1.bf16.msra.mxu0 %v14405_v35  ;;  %v5959_v35 = vld [vmem:[#allocation18 + $0x398] sm:$0xff] }
 0xa3b   : > { %7683 = vmatpush1.bf16.msra.mxu1 %v14407_v52  ;;  %7602 = vmatprep.subr.bf16.mxu0 %v14414_v16  ;;  %v5963_v52 = vld [vmem:[#allocation18 + $0x3b8] sm:$0xff]  ;;  %v14453_v16 = vcombine.low %v5950_v14, %v5954_v60  ;;  %v14494_v14 = vcombine.high %v5990_v12, %v5994_v27 }
 0xa3c   : > { %7684 = vmatprep.subr.bf16.mxu1 %v14416_v53  ;;  %v14455_v53 = vcombine.low %v5951_v15, %v5955_v63  ;;  %v14464_v18 = vcombine.high %v5959_v35, %v5963_v52  ;;  %v5998_v15 = vld [vmem:[#allocation18 + $0x4d0] sm:$0xff] }
 0xa3d   : > { %v6002_v63 = vld [vmem:[#allocation18 + $0x4f0] sm:$0xff] }
 0xa3e   : > { %7603 = vmatpush1.bf16.msra.mxu0 %v14413_v24  ;;  %v5967_v24 = vld [vmem:[#allocation18 + $0x3d8] sm:$0xff] }
 0xa3f   : > { %7685 = vmatpush1.bf16.msra.mxu1 %v14415_v25  ;;  %7604 = vmatprep.subr.bf16.mxu0 %v14422_v61  ;;  %v5971_v25 = vld [vmem:[#allocation18 + $0x3f8] sm:$0xff]  ;;  %v14461_v61 = vcombine.low %v5958_v31, %v5962_v9  ;;  %v6006_v9 = vld [vmem:[#allocation18 + $0x510] sm:$0xff] }
 0xa40   : > { %7686 = vmatprep.subr.bf16.mxu1 %v14424_v26  ;;  %v14463_v26 = vcombine.low %v5959_v35, %v5963_v52  ;;  %v14472_v28 = vcombine.high %v5967_v24, %v5971_v25  ;;  %v6010_v35 = vld [vmem:[#allocation18 + $0x530] sm:$0xff]  ;;  %v6007_v52 = vld [vmem:[#allocation18 + $0x518] sm:$0xff] }
 0xa42   : > { %7605 = vmatpush1.bf16.msra.mxu0 %v14421_v48  ;;  %v5975_v48 = vld [vmem:[#allocation18 + $0x418] sm:$0xff] }
 0xa43   : > { %7687 = vmatpush1.bf16.msra.mxu1 %v14423_v11  ;;  %7606 = vmatprep.subr.bf16.mxu0 %v14430_v43  ;;  %v5979_v11 = vld [vmem:[#allocation18 + $0x438] sm:$0xff]  ;;  %v14469_v43 = vcombine.low %v5966_v19, %v5970_v22  ;;  %v6014_v19 = vld [vmem:[#allocation18 + $0x550] sm:$0xff] }
 0xa44   : > { %7688 = vmatprep.subr.bf16.mxu1 %v14432_v21  ;;  %v14471_v21 = vcombine.low %v5967_v24, %v5971_v25  ;;  %v14480_v44 = vcombine.high %v5975_v48, %v5979_v11  ;;  %v6018_v22 = vld [vmem:[#allocation18 + $0x570] sm:$0xff]  ;;  %v6015_v24 = vld [vmem:[#allocation18 + $0x558] sm:$0xff] }
 0xa45   : > { %v6019_v25 = vld [vmem:[#allocation18 + $0x578] sm:$0xff] }
 0xa46   : > { %7607 = vmatpush1.bf16.msra.mxu0 %v14429_v47  ;;  %v14477_v47 = vcombine.low %v5974_v29, %v5978_v30  ;;  %v6022_v29 = vld [vmem:[#allocation18 + $0x590] sm:$0xff] }
 0xa47   : > { %7689 = vmatpush1.bf16.msra.mxu1 %v14431_v41  ;;  %7608 = vmatprep.subr.bf16.mxu0 %v14438_v51  ;;  %v5983_v41 = vld [vmem:[#allocation18 + $0x458] sm:$0xff]  ;;  %v6026_v30 = vld [vmem:[#allocation18 + $0x5b0] sm:$0xff] }
 0xa48   : > { %7690 = vmatprep.subr.bf16.mxu1 %v14440_v3  ;;  %v5987_v51 = vld [vmem:[#allocation18 + $0x478] sm:$0xff]  ;;  %v14479_v3 = vcombine.low %v5975_v48, %v5979_v11 }
 0xa49   : > { %v14488_v13 = vcombine.high %v5983_v41, %v5987_v51  ;;  %v6023_v48 = vld [vmem:[#allocation18 + $0x598] sm:$0xff] }
 0xa4a   : > { %7609 = vmatpush1.bf16.msra.mxu0 %v14437_v55  ;;  %v5991_v55 = vld [vmem:[#allocation18 + $0x498] sm:$0xff] }
 0xa4b   : > { %7691 = vmatpush1.bf16.msra.mxu1 %v14439_v56  ;;  %7610 = vmatprep.subr.bf16.mxu0 %v14446_v57  ;;  %v5995_v56 = vld [vmem:[#allocation18 + $0x4b8] sm:$0xff]  ;;  %v14485_v57 = vcombine.low %v5982_v46, %v5986_v33  ;;  %v6030_v46 = vld [vmem:[#allocation18 + $0x5d0] sm:$0xff] }
 0xa4c   : > { %7692 = vmatprep.subr.bf16.mxu1 %v14448_v58  ;;  %v14487_v58 = vcombine.low %v5983_v41, %v5987_v51  ;;  %v14496_v60 = vcombine.high %v5991_v55, %v5995_v56  ;;  %v6027_v11 = vld [vmem:[#allocation18 + $0x5b8] sm:$0xff]  ;;  %v6034_v33 = vld [vmem:[#allocation18 + $0x5f0] sm:$0xff]  ;;  %v14525_v51 = vcombine.low %v6022_v29, %v6026_v30 }
 0xa4d   : > { %v6035_v41 = vld [vmem:[#allocation18 + $0x5f8] sm:$0xff] }
 0xa4e   : > { %7611 = vmatpush1.bf16.msra.mxu0 %v14445_v0  ;;  %v5999_v0 = vld [vmem:[#allocation18 + $0x4d8] sm:$0xff] }
 0xa4f   : > { %7693 = vmatpush1.bf16.msra.mxu1 %v14447_v1  ;;  %7612 = vmatprep.subr.bf16.mxu0 %v14454_v2  ;;  %v6003_v1 = vld [vmem:[#allocation18 + $0x4f8] sm:$0xff]  ;;  %v14493_v2 = vcombine.low %v5990_v12, %v5994_v27  ;;  %v6038_v27 = vld [vmem:[#allocation18 + $0x610] sm:$0xff] }
 0xa50   : > { %7694 = vmatprep.subr.bf16.mxu1 %v14456_v7  ;;  %v14502_v7 = vcombine.high %v5998_v15, %v6002_v63  ;;  %v14504_v31 = vcombine.high %v5999_v0, %v6003_v1 }
 0xa52   : > { %7613 = vmatpush1.bf16.msra.mxu0 %v14453_v16  ;;  %v6011_v16 = vld [vmem:[#allocation18 + $0x538] sm:$0xff] }
 0xa53   : > { %7695 = vmatpush1.bf16.msra.mxu1 %v14455_v53  ;;  %7614 = vmatprep.subr.bf16.mxu0 %v14462_v17  ;;  %v14503_v53 = vcombine.low %v5999_v0, %v6003_v1  ;;  %v14510_v17 = vcombine.high %v6006_v9, %v6010_v35  ;;  %v6047_v0 = vld [vmem:[#allocation18 + $0x658] sm:$0xff] }
 0xa54   : > { %7696 = vmatprep.subr.bf16.mxu1 %v14464_v18  ;;  %v14512_v18 = vcombine.high %v6007_v52, %v6011_v16  ;;  %v6051_v1 = vld [vmem:[#allocation18 + $0x678] sm:$0xff] }
 0xa56   : > { %7615 = vmatpush1.bf16.msra.mxu0 %v14461_v61  ;;  %v14509_v61 = vcombine.low %v6006_v9, %v6010_v35  ;;  %v6054_v9 = vld [vmem:[#allocation18 + $0x690] sm:$0xff] }
 0xa57   : > { %7697 = vmatpush1.bf16.msra.mxu1 %v14463_v26  ;;  %7616 = vmatprep.subr.bf16.mxu0 %v14470_v62  ;;  %v14511_v26 = vcombine.low %v6007_v52, %v6011_v16  ;;  %v14518_v62 = vcombine.high %v6014_v19, %v6018_v22  ;;  %v6058_v35 = vld [vmem:[#allocation18 + $0x6b0] sm:$0xff]  ;;  %v6055_v52 = vld [vmem:[#allocation18 + $0x698] sm:$0xff] }
 0xa58   : > { %7698 = vmatprep.subr.bf16.mxu1 %v14472_v28  ;;  %v14520_v28 = vcombine.high %v6015_v24, %v6019_v25  ;;  %v6059_v16 = vld [vmem:[#allocation18 + $0x6b8] sm:$0xff] }
 0xa5a   : > { %7617 = vmatpush1.bf16.msra.mxu0 %v14469_v43  ;;  %v14517_v43 = vcombine.low %v6014_v19, %v6018_v22  ;;  %v6062_v19 = vld [vmem:[#allocation18 + $0x6d0] sm:$0xff] }
 0xa5b   : > { %7699 = vmatpush1.bf16.msra.mxu1 %v14471_v21  ;;  %7627 = vmatprep.subr.bf16.mxu0 %v14478_v23  ;;  %v14519_v21 = vcombine.low %v6015_v24, %v6019_v25  ;;  %v14526_v23 = vcombine.high %v6022_v29, %v6026_v30  ;;  %v6066_v22 = vld [vmem:[#allocation18 + $0x6f0] sm:$0xff]  ;;  %v6063_v24 = vld [vmem:[#allocation18 + $0x6d8] sm:$0xff] }
 0xa5c   : > { %7709 = vmatprep.subr.bf16.mxu1 %v14480_v44  ;;  %v14528_v44 = vcombine.high %v6023_v48, %v6027_v11  ;;  %v6067_v25 = vld [vmem:[#allocation18 + $0x6f8] sm:$0xff]  ;;  %v6070_v29 = vld [vmem:[#allocation18 + $0x710] sm:$0xff] }
 0xa5d   : > { %7619 = vmatmul.mubr.bf16.vlgmr.msra.gmra.mrb[40].mxu0 %v19260_v10  ;;  %v6074_v30 = vld [vmem:[#allocation18 + $0x730] sm:$0xff] }
 0xa5e   : > { %7701 = vmatmul.mubr.bf16.vlgmr.msra.gmra.mrb[40].mxu1 %v19260_v10  ;;  %7628 = vmatpush1.bf16.msra.mxu0 %v14477_v47  ;;  %v14495_v10 = vcombine.low %v5991_v55, %v5995_v56  ;;  %v6031_v47 = vld [vmem:[#allocation18 + $0x5d8] sm:$0xff] }
 0xa5f   : > { %7659 = vmatprep.mubr.bf16.mxu0 %v19268_v20  ;;  %7710 = vmatpush1.bf16.msra.mxu1 %v14479_v3  ;;  %v14527_v3 = vcombine.low %v6023_v48, %v6027_v11  ;;  %v14536_v12 = vcombine.high %v6031_v47, %v6035_v41  ;;  %v6039_v55 = vld [vmem:[#allocation18 + $0x618] sm:$0xff] }
 0xa60   : > { %7741 = vmatprep.mubr.bf16.mxu1 %v19268_v20  ;;  %7629 = vmatprep.subr.bf16.mxu0 %v14486_v54  ;;  %v14501_v20 = vcombine.low %v5998_v15, %v6002_v63  ;;  %v14534_v54 = vcombine.high %v6030_v46, %v6034_v33  ;;  %v6043_v56 = vld [vmem:[#allocation18 + $0x638] sm:$0xff]  ;;  %v6046_v15 = vld [vmem:[#allocation18 + $0x650] sm:$0xff] }
 0xa61   : > { %7711 = vmatprep.subr.bf16.mxu1 %v14488_v13  ;;  %v6042_v13 = vld [vmem:[#allocation18 + $0x630] sm:$0xff]  ;;  %v6071_v48 = vld [vmem:[#allocation18 + $0x718] sm:$0xff] }
 0xa62   : > { %7630 = vmatpush1.bf16.msra.mxu0 %v14485_v57  ;;  %v14533_v57 = vcombine.low %v6030_v46, %v6034_v33  ;;  %v6050_v63 = vld [vmem:[#allocation18 + $0x670] sm:$0xff]  ;;  %v6075_v11 = vld [vmem:[#allocation18 + $0x738] sm:$0xff] }
 0xa63   : > { %7712 = vmatpush1.bf16.msra.mxu1 %v14487_v58  ;;  %7631 = vmatprep.subr.bf16.mxu0 %v14494_v14  ;;  %v14535_v58 = vcombine.low %v6031_v47, %v6035_v41  ;;  %v14542_v14 = vcombine.high %v6038_v27, %v6042_v13  ;;  %v6078_v46 = vld [vmem:[#allocation18 + $0x750] sm:$0xff]  ;;  %v6079_v47 = vld [vmem:[#allocation18 + $0x758] sm:$0xff] }
 0xa64   : > { %7713 = vmatprep.subr.bf16.mxu1 %v14496_v60  ;;  %v14544_v60 = vcombine.high %v6039_v55, %v6043_v56  ;;  %v6082_v33 = vld [vmem:[#allocation18 + $0x770] sm:$0xff]  ;;  %v6083_v41 = vld [vmem:[#allocation18 + $0x778] sm:$0xff] }
 0xa66   : > { %7632 = vmatpush1.bf16.msra.mxu0 %v14493_v2  ;;  %v14541_v2 = vcombine.low %v6038_v27, %v6042_v13  ;;  %v6086_v27 = vld [vmem:[#allocation18 + $0x790] sm:$0xff] }
 0xa67   : > { %7714 = vmatpush1.bf16.msra.mxu1 %v14495_v10  ;;  %7633 = vmatprep.subr.bf16.mxu0 %v14502_v7  ;;  %v14543_v10 = vcombine.low %v6039_v55, %v6043_v56  ;;  %v14550_v7 = vcombine.high %v6046_v15, %v6050_v63  ;;  %v6090_v13 = vld [vmem:[#allocation18 + $0x7b0] sm:$0xff]  ;;  %v6087_v55 = vld [vmem:[#allocation18 + $0x798] sm:$0xff] }
 0xa68   : > { %7715 = vmatprep.subr.bf16.mxu1 %v14504_v31  ;;  %v14552_v31 = vcombine.high %v6047_v0, %v6051_v1  ;;  %v6091_v56 = vld [vmem:[#allocation18 + $0x7b8] sm:$0xff] }
 0xa6a   : > { %7634 = vmatpush1.bf16.msra.mxu0 %v14501_v20  ;;  %v14549_v20 = vcombine.low %v6046_v15, %v6050_v63  ;;  %v6094_v15 = vld [vmem:[#allocation18 + $0x7d0] sm:$0xff] }
 0xa6b   : > { %7716 = vmatpush1.bf16.msra.mxu1 %v14503_v53  ;;  %7635 = vmatprep.subr.bf16.mxu0 %v14510_v17  ;;  %v14551_v53 = vcombine.low %v6047_v0, %v6051_v1  ;;  %v14558_v17 = vcombine.high %v6054_v9, %v6058_v35  ;;  %v6098_v63 = vld [vmem:[#allocation18 + $0x7f0] sm:$0xff]  ;;  %v6095_v0 = vld [vmem:[#allocation18 + $0x7d8] sm:$0xff] }
 0xa6c   : > { %7717 = vmatprep.subr.bf16.mxu1 %v14512_v18  ;;  %v14560_v18 = vcombine.high %v6055_v52, %v6059_v16  ;;  %v6099_v1 = vld [vmem:[#allocation18 + $0x7f8] sm:$0xff] }
 0xa6e   : > { %7636 = vmatpush1.bf16.msra.mxu0 %v14509_v61  ;;  %v14557_v61 = vcombine.low %v6054_v9, %v6058_v35  ;;  %v14597_v9 = vcombine.low %v6094_v15, %v6098_v63  ;;  %v14599_v35 = vcombine.low %v6095_v0, %v6099_v1 }
 0xa6f   : > { %7718 = vmatpush1.bf16.msra.mxu1 %v14511_v26  ;;  %7637 = vmatprep.subr.bf16.mxu0 %v14518_v62  ;;  %v14559_v26 = vcombine.low %v6055_v52, %v6059_v16  ;;  %v14566_v62 = vcombine.high %v6062_v19, %v6066_v22  ;;  %v16482_v52 = vld [vmem:[#allocation21 + $0x4] ss:$16 sps:$4 sm:$0xff]  }
 0xa70   : > { %7719 = vmatprep.subr.bf16.mxu1 %v14520_v28  ;;  %v14568_v28 = vcombine.high %v6063_v24, %v6067_v25  ;;  %v16485_v16 = vld [vmem:[#allocation21 + $0x204] ss:$16 sps:$4 sm:$0xff]  }
 0xa72   : > { %7638 = vmatpush1.bf16.msra.mxu0 %v14517_v43  ;;  %v14565_v43 = vcombine.low %v6062_v19, %v6066_v22  ;;  %v16486_v19 = vld [vmem:[#allocation21 + $0x20] ss:$16 sps:$4 sm:$0xff]  }
 0xa73   : > { %7720 = vmatpush1.bf16.msra.mxu1 %v14519_v21  ;;  %7639 = vmatprep.subr.bf16.mxu0 %v14526_v23  ;;  %v14567_v21 = vcombine.low %v6063_v24, %v6067_v25  ;;  %v14574_v23 = vcombine.high %v6070_v29, %v6074_v30  ;;  %v16489_v22 = vld [vmem:[#allocation21 + $0x220] ss:$16 sps:$4 sm:$0xff]   ;;  %v16494_v24 = vld [vmem:[#allocation21 + $0x44] ss:$16 sps:$4 sm:$0xff]  }
 0xa74   : > { %7721 = vmatprep.subr.bf16.mxu1 %v14528_v44  ;;  %v14576_v44 = vcombine.high %v6071_v48, %v6075_v11  ;;  %v16497_v25 = vld [vmem:[#allocation21 + $0x244] ss:$16 sps:$4 sm:$0xff]  }
 0xa76   : > { %7640 = vmatpush1.bf16.msra.mxu0 %v14525_v51  ;;  %v14573_v51 = vcombine.low %v6070_v29, %v6074_v30  ;;  %v16498_v29 = vld [vmem:[#allocation21 + $0x60] ss:$16 sps:$4 sm:$0xff]   ;;  %v16506_v30 = vld [vmem:[#allocation21 + $0x84] ss:$16 sps:$4 sm:$0xff]  }
 0xa77   : > { %7722 = vmatpush1.bf16.msra.mxu1 %v14527_v3  ;;  %7641 = vmatprep.subr.bf16.mxu0 %v14534_v54  ;;  %v14575_v3 = vcombine.low %v6071_v48, %v6075_v11  ;;  %v14582_v54 = vcombine.high %v6078_v46, %v6082_v33  ;;  %v16509_v48 = vld [vmem:[#allocation21 + $0x284] ss:$16 sps:$4 sm:$0xff]   ;;  %v16504_v11 = vld [vmem:[#allocation21 + $0x80] ss:$16 sps:$4 sm:$0xff]  }
 0xa78   : > { %7723 = vmatprep.subr.bf16.mxu1 %v14536_v12  ;;  %v14584_v12 = vcombine.high %v6079_v47, %v6083_v41 }
 0xa7a   : > { %7642 = vmatpush1.bf16.msra.mxu0 %v14533_v57  ;;  %v14581_v57 = vcombine.low %v6078_v46, %v6082_v33  ;;  %v16513_v46 = vld [vmem:[#allocation21 + $0x2a0] ss:$16 sps:$4 sm:$0xff]   ;;  %v16518_v33 = vld [vmem:[#allocation21 + $0xc4] ss:$16 sps:$4 sm:$0xff]  }
 0xa7b   : > { %7724 = vmatpush1.bf16.msra.mxu1 %v14535_v58  ;;  %7643 = vmatprep.subr.bf16.mxu0 %v14542_v14  ;;  %v14583_v58 = vcombine.low %v6079_v47, %v6083_v41  ;;  %v14590_v14 = vcombine.high %v6086_v27, %v6090_v13  ;;  %v16521_v47 = vld [vmem:[#allocation21 + $0x2c4] ss:$16 sps:$4 sm:$0xff]   ;;  %v16516_v41 = vld [vmem:[#allocation21 + $0xc0] ss:$16 sps:$4 sm:$0xff]  }
 0xa7c   : > { %7725 = vmatprep.subr.bf16.mxu1 %v14544_v60  ;;  %v14592_v60 = vcombine.high %v6087_v55, %v6091_v56 }
 0xa7e   : > { %7644 = vmatpush1.bf16.msra.mxu0 %v14541_v2  ;;  %v14589_v2 = vcombine.low %v6086_v27, %v6090_v13  ;;  %v16525_v27 = vld [vmem:[#allocation21 + $0x2e0] ss:$16 sps:$4 sm:$0xff]   ;;  %v16530_v13 = vld [vmem:[#allocation21 + $0x104] ss:$16 sps:$4 sm:$0xff]  }
 0xa7f   : > { %7726 = vmatpush1.bf16.msra.mxu1 %v14543_v10  ;;  %7645 = vmatprep.subr.bf16.mxu0 %v14550_v7  ;;  %v14591_v10 = vcombine.low %v6087_v55, %v6091_v56  ;;  %v14598_v7 = vcombine.high %v6094_v15, %v6098_v63  ;;  %v16533_v55 = vld [vmem:[#allocation21 + $0x304] ss:$16 sps:$4 sm:$0xff]   ;;  %v16528_v56 = vld [vmem:[#allocation21 + $0x100] ss:$16 sps:$4 sm:$0xff]  }
 0xa80   : > { %7727 = vmatprep.subr.bf16.mxu1 %v14552_v31  ;;  %v14600_v31 = vcombine.high %v6095_v0, %v6099_v1  ;;  %v16537_v15 = vld [vmem:[#allocation21 + $0x320] ss:$16 sps:$4 sm:$0xff]   ;;  %v16542_v63 = vld [vmem:[#allocation21 + $0x144] ss:$16 sps:$4 sm:$0xff]  }
 0xa81   : > { %v16545_v0 = vld [vmem:[#allocation21 + $0x344] ss:$16 sps:$4 sm:$0xff]   ;;  %v16540_v1 = vld [vmem:[#allocation21 + $0x140] ss:$16 sps:$4 sm:$0xff]  }
 0xa82   : > { %7646 = vmatpush1.bf16.msra.mxu0 %v14549_v20  ;;  %v16480_v20 = vld [vmem:[#allocation21] ss:$16 sps:$4 sm:$0xff]  }
 0xa83   : > { %7728 = vmatpush1.bf16.msra.mxu1 %v14551_v53  ;;  %7647 = vmatprep.subr.bf16.mxu0 %v14558_v17  ;;  %v16483_v53 = vld [vmem:[#allocation21 + $0x200] ss:$16 sps:$4 sm:$0xff]   ;;  %v16488_v17 = vld [vmem:[#allocation21 + $0x24] ss:$16 sps:$4 sm:$0xff]  }
 0xa84   : > { %7729 = vmatprep.subr.bf16.mxu1 %v14560_v18  ;;  %v16491_v18 = vld [vmem:[#allocation21 + $0x224] ss:$16 sps:$4 sm:$0xff]  }
 0xa86   : > { %7648 = vmatpush1.bf16.msra.mxu0 %v14557_v61  ;;  %v16492_v61 = vld [vmem:[#allocation21 + $0x40] ss:$16 sps:$4 sm:$0xff]  }
 0xa87   : > { %7730 = vmatpush1.bf16.msra.mxu1 %v14559_v26  ;;  %7649 = vmatprep.subr.bf16.mxu0 %v14566_v62  ;;  %v16495_v26 = vld [vmem:[#allocation21 + $0x240] ss:$16 sps:$4 sm:$0xff]   ;;  %v16500_v62 = vld [vmem:[#allocation21 + $0x64] ss:$16 sps:$4 sm:$0xff]  }
 0xa88   : > { %7731 = vmatprep.subr.bf16.mxu1 %v14568_v28  ;;  %v16503_v28 = vld [vmem:[#allocation21 + $0x264] ss:$16 sps:$4 sm:$0xff]  }
 0xa8a   : > { %7650 = vmatpush1.bf16.msra.mxu0 %v14565_v43  ;;  %v16507_v43 = vld [vmem:[#allocation21 + $0x280] ss:$16 sps:$4 sm:$0xff]  }
 0xa8b   : > { %7732 = vmatpush1.bf16.msra.mxu1 %v14567_v21  ;;  %7651 = vmatprep.subr.bf16.mxu0 %v14574_v23  ;;  %v16512_v21 = vld [vmem:[#allocation21 + $0xa4] ss:$16 sps:$4 sm:$0xff]  }
 0xa8c   : > { %7733 = vmatprep.subr.bf16.mxu1 %v14576_v44  ;;  %v16515_v23 = vld [vmem:[#allocation21 + $0x2a4] ss:$16 sps:$4 sm:$0xff]   ;;  %v16510_v44 = vld [vmem:[#allocation21 + $0xa0] ss:$16 sps:$4 sm:$0xff]  }
 0xa8e   : > { %7652 = vmatpush1.bf16.msra.mxu0 %v14573_v51  ;;  %v16519_v51 = vld [vmem:[#allocation21 + $0x2c0] ss:$16 sps:$4 sm:$0xff]  }
 0xa8f   : > { %7734 = vmatpush1.bf16.msra.mxu1 %v14575_v3  ;;  %7653 = vmatprep.subr.bf16.mxu0 %v14582_v54  ;;  %v16524_v3 = vld [vmem:[#allocation21 + $0xe4] ss:$16 sps:$4 sm:$0xff]  }
 0xa90   : > { %7735 = vmatprep.subr.bf16.mxu1 %v14584_v12  ;;  %v16527_v54 = vld [vmem:[#allocation21 + $0x2e4] ss:$16 sps:$4 sm:$0xff]   ;;  %v16522_v12 = vld [vmem:[#allocation21 + $0xe0] ss:$16 sps:$4 sm:$0xff]  }
 0xa92   : > { %7654 = vmatpush1.bf16.msra.mxu0 %v14581_v57  ;;  %v16531_v57 = vld [vmem:[#allocation21 + $0x300] ss:$16 sps:$4 sm:$0xff]  }
 0xa93   : > { %7736 = vmatpush1.bf16.msra.mxu1 %v14583_v58  ;;  %7655 = vmatprep.subr.bf16.mxu0 %v14590_v14  ;;  %v16536_v58 = vld [vmem:[#allocation21 + $0x124] ss:$16 sps:$4 sm:$0xff]  }
 0xa94   : > { %7737 = vmatprep.subr.bf16.mxu1 %v14592_v60  ;;  %v16539_v14 = vld [vmem:[#allocation21 + $0x324] ss:$16 sps:$4 sm:$0xff]   ;;  %v16534_v60 = vld [vmem:[#allocation21 + $0x120] ss:$16 sps:$4 sm:$0xff]  }
 0xa96   : > { %7656 = vmatpush1.bf16.msra.mxu0 %v14589_v2  ;;  %v16543_v2 = vld [vmem:[#allocation21 + $0x340] ss:$16 sps:$4 sm:$0xff]  }
 0xa97   : > { %7738 = vmatpush1.bf16.msra.mxu1 %v14591_v10  ;;  %7657 = vmatprep.subr.bf16.mxu0 %v14598_v7  ;;  %v16548_v10 = vld [vmem:[#allocation21 + $0x164] ss:$16 sps:$4 sm:$0xff]  }
 0xa98   : > { %7739 = vmatprep.subr.bf16.mxu1 %v14600_v31  ;;  %v16551_v7 = vld [vmem:[#allocation21 + $0x364] ss:$16 sps:$4 sm:$0xff]   ;;  %v16546_v31 = vld [vmem:[#allocation21 + $0x160] ss:$16 sps:$4 sm:$0xff]  }
 0xa9a   : > { %7658 = vmatpush1.bf16.msra.mxu0 %v14597_v9  ;;  %v16549_v9 = vld [vmem:[#allocation21 + $0x360] ss:$16 sps:$4 sm:$0xff]  }
 0xa9b   : > { %7740 = vmatpush1.bf16.msra.mxu1 %v14599_v35  ;;  %9388 = vmatprep.subr.bf16.mxu0 %v16482_v52  ;;  %v16554_v35 = vld [vmem:[#allocation21 + $0x184] ss:$16 sps:$4 sm:$0xff]  }
 0xa9c   : > { %9429 = vmatprep.subr.bf16.mxu1 %v16485_v16  ;;  %v16557_v52 = vld [vmem:[#allocation21 + $0x384] ss:$16 sps:$4 sm:$0xff]   ;;  %v16552_v16 = vld [vmem:[#allocation21 + $0x180] ss:$16 sps:$4 sm:$0xff]  }
 0xa9d   : > { %7660 = vmatmul.mubr.bf16.vlgmr.msra.gmra.mrb[40].mxu0 %v19274_v59 }
 0xa9e   : > { %7742 = vmatmul.mubr.bf16.vlgmr.msra.gmra.mrb[40].mxu1 %v19274_v59  ;;  %9389 = vmatpush1.bf16.msra.mxu0 %v16480_v20  ;;  %v16501_v59 = vld [vmem:[#allocation21 + $0x260] ss:$16 sps:$4 sm:$0xff]  }
 0xa9f   : > { %9430 = vmatpush1.bf16.msra.mxu1 %v16483_v53  ;;  %9390 = vmatprep.subr.bf16.mxu0 %v16488_v17  ;;  %v16555_v20 = vld [vmem:[#allocation21 + $0x380] ss:$16 sps:$4 sm:$0xff]   ;;  %v16560_v53 = vld [vmem:[#allocation21 + $0x1a4] ss:$16 sps:$4 sm:$0xff]  }
 0xaa0   : > { %9431 = vmatprep.subr.bf16.mxu1 %v16491_v18  ;;  %v16563_v17 = vld [vmem:[#allocation21 + $0x3a4] ss:$16 sps:$4 sm:$0xff]   ;;  %v16558_v18 = vld [vmem:[#allocation21 + $0x1a0] ss:$16 sps:$4 sm:$0xff]  }
 0xaa2   : > { %9391 = vmatpush1.bf16.msra.mxu0 %v16486_v19  ;;  %v16561_v19 = vld [vmem:[#allocation21 + $0x3a0] ss:$16 sps:$4 sm:$0xff]  }
 0xaa3   : > { %9432 = vmatpush1.bf16.msra.mxu1 %v16489_v22  ;;  %9392 = vmatprep.subr.bf16.mxu0 %v16494_v24  ;;  %v16566_v22 = vld [vmem:[#allocation21 + $0x1c4] ss:$16 sps:$4 sm:$0xff]  }
 0xaa4   : > { %9433 = vmatprep.subr.bf16.mxu1 %v16497_v25  ;;  %v16569_v24 = vld [vmem:[#allocation21 + $0x3c4] ss:$16 sps:$4 sm:$0xff]   ;;  %v16564_v25 = vld [vmem:[#allocation21 + $0x1c0] ss:$16 sps:$4 sm:$0xff]  }
 0xaa6   : > { %9393 = vmatpush1.bf16.msra.mxu0 %v16492_v61  ;;  %v16567_v61 = vld [vmem:[#allocation21 + $0x3c0] ss:$16 sps:$4 sm:$0xff]  }
 0xaa7   : > { %9434 = vmatpush1.bf16.msra.mxu1 %v16495_v26  ;;  %9394 = vmatprep.subr.bf16.mxu0 %v16500_v62  ;;  %v16572_v26 = vld [vmem:[#allocation21 + $0x1e4] ss:$16 sps:$4 sm:$0xff]  }
 0xaa8   : > { %9435 = vmatprep.subr.bf16.mxu1 %v16503_v28  ;;  %v16575_v62 = vld [vmem:[#allocation21 + $0x3e4] ss:$16 sps:$4 sm:$0xff]   ;;  %v16570_v28 = vld [vmem:[#allocation21 + $0x1e0] ss:$16 sps:$4 sm:$0xff]  }
 0xaaa   : > { %9395 = vmatpush1.bf16.msra.mxu0 %v16498_v29  ;;  %v16573_v29 = vld [vmem:[#allocation21 + $0x3e0] ss:$16 sps:$4 sm:$0xff]  }
 0xaab   : > { %9436 = vmatpush1.bf16.msra.mxu1 %v16501_v59  ;;  %9396 = vmatprep.subr.bf16.mxu0 %v16506_v30  ;;  %v16578_v59 = vld [vmem:[#allocation21 + $0x404] ss:$16 sps:$4 sm:$0xff]  }
 0xaac   : > { %9437 = vmatprep.subr.bf16.mxu1 %v16509_v48  ;;  %v16581_v30 = vld [vmem:[#allocation21 + $0x604] ss:$16 sps:$4 sm:$0xff]   ;;  %v19286_v48 = vld [vmem:[#allocation19] sm:$0xff] }
 0xaae   : > { %9397 = vmatpush1.bf16.msra.mxu0 %v16504_v11  ;;  %v6105_v11 = vrot.slane %v19286_v48, %v19022_v42 }
 0xaaf   : > { %9438 = vmatpush1.bf16.msra.mxu1 %v16507_v43  ;;  %9398 = vmatprep.subr.bf16.mxu0 %v16512_v21  ;;  %v6113_v43 = vrot.slane %v19286_v48, %v19025_v45  ;;  %v6109_v21 = vrot.slane %v19286_v48, %v19028_v49 }
 0xab0   : > { %9439 = vmatprep.subr.bf16.mxu1 %v16515_v23  ;;  %v6117_v23 = vrot.slane %v19286_v48, %v19031_v50 }
 0xab2   : > { %9399 = vmatpush1.bf16.msra.mxu0 %v16510_v44 }
 0xab3   : > { %9440 = vmatpush1.bf16.msra.mxu1 %v16513_v46  ;;  %9400 = vmatprep.subr.bf16.mxu0 %v16518_v33 }
 0xab4   : > { %9441 = vmatprep.subr.bf16.mxu1 %v16521_v47 }
 0xab6   : > { %9401 = vmatpush1.bf16.msra.mxu0 %v16516_v41 }
 0xab7   : > { %9442 = vmatpush1.bf16.msra.mxu1 %v16519_v51  ;;  %9402 = vmatprep.subr.bf16.mxu0 %v16524_v3 }
 0xab8   : > { %9443 = vmatprep.subr.bf16.mxu1 %v16527_v54 }
 0xaba   : > { %9403 = vmatpush1.bf16.msra.mxu0 %v16522_v12 }
 0xabb   : > { %9444 = vmatpush1.bf16.msra.mxu1 %v16525_v27  ;;  %9404 = vmatprep.subr.bf16.mxu0 %v16530_v13 }
 0xabc   : > { %9445 = vmatprep.subr.bf16.mxu1 %v16533_v55 }
 0xabe   : > { %9405 = vmatpush1.bf16.msra.mxu0 %v16528_v56 }
 0xabf   : > { %9446 = vmatpush1.bf16.msra.mxu1 %v16531_v57  ;;  %9406 = vmatprep.subr.bf16.mxu0 %v16536_v58 }
 0xac0   : > { %9447 = vmatprep.subr.bf16.mxu1 %v16539_v14 }
 0xac2   : > { %9407 = vmatpush1.bf16.msra.mxu0 %v16534_v60 }
 0xac3   : > { %9448 = vmatpush1.bf16.msra.mxu1 %v16537_v15  ;;  %9408 = vmatprep.subr.bf16.mxu0 %v16542_v63 }
 0xac4   : > { %9449 = vmatprep.subr.bf16.mxu1 %v16545_v0 }
 0xac6   : > { %9409 = vmatpush1.bf16.msra.mxu0 %v16540_v1 }
 0xac7   : > { %9450 = vmatpush1.bf16.msra.mxu1 %v16543_v2  ;;  %9410 = vmatprep.subr.bf16.mxu0 %v16548_v10 }
 0xac8   : > { %9451 = vmatprep.subr.bf16.mxu1 %v16551_v7 }
 0xaca   : > { %9411 = vmatpush1.bf16.msra.mxu0 %v16546_v31 }
 0xacb   : > { %9452 = vmatpush1.bf16.msra.mxu1 %v16549_v9  ;;  %9412 = vmatprep.subr.bf16.mxu0 %v16554_v35 }
 0xacc   : > { %9453 = vmatprep.subr.bf16.mxu1 %v16557_v52 }
 0xace   : > { %9413 = vmatpush1.bf16.msra.mxu0 %v16552_v16 }
 0xacf   : > { %9454 = vmatpush1.bf16.msra.mxu1 %v16555_v20  ;;  %9414 = vmatprep.subr.bf16.mxu0 %v16560_v53 }
 0xad0   : > { %9455 = vmatprep.subr.bf16.mxu1 %v16563_v17 }
 0xad2   : > { %9415 = vmatpush1.bf16.msra.mxu0 %v16558_v18 }
 0xad3   : > { %9456 = vmatpush1.bf16.msra.mxu1 %v16561_v19  ;;  %9416 = vmatprep.subr.bf16.mxu0 %v16566_v22 }
 0xad4   : > { %9457 = vmatprep.subr.bf16.mxu1 %v16569_v24 }
 0xad6   : > { %9417 = vmatpush1.bf16.msra.mxu0 %v16564_v25 }
 0xad7   : > { %9458 = vmatpush1.bf16.msra.mxu1 %v16567_v61  ;;  %9418 = vmatprep.subr.bf16.mxu0 %v16572_v26 }
 0xad8   : > { %9459 = vmatprep.subr.bf16.mxu1 %v16575_v62 }
 0xada   : > { %9419 = vmatpush1.bf16.msra.mxu0 %v16570_v28 }
 0xadb   : > { %9460 = vmatpush1.bf16.msra.mxu1 %v16573_v29  ;;  %9470 = vmatprep.subr.bf16.mxu0 %v16578_v59 }
 0xadc   : > { %9511 = vmatprep.subr.bf16.mxu1 %v16581_v30 }
 0xaf0   : > { %v7497_v44 = vpop.f32.mrb[36].mxu0  ;;  %v7579_v46 = vpop.f32.mrb[36].mxu1 }
 0xaf1   : > { %v15413_v33 = vadd.f32 %v7497_v44, %v6105_v11  ;;  %v15415_v47 = vadd.f32 %v7579_v46, %v6113_v43  ;;  %v7499_v41 = vpop.f32.mrb[37].mxu0  ;;  %v7581_v51 = vpop.f32.mrb[37].mxu1  ;;  %v16576_v46 = vld [vmem:[#allocation21 + $0x400] ss:$16 sps:$4 sm:$0xff]  }
 0xaf2   : > { %v15414_v3 = vadd.f32 %v7499_v41, %v6109_v21  ;;  %v15416_v54 = vadd.f32 %v7581_v51, %v6117_v23  ;;  %v7501_v12 = vpop.f32.mrb[38].mxu0  ;;  %v7583_v27 = vpop.f32.mrb[38].mxu1 }
 0xaf3   : > { %v7750_v13 = vmul.f32 %v15413_v33, %v15413_v33  ;;  %v7752_v55 = vmul.f32 %v15415_v47, %v15415_v47  ;;  %v7502_v56 = vpop.f32.mrb[39].mxu0  ;;  %v7584_v57 = vpop.f32.mrb[39].mxu1  ;;  %v16579_v12 = vld [vmem:[#allocation21 + $0x600] ss:$16 sps:$4 sm:$0xff]   ;;  %v16584_v27 = vld [vmem:[#allocation21 + $0x424] ss:$16 sps:$4 sm:$0xff]  }
 0xaf4   : > { %v7751_v58 = vmul.f32 %v15414_v3, %v15414_v3  ;;  %v7753_v14 = vmul.f32 %v15416_v54, %v15416_v54  ;;  %v16588_v56 = vld [vmem:[#allocation21 + $0x440] ss:$16 sps:$4 sm:$0xff]  }
 0xaf5   : > { %v7758_v60 = vmul.f32 %v15413_v33, %v7750_v13  ;;  %v7760_v15 = vmul.f32 %v15415_v47, %v7752_v55  ;;  %v16587_v55 = vld [vmem:[#allocation21 + $0x624] ss:$16 sps:$4 sm:$0xff]   ;;  %v16591_v57 = vld [vmem:[#allocation21 + $0x640] ss:$16 sps:$4 sm:$0xff]  }
 0xaf6   : > { %v7759_v63 = vmul.f32 %v15414_v3, %v7751_v58  ;;  %v7761_v0 = vmul.f32 %v15416_v54, %v7753_v14  ;;  %v16596_v58 = vld [vmem:[#allocation21 + $0x464] ss:$16 sps:$4 sm:$0xff]  }
 0xaf7   : > { %v7766_v1 = vmul.f32 0.044715, %v7758_v60  ;;  %v7768_v2 = vmul.f32 0.044715, %v7760_v15  ;;  %v16599_v14 = vld [vmem:[#allocation21 + $0x664] ss:$16 sps:$4 sm:$0xff]  }
 0xaf8   : > { %v7767_v10 = vmul.f32 0.044715, %v7759_v63  ;;  %v7769_v7 = vmul.f32 0.044715, %v7761_v0  ;;  %v16594_v60 = vld [vmem:[#allocation21 + $0x460] ss:$16 sps:$4 sm:$0xff]  }
 0xaf9   : > { %v7774_v31 = vadd.f32 %v15413_v33, %v7766_v1  ;;  %v7776_v9 = vadd.f32 %v15415_v47, %v7768_v2  ;;  %v16597_v15 = vld [vmem:[#allocation21 + $0x660] ss:$16 sps:$4 sm:$0xff]   ;;  %v16602_v63 = vld [vmem:[#allocation21 + $0x484] ss:$16 sps:$4 sm:$0xff]  }
 0xafa   : > { %v7775_v35 = vadd.f32 %v15414_v3, %v7767_v10  ;;  %v7777_v52 = vadd.f32 %v15416_v54, %v7769_v7  ;;  %v16605_v0 = vld [vmem:[#allocation21 + $0x684] ss:$16 sps:$4 sm:$0xff]   ;;  %v16600_v1 = vld [vmem:[#allocation21 + $0x480] ss:$16 sps:$4 sm:$0xff]  }
 0xafb   : > { %v7782_v16 = vmul.f32 0.7978846, %v7774_v31  ;;  %v7784_v20 = vmul.f32 0.7978846, %v7776_v9  ;;  %v16603_v2 = vld [vmem:[#allocation21 + $0x680] ss:$16 sps:$4 sm:$0xff]  }
 0xafc   : > { %v7783_v53 = vmul.f32 0.7978846, %v7775_v35  ;;  %v7785_v17 = vmul.f32 0.7978846, %v7777_v52  ;;  %v16608_v10 = vld [vmem:[#allocation21 + $0x4a4] ss:$16 sps:$4 sm:$0xff]  }
 0xafd   : > { %17490 = vtanh.f32 %v7782_v16  ;;  %v16611_v7 = vld [vmem:[#allocation21 + $0x6a4] ss:$16 sps:$4 sm:$0xff]   ;;  %v16606_v31 = vld [vmem:[#allocation21 + $0x4a0] ss:$16 sps:$4 sm:$0xff]  }
 0xafe   : > { %17492 = vtanh.f32 %v7784_v20  ;;  %v16609_v9 = vld [vmem:[#allocation21 + $0x6a0] ss:$16 sps:$4 sm:$0xff]   ;;  %v16614_v35 = vld [vmem:[#allocation21 + $0x4c4] ss:$16 sps:$4 sm:$0xff]  }
 0xaff   : > { %17494 = vtanh.f32 %v7783_v53  ;;  %v16617_v52 = vld [vmem:[#allocation21 + $0x6c4] ss:$16 sps:$4 sm:$0xff]   ;;  %v16612_v16 = vld [vmem:[#allocation21 + $0x4c0] ss:$16 sps:$4 sm:$0xff]  }
 0xb00   : > { %17496 = vtanh.f32 %v7785_v17  ;;  %v16615_v20 = vld [vmem:[#allocation21 + $0x6c0] ss:$16 sps:$4 sm:$0xff]   ;;  %v16620_v53 = vld [vmem:[#allocation21 + $0x4e4] ss:$16 sps:$4 sm:$0xff]  }
 0xb01   : > { %v16623_v17 = vld [vmem:[#allocation21 + $0x6e4] ss:$16 sps:$4 sm:$0xff]  }
 0xb07   : > { %v17491_v18 = vpop.eup %17490 }
 0xb08   : > { %v17493_v19 = vpop.eup %17492  ;;  %v7798_v22 = vadd.f32 1.0, %v17491_v18  ;;  %v16618_v18 = vld [vmem:[#allocation21 + $0x4e0] ss:$16 sps:$4 sm:$0xff]  }
 0xb09   : > { %v17495_v24 = vpop.eup %17494  ;;  %v7800_v25 = vadd.f32 1.0, %v17493_v19  ;;  %v16621_v19 = vld [vmem:[#allocation21 + $0x6e0] ss:$16 sps:$4 sm:$0xff]  }
 0xb0a   : > { %v17497_v61 = vpop.eup %17496  ;;  %v7799_v26 = vadd.f32 1.0, %v17495_v24  ;;  %v7806_v62 = vmul.f32 0.5, %v7798_v22  ;;  %v16626_v22 = vld [vmem:[#allocation21 + $0x504] ss:$16 sps:$4 sm:$0xff]  }
 0xb0b   : > { %v7801_v28 = vadd.f32 1.0, %v17497_v61  ;;  %v7808_v29 = vmul.f32 0.5, %v7800_v25  ;;  %v16629_v24 = vld [vmem:[#allocation21 + $0x704] ss:$16 sps:$4 sm:$0xff]   ;;  %v16624_v25 = vld [vmem:[#allocation21 + $0x500] ss:$16 sps:$4 sm:$0xff]  }
 0xb0c   : > { %v7807_v59 = vmul.f32 0.5, %v7799_v26  ;;  %v7814_v11 = vmul.f32 %v15413_v33, %v7806_v62  ;;  %v16582_v33 = vld [vmem:[#allocation21 + $0x420] ss:$16 sps:$4 sm:$0xff]   ;;  %v16632_v26 = vld [vmem:[#allocation21 + $0x524] ss:$16 sps:$4 sm:$0xff]  }
 0xb0d   : > { %v7809_v30 = vmul.f32 0.5, %v7801_v28  ;;  %v7816_v21 = vmul.f32 %v15415_v47, %v7808_v29  ;;  %v16585_v47 = vld [vmem:[#allocation21 + $0x620] ss:$16 sps:$4 sm:$0xff]   ;;  %v16635_v62 = vld [vmem:[#allocation21 + $0x724] ss:$16 sps:$4 sm:$0xff]  }
 0xb0e   : > { %v7815_v43 = vmul.f32 %v15414_v3, %v7807_v59  ;;  %v19300_v51 = vpack.c.bf16 %v7814_v11, %v7814_v11  ;;  %v16590_v3 = vld [vmem:[#allocation21 + $0x444] ss:$16 sps:$4 sm:$0xff]   ;;  %v16627_v61 = vld [vmem:[#allocation21 + $0x700] ss:$16 sps:$4 sm:$0xff]  }
 0xb0f   : > { %v7817_v23 = vmul.f32 %v15416_v54, %v7809_v30  ;;  %v19303_v13 = vpack.c.bf16 %v7816_v21, %v7816_v21  ;;  %v16593_v54 = vld [vmem:[#allocation21 + $0x644] ss:$16 sps:$4 sm:$0xff]   ;;  %v16630_v28 = vld [vmem:[#allocation21 + $0x520] ss:$16 sps:$4 sm:$0xff]  }
 0xb10   : > { %v19296_v44 = vpack.c.bf16 %v7815_v43, %v7815_v43  ;;  %v16633_v29 = vld [vmem:[#allocation21 + $0x720] ss:$16 sps:$4 sm:$0xff]   ;;  %v16638_v59 = vld [vmem:[#allocation21 + $0x544] ss:$16 sps:$4 sm:$0xff]  }
 0xb11   : > { %v19298_v41 = vpack.c.bf16 %v7817_v23, %v7817_v23  ;;  %v16641_v30 = vld [vmem:[#allocation21 + $0x744] ss:$16 sps:$4 sm:$0xff]   ;;  %v16636_v11 = vld [vmem:[#allocation21 + $0x540] ss:$16 sps:$4 sm:$0xff]  }
 0xb12   : > { %9420 = vmatprep.mubr.bf16.mxu0 %v19296_v44  ;;  %v16639_v43 = vld [vmem:[#allocation21 + $0x740] ss:$16 sps:$4 sm:$0xff]   ;;  %v16644_v21 = vld [vmem:[#allocation21 + $0x564] ss:$16 sps:$4 sm:$0xff]  }
 0xb13   : > { %9461 = vmatprep.mubr.bf16.mxu1 %v19298_v41  ;;  %9421 = vmatmul.mubr.bf16.vlgmr.msra.gmra.mrb[44].mxu0 %v19300_v51  ;;  %v16647_v23 = vld [vmem:[#allocation21 + $0x764] ss:$16 sps:$4 sm:$0xff]  }
 0xb14   : > { %9462 = vmatmul.mubr.bf16.vlgmr.msra.gmra.mrb[44].mxu1 %v19303_v13  ;;  %9471 = vmatpush1.bf16.msra.mxu0 %v16576_v46  ;;  %v16642_v46 = vld [vmem:[#allocation21 + $0x560] ss:$16 sps:$4 sm:$0xff]  }
 0xb15   : > { %9512 = vmatpush1.bf16.msra.mxu1 %v16579_v12  ;;  %9472 = vmatprep.subr.bf16.mxu0 %v16584_v27  ;;  %v16645_v12 = vld [vmem:[#allocation21 + $0x760] ss:$16 sps:$4 sm:$0xff]   ;;  %v16650_v27 = vld [vmem:[#allocation21 + $0x584] ss:$16 sps:$4 sm:$0xff]  }
 0xb16   : > { %9513 = vmatprep.subr.bf16.mxu1 %v16587_v55  ;;  %v16653_v55 = vld [vmem:[#allocation21 + $0x784] ss:$16 sps:$4 sm:$0xff]  }
 0xb18   : > { %9473 = vmatpush1.bf16.msra.mxu0 %v16582_v33  ;;  %v16648_v33 = vld [vmem:[#allocation21 + $0x580] ss:$16 sps:$4 sm:$0xff]  }
 0xb19   : > { %9514 = vmatpush1.bf16.msra.mxu1 %v16585_v47  ;;  %9474 = vmatprep.subr.bf16.mxu0 %v16590_v3  ;;  %v16651_v47 = vld [vmem:[#allocation21 + $0x780] ss:$16 sps:$4 sm:$0xff]   ;;  %v16656_v3 = vld [vmem:[#allocation21 + $0x5a4] ss:$16 sps:$4 sm:$0xff]  }
 0xb1a   : > { %9515 = vmatprep.subr.bf16.mxu1 %v16593_v54  ;;  %v16659_v54 = vld [vmem:[#allocation21 + $0x7a4] ss:$16 sps:$4 sm:$0xff]  }
 0xb1c   : > { %9475 = vmatpush1.bf16.msra.mxu0 %v16588_v56  ;;  %v16654_v56 = vld [vmem:[#allocation21 + $0x5a0] ss:$16 sps:$4 sm:$0xff]  }
 0xb1d   : > { %9516 = vmatpush1.bf16.msra.mxu1 %v16591_v57  ;;  %9476 = vmatprep.subr.bf16.mxu0 %v16596_v58  ;;  %v16657_v57 = vld [vmem:[#allocation21 + $0x7a0] ss:$16 sps:$4 sm:$0xff]   ;;  %v16662_v58 = vld [vmem:[#allocation21 + $0x5c4] ss:$16 sps:$4 sm:$0xff]  }
 0xb1e   : > { %9517 = vmatprep.subr.bf16.mxu1 %v16599_v14  ;;  %v16665_v14 = vld [vmem:[#allocation21 + $0x7c4] ss:$16 sps:$4 sm:$0xff]  }
 0xb20   : > { %9477 = vmatpush1.bf16.msra.mxu0 %v16594_v60  ;;  %v16660_v60 = vld [vmem:[#allocation21 + $0x5c0] ss:$16 sps:$4 sm:$0xff]  }
 0xb21   : > { %9518 = vmatpush1.bf16.msra.mxu1 %v16597_v15  ;;  %9478 = vmatprep.subr.bf16.mxu0 %v16602_v63  ;;  %v16663_v15 = vld [vmem:[#allocation21 + $0x7c0] ss:$16 sps:$4 sm:$0xff]   ;;  %v16668_v63 = vld [vmem:[#allocation21 + $0x5e4] ss:$16 sps:$4 sm:$0xff]  }
 0xb22   : > { %9519 = vmatprep.subr.bf16.mxu1 %v16605_v0  ;;  %v16671_v0 = vld [vmem:[#allocation21 + $0x7e4] ss:$16 sps:$4 sm:$0xff]  }
 0xb24   : > { %9479 = vmatpush1.bf16.msra.mxu0 %v16600_v1  ;;  %v16666_v1 = vld [vmem:[#allocation21 + $0x5e0] ss:$16 sps:$4 sm:$0xff]  }
 0xb25   : > { %9520 = vmatpush1.bf16.msra.mxu1 %v16603_v2  ;;  %9480 = vmatprep.subr.bf16.mxu0 %v16608_v10  ;;  %v16669_v2 = vld [vmem:[#allocation21 + $0x7e0] ss:$16 sps:$4 sm:$0xff]   ;;  %v16674_v10 = vld [vmem:[#allocation21 + $0xc] ss:$16 sps:$4 sm:$0xff]  }
 0xb26   : > { %9521 = vmatprep.subr.bf16.mxu1 %v16611_v7  ;;  %v16677_v7 = vld [vmem:[#allocation21 + $0x20c] ss:$16 sps:$4 sm:$0xff]  }
 0xb28   : > { %9481 = vmatpush1.bf16.msra.mxu0 %v16606_v31  ;;  %v6121_v31 = vrot.slane %v19286_v48, %v1378_v5 }
 0xb29   : > { %9522 = vmatpush1.bf16.msra.mxu1 %v16609_v9  ;;  %9482 = vmatprep.subr.bf16.mxu0 %v16614_v35  ;;  %v6129_v9 = vrot.slane %v19286_v48, %v1386_v37  ;;  %v6125_v35 = vrot.slane %v19286_v48, %v1382_v39 }
 0xb2a   : > { %9523 = vmatprep.subr.bf16.mxu1 %v16617_v52  ;;  %v6133_v52 = vrot.slane %v19286_v48, %v1390_v40 }
 0xb2c   : > { %9483 = vmatpush1.bf16.msra.mxu0 %v16612_v16 }
 0xb2d   : > { %9524 = vmatpush1.bf16.msra.mxu1 %v16615_v20  ;;  %9484 = vmatprep.subr.bf16.mxu0 %v16620_v53 }
 0xb2e   : > { %9525 = vmatprep.subr.bf16.mxu1 %v16623_v17 }
 0xb30   : > { %9485 = vmatpush1.bf16.msra.mxu0 %v16618_v18 }
 0xb31   : > { %9526 = vmatpush1.bf16.msra.mxu1 %v16621_v19  ;;  %9486 = vmatprep.subr.bf16.mxu0 %v16626_v22 }
 0xb32   : > { %9527 = vmatprep.subr.bf16.mxu1 %v16629_v24 }
 0xb34   : > { %9487 = vmatpush1.bf16.msra.mxu0 %v16624_v25 }
 0xb35   : > { %9528 = vmatpush1.bf16.msra.mxu1 %v16627_v61  ;;  %9488 = vmatprep.subr.bf16.mxu0 %v16632_v26 }
 0xb36   : > { %9529 = vmatprep.subr.bf16.mxu1 %v16635_v62 }
 0xb38   : > { %9489 = vmatpush1.bf16.msra.mxu0 %v16630_v28 }
 0xb39   : > { %9530 = vmatpush1.bf16.msra.mxu1 %v16633_v29  ;;  %9490 = vmatprep.subr.bf16.mxu0 %v16638_v59 }
 0xb3a   : > { %9531 = vmatprep.subr.bf16.mxu1 %v16641_v30 }
 0xb3c   : > { %9491 = vmatpush1.bf16.msra.mxu0 %v16636_v11 }
 0xb3d   : > { %9532 = vmatpush1.bf16.msra.mxu1 %v16639_v43  ;;  %9492 = vmatprep.subr.bf16.mxu0 %v16644_v21 }
 0xb3e   : > { %9533 = vmatprep.subr.bf16.mxu1 %v16647_v23 }
 0xb40   : > { %9493 = vmatpush1.bf16.msra.mxu0 %v16642_v46 }
 0xb41   : > { %9534 = vmatpush1.bf16.msra.mxu1 %v16645_v12  ;;  %9494 = vmatprep.subr.bf16.mxu0 %v16650_v27 }
 0xb42   : > { %9535 = vmatprep.subr.bf16.mxu1 %v16653_v55 }
 0xb44   : > { %9495 = vmatpush1.bf16.msra.mxu0 %v16648_v33 }
 0xb45   : > { %9536 = vmatpush1.bf16.msra.mxu1 %v16651_v47  ;;  %9496 = vmatprep.subr.bf16.mxu0 %v16656_v3 }
 0xb46   : > { %9537 = vmatprep.subr.bf16.mxu1 %v16659_v54 }
 0xb48   : > { %9497 = vmatpush1.bf16.msra.mxu0 %v16654_v56 }
 0xb49   : > { %9538 = vmatpush1.bf16.msra.mxu1 %v16657_v57  ;;  %9498 = vmatprep.subr.bf16.mxu0 %v16662_v58 }
 0xb4a   : > { %9539 = vmatprep.subr.bf16.mxu1 %v16665_v14 }
 0xb4c   : > { %9499 = vmatpush1.bf16.msra.mxu0 %v16660_v60 }
 0xb4d   : > { %9540 = vmatpush1.bf16.msra.mxu1 %v16663_v15  ;;  %9500 = vmatprep.subr.bf16.mxu0 %v16668_v63 }
 0xb4e   : > { %9541 = vmatprep.subr.bf16.mxu1 %v16671_v0 }
 0xb50   : > { %9501 = vmatpush1.bf16.msra.mxu0 %v16666_v1 }
 0xb51   : > { %9542 = vmatpush1.bf16.msra.mxu1 %v16669_v2  ;;  %9552 = vmatprep.subr.bf16.mxu0 %v16674_v10 }
 0xb52   : > { %9593 = vmatprep.subr.bf16.mxu1 %v16677_v7 }
 0xb70   : > { %v7661_v16 = vpop.f32.mrb[40].mxu0 }
 0xb71   : > { %v15417_v20 = vadd.f32 %v7661_v16, %v6121_v31  ;;  %v7743_v53 = vpop.f32.mrb[40].mxu1  ;;  %v7663_v17 = vpop.f32.mrb[41].mxu0 }
 0xb72   : > { %v15419_v18 = vadd.f32 %v7743_v53, %v6129_v9  ;;  %v15418_v19 = vadd.f32 %v7663_v17, %v6125_v35  ;;  %v7745_v22 = vpop.f32.mrb[41].mxu1  ;;  %v7665_v5 = vpop.f32.mrb[42].mxu0  ;;  %v16675_v53 = vld [vmem:[#allocation21 + $0x208] ss:$16 sps:$4 sm:$0xff]  }
 0xb73   : > { %v7754_v24 = vmul.f32 %v15417_v20, %v15417_v20  ;;  %v15420_v25 = vadd.f32 %v7745_v22, %v6133_v52  ;;  %v7747_v61 = vpop.f32.mrb[42].mxu1  ;;  %v7666_v37 = vpop.f32.mrb[43].mxu0  ;;  %v16672_v52 = vld [vmem:[#allocation21 + $0x8] ss:$16 sps:$4 sm:$0xff]   ;;  %v16680_v5 = vld [vmem:[#allocation21 + $0x2c] ss:$16 sps:$4 sm:$0xff]  }
 0xb74   : > { %v7756_v26 = vmul.f32 %v15419_v18, %v15419_v18  ;;  %v7755_v62 = vmul.f32 %v15418_v19, %v15418_v19  ;;  %v7748_v28 = vpop.f32.mrb[43].mxu1  ;;  %v16684_v61 = vld [vmem:[#allocation21 + $0x48] ss:$16 sps:$4 sm:$0xff]  }
 0xb75   : > { %v7762_v39 = vmul.f32 %v15417_v20, %v7754_v24  ;;  %v7757_v29 = vmul.f32 %v15420_v25, %v15420_v25  ;;  %v16686_v24 = vld [vmem:[#allocation21 + $0x4c] ss:$16 sps:$4 sm:$0xff]   ;;  %v16687_v37 = vld [vmem:[#allocation21 + $0x248] ss:$16 sps:$4 sm:$0xff]  }
 0xb76   : > { %v7764_v38 = vmul.f32 %v15419_v18, %v7756_v26  ;;  %v7763_v59 = vmul.f32 %v15418_v19, %v7755_v62  ;;  %v16692_v26 = vld [vmem:[#allocation21 + $0x6c] ss:$16 sps:$4 sm:$0xff]   ;;  %v16690_v28 = vld [vmem:[#allocation21 + $0x68] ss:$16 sps:$4 sm:$0xff]  }
 0xb77   : > { %v7770_v40 = vmul.f32 0.044715, %v7762_v39  ;;  %v7765_v48 = vmul.f32 %v15420_v25, %v7757_v29  ;;  %v16695_v62 = vld [vmem:[#allocation21 + $0x26c] ss:$16 sps:$4 sm:$0xff]  }
 0xb78   : > { %v7772_v30 = vmul.f32 0.044715, %v7764_v38  ;;  %v7771_v11 = vmul.f32 0.044715, %v7763_v59  ;;  %v16698_v39 = vld [vmem:[#allocation21 + $0x8c] ss:$16 sps:$4 sm:$0xff]  }
 0xb79   : > { %v7778_v43 = vadd.f32 %v15417_v20, %v7770_v40  ;;  %v7773_v21 = vmul.f32 0.044715, %v7765_v48  ;;  %v16701_v29 = vld [vmem:[#allocation21 + $0x28c] ss:$16 sps:$4 sm:$0xff]   ;;  %v16699_v38 = vld [vmem:[#allocation21 + $0x288] ss:$16 sps:$4 sm:$0xff]  }
 0xb7a   : > { %v7780_v23 = vadd.f32 %v15419_v18, %v7772_v30  ;;  %v7779_v46 = vadd.f32 %v15418_v19, %v7771_v11  ;;  %v16704_v59 = vld [vmem:[#allocation21 + $0xac] ss:$16 sps:$4 sm:$0xff]   ;;  %v16702_v48 = vld [vmem:[#allocation21 + $0xa8] ss:$16 sps:$4 sm:$0xff]  }
 0xb7b   : > { %v7786_v12 = vmul.f32 0.7978846, %v7778_v43  ;;  %v7781_v27 = vadd.f32 %v15420_v25, %v7773_v21  ;;  %v16707_v40 = vld [vmem:[#allocation21 + $0x2ac] ss:$16 sps:$4 sm:$0xff]   ;;  %v16705_v30 = vld [vmem:[#allocation21 + $0x2a8] ss:$16 sps:$4 sm:$0xff]  }
 0xb7c   : > { %v7788_v55 = vmul.f32 0.7978846, %v7780_v23  ;;  %v7787_v33 = vmul.f32 0.7978846, %v7779_v46  ;;  %v16710_v11 = vld [vmem:[#allocation21 + $0xcc] ss:$16 sps:$4 sm:$0xff]  }
 0xb7d   : > { %17498 = vtanh.f32 %v7786_v12  ;;  %v7789_v47 = vmul.f32 0.7978846, %v7781_v27  ;;  %v16713_v43 = vld [vmem:[#allocation21 + $0x2cc] ss:$16 sps:$4 sm:$0xff]   ;;  %v16708_v21 = vld [vmem:[#allocation21 + $0xc8] ss:$16 sps:$4 sm:$0xff]  }
 0xb7e   : > { %17500 = vtanh.f32 %v7788_v55  ;;  %v16711_v23 = vld [vmem:[#allocation21 + $0x2c8] ss:$16 sps:$4 sm:$0xff]   ;;  %v16716_v46 = vld [vmem:[#allocation21 + $0xec] ss:$16 sps:$4 sm:$0xff]  }
 0xb7f   : > { %17502 = vtanh.f32 %v7787_v33  ;;  %v16719_v12 = vld [vmem:[#allocation21 + $0x2ec] ss:$16 sps:$4 sm:$0xff]   ;;  %v16714_v27 = vld [vmem:[#allocation21 + $0xe8] ss:$16 sps:$4 sm:$0xff]  }
 0xb80   : > { %17504 = vtanh.f32 %v7789_v47  ;;  %v16717_v55 = vld [vmem:[#allocation21 + $0x2e8] ss:$16 sps:$4 sm:$0xff]   ;;  %v16722_v33 = vld [vmem:[#allocation21 + $0x10c] ss:$16 sps:$4 sm:$0xff]  }
 0xb81   : > { %v16725_v47 = vld [vmem:[#allocation21 + $0x30c] ss:$16 sps:$4 sm:$0xff]  }
 0xb87   : > { %v17499_v3 = vpop.eup %17498 }
 0xb88   : > { %v17501_v54 = vpop.eup %17500  ;;  %v7802_v56 = vadd.f32 1.0, %v17499_v3  ;;  %v16720_v3 = vld [vmem:[#allocation21 + $0x108] ss:$16 sps:$4 sm:$0xff]  }
 0xb89   : > { %v17503_v57 = vpop.eup %17502  ;;  %v7804_v58 = vadd.f32 1.0, %v17501_v54  ;;  %v16723_v54 = vld [vmem:[#allocation21 + $0x308] ss:$16 sps:$4 sm:$0xff]  }
 0xb8a   : > { %v17505_v14 = vpop.eup %17504  ;;  %v7803_v60 = vadd.f32 1.0, %v17503_v57  ;;  %v7810_v15 = vmul.f32 0.5, %v7802_v56  ;;  %v16728_v56 = vld [vmem:[#allocation21 + $0x12c] ss:$16 sps:$4 sm:$0xff]  }
 0xb8b   : > { %v7805_v63 = vadd.f32 1.0, %v17505_v14  ;;  %v7812_v0 = vmul.f32 0.5, %v7804_v58  ;;  %v16731_v57 = vld [vmem:[#allocation21 + $0x32c] ss:$16 sps:$4 sm:$0xff]   ;;  %v16726_v58 = vld [vmem:[#allocation21 + $0x128] ss:$16 sps:$4 sm:$0xff]  }
 0xb8c   : > { %v7811_v1 = vmul.f32 0.5, %v7803_v60  ;;  %v7818_v10 = vmul.f32 %v15417_v20, %v7810_v15  ;;  %v16683_v20 = vld [vmem:[#allocation21 + $0x22c] ss:$16 sps:$4 sm:$0xff]   ;;  %v16729_v14 = vld [vmem:[#allocation21 + $0x328] ss:$16 sps:$4 sm:$0xff]  }
 0xb8d   : > { %v7813_v2 = vmul.f32 0.5, %v7805_v63  ;;  %v7820_v31 = vmul.f32 %v15419_v18, %v7812_v0  ;;  %v16678_v18 = vld [vmem:[#allocation21 + $0x28] ss:$16 sps:$4 sm:$0xff]   ;;  %v16734_v60 = vld [vmem:[#allocation21 + $0x14c] ss:$16 sps:$4 sm:$0xff]  }
 0xb8e   : > { %v7819_v7 = vmul.f32 %v15418_v19, %v7811_v1  ;;  %v19324_v17 = vpack.c.bf16 %v7818_v10, %v7818_v10  ;;  %v16681_v19 = vld [vmem:[#allocation21 + $0x228] ss:$16 sps:$4 sm:$0xff]   ;;  %v16737_v15 = vld [vmem:[#allocation21 + $0x34c] ss:$16 sps:$4 sm:$0xff]  }
 0xb8f   : > { %v7821_v9 = vmul.f32 %v15420_v25, %v7813_v2  ;;  %v19327_v22 = vpack.c.bf16 %v7820_v31, %v7820_v31  ;;  %v16689_v25 = vld [vmem:[#allocation21 + $0x24c] ss:$16 sps:$4 sm:$0xff]   ;;  %v16732_v63 = vld [vmem:[#allocation21 + $0x148] ss:$16 sps:$4 sm:$0xff]  }
 0xb90   : > { %v19320_v35 = vpack.c.bf16 %v7819_v7, %v7819_v7  ;;  %v16735_v0 = vld [vmem:[#allocation21 + $0x348] ss:$16 sps:$4 sm:$0xff]   ;;  %v16740_v1 = vld [vmem:[#allocation21 + $0x16c] ss:$16 sps:$4 sm:$0xff]  }
 0xb91   : > { %v19322_v16 = vpack.c.bf16 %v7821_v9, %v7821_v9  ;;  %v16743_v2 = vld [vmem:[#allocation21 + $0x36c] ss:$16 sps:$4 sm:$0xff]   ;;  %v16738_v10 = vld [vmem:[#allocation21 + $0x168] ss:$16 sps:$4 sm:$0xff]  }
 0xb92   : > { %9502 = vmatprep.mubr.bf16.mxu0 %v19320_v35  ;;  %v16741_v7 = vld [vmem:[#allocation21 + $0x368] ss:$16 sps:$4 sm:$0xff]   ;;  %v16746_v31 = vld [vmem:[#allocation21 + $0x18c] ss:$16 sps:$4 sm:$0xff]  }
 0xb93   : > { %9543 = vmatprep.mubr.bf16.mxu1 %v19322_v16  ;;  %9503 = vmatmul.mubr.bf16.vlgmr.msra.gmra.mrb[48].mxu0 %v19324_v17  ;;  %v16749_v9 = vld [vmem:[#allocation21 + $0x38c] ss:$16 sps:$4 sm:$0xff]  }
 0xb94   : > { %9544 = vmatmul.mubr.bf16.vlgmr.msra.gmra.mrb[48].mxu1 %v19327_v22  ;;  %9553 = vmatpush1.bf16.msra.mxu0 %v16672_v52  ;;  %v16744_v52 = vld [vmem:[#allocation21 + $0x188] ss:$16 sps:$4 sm:$0xff]  }
 0xb95   : > { %9594 = vmatpush1.bf16.msra.mxu1 %v16675_v53  ;;  %9584 = vmatprep.mubr.bf16.mxu0 %v19296_v44  ;;  %v16693_v44 = vld [vmem:[#allocation21 + $0x268] ss:$16 sps:$4 sm:$0xff]  }
 0xb96   : > { %9625 = vmatprep.mubr.bf16.mxu1 %v19298_v41  ;;  %9554 = vmatprep.subr.bf16.mxu0 %v16680_v5  ;;  %v16696_v41 = vld [vmem:[#allocation21 + $0x88] ss:$16 sps:$4 sm:$0xff]   ;;  %v16752_v5 = vld [vmem:[#allocation21 + $0x1ac] ss:$16 sps:$4 sm:$0xff]  }
 0xb97   : > { %9595 = vmatprep.subr.bf16.mxu1 %v16683_v20  ;;  %v16747_v53 = vld [vmem:[#allocation21 + $0x388] ss:$16 sps:$4 sm:$0xff]   ;;  %v16755_v20 = vld [vmem:[#allocation21 + $0x3ac] ss:$16 sps:$4 sm:$0xff]  }
 0xb98   : > { %9555 = vmatpush1.bf16.msra.mxu0 %v16678_v18  ;;  %v16750_v18 = vld [vmem:[#allocation21 + $0x1a8] ss:$16 sps:$4 sm:$0xff]  }
 0xb99   : > { %9596 = vmatpush1.bf16.msra.mxu1 %v16681_v19  ;;  %9556 = vmatprep.subr.bf16.mxu0 %v16686_v24  ;;  %v16753_v19 = vld [vmem:[#allocation21 + $0x3a8] ss:$16 sps:$4 sm:$0xff]   ;;  %v16758_v24 = vld [vmem:[#allocation21 + $0x1cc] ss:$16 sps:$4 sm:$0xff]  }
 0xb9a   : > { %9597 = vmatprep.subr.bf16.mxu1 %v16689_v25  ;;  %v16761_v25 = vld [vmem:[#allocation21 + $0x3cc] ss:$16 sps:$4 sm:$0xff]  }
 0xb9c   : > { %9557 = vmatpush1.bf16.msra.mxu0 %v16684_v61  ;;  %v16756_v61 = vld [vmem:[#allocation21 + $0x1c8] ss:$16 sps:$4 sm:$0xff]  }
 0xb9d   : > { %9598 = vmatpush1.bf16.msra.mxu1 %v16687_v37  ;;  %9558 = vmatprep.subr.bf16.mxu0 %v16692_v26  ;;  %v16759_v37 = vld [vmem:[#allocation21 + $0x3c8] ss:$16 sps:$4 sm:$0xff]   ;;  %v16764_v26 = vld [vmem:[#allocation21 + $0x1ec] ss:$16 sps:$4 sm:$0xff]  }
 0xb9e   : > { %9599 = vmatprep.subr.bf16.mxu1 %v16695_v62  ;;  %v16767_v62 = vld [vmem:[#allocation21 + $0x3ec] ss:$16 sps:$4 sm:$0xff]  }
 0xba0   : > { %9559 = vmatpush1.bf16.msra.mxu0 %v16690_v28  ;;  %v16762_v28 = vld [vmem:[#allocation21 + $0x1e8] ss:$16 sps:$4 sm:$0xff]  }
 0xba1   : > { %9600 = vmatpush1.bf16.msra.mxu1 %v16693_v44  ;;  %9560 = vmatprep.subr.bf16.mxu0 %v16698_v39  ;;  %v16765_v44 = vld [vmem:[#allocation21 + $0x3e8] ss:$16 sps:$4 sm:$0xff]   ;;  %v16770_v39 = vld [vmem:[#allocation21 + $0x40c] ss:$16 sps:$4 sm:$0xff]  }
 0xba2   : > { %9601 = vmatprep.subr.bf16.mxu1 %v16701_v29  ;;  %v16773_v29 = vld [vmem:[#allocation21 + $0x60c] ss:$16 sps:$4 sm:$0xff]  }
 0xba4   : > { %9561 = vmatpush1.bf16.msra.mxu0 %v16696_v41  ;;  %v16768_v41 = vld [vmem:[#allocation21 + $0x408] ss:$16 sps:$4 sm:$0xff]  }
 0xba5   : > { %9602 = vmatpush1.bf16.msra.mxu1 %v16699_v38  ;;  %9562 = vmatprep.subr.bf16.mxu0 %v16704_v59  ;;  %v16771_v38 = vld [vmem:[#allocation21 + $0x608] ss:$16 sps:$4 sm:$0xff]   ;;  %v16776_v59 = vld [vmem:[#allocation21 + $0x42c] ss:$16 sps:$4 sm:$0xff]  }
 0xba6   : > { %9603 = vmatprep.subr.bf16.mxu1 %v16707_v40  ;;  %v16779_v40 = vld [vmem:[#allocation21 + $0x62c] ss:$16 sps:$4 sm:$0xff]  }
 0xba8   : > { %9563 = vmatpush1.bf16.msra.mxu0 %v16702_v48  ;;  %v16774_v48 = vld [vmem:[#allocation21 + $0x428] ss:$16 sps:$4 sm:$0xff]  }
 0xba9   : > { %9604 = vmatpush1.bf16.msra.mxu1 %v16705_v30  ;;  %9564 = vmatprep.subr.bf16.mxu0 %v16710_v11  ;;  %v16777_v30 = vld [vmem:[#allocation21 + $0x628] ss:$16 sps:$4 sm:$0xff]   ;;  %v16782_v11 = vld [vmem:[#allocation21 + $0x44c] ss:$16 sps:$4 sm:$0xff]  }
 0xbaa   : > { %9605 = vmatprep.subr.bf16.mxu1 %v16713_v43  ;;  %v16785_v43 = vld [vmem:[#allocation21 + $0x64c] ss:$16 sps:$4 sm:$0xff]  }
 0xbac   : > { %9565 = vmatpush1.bf16.msra.mxu0 %v16708_v21  ;;  %v16780_v21 = vld [vmem:[#allocation21 + $0x448] ss:$16 sps:$4 sm:$0xff]  }
 0xbad   : > { %9606 = vmatpush1.bf16.msra.mxu1 %v16711_v23  ;;  %9566 = vmatprep.subr.bf16.mxu0 %v16716_v46  ;;  %v16788_v23 = vld [vmem:[#allocation21 + $0x46c] ss:$16 sps:$4 sm:$0xff]   ;;  %v16786_v46 = vld [vmem:[#allocation21 + $0x468] ss:$16 sps:$4 sm:$0xff]  }
 0xbae   : > { %9607 = vmatprep.subr.bf16.mxu1 %v16719_v12  ;;  %v16794_v12 = vld [vmem:[#allocation21 + $0x48c] ss:$16 sps:$4 sm:$0xff]  }
 0xbb0   : > { %9567 = vmatpush1.bf16.msra.mxu0 %v16714_v27  ;;  %v16797_v27 = vld [vmem:[#allocation21 + $0x68c] ss:$16 sps:$4 sm:$0xff]  }
 0xbb1   : > { %9608 = vmatpush1.bf16.msra.mxu1 %v16717_v55  ;;  %9568 = vmatprep.subr.bf16.mxu0 %v16722_v33  ;;  %v19338_v55 = vld [vmem:[#allocation22] sm:$0xf]  ;;  %v16795_v33 = vld [vmem:[#allocation21 + $0x688] ss:$16 sps:$4 sm:$0xff]  }
 0xbb2   : > { %9609 = vmatprep.subr.bf16.mxu1 %v16725_v47  ;;  %v16800_v47 = vld [vmem:[#allocation21 + $0x4ac] ss:$16 sps:$4 sm:$0xff]  }
 0xbb4   : > { %9569 = vmatpush1.bf16.msra.mxu0 %v16720_v3  ;;  %v16803_v3 = vld [vmem:[#allocation21 + $0x6ac] ss:$16 sps:$4 sm:$0xff]  }
 0xbb5   : > { %9610 = vmatpush1.bf16.msra.mxu1 %v16723_v54  ;;  %9570 = vmatprep.subr.bf16.mxu0 %v16728_v56  ;;  %v8091_v54 = vrot.slane %v19338_v55, %v19022_v42  ;;  %v16798_v56 = vld [vmem:[#allocation21 + $0x4a8] ss:$16 sps:$4 sm:$0xff]  }
 0xbb6   : > { %9611 = vmatprep.subr.bf16.mxu1 %v16731_v57  ;;  %v8095_v57 = vrot.slane %v19338_v55, %v19028_v49 }
 0xbb8   : > { %9571 = vmatpush1.bf16.msra.mxu0 %v16726_v58  ;;  %v16801_v58 = vld [vmem:[#allocation21 + $0x6a8] ss:$16 sps:$4 sm:$0xff]  }
 0xbb9   : > { %9612 = vmatpush1.bf16.msra.mxu1 %v16729_v14  ;;  %9572 = vmatprep.subr.bf16.mxu0 %v16734_v60  ;;  %v16806_v14 = vld [vmem:[#allocation21 + $0x4cc] ss:$16 sps:$4 sm:$0xff]  }
 0xbba   : > { %9613 = vmatprep.subr.bf16.mxu1 %v16737_v15  ;;  %v16809_v15 = vld [vmem:[#allocation21 + $0x6cc] ss:$16 sps:$4 sm:$0xff]  }
 0xbbc   : > { %9573 = vmatpush1.bf16.msra.mxu0 %v16732_v63 }
 0xbbd   : > { %9614 = vmatpush1.bf16.msra.mxu1 %v16735_v0  ;;  %9574 = vmatprep.subr.bf16.mxu0 %v16740_v1 }
 0xbbe   : > { %9615 = vmatprep.subr.bf16.mxu1 %v16743_v2 }
 0xbc0   : > { %9575 = vmatpush1.bf16.msra.mxu0 %v16738_v10 }
 0xbc1   : > { %9616 = vmatpush1.bf16.msra.mxu1 %v16741_v7  ;;  %9576 = vmatprep.subr.bf16.mxu0 %v16746_v31  ;;  %v16804_v31 = vld [vmem:[#allocation21 + $0x4c8] ss:$16 sps:$4 sm:$0xff]  }
 0xbc2   : > { %9617 = vmatprep.subr.bf16.mxu1 %v16749_v9 }
 0xbc4   : > { %9577 = vmatpush1.bf16.msra.mxu0 %v16744_v52 }
 0xbc5   : > { %9618 = vmatpush1.bf16.msra.mxu1 %v16747_v53  ;;  %9578 = vmatprep.subr.bf16.mxu0 %v16752_v5  ;;  %v16807_v5 = vld [vmem:[#allocation21 + $0x6c8] ss:$16 sps:$4 sm:$0xff]  }
 0xbc6   : > { %9619 = vmatprep.subr.bf16.mxu1 %v16755_v20  ;;  %v16812_v20 = vld [vmem:[#allocation21 + $0x4ec] ss:$16 sps:$4 sm:$0xff]  }
 0xbc8   : > { %9579 = vmatpush1.bf16.msra.mxu0 %v16750_v18 }
 0xbc9   : > { %9620 = vmatpush1.bf16.msra.mxu1 %v16753_v19  ;;  %9580 = vmatprep.subr.bf16.mxu0 %v16758_v24  ;;  %v16815_v24 = vld [vmem:[#allocation21 + $0x6ec] ss:$16 sps:$4 sm:$0xff]  }
 0xbca   : > { %9621 = vmatprep.subr.bf16.mxu1 %v16761_v25  ;;  %v16810_v25 = vld [vmem:[#allocation21 + $0x4e8] ss:$16 sps:$4 sm:$0xff]  }
 0xbcc   : > { %9581 = vmatpush1.bf16.msra.mxu0 %v16756_v61  ;;  %v16813_v61 = vld [vmem:[#allocation21 + $0x6e8] ss:$16 sps:$4 sm:$0xff]  }
 0xbcd   : > { %9622 = vmatpush1.bf16.msra.mxu1 %v16759_v37  ;;  %9582 = vmatprep.subr.bf16.mxu0 %v16764_v26  ;;  %v16818_v37 = vld [vmem:[#allocation21 + $0x50c] ss:$16 sps:$4 sm:$0xff]  }
 0xbce   : > { %9623 = vmatprep.subr.bf16.mxu1 %v16767_v62  ;;  %v16821_v26 = vld [vmem:[#allocation21 + $0x70c] ss:$16 sps:$4 sm:$0xff]   ;;  %v16816_v62 = vld [vmem:[#allocation21 + $0x508] ss:$16 sps:$4 sm:$0xff]  }
 0xbd0   : > { %9583 = vmatpush1.bf16.msra.mxu0 %v16762_v28  ;;  %v16819_v28 = vld [vmem:[#allocation21 + $0x708] ss:$16 sps:$4 sm:$0xff]  }
 0xbd1   : > { %9624 = vmatpush1.bf16.msra.mxu1 %v16765_v44  ;;  %9634 = vmatprep.subr.bf16.mxu0 %v16770_v39  ;;  %v16824_v44 = vld [vmem:[#allocation21 + $0x52c] ss:$16 sps:$4 sm:$0xff]  }
 0xbd2   : > { %9675 = vmatprep.subr.bf16.mxu1 %v16773_v29  ;;  %v16827_v39 = vld [vmem:[#allocation21 + $0x72c] ss:$16 sps:$4 sm:$0xff]   ;;  %v16822_v29 = vld [vmem:[#allocation21 + $0x528] ss:$16 sps:$4 sm:$0xff]  }
 0xbd3   : > { %9585 = vmatmul.mubr.bf16.vlgmr.msra.gmra.mrb[52].mxu0 %v19300_v51  ;;  %v16783_v51 = vld [vmem:[#allocation21 + $0x648] ss:$16 sps:$4 sm:$0xff]  }
 0xbd4   : > { %9626 = vmatmul.mubr.bf16.vlgmr.msra.gmra.mrb[52].mxu1 %v19303_v13  ;;  %9635 = vmatpush1.bf16.msra.mxu0 %v16768_v41  ;;  %v16791_v13 = vld [vmem:[#allocation21 + $0x66c] ss:$16 sps:$4 sm:$0xff]   ;;  %v16825_v41 = vld [vmem:[#allocation21 + $0x728] ss:$16 sps:$4 sm:$0xff]  }
 0xbd5   : > { %9666 = vmatprep.mubr.bf16.mxu0 %v19320_v35  ;;  %9676 = vmatpush1.bf16.msra.mxu1 %v16771_v38  ;;  %v16789_v35 = vld [vmem:[#allocation21 + $0x668] ss:$16 sps:$4 sm:$0xff]   ;;  %v16830_v38 = vld [vmem:[#allocation21 + $0x54c] ss:$16 sps:$4 sm:$0xff]  }
 0xbd6   : > { %9707 = vmatprep.mubr.bf16.mxu1 %v19322_v16  ;;  %9636 = vmatprep.subr.bf16.mxu0 %v16776_v59  ;;  %v16792_v16 = vld [vmem:[#allocation21 + $0x488] ss:$16 sps:$4 sm:$0xff]   ;;  %v16833_v59 = vld [vmem:[#allocation21 + $0x74c] ss:$16 sps:$4 sm:$0xff]  }
 0xbd7   : > { %9677 = vmatprep.subr.bf16.mxu1 %v16779_v40  ;;  %v16828_v40 = vld [vmem:[#allocation21 + $0x548] ss:$16 sps:$4 sm:$0xff]  }
 0xbd8   : > { %9637 = vmatpush1.bf16.msra.mxu0 %v16774_v48  ;;  %v16831_v48 = vld [vmem:[#allocation21 + $0x748] ss:$16 sps:$4 sm:$0xff]  }
 0xbd9   : > { %9678 = vmatpush1.bf16.msra.mxu1 %v16777_v30  ;;  %9638 = vmatprep.subr.bf16.mxu0 %v16782_v11  ;;  %v16836_v30 = vld [vmem:[#allocation21 + $0x56c] ss:$16 sps:$4 sm:$0xff]  }
 0xbda   : > { %9679 = vmatprep.subr.bf16.mxu1 %v16785_v43  ;;  %v16839_v11 = vld [vmem:[#allocation21 + $0x76c] ss:$16 sps:$4 sm:$0xff]   ;;  %v16834_v43 = vld [vmem:[#allocation21 + $0x568] ss:$16 sps:$4 sm:$0xff]  }
 0xbdc   : > { %9639 = vmatpush1.bf16.msra.mxu0 %v16780_v21  ;;  %v16837_v21 = vld [vmem:[#allocation21 + $0x768] ss:$16 sps:$4 sm:$0xff]  }
 0xbdd   : > { %9680 = vmatpush1.bf16.msra.mxu1 %v16783_v51  ;;  %9640 = vmatprep.subr.bf16.mxu0 %v16788_v23  ;;  %v16842_v51 = vld [vmem:[#allocation21 + $0x58c] ss:$16 sps:$4 sm:$0xff]  }
 0xbde   : > { %9681 = vmatprep.subr.bf16.mxu1 %v16791_v13  ;;  %v16845_v23 = vld [vmem:[#allocation21 + $0x78c] ss:$16 sps:$4 sm:$0xff]   ;;  %v16840_v13 = vld [vmem:[#allocation21 + $0x588] ss:$16 sps:$4 sm:$0xff]  }
 0xbe0   : > { %9641 = vmatpush1.bf16.msra.mxu0 %v16786_v46  ;;  %v16843_v46 = vld [vmem:[#allocation21 + $0x788] ss:$16 sps:$4 sm:$0xff]  }
 0xbe1   : > { %9682 = vmatpush1.bf16.msra.mxu1 %v16789_v35  ;;  %9642 = vmatprep.subr.bf16.mxu0 %v16794_v12  ;;  %v16848_v35 = vld [vmem:[#allocation21 + $0x5ac] ss:$16 sps:$4 sm:$0xff]  }
 0xbe2   : > { %9683 = vmatprep.subr.bf16.mxu1 %v16797_v27  ;;  %v16851_v12 = vld [vmem:[#allocation21 + $0x7ac] ss:$16 sps:$4 sm:$0xff]   ;;  %v16846_v27 = vld [vmem:[#allocation21 + $0x5a8] ss:$16 sps:$4 sm:$0xff]  }
 0xbe4   : > { %9643 = vmatpush1.bf16.msra.mxu0 %v16792_v16  ;;  %v16849_v16 = vld [vmem:[#allocation21 + $0x7a8] ss:$16 sps:$4 sm:$0xff]  }
 0xbe5   : > { %9684 = vmatpush1.bf16.msra.mxu1 %v16795_v33  ;;  %9644 = vmatprep.subr.bf16.mxu0 %v16800_v47  ;;  %v16854_v33 = vld [vmem:[#allocation21 + $0x5cc] ss:$16 sps:$4 sm:$0xff]  }
 0xbe6   : > { %v9422_v60 = vpop.f32.mrb[44].mxu0  ;;  %9685 = vmatprep.subr.bf16.mxu1 %v16803_v3  ;;  %v16857_v47 = vld [vmem:[#allocation21 + $0x7cc] ss:$16 sps:$4 sm:$0xff]   ;;  %v16852_v3 = vld [vmem:[#allocation21 + $0x5c8] ss:$16 sps:$4 sm:$0xff]  }
 0xbe7   : > { %v9423_v63 = vadd.f32 %v9422_v60, %v8091_v54  ;;  %v9463_v0 = vpop.f32.mrb[44].mxu1  ;;  %v9424_v1 = vpop.f32.mrb[45].mxu0  ;;  %v16855_v54 = vld [vmem:[#allocation21 + $0x7c8] ss:$16 sps:$4 sm:$0xff]  }
 0xbe8   : > { %v9425_v2 = vadd.f32 %v9424_v1, %v8095_v57  ;;  %v9465_v10 = vpop.f32.mrb[45].mxu1  ;;  %9645 = vmatpush1.bf16.msra.mxu0 %v16798_v56  ;;  %v9426_v7 = vpop.f32.mrb[46].mxu0  ;;  %v16860_v56 = vld [vmem:[#allocation21 + $0x5ec] ss:$16 sps:$4 sm:$0xff]  }
 0xbe9   : > { %v19344_v9 = vadd.f32 %v9463_v0, %v9423_v63  ;;  %9686 = vmatpush1.bf16.msra.mxu1 %v16801_v58  ;;  %v9467_v52 = vpop.f32.mrb[46].mxu1  ;;  %v9427_v53 = vpop.f32.mrb[47].mxu0  ;;  %9646 = vmatprep.subr.bf16.mxu0 %v16806_v14  ;;  %v16863_v57 = vld [vmem:[#allocation21 + $0x7ec] ss:$16 sps:$4 sm:$0xff]   ;;  %v16858_v58 = vld [vmem:[#allocation21 + $0x5e8] ss:$16 sps:$4 sm:$0xff]  }
 0xbea   : > { %v19346_v18 = vadd.f32 %v9465_v10, %v9425_v2  ;;  %v9468_v19 = vpop.f32.mrb[47].mxu1  ;;  %9687 = vmatprep.subr.bf16.mxu1 %v16809_v15  ;;  %v16861_v14 = vld [vmem:[#allocation21 + $0x7e8] ss:$16 sps:$4 sm:$0xff]  }
 0xbec   : > { %9647 = vmatpush1.bf16.msra.mxu0 %v16804_v31 }
 0xbed   : > { %9688 = vmatpush1.bf16.msra.mxu1 %v16807_v5  ;;  %9648 = vmatprep.subr.bf16.mxu0 %v16812_v20  ;;  %v8103_v5 = vrot.slane %v19338_v55, %v19031_v50 }
 0xbee   : > { %9689 = vmatprep.subr.bf16.mxu1 %v16815_v24 }
 0xbf0   : > { %9649 = vmatpush1.bf16.msra.mxu0 %v16810_v25 }
 0xbf1   : > { %9690 = vmatpush1.bf16.msra.mxu1 %v16813_v61  ;;  %9650 = vmatprep.subr.bf16.mxu0 %v16818_v37 }
 0xbf2   : > { %9691 = vmatprep.subr.bf16.mxu1 %v16821_v26 }
 0xbf4   : > { %9651 = vmatpush1.bf16.msra.mxu0 %v16816_v62 }
 0xbf5   : > { %9692 = vmatpush1.bf16.msra.mxu1 %v16819_v28  ;;  %9652 = vmatprep.subr.bf16.mxu0 %v16824_v44 }
 0xbf6   : > { %9693 = vmatprep.subr.bf16.mxu1 %v16827_v39 }
 0xbf8   : > { %9653 = vmatpush1.bf16.msra.mxu0 %v16822_v29 }
 0xbf9   : > { %9694 = vmatpush1.bf16.msra.mxu1 %v16825_v41  ;;  %9654 = vmatprep.subr.bf16.mxu0 %v16830_v38 }
 0xbfa   : > { %9695 = vmatprep.subr.bf16.mxu1 %v16833_v59 }
 0xbfc   : > { %9655 = vmatpush1.bf16.msra.mxu0 %v16828_v40 }
 0xbfd   : > { %9696 = vmatpush1.bf16.msra.mxu1 %v16831_v48  ;;  %9656 = vmatprep.subr.bf16.mxu0 %v16836_v30 }
 0xbfe   : > { %9697 = vmatprep.subr.bf16.mxu1 %v16839_v11 }
 0xc00   : > { %9657 = vmatpush1.bf16.msra.mxu0 %v16834_v43 }
 0xc01   : > { %9698 = vmatpush1.bf16.msra.mxu1 %v16837_v21  ;;  %9658 = vmatprep.subr.bf16.mxu0 %v16842_v51 }
 0xc02   : > { %9699 = vmatprep.subr.bf16.mxu1 %v16845_v23 }
 0xc04   : > { %9659 = vmatpush1.bf16.msra.mxu0 %v16840_v13 }
 0xc05   : > { %9700 = vmatpush1.bf16.msra.mxu1 %v16843_v46  ;;  %9660 = vmatprep.subr.bf16.mxu0 %v16848_v35 }
 0xc06   : > { %9701 = vmatprep.subr.bf16.mxu1 %v16851_v12 }
 0xc08   : > { %9661 = vmatpush1.bf16.msra.mxu0 %v16846_v27 }
 0xc09   : > { %9702 = vmatpush1.bf16.msra.mxu1 %v16849_v16  ;;  %9662 = vmatprep.subr.bf16.mxu0 %v16854_v33 }
 0xc0a   : > { %9703 = vmatprep.subr.bf16.mxu1 %v16857_v47 }
 0xc0c   : > { %9663 = vmatpush1.bf16.msra.mxu0 %v16852_v3 }
 0xc0d   : > { %9704 = vmatpush1.bf16.msra.mxu1 %v16855_v54  ;;  %9664 = vmatprep.subr.bf16.mxu0 %v16860_v56 }
 0xc0e   : > { %9705 = vmatprep.subr.bf16.mxu1 %v16863_v57 }
 0xc10   : > { %9665 = vmatpush1.bf16.msra.mxu0 %v16858_v58 }
 0xc11   : > { %9706 = vmatpush1.bf16.msra.mxu1 %v16861_v14 }
 0xc13   : > { %9667 = vmatmul.mubr.bf16.vlgmr.msra.gmra.mrb[56].mxu0 %v19324_v17 }
 0xc14   : > { %9708 = vmatmul.mubr.bf16.vlgmr.msra.gmra.mrb[56].mxu1 %v19327_v22  ;;  %9882 = vmatprep.mubr.f32.mxu0 %v18264_v36  ;;  %v8099_v22 = vrot.slane %v19338_v55, %v19025_v45 }
 0xc15   : > { %9953 = vmatprep.mubr.f32.mxu1 %v18264_v36 }
 0xc66   : > { %v9504_v60 = vpop.f32.mrb[48].mxu0 }
 0xc67   : > { %v9505_v15 = vadd.f32 %v9504_v60, %v19344_v9  ;;  %v9545_v63 = vpop.f32.mrb[48].mxu1  ;;  %v9506_v0 = vpop.f32.mrb[49].mxu0 }
 0xc68   : > { %v9507_v1 = vadd.f32 %v9506_v0, %v19346_v18  ;;  %v9547_v2 = vpop.f32.mrb[49].mxu1  ;;  %v9508_v10 = vpop.f32.mrb[50].mxu0  ;;  %v9720_v0 = vld [vmem:[#allocation24] sm:$0xf] }
 0xc69   : > { %v9546_v7 = vadd.f32 %v9545_v63, %v9505_v15  ;;  %v9549_v31 = vpop.f32.mrb[50].mxu1  ;;  %v9509_v52 = vpop.f32.mrb[51].mxu0  ;;  %v9960_v10 = vstv %s9803_s7  ;;  %s18087_s7 = scalar_lea.vmem %s13474_s0, 512 }
 0xc6a   : > { %v9548_v53 = vadd.f32 %v9547_v2, %v9507_v1  ;;  %v9550_v17 = vpop.f32.mrb[51].mxu1  ;;  %v9721_v1 = vld [vmem:[#allocation25] sm:$0xf]  ;;  %v9811_v2 = vand.u32 127, %v1360_v34  ;;  %v9756_v31 = vrot.slane %v9720_v0, %v19028_v49  ;;  %p18088_p6 = scmp.ne.s32.totalorder %s13474_s0, %s18087_s7 }
 0xc6b   : > { %v9716_v29 = vadd.f32 %v9546_v7, %v19248_v6  ;;  %v9964_v7 = vstv %s9805_s30  ;;  %v9781_v52 = vrot.slane %v9721_v1, %v19028_v49  ;;  %v9752_v17 = vrot.slane %v9720_v0, %v19022_v42  ;;  %s18267_s30 = smov [#allocation36]  }
 0xc6c   : > { %v9717_v41 = vadd.f32 %v9548_v53, %v19246_v4  ;;  %v9764_v53 = vrot.slane %v9720_v0, %v19031_v50  ;;  %vm9961_vm4 = vcmp.eq.s32.totalorder %v9811_v2, %v9960_v10  ;;  %vm9965_vm5 = vcmp.eq.s32.totalorder %v9811_v2, %v9964_v7  ;;  %v16900_v10 = vld [vmem:[#allocation28 + $0xc0] ss:$16 sps:$4 sm:$0xff]   ;;  %p18089_p7 = pnand %p18088_p6, %p19700_p5  ;;  %s18091_s21 = sshll.u32 %s18267_s30, 4  ;;  %s18092_s21 = int_to_ptr.vmem [resolvable:$false] %s18091_s21 }
 0xc6d   : > { %v9785_v34 = vrot.slane %v9721_v1, %v19025_v45  ;;  %vm9812_vm6 = vcmp.eq.s32.totalorder %v9811_v2, 0  ;;  %v16903_v7 = vld [vmem:[#allocation28 + $0x2c0] ss:$16 sps:$4 sm:$0xff]   ;;  %s18093_s23 = scalar_lea.vmem %s18092_s21, 1024  ;;  %p18094_p8 = scmp.lt.s32.totalorder %s13474_s0, %s18092_s21 }
 0xc6e   : > { %v9722_v13 = vadd.f32 %v9717_v41, %v9716_v29  ;;  %p18090_p13 = pneg %p18089_p7  ;;  %p18095_p10 = scmp.lt.s32.totalorder %s18093_s23, %s18087_s7 }
 0xc70   : > { %p18096_p3 = por %p18095_p10, %p18094_p8 }
 0xc72   : > { %p18097_p9 = pnand %p18096_p3, %p18090_p13 }
 0xca6   : > { %v9586_v20 = vpop.f32.mrb[52].mxu0 }
 0xca7   : > { %v9587_v19 = vadd.f32 %v9586_v20, %v8099_v22  ;;  %v9627_v9 = vpop.f32.mrb[52].mxu1  ;;  %v9588_v24 = vpop.f32.mrb[53].mxu0  ;;  %v9789_v22 = vrot.slane %v9721_v1, %v19031_v50 }
 0xca8   : > { %v9589_v25 = vadd.f32 %v9588_v24, %v8103_v5  ;;  %v9629_v61 = vpop.f32.mrb[53].mxu1  ;;  %v9590_v18 = vpop.f32.mrb[54].mxu0  ;;  %v9760_v5 = vrot.slane %v9720_v0, %v19025_v45  ;;  %v10119_v24 = vstv %s19365_s1  ;;  %v16897_v0 = vld [vmem:[#allocation28 + $0x2a0] ss:$16 sps:$4 sm:$0xff]  }
 0xca9   : > { %v9628_v37 = vadd.f32 %v9627_v9, %v9587_v19  ;;  %v9631_v26 = vpop.f32.mrb[54].mxu1  ;;  %v9591_v62 = vpop.f32.mrb[55].mxu0  ;;  %v9777_v19 = vrot.slane %v9721_v1, %v19022_v42  ;;  %v10115_v9 = vstv %s19363_s12  ;;  %vm10120_vm8 = vcmp.eq.s32.totalorder %v9811_v2, %v10119_v24  ;;  %v16902_v1 = vld [vmem:[#allocation28 + $0xc4] ss:$16 sps:$4 sm:$0xff]   ;;  %v16918_v24 = vld [vmem:[#allocation28 + $0x120] ss:$16 sps:$4 sm:$0xff]  }
 0xcaa   : > { %v9630_v28 = vadd.f32 %v9629_v61, %v9589_v25  ;;  %v9632_v44 = vpop.f32.mrb[55].mxu1  ;;  %v14861_v26 = vsel %vm9961_vm4, 1.0, %v18264_v36  ;;  %v14862_v62 = vsel %vm9965_vm5, 1.0, %v18264_v36  ;;  %vm10116_vm7 = vcmp.eq.s32.totalorder %v9811_v2, %v10115_v9  ;;  %v16905_v2 = vld [vmem:[#allocation28 + $0x2c4] ss:$16 sps:$4 sm:$0xff]  }
 0xcab   : > { %v16923_v9 = vld [vmem:[#allocation28 + $0x324] ss:$16 sps:$4 sm:$0xff]  }
 0xce6   : > { %v9668_v39 = vpop.f32.mrb[56].mxu0 }
 0xce7   : > { %v9669_v38 = vadd.f32 %v9668_v39, %v9628_v37  ;;  %v9709_v59 = vpop.f32.mrb[56].mxu1  ;;  %v9670_v55 = vpop.f32.mrb[57].mxu0 }
 0xce8   : > { %v9671_v40 = vadd.f32 %v9670_v55, %v9630_v28  ;;  %v9711_v48 = vpop.f32.mrb[57].mxu1  ;;  %v9672_v30 = vpop.f32.mrb[58].mxu0 }
 0xce9   : > { %v9710_v11 = vadd.f32 %v9709_v59, %v9669_v38  ;;  %v9713_v43 = vpop.f32.mrb[58].mxu1  ;;  %v9673_v21 = vpop.f32.mrb[59].mxu0  ;;  %v14865_v30 = vsel %vm10116_vm7, 1.0, %v18264_v36 }
 0xcea   : > { %v9712_v51 = vadd.f32 %v9711_v48, %v9671_v40  ;;  %v9714_v23 = vpop.f32.mrb[59].mxu1  ;;  %v14858_v40 = vsel %vm9812_vm6, 1.0, %v18264_v36  ;;  %v9968_v48 = vadd.f32 %v14862_v62, %v14861_v26  ;;  %v16927_v26 = vld [vmem:[#allocation28 + $0x340] ss:$16 sps:$4 sm:$0xff]   ;;  %v16932_v62 = vld [vmem:[#allocation28 + $0x164] ss:$16 sps:$4 sm:$0xff]  }
 0xceb   : > { %v9718_v46 = vadd.f32 %v9710_v11, %v19250_v8  ;;  %v14866_v11 = vsel %vm10120_vm8, 1.0, %v18264_v36  ;;  %v16869_v23 = vld [vmem:[#allocation28 + $0x204] ss:$16 sps:$4 sm:$0xff]  }
 0xcec   : > { %v9719_v35 = vadd.f32 %v9712_v51, %v19252_v32  ;;  %v9969_v43 = vmul.f32 0.5, %v9968_v48  ;;  %v10123_v21 = vadd.f32 %v14866_v11, %v14865_v30  ;;  %v16866_v51 = vld [vmem:[#allocation28 + $0x4] ss:$16 sps:$4 sm:$0xff]   ;;  %v16942_v48 = vld [vmem:[#allocation28 + $0x1a0] ss:$16 sps:$4 sm:$0xff]  }
 0xced   : > { %v9723_v12 = vadd.f32 %v9722_v13, %v9718_v46  ;;  %v16945_v30 = vld [vmem:[#allocation28 + $0x3a0] ss:$16 sps:$4 sm:$0xff]   ;;  %v16950_v11 = vld [vmem:[#allocation28 + $0x1c4] ss:$16 sps:$4 sm:$0xff]  }
 0xcee   : > { %v10124_v13 = vmul.f32 0.5, %v10123_v21  ;;  %v16948_v21 = vld [vmem:[#allocation28 + $0x1c0] ss:$16 sps:$4 sm:$0xff]  }
 0xcef   : > { %v9724_v6 = vadd.f32 %v9723_v12, %v9719_v35  ;;  %v16872_v12 = vld [vmem:[#allocation28 + $0x24] ss:$16 sps:$4 sm:$0xff]  }
 0xcf1   : > { %9725 = vadd.xlane.f32.xlu0 %v9724_v6  ;;  %v16875_v6 = vld [vmem:[#allocation28 + $0x224] ss:$16 sps:$4 sm:$0xff]  }
 0xd7e   : > { %v9726_v4 = vpop.xlane.xlu0 %9725 }
 0xd7f   : > { %v9727_v27 = vmul.f32 0.001953125, %v9726_v4  ;;  %v16870_v4 = vld [vmem:[#allocation28 + $0x20] ss:$16 sps:$4 sm:$0xff]  }
 0xd81   : > { %v9728_v16 = vsub.f32 %v9716_v29, %v9727_v27  ;;  %v9729_v33 = vsub.f32 %v9717_v41, %v9727_v27  ;;  %v9730_v47 = vsub.f32 %v9718_v46, %v9727_v27  ;;  %v9731_v3 = vsub.f32 %v9719_v35, %v9727_v27  ;;  %v16864_v46 = vld [vmem:[#allocation28] ss:$16 sps:$4 sm:$0xff]  }
 0xd82   : > { %v16867_v35 = vld [vmem:[#allocation28 + $0x200] ss:$16 sps:$4 sm:$0xff]  }
 0xd83   : > { %v9732_v54 = vmul.f32 %v9728_v16, %v9728_v16  ;;  %v9733_v56 = vmul.f32 %v9729_v33, %v9729_v33  ;;  %v9734_v57 = vmul.f32 %v9730_v47, %v9730_v47  ;;  %v9735_v14 = vmul.f32 %v9731_v3, %v9731_v3  ;;  %v16873_v27 = vld [vmem:[#allocation28 + $0x220] ss:$16 sps:$4 sm:$0xff]  }
 0xd85   : > { %v9736_v58 = vadd.f32 %v9733_v56, %v9732_v54  ;;  %v16887_v54 = vld [vmem:[#allocation28 + $0x264] ss:$16 sps:$4 sm:$0xff]   ;;  %v16882_v56 = vld [vmem:[#allocation28 + $0x60] ss:$16 sps:$4 sm:$0xff]  }
 0xd87   : > { %v9737_v60 = vadd.f32 %v9736_v58, %v9734_v57  ;;  %v16885_v57 = vld [vmem:[#allocation28 + $0x260] ss:$16 sps:$4 sm:$0xff]   ;;  %v16890_v58 = vld [vmem:[#allocation28 + $0x84] ss:$16 sps:$4 sm:$0xff]  }
 0xd89   : > { %v9738_v15 = vadd.f32 %v9737_v60, %v9735_v14  ;;  %v16893_v14 = vld [vmem:[#allocation28 + $0x284] ss:$16 sps:$4 sm:$0xff]   ;;  %v16888_v60 = vld [vmem:[#allocation28 + $0x80] ss:$16 sps:$4 sm:$0xff]  }
 0xd8b   : > { %9739 = vadd.xlane.f32.xlu1 %v9738_v15  ;;  %v16891_v15 = vld [vmem:[#allocation28 + $0x280] ss:$16 sps:$4 sm:$0xff]  }
 0xe18   : > { %v9740_v8 = vpop.xlane.xlu1 %9739 }
 0xe19   : > { %v9741_v32 = vmul.f32 0.001953125, %v9740_v8  ;;  %v16896_v8 = vld [vmem:[#allocation28 + $0xa4] ss:$16 sps:$4 sm:$0xff]  }
 0xe1b   : > { %v9742_v63 = vadd.f32 1e-12, %v9741_v32  ;;  %v16899_v32 = vld [vmem:[#allocation28 + $0x2a4] ss:$16 sps:$4 sm:$0xff]  }
 0xe1d   : > { %17506 = vrsqrt.f32 %v9742_v63  ;;  %v16894_v63 = vld [vmem:[#allocation28 + $0xa0] ss:$16 sps:$4 sm:$0xff]  }
 0xe27   : > { %v17507_v20 = vpop.eup %17506 }
 0xe28   : > { %v9745_v25 = vmul.f32 %v17507_v20, %v9729_v33  ;;  %v9747_v61 = vmul.f32 %v17507_v20, %v9731_v3  ;;  %v9744_v18 = vmul.f32 %v17507_v20, %v9728_v16  ;;  %v9746_v37 = vmul.f32 %v17507_v20, %v9730_v47  ;;  %v16878_v16 = vld [vmem:[#allocation28 + $0x44] ss:$16 sps:$4 sm:$0xff]   ;;  %v16876_v47 = vld [vmem:[#allocation28 + $0x40] ss:$16 sps:$4 sm:$0xff]  }
 0xe29   : > { %v16881_v33 = vld [vmem:[#allocation28 + $0x244] ss:$16 sps:$4 sm:$0xff]   ;;  %v16912_v20 = vld [vmem:[#allocation28 + $0x100] ss:$16 sps:$4 sm:$0xff]  }
 0xe2a   : > { %v9770_v28 = vmul.f32 %v9756_v31, %v9745_v25  ;;  %v9772_v44 = vmul.f32 %v9764_v53, %v9747_v61  ;;  %v9769_v39 = vmul.f32 %v9752_v17, %v9744_v18  ;;  %v9771_v29 = vmul.f32 %v9760_v5, %v9746_v37  ;;  %v16884_v3 = vld [vmem:[#allocation28 + $0x64] ss:$16 sps:$4 sm:$0xff]   ;;  %v16906_v53 = vld [vmem:[#allocation28 + $0xe0] ss:$16 sps:$4 sm:$0xff]  }
 0xe2b   : > { %v16908_v31 = vld [vmem:[#allocation28 + $0xe4] ss:$16 sps:$4 sm:$0xff]   ;;  %v16909_v17 = vld [vmem:[#allocation28 + $0x2e0] ss:$16 sps:$4 sm:$0xff]  }
 0xe2c   : > { %v9795_v41 = vadd.f32 %v9781_v52, %v9770_v28  ;;  %v9797_v38 = vadd.f32 %v9789_v22, %v9772_v44  ;;  %v9794_v59 = vadd.f32 %v9777_v19, %v9769_v39  ;;  %v9796_v55 = vadd.f32 %v9785_v34, %v9771_v29  ;;  %v16911_v52 = vld [vmem:[#allocation28 + $0x2e4] ss:$16 sps:$4 sm:$0xff]   ;;  %v16915_v19 = vld [vmem:[#allocation28 + $0x300] ss:$16 sps:$4 sm:$0xff]  }
 0xe2d   : > { %v16914_v22 = vld [vmem:[#allocation28 + $0x104] ss:$16 sps:$4 sm:$0xff]   ;;  %v16921_v25 = vld [vmem:[#allocation28 + $0x320] ss:$16 sps:$4 sm:$0xff]  }
 0xe2e   : > { %9818 = vmatprep.subr.mxu0 %v9795_v41  ;;  %9889 = vmatprep.subr.mxu1 %v9797_v38  ;;  %9798 = vst [vmem:[%s19385_s2] sm:$0xff] %v9794_v59  ;;  %9799 = vst [vmem:[%s19385_s2 + $0x8] sm:$0xff] %v9795_v41  ;;  %v16917_v5 = vld [vmem:[#allocation28 + $0x304] ss:$16 sps:$4 sm:$0xff]   ;;  %v16924_v37 = vld [vmem:[#allocation28 + $0x140] ss:$16 sps:$4 sm:$0xff]  }
 0xe2f   : > { %9800 = vst [vmem:[%s19385_s2 + $0x10] sm:$0xff] %v9796_v55  ;;  %9801 = vst [vmem:[%s19385_s2 + $0x18] sm:$0xff] %v9797_v38  ;;  %9819 = vmatpush1.msra.mxu0 %v9794_v59  ;;  %9890 = vmatpush1.msra.mxu1 %v9796_v55  ;;  %v16920_v34 = vld [vmem:[#allocation28 + $0x124] ss:$16 sps:$4 sm:$0xff]   ;;  %v16930_v44 = vld [vmem:[#allocation28 + $0x160] ss:$16 sps:$4 sm:$0xff]  }
 0xe30   : > { %14859 = vmatmul.mubr.msk.f32.vlgmr.msra.gmra.mrb[60].mxu0 %vm4425_vm3, %v14858_v40  ;;  %14860 = vmatmul.mubr.msk.f32.vlgmr.msra.gmra.mrb[60].mxu1 %vm4425_vm3, %v14858_v40  ;;  %v16926_v61 = vld [vmem:[#allocation28 + $0x144] ss:$16 sps:$4 sm:$0xff]   ;;  %v16933_v39 = vld [vmem:[#allocation28 + $0x360] ss:$16 sps:$4 sm:$0xff]  }
 0xe31   : > { %9973 = vmatprep.subr.mxu0 %v9795_v41  ;;  %10044 = vmatprep.subr.mxu1 %v9797_v38  ;;  %v16929_v18 = vld [vmem:[#allocation28 + $0x344] ss:$16 sps:$4 sm:$0xff]  }
 0xe32   : > { %9974 = vmatpush1.msra.mxu0 %v9794_v59  ;;  %10045 = vmatpush1.msra.mxu1 %v9796_v55  ;;  %v16935_v28 = vld [vmem:[#allocation28 + $0x364] ss:$16 sps:$4 sm:$0xff]  }
 0xe33   : > { %10128 = vmatprep.subr.mxu0 %v9795_v41  ;;  %10199 = vmatprep.subr.mxu1 %v9797_v38  ;;  %v16938_v29 = vld [vmem:[#allocation28 + $0x184] ss:$16 sps:$4 sm:$0xff]   ;;  %v16936_v38 = vld [vmem:[#allocation28 + $0x180] ss:$16 sps:$4 sm:$0xff]  }
 0xe34   : > { %10037 = vmatprep.mubr.f32.mxu0 %v18264_v36  ;;  %10108 = vmatprep.mubr.f32.mxu1 %v18264_v36  ;;  %v16941_v41 = vld [vmem:[#allocation28 + $0x384] ss:$16 sps:$4 sm:$0xff]  }
 0xe35   : > { %14863 = vmatmul.mubr.msk.f32.vlgmr.msra.gmra.mrb[62].mxu0 %vm4425_vm3, %v9969_v43  ;;  %14864 = vmatmul.mubr.msk.f32.vlgmr.msra.gmra.mrb[62].mxu1 %vm4425_vm3, %v9969_v43  ;;  %v16947_v40 = vld [vmem:[#allocation28 + $0x3a4] ss:$16 sps:$4 sm:$0xff]  }
 0xe36   : > { %10129 = vmatpush1.msra.mxu0 %v9794_v59  ;;  %10200 = vmatpush1.msra.mxu1 %v9796_v55  ;;  %v16939_v59 = vld [vmem:[#allocation28 + $0x380] ss:$16 sps:$4 sm:$0xff]   ;;  %v16944_v55 = vld [vmem:[#allocation28 + $0x1a4] ss:$16 sps:$4 sm:$0xff]  }
 0xe37   : > { %10192 = vmatprep.mubr.f32.mxu0 %v18264_v36  ;;  %10263 = vmatprep.mubr.f32.mxu1 %v18264_v36  ;;  %v16879_v36 = vld [vmem:[#allocation28 + $0x240] ss:$16 sps:$4 sm:$0xff]   ;;  %v16953_v43 = vld [vmem:[#allocation28 + $0x3c4] ss:$16 sps:$4 sm:$0xff]  }
 0xe38   : > { %11174 = vmatprep.subr.bf16.mxu0 %v16866_v51  ;;  %11215 = vmatprep.subr.bf16.mxu1 %v16869_v23  ;;  %v16951_v51 = vld [vmem:[#allocation28 + $0x3c0] ss:$16 sps:$4 sm:$0xff]   ;;  %v16956_v23 = vld [vmem:[#allocation28 + $0x1e4] ss:$16 sps:$4 sm:$0xff]  }
 0xe39   : > { %14867 = vmatmul.mubr.msk.f32.vlgmr.msra.gmra.mrb[64].mxu0 %vm4425_vm3, %v10124_v13  ;;  %14868 = vmatmul.mubr.msk.f32.vlgmr.msra.gmra.mrb[64].mxu1 %vm4425_vm3, %v10124_v13  ;;  %v16959_v13 = vld [vmem:[#allocation28 + $0x3e4] ss:$16 sps:$4 sm:$0xff]  }
 0xe3a   : > { %11175 = vmatpush1.bf16.msra.mxu0 %v16864_v46  ;;  %11216 = vmatpush1.bf16.msra.mxu1 %v16867_v35  ;;  %v16954_v46 = vld [vmem:[#allocation28 + $0x1e0] ss:$16 sps:$4 sm:$0xff]  }
 0xe3b   : > { %11176 = vmatprep.subr.bf16.mxu0 %v16872_v12  ;;  %11217 = vmatprep.subr.bf16.mxu1 %v16875_v6  ;;  %v16957_v35 = vld [vmem:[#allocation28 + $0x3e0] ss:$16 sps:$4 sm:$0xff]   ;;  %v16962_v12 = vld [vmem:[#allocation28 + $0xc] ss:$16 sps:$4 sm:$0xff]  }
 0xe3c   : > { %v16965_v6 = vld [vmem:[#allocation28 + $0x20c] ss:$16 sps:$4 sm:$0xff]  }
 0xe3e   : > { %11177 = vmatpush1.bf16.msra.mxu0 %v16870_v4  ;;  %11218 = vmatpush1.bf16.msra.mxu1 %v16873_v27 }
 0xe3f   : > { %11178 = vmatprep.subr.bf16.mxu0 %v16878_v16  ;;  %11219 = vmatprep.subr.bf16.mxu1 %v16881_v33 }
 0xe42   : > { %11179 = vmatpush1.bf16.msra.mxu0 %v16876_v47  ;;  %11220 = vmatpush1.bf16.msra.mxu1 %v16879_v36 }
 0xe43   : > { %11180 = vmatprep.subr.bf16.mxu0 %v16884_v3  ;;  %11221 = vmatprep.subr.bf16.mxu1 %v16887_v54 }
 0xe46   : > { %11181 = vmatpush1.bf16.msra.mxu0 %v16882_v56  ;;  %11222 = vmatpush1.bf16.msra.mxu1 %v16885_v57 }
 0xe47   : > { %11182 = vmatprep.subr.bf16.mxu0 %v16890_v58  ;;  %11223 = vmatprep.subr.bf16.mxu1 %v16893_v14  ;;  %v16960_v58 = vld [vmem:[#allocation28 + $0x8] ss:$16 sps:$4 sm:$0xff]  }
 0xe48   : > { %v16963_v14 = vld [vmem:[#allocation28 + $0x208] ss:$16 sps:$4 sm:$0xff]  }
 0xe4a   : > { %11183 = vmatpush1.bf16.msra.mxu0 %v16888_v60  ;;  %11224 = vmatpush1.bf16.msra.mxu1 %v16891_v15 }
 0xe4b   : > { %11184 = vmatprep.subr.bf16.mxu0 %v16896_v8  ;;  %11225 = vmatprep.subr.bf16.mxu1 %v16899_v32  ;;  %v16968_v8 = vld [vmem:[#allocation28 + $0x2c] ss:$16 sps:$4 sm:$0xff]  }
 0xe4c   : > { %v16971_v32 = vld [vmem:[#allocation28 + $0x22c] ss:$16 sps:$4 sm:$0xff]  }
 0xe4e   : > { %11185 = vmatpush1.bf16.msra.mxu0 %v16894_v63  ;;  %11226 = vmatpush1.bf16.msra.mxu1 %v16897_v0  ;;  %v16966_v63 = vld [vmem:[#allocation28 + $0x28] ss:$16 sps:$4 sm:$0xff]  }
 0xe4f   : > { %11186 = vmatprep.subr.bf16.mxu0 %v16902_v1  ;;  %11227 = vmatprep.subr.bf16.mxu1 %v16905_v2  ;;  %v16969_v0 = vld [vmem:[#allocation28 + $0x228] ss:$16 sps:$4 sm:$0xff]   ;;  %v16974_v1 = vld [vmem:[#allocation28 + $0x4c] ss:$16 sps:$4 sm:$0xff]  }
 0xe50   : > { %v16977_v2 = vld [vmem:[#allocation28 + $0x24c] ss:$16 sps:$4 sm:$0xff]  }
 0xe52   : > { %11187 = vmatpush1.bf16.msra.mxu0 %v16900_v10  ;;  %11228 = vmatpush1.bf16.msra.mxu1 %v16903_v7  ;;  %v16972_v10 = vld [vmem:[#allocation28 + $0x48] ss:$16 sps:$4 sm:$0xff]  }
 0xe53   : > { %11188 = vmatprep.subr.bf16.mxu0 %v16908_v31  ;;  %11229 = vmatprep.subr.bf16.mxu1 %v16911_v52  ;;  %v16975_v7 = vld [vmem:[#allocation28 + $0x248] ss:$16 sps:$4 sm:$0xff]   ;;  %v16980_v31 = vld [vmem:[#allocation28 + $0x6c] ss:$16 sps:$4 sm:$0xff]  }
 0xe54   : > { %v16983_v52 = vld [vmem:[#allocation28 + $0x26c] ss:$16 sps:$4 sm:$0xff]  }
 0xe56   : > { %11189 = vmatpush1.bf16.msra.mxu0 %v16906_v53  ;;  %11230 = vmatpush1.bf16.msra.mxu1 %v16909_v17  ;;  %v16978_v53 = vld [vmem:[#allocation28 + $0x68] ss:$16 sps:$4 sm:$0xff]  }
 0xe57   : > { %11190 = vmatprep.subr.bf16.mxu0 %v16914_v22  ;;  %11231 = vmatprep.subr.bf16.mxu1 %v16917_v5  ;;  %v16981_v17 = vld [vmem:[#allocation28 + $0x268] ss:$16 sps:$4 sm:$0xff]   ;;  %v16986_v22 = vld [vmem:[#allocation28 + $0x8c] ss:$16 sps:$4 sm:$0xff]  }
 0xe58   : > { %v16989_v5 = vld [vmem:[#allocation28 + $0x28c] ss:$16 sps:$4 sm:$0xff]  }
 0xe5a   : > { %11191 = vmatpush1.bf16.msra.mxu0 %v16912_v20  ;;  %11232 = vmatpush1.bf16.msra.mxu1 %v16915_v19  ;;  %v16984_v20 = vld [vmem:[#allocation28 + $0x88] ss:$16 sps:$4 sm:$0xff]  }
 0xe5b   : > { %11192 = vmatprep.subr.bf16.mxu0 %v16920_v34  ;;  %11233 = vmatprep.subr.bf16.mxu1 %v16923_v9  ;;  %v16987_v19 = vld [vmem:[#allocation28 + $0x288] ss:$16 sps:$4 sm:$0xff]   ;;  %v16992_v34 = vld [vmem:[#allocation28 + $0xac] ss:$16 sps:$4 sm:$0xff]  }
 0xe5c   : > { %v16995_v9 = vld [vmem:[#allocation28 + $0x2ac] ss:$16 sps:$4 sm:$0xff]  }
 0xe5e   : > { %11193 = vmatpush1.bf16.msra.mxu0 %v16918_v24  ;;  %11234 = vmatpush1.bf16.msra.mxu1 %v16921_v25  ;;  %v16990_v24 = vld [vmem:[#allocation28 + $0xa8] ss:$16 sps:$4 sm:$0xff]  }
 0xe5f   : > { %11194 = vmatprep.subr.bf16.mxu0 %v16926_v61  ;;  %11235 = vmatprep.subr.bf16.mxu1 %v16929_v18  ;;  %v16993_v25 = vld [vmem:[#allocation28 + $0x2a8] ss:$16 sps:$4 sm:$0xff]   ;;  %v16998_v61 = vld [vmem:[#allocation28 + $0xcc] ss:$16 sps:$4 sm:$0xff]  }
 0xe60   : > { %v17001_v18 = vld [vmem:[#allocation28 + $0x2cc] ss:$16 sps:$4 sm:$0xff]  }
 0xe62   : > { %11195 = vmatpush1.bf16.msra.mxu0 %v16924_v37  ;;  %11236 = vmatpush1.bf16.msra.mxu1 %v16927_v26  ;;  %v16996_v37 = vld [vmem:[#allocation28 + $0xc8] ss:$16 sps:$4 sm:$0xff]  }
 0xe63   : > { %11196 = vmatprep.subr.bf16.mxu0 %v16932_v62  ;;  %11237 = vmatprep.subr.bf16.mxu1 %v16935_v28  ;;  %v16999_v26 = vld [vmem:[#allocation28 + $0x2c8] ss:$16 sps:$4 sm:$0xff]  }
 0xe66   : > { %11197 = vmatpush1.bf16.msra.mxu0 %v16930_v44  ;;  %11238 = vmatpush1.bf16.msra.mxu1 %v16933_v39  ;;  %v17004_v44 = vld [vmem:[#allocation28 + $0xec] ss:$16 sps:$4 sm:$0xff]  }
 0xe67   : > { %11198 = vmatprep.subr.bf16.mxu0 %v16938_v29  ;;  %11239 = vmatprep.subr.bf16.mxu1 %v16941_v41  ;;  %v17007_v39 = vld [vmem:[#allocation28 + $0x2ec] ss:$16 sps:$4 sm:$0xff]  }
 0xe6a   : > { %11199 = vmatpush1.bf16.msra.mxu0 %v16936_v38  ;;  %11240 = vmatpush1.bf16.msra.mxu1 %v16939_v59  ;;  %v17002_v38 = vld [vmem:[#allocation28 + $0xe8] ss:$16 sps:$4 sm:$0xff]  }
 0xe6b   : > { %11200 = vmatprep.subr.bf16.mxu0 %v16944_v55  ;;  %11241 = vmatprep.subr.bf16.mxu1 %v16947_v40  ;;  %v17005_v59 = vld [vmem:[#allocation28 + $0x2e8] ss:$16 sps:$4 sm:$0xff]   ;;  %v17010_v55 = vld [vmem:[#allocation28 + $0x10c] ss:$16 sps:$4 sm:$0xff]  }
 0xe6c   : > { %v17013_v40 = vld [vmem:[#allocation28 + $0x30c] ss:$16 sps:$4 sm:$0xff]  }
 0xe6e   : > { %11201 = vmatpush1.bf16.msra.mxu0 %v16942_v48  ;;  %11242 = vmatpush1.bf16.msra.mxu1 %v16945_v30  ;;  %v17008_v48 = vld [vmem:[#allocation28 + $0x108] ss:$16 sps:$4 sm:$0xff]  }
 0xe6f   : > { %11202 = vmatprep.subr.bf16.mxu0 %v16950_v11  ;;  %11243 = vmatprep.subr.bf16.mxu1 %v16953_v43  ;;  %v17011_v30 = vld [vmem:[#allocation28 + $0x308] ss:$16 sps:$4 sm:$0xff]   ;;  %v17016_v11 = vld [vmem:[#allocation28 + $0x12c] ss:$16 sps:$4 sm:$0xff]  }
 0xe70   : > { %v17019_v43 = vld [vmem:[#allocation28 + $0x32c] ss:$16 sps:$4 sm:$0xff]  }
 0xe72   : > { %11203 = vmatpush1.bf16.msra.mxu0 %v16948_v21  ;;  %11244 = vmatpush1.bf16.msra.mxu1 %v16951_v51  ;;  %v17014_v21 = vld [vmem:[#allocation28 + $0x128] ss:$16 sps:$4 sm:$0xff]  }
 0xe73   : > { %11204 = vmatprep.subr.bf16.mxu0 %v16956_v23  ;;  %11245 = vmatprep.subr.bf16.mxu1 %v16959_v13  ;;  %v17017_v51 = vld [vmem:[#allocation28 + $0x328] ss:$16 sps:$4 sm:$0xff]   ;;  %v17022_v23 = vld [vmem:[#allocation28 + $0x14c] ss:$16 sps:$4 sm:$0xff]  }
 0xe74   : > { %v17025_v13 = vld [vmem:[#allocation28 + $0x34c] ss:$16 sps:$4 sm:$0xff]  }
 0xe76   : > { %11205 = vmatpush1.bf16.msra.mxu0 %v16954_v46  ;;  %11246 = vmatpush1.bf16.msra.mxu1 %v16957_v35  ;;  %v17020_v46 = vld [vmem:[#allocation28 + $0x148] ss:$16 sps:$4 sm:$0xff]  }
 0xe77   : > { %11256 = vmatprep.subr.bf16.mxu0 %v16962_v12  ;;  %11297 = vmatprep.subr.bf16.mxu1 %v16965_v6  ;;  %v17023_v35 = vld [vmem:[#allocation28 + $0x348] ss:$16 sps:$4 sm:$0xff]   ;;  %v17028_v12 = vld [vmem:[#allocation28 + $0x16c] ss:$16 sps:$4 sm:$0xff]  }
 0xe78   : > { %v17031_v6 = vld [vmem:[#allocation28 + $0x36c] ss:$16 sps:$4 sm:$0xff]  }
 0xf03   : > { %v19401_v4 = vpop.f32.mrb[60].mxu0  ;;  %v19403_v27 = vpop.f32.mrb[60].mxu1 }
 0xf04   : > { %v19405_v16 = vpop.f32.mrb[61].mxu0  ;;  %v19407_v33 = vpop.f32.mrb[61].mxu1 }
 0xf08   : > { %v10039_v47 = vpop.f32.mrb[62].mxu0  ;;  %v10110_v36 = vpop.f32.mrb[62].mxu1 }
 0xf09   : > { %v10041_v3 = vpop.f32.mrb[63].mxu0  ;;  %v10112_v54 = vpop.f32.mrb[63].mxu1  ;;  %v19409_v60 = vpack.c.bf16 %v10039_v47, %v10039_v47  ;;  %v19411_v15 = vpack.c.bf16 %v10110_v36, %v10110_v36  ;;  %v17026_v47 = vld [vmem:[#allocation28 + $0x168] ss:$16 sps:$4 sm:$0xff]  }
 0xf0a   : > { %v10403_v56 = vpack.c.bf16 %v10041_v3, %v10041_v3  ;;  %v10405_v57 = vpack.c.bf16 %v10112_v54, %v10112_v54  ;;  %v17029_v36 = vld [vmem:[#allocation28 + $0x368] ss:$16 sps:$4 sm:$0xff]   ;;  %v17034_v3 = vld [vmem:[#allocation28 + $0x18c] ss:$16 sps:$4 sm:$0xff]  }
 0xf0b   : > { %v17037_v54 = vld [vmem:[#allocation28 + $0x38c] ss:$16 sps:$4 sm:$0xff]  }
 0xf0c   : > { %11206 = vmatprep.mubr.bf16.mxu0 %v10403_v56  ;;  %11247 = vmatprep.mubr.bf16.mxu1 %v10405_v57  ;;  %v19415_v62 = vpop.f32.mrb[64].mxu0  ;;  %v19417_v28 = vpop.f32.mrb[64].mxu1 }
 0xf0d   : > { %11207 = vmatmul.mubr.bf16.vlgmr.msra.gmra.mrb[68].mxu0 %v19409_v60  ;;  %11248 = vmatmul.mubr.bf16.vlgmr.msra.gmra.mrb[68].mxu1 %v19411_v15  ;;  %v19419_v29 = vpop.f32.mrb[65].mxu0  ;;  %v19421_v41 = vpop.f32.mrb[65].mxu1 }
 0xf0e   : > { %11257 = vmatpush1.bf16.msra.mxu0 %v16960_v58  ;;  %11298 = vmatpush1.bf16.msra.mxu1 %v16963_v14  ;;  %v17040_v58 = vld [vmem:[#allocation28 + $0x1ac] ss:$16 sps:$4 sm:$0xff]  }
 0xf0f   : > { %11258 = vmatprep.subr.bf16.mxu0 %v16968_v8  ;;  %11299 = vmatprep.subr.bf16.mxu1 %v16971_v32  ;;  %v17043_v14 = vld [vmem:[#allocation28 + $0x3ac] ss:$16 sps:$4 sm:$0xff]   ;;  %v17038_v8 = vld [vmem:[#allocation28 + $0x1a8] ss:$16 sps:$4 sm:$0xff]  }
 0xf10   : > { %11288 = vmatprep.mubr.bf16.mxu0 %v10403_v56  ;;  %11329 = vmatprep.mubr.bf16.mxu1 %v10405_v57  ;;  %v17032_v56 = vld [vmem:[#allocation28 + $0x188] ss:$16 sps:$4 sm:$0xff]  }
 0xf11   : > { %v17035_v57 = vld [vmem:[#allocation28 + $0x388] ss:$16 sps:$4 sm:$0xff]  }
 0xf12   : > { %11259 = vmatpush1.bf16.msra.mxu0 %v16966_v63  ;;  %11300 = vmatpush1.bf16.msra.mxu1 %v16969_v0  ;;  %v17041_v32 = vld [vmem:[#allocation28 + $0x3a8] ss:$16 sps:$4 sm:$0xff]   ;;  %v17046_v63 = vld [vmem:[#allocation28 + $0x1cc] ss:$16 sps:$4 sm:$0xff]  }
 0xf13   : > { %11260 = vmatprep.subr.bf16.mxu0 %v16974_v1  ;;  %11301 = vmatprep.subr.bf16.mxu1 %v16977_v2  ;;  %v17049_v0 = vld [vmem:[#allocation28 + $0x3cc] ss:$16 sps:$4 sm:$0xff]   ;;  %v17044_v1 = vld [vmem:[#allocation28 + $0x1c8] ss:$16 sps:$4 sm:$0xff]  }
 0xf14   : > { %v17047_v2 = vld [vmem:[#allocation28 + $0x3c8] ss:$16 sps:$4 sm:$0xff]  }
 0xf16   : > { %11261 = vmatpush1.bf16.msra.mxu0 %v16972_v10  ;;  %11302 = vmatpush1.bf16.msra.mxu1 %v16975_v7  ;;  %v17052_v10 = vld [vmem:[#allocation28 + $0x1ec] ss:$16 sps:$4 sm:$0xff]  }
 0xf17   : > { %11262 = vmatprep.subr.bf16.mxu0 %v16980_v31  ;;  %11303 = vmatprep.subr.bf16.mxu1 %v16983_v52  ;;  %v17055_v7 = vld [vmem:[#allocation28 + $0x3ec] ss:$16 sps:$4 sm:$0xff]   ;;  %v17050_v31 = vld [vmem:[#allocation28 + $0x1e8] ss:$16 sps:$4 sm:$0xff]  }
 0xf18   : > { %v17053_v52 = vld [vmem:[#allocation28 + $0x3e8] ss:$16 sps:$4 sm:$0xff]  }
 0xf1a   : > { %11263 = vmatpush1.bf16.msra.mxu0 %v16978_v53  ;;  %11304 = vmatpush1.bf16.msra.mxu1 %v16981_v17  ;;  %v17058_v53 = vld [vmem:[#allocation27 + $0x4] ss:$16 sps:$4 sm:$0xff]  }
 0xf1b   : > { %11264 = vmatprep.subr.bf16.mxu0 %v16986_v22  ;;  %11305 = vmatprep.subr.bf16.mxu1 %v16989_v5  ;;  %v17061_v17 = vld [vmem:[#allocation27 + $0x204] ss:$16 sps:$4 sm:$0xff]   ;;  %v17056_v22 = vld [vmem:[#allocation27] ss:$16 sps:$4 sm:$0xff]  }
 0xf1c   : > { %v17059_v5 = vld [vmem:[#allocation27 + $0x200] ss:$16 sps:$4 sm:$0xff]  }
 0xf1e   : > { %11265 = vmatpush1.bf16.msra.mxu0 %v16984_v20  ;;  %11306 = vmatpush1.bf16.msra.mxu1 %v16987_v19  ;;  %v19425_v20 = vpack.c.bf16 %v19405_v16, %v19405_v16  ;;  %v17064_v19 = vld [vmem:[#allocation27 + $0x24] ss:$16 sps:$4 sm:$0xff]  }
 0xf1f   : > { %11266 = vmatprep.subr.bf16.mxu0 %v16992_v34  ;;  %11307 = vmatprep.subr.bf16.mxu1 %v16995_v9  ;;  %v17067_v34 = vld [vmem:[#allocation27 + $0x224] ss:$16 sps:$4 sm:$0xff]   ;;  %v19429_v9 = vpack.c.bf16 %v19407_v33, %v19407_v33  ;;  %v17071_v33 = vld [vmem:[#allocation27 + $0x240] ss:$16 sps:$4 sm:$0xff]  }
 0xf20   : > { %v17070_v16 = vld [vmem:[#allocation27 + $0x44] ss:$16 sps:$4 sm:$0xff]  }
 0xf22   : > { %11267 = vmatpush1.bf16.msra.mxu0 %v16990_v24  ;;  %11308 = vmatpush1.bf16.msra.mxu1 %v16993_v25  ;;  %v17062_v24 = vld [vmem:[#allocation27 + $0x20] ss:$16 sps:$4 sm:$0xff]  }
 0xf23   : > { %11268 = vmatprep.subr.bf16.mxu0 %v16998_v61  ;;  %11309 = vmatprep.subr.bf16.mxu1 %v17001_v18  ;;  %v17065_v25 = vld [vmem:[#allocation27 + $0x220] ss:$16 sps:$4 sm:$0xff]   ;;  %v17073_v61 = vld [vmem:[#allocation27 + $0x244] ss:$16 sps:$4 sm:$0xff]  }
 0xf24   : > { %v17068_v18 = vld [vmem:[#allocation27 + $0x40] ss:$16 sps:$4 sm:$0xff]  }
 0xf26   : > { %11269 = vmatpush1.bf16.msra.mxu0 %v16996_v37  ;;  %11310 = vmatpush1.bf16.msra.mxu1 %v16999_v26  ;;  %v17074_v37 = vld [vmem:[#allocation27 + $0x60] ss:$16 sps:$4 sm:$0xff]  }
 0xf27   : > { %11270 = vmatprep.subr.bf16.mxu0 %v17004_v44  ;;  %11311 = vmatprep.subr.bf16.mxu1 %v17007_v39  ;;  %v17077_v26 = vld [vmem:[#allocation27 + $0x260] ss:$16 sps:$4 sm:$0xff]   ;;  %v17082_v44 = vld [vmem:[#allocation27 + $0x84] ss:$16 sps:$4 sm:$0xff]  }
 0xf28   : > { %v17085_v39 = vld [vmem:[#allocation27 + $0x284] ss:$16 sps:$4 sm:$0xff]  }
 0xf2a   : > { %11271 = vmatpush1.bf16.msra.mxu0 %v17002_v38  ;;  %11312 = vmatpush1.bf16.msra.mxu1 %v17005_v59  ;;  %v17080_v38 = vld [vmem:[#allocation27 + $0x80] ss:$16 sps:$4 sm:$0xff]  }
 0xf2b   : > { %11272 = vmatprep.subr.bf16.mxu0 %v17010_v55  ;;  %11313 = vmatprep.subr.bf16.mxu1 %v17013_v40  ;;  %v17083_v59 = vld [vmem:[#allocation27 + $0x280] ss:$16 sps:$4 sm:$0xff]   ;;  %v17088_v55 = vld [vmem:[#allocation27 + $0xa4] ss:$16 sps:$4 sm:$0xff]  }
 0xf2c   : > { %v17091_v40 = vld [vmem:[#allocation27 + $0x2a4] ss:$16 sps:$4 sm:$0xff]  }
 0xf2e   : > { %11273 = vmatpush1.bf16.msra.mxu0 %v17008_v48  ;;  %11314 = vmatpush1.bf16.msra.mxu1 %v17011_v30  ;;  %v17086_v48 = vld [vmem:[#allocation27 + $0xa0] ss:$16 sps:$4 sm:$0xff]  }
 0xf2f   : > { %11274 = vmatprep.subr.bf16.mxu0 %v17016_v11  ;;  %11315 = vmatprep.subr.bf16.mxu1 %v17019_v43  ;;  %v17089_v30 = vld [vmem:[#allocation27 + $0x2a0] ss:$16 sps:$4 sm:$0xff]   ;;  %v17094_v11 = vld [vmem:[#allocation27 + $0xc4] ss:$16 sps:$4 sm:$0xff]  }
 0xf30   : > { %v17097_v43 = vld [vmem:[#allocation27 + $0x2c4] ss:$16 sps:$4 sm:$0xff]  }
 0xf32   : > { %11275 = vmatpush1.bf16.msra.mxu0 %v17014_v21  ;;  %11316 = vmatpush1.bf16.msra.mxu1 %v17017_v51  ;;  %v17092_v21 = vld [vmem:[#allocation27 + $0xc0] ss:$16 sps:$4 sm:$0xff]  }
 0xf33   : > { %11276 = vmatprep.subr.bf16.mxu0 %v17022_v23  ;;  %11317 = vmatprep.subr.bf16.mxu1 %v17025_v13  ;;  %v17095_v51 = vld [vmem:[#allocation27 + $0x2c0] ss:$16 sps:$4 sm:$0xff]   ;;  %v17100_v23 = vld [vmem:[#allocation27 + $0xe4] ss:$16 sps:$4 sm:$0xff]  }
 0xf34   : > { %v17103_v13 = vld [vmem:[#allocation27 + $0x2e4] ss:$16 sps:$4 sm:$0xff]  }
 0xf36   : > { %11277 = vmatpush1.bf16.msra.mxu0 %v17020_v46  ;;  %11318 = vmatpush1.bf16.msra.mxu1 %v17023_v35  ;;  %v17098_v46 = vld [vmem:[#allocation27 + $0xe0] ss:$16 sps:$4 sm:$0xff]  }
 0xf37   : > { %11278 = vmatprep.subr.bf16.mxu0 %v17028_v12  ;;  %11319 = vmatprep.subr.bf16.mxu1 %v17031_v6  ;;  %v17101_v35 = vld [vmem:[#allocation27 + $0x2e0] ss:$16 sps:$4 sm:$0xff]   ;;  %v17106_v12 = vld [vmem:[#allocation27 + $0x104] ss:$16 sps:$4 sm:$0xff]  }
 0xf38   : > { %v17109_v6 = vld [vmem:[#allocation27 + $0x304] ss:$16 sps:$4 sm:$0xff]  }
 0xf3a   : > { %11279 = vmatpush1.bf16.msra.mxu0 %v17026_v47  ;;  %11320 = vmatpush1.bf16.msra.mxu1 %v17029_v36  ;;  %v17104_v47 = vld [vmem:[#allocation27 + $0x100] ss:$16 sps:$4 sm:$0xff]  }
 0xf3b   : > { %11280 = vmatprep.subr.bf16.mxu0 %v17034_v3  ;;  %11321 = vmatprep.subr.bf16.mxu1 %v17037_v54  ;;  %v17107_v36 = vld [vmem:[#allocation27 + $0x300] ss:$16 sps:$4 sm:$0xff]   ;;  %v17112_v3 = vld [vmem:[#allocation27 + $0x124] ss:$16 sps:$4 sm:$0xff]  }
 0xf3c   : > { %v17115_v54 = vld [vmem:[#allocation27 + $0x324] ss:$16 sps:$4 sm:$0xff]  }
 0xf3e   : > { %11281 = vmatpush1.bf16.msra.mxu0 %v17032_v56  ;;  %11322 = vmatpush1.bf16.msra.mxu1 %v17035_v57  ;;  %v17110_v56 = vld [vmem:[#allocation27 + $0x120] ss:$16 sps:$4 sm:$0xff]  }
 0xf3f   : > { %11282 = vmatprep.subr.bf16.mxu0 %v17040_v58  ;;  %11323 = vmatprep.subr.bf16.mxu1 %v17043_v14  ;;  %v17113_v57 = vld [vmem:[#allocation27 + $0x320] ss:$16 sps:$4 sm:$0xff]   ;;  %v17118_v58 = vld [vmem:[#allocation27 + $0x144] ss:$16 sps:$4 sm:$0xff]  }
 0xf40   : > { %v17121_v14 = vld [vmem:[#allocation27 + $0x344] ss:$16 sps:$4 sm:$0xff]  }
 0xf42   : > { %11283 = vmatpush1.bf16.msra.mxu0 %v17038_v8  ;;  %11324 = vmatpush1.bf16.msra.mxu1 %v17041_v32  ;;  %v17116_v8 = vld [vmem:[#allocation27 + $0x140] ss:$16 sps:$4 sm:$0xff]  }
 0xf43   : > { %11284 = vmatprep.subr.bf16.mxu0 %v17046_v63  ;;  %11325 = vmatprep.subr.bf16.mxu1 %v17049_v0  ;;  %v17119_v32 = vld [vmem:[#allocation27 + $0x340] ss:$16 sps:$4 sm:$0xff]   ;;  %v17124_v63 = vld [vmem:[#allocation27 + $0x164] ss:$16 sps:$4 sm:$0xff]  }
 0xf44   : > { %v17127_v0 = vld [vmem:[#allocation27 + $0x364] ss:$16 sps:$4 sm:$0xff]  }
 0xf46   : > { %11285 = vmatpush1.bf16.msra.mxu0 %v17044_v1  ;;  %11326 = vmatpush1.bf16.msra.mxu1 %v17047_v2  ;;  %v17122_v1 = vld [vmem:[#allocation27 + $0x160] ss:$16 sps:$4 sm:$0xff]  }
 0xf47   : > { %11286 = vmatprep.subr.bf16.mxu0 %v17052_v10  ;;  %11327 = vmatprep.subr.bf16.mxu1 %v17055_v7  ;;  %v17125_v2 = vld [vmem:[#allocation27 + $0x360] ss:$16 sps:$4 sm:$0xff]   ;;  %v17130_v10 = vld [vmem:[#allocation27 + $0x184] ss:$16 sps:$4 sm:$0xff]  }
 0xf48   : > { %v17133_v7 = vld [vmem:[#allocation27 + $0x384] ss:$16 sps:$4 sm:$0xff]  }
 0xf4a   : > { %11287 = vmatpush1.bf16.msra.mxu0 %v17050_v31  ;;  %11328 = vmatpush1.bf16.msra.mxu1 %v17053_v52  ;;  %v17128_v31 = vld [vmem:[#allocation27 + $0x180] ss:$16 sps:$4 sm:$0xff]  }
 0xf4b   : > { %11978 = vmatprep.subr.bf16.mxu0 %v17058_v53  ;;  %12019 = vmatprep.subr.bf16.mxu1 %v17061_v17  ;;  %v17131_v52 = vld [vmem:[#allocation27 + $0x380] ss:$16 sps:$4 sm:$0xff]   ;;  %v17136_v53 = vld [vmem:[#allocation27 + $0x1a4] ss:$16 sps:$4 sm:$0xff]  }
 0xf4c   : > { %v17139_v17 = vld [vmem:[#allocation27 + $0x3a4] ss:$16 sps:$4 sm:$0xff]  }
 0xf4d   : > { %11289 = vmatmul.mubr.bf16.vlgmr.msra.gmra.mrb[72].mxu0 %v19409_v60  ;;  %11330 = vmatmul.mubr.bf16.vlgmr.msra.gmra.mrb[72].mxu1 %v19411_v15  ;;  %v17076_v60 = vld [vmem:[#allocation27 + $0x64] ss:$16 sps:$4 sm:$0xff]  }
 0xf4e   : > { %11979 = vmatpush1.bf16.msra.mxu0 %v17056_v22  ;;  %12010 = vmatprep.mubr.bf16.mxu0 %v19425_v20  ;;  %v17079_v15 = vld [vmem:[#allocation27 + $0x264] ss:$16 sps:$4 sm:$0xff]   ;;  %v17134_v22 = vld [vmem:[#allocation27 + $0x1a0] ss:$16 sps:$4 sm:$0xff]  }
 0xf4f   : > { %12020 = vmatpush1.bf16.msra.mxu1 %v17059_v5  ;;  %12051 = vmatprep.mubr.bf16.mxu1 %v19429_v9  ;;  %v17137_v5 = vld [vmem:[#allocation27 + $0x3a0] ss:$16 sps:$4 sm:$0xff]  }
 0xf50   : > { %11980 = vmatprep.subr.bf16.mxu0 %v17064_v19  ;;  %12021 = vmatprep.subr.bf16.mxu1 %v17067_v34  ;;  %v17142_v19 = vld [vmem:[#allocation27 + $0x1c4] ss:$16 sps:$4 sm:$0xff]  }
 0xf51   : > { %v17145_v34 = vld [vmem:[#allocation27 + $0x3c4] ss:$16 sps:$4 sm:$0xff]  }
 0xf52   : > { %11981 = vmatpush1.bf16.msra.mxu0 %v17062_v24  ;;  %v17140_v24 = vld [vmem:[#allocation27 + $0x1c0] ss:$16 sps:$4 sm:$0xff]  }
 0xf53   : > { %12022 = vmatpush1.bf16.msra.mxu1 %v17065_v25  ;;  %11982 = vmatprep.subr.bf16.mxu0 %v17070_v16  ;;  %v17143_v25 = vld [vmem:[#allocation27 + $0x3c0] ss:$16 sps:$4 sm:$0xff]   ;;  %v17148_v16 = vld [vmem:[#allocation27 + $0x1e4] ss:$16 sps:$4 sm:$0xff]  }
 0xf54   : > { %12023 = vmatprep.subr.bf16.mxu1 %v17073_v61  ;;  %v17151_v61 = vld [vmem:[#allocation27 + $0x3e4] ss:$16 sps:$4 sm:$0xff]  }
 0xf56   : > { %11983 = vmatpush1.bf16.msra.mxu0 %v17068_v18  ;;  %v17146_v18 = vld [vmem:[#allocation27 + $0x1e0] ss:$16 sps:$4 sm:$0xff]  }
 0xf57   : > { %12024 = vmatpush1.bf16.msra.mxu1 %v17071_v33  ;;  %11984 = vmatprep.subr.bf16.mxu0 %v17076_v60  ;;  %v17149_v33 = vld [vmem:[#allocation27 + $0x3e0] ss:$16 sps:$4 sm:$0xff]   ;;  %v17154_v60 = vld [vmem:[#allocation27 + $0xc] ss:$16 sps:$4 sm:$0xff]  }
 0xf58   : > { %12025 = vmatprep.subr.bf16.mxu1 %v17079_v15  ;;  %v17157_v15 = vld [vmem:[#allocation27 + $0x20c] ss:$16 sps:$4 sm:$0xff]  }
 0xf5a   : > { %11985 = vmatpush1.bf16.msra.mxu0 %v17074_v37  ;;  %v17152_v37 = vld [vmem:[#allocation27 + $0x8] ss:$16 sps:$4 sm:$0xff]  }
 0xf5b   : > { %12026 = vmatpush1.bf16.msra.mxu1 %v17077_v26  ;;  %11986 = vmatprep.subr.bf16.mxu0 %v17082_v44  ;;  %v19437_v26 = vpack.c.bf16 %v19401_v4, %v19401_v4  ;;  %v17155_v44 = vld [vmem:[#allocation27 + $0x208] ss:$16 sps:$4 sm:$0xff]  }
 0xf5c   : > { %12027 = vmatprep.subr.bf16.mxu1 %v17085_v39  ;;  %v19441_v39 = vpack.c.bf16 %v19403_v27, %v19403_v27  ;;  %v17161_v4 = vld [vmem:[#allocation27 + $0x228] ss:$16 sps:$4 sm:$0xff]  }
 0xf5d   : > { %v17164_v27 = vld [vmem:[#allocation27 + $0x48] ss:$16 sps:$4 sm:$0xff]  }
 0xf5e   : > { %11987 = vmatpush1.bf16.msra.mxu0 %v17080_v38  ;;  %v17160_v38 = vld [vmem:[#allocation27 + $0x2c] ss:$16 sps:$4 sm:$0xff]  }
 0xf5f   : > { %12028 = vmatpush1.bf16.msra.mxu1 %v17083_v59  ;;  %11988 = vmatprep.subr.bf16.mxu0 %v17088_v55  ;;  %v17163_v59 = vld [vmem:[#allocation27 + $0x22c] ss:$16 sps:$4 sm:$0xff]   ;;  %v17158_v55 = vld [vmem:[#allocation27 + $0x28] ss:$16 sps:$4 sm:$0xff]  }
 0xf60   : > { %12029 = vmatprep.subr.bf16.mxu1 %v17091_v40  ;;  %v17166_v40 = vld [vmem:[#allocation27 + $0x4c] ss:$16 sps:$4 sm:$0xff]  }
 0xf62   : > { %11989 = vmatpush1.bf16.msra.mxu0 %v17086_v48  ;;  %v17169_v48 = vld [vmem:[#allocation27 + $0x24c] ss:$16 sps:$4 sm:$0xff]  }
 0xf63   : > { %12030 = vmatpush1.bf16.msra.mxu1 %v17089_v30  ;;  %11990 = vmatprep.subr.bf16.mxu0 %v17094_v11  ;;  %v17167_v30 = vld [vmem:[#allocation27 + $0x248] ss:$16 sps:$4 sm:$0xff]   ;;  %v17172_v11 = vld [vmem:[#allocation27 + $0x6c] ss:$16 sps:$4 sm:$0xff]  }
 0xf64   : > { %12031 = vmatprep.subr.bf16.mxu1 %v17097_v43  ;;  %v17175_v43 = vld [vmem:[#allocation27 + $0x26c] ss:$16 sps:$4 sm:$0xff]  }
 0xf66   : > { %11991 = vmatpush1.bf16.msra.mxu0 %v17092_v21  ;;  %v17170_v21 = vld [vmem:[#allocation27 + $0x68] ss:$16 sps:$4 sm:$0xff]  }
 0xf67   : > { %12032 = vmatpush1.bf16.msra.mxu1 %v17095_v51  ;;  %11992 = vmatprep.subr.bf16.mxu0 %v17100_v23  ;;  %v17178_v51 = vld [vmem:[#allocation27 + $0x8c] ss:$16 sps:$4 sm:$0xff]  }
 0xf68   : > { %12033 = vmatprep.subr.bf16.mxu1 %v17103_v13  ;;  %v17181_v23 = vld [vmem:[#allocation27 + $0x28c] ss:$16 sps:$4 sm:$0xff]   ;;  %v17179_v13 = vld [vmem:[#allocation27 + $0x288] ss:$16 sps:$4 sm:$0xff]  }
 0xf6a   : > { %11993 = vmatpush1.bf16.msra.mxu0 %v17098_v46  ;;  %v17184_v46 = vld [vmem:[#allocation27 + $0xac] ss:$16 sps:$4 sm:$0xff]  }
 0xf6b   : > { %12034 = vmatpush1.bf16.msra.mxu1 %v17101_v35  ;;  %11994 = vmatprep.subr.bf16.mxu0 %v17106_v12  ;;  %v17187_v35 = vld [vmem:[#allocation27 + $0x2ac] ss:$16 sps:$4 sm:$0xff]   ;;  %v17182_v12 = vld [vmem:[#allocation27 + $0xa8] ss:$16 sps:$4 sm:$0xff]  }
 0xf6c   : > { %12035 = vmatprep.subr.bf16.mxu1 %v17109_v6  ;;  %v17185_v6 = vld [vmem:[#allocation27 + $0x2a8] ss:$16 sps:$4 sm:$0xff]  }
 0xf6e   : > { %11995 = vmatpush1.bf16.msra.mxu0 %v17104_v47  ;;  %v17190_v47 = vld [vmem:[#allocation27 + $0xcc] ss:$16 sps:$4 sm:$0xff]  }
 0xf6f   : > { %12036 = vmatpush1.bf16.msra.mxu1 %v17107_v36  ;;  %11996 = vmatprep.subr.bf16.mxu0 %v17112_v3  ;;  %v17193_v36 = vld [vmem:[#allocation27 + $0x2cc] ss:$16 sps:$4 sm:$0xff]   ;;  %v17188_v3 = vld [vmem:[#allocation27 + $0xc8] ss:$16 sps:$4 sm:$0xff]  }
 0xf70   : > { %12037 = vmatprep.subr.bf16.mxu1 %v17115_v54  ;;  %v17191_v54 = vld [vmem:[#allocation27 + $0x2c8] ss:$16 sps:$4 sm:$0xff]  }
 0xf72   : > { %11997 = vmatpush1.bf16.msra.mxu0 %v17110_v56  ;;  %v17196_v56 = vld [vmem:[#allocation27 + $0xec] ss:$16 sps:$4 sm:$0xff]  }
 0xf73   : > { %12038 = vmatpush1.bf16.msra.mxu1 %v17113_v57  ;;  %11998 = vmatprep.subr.bf16.mxu0 %v17118_v58  ;;  %v17199_v57 = vld [vmem:[#allocation27 + $0x2ec] ss:$16 sps:$4 sm:$0xff]   ;;  %v17194_v58 = vld [vmem:[#allocation27 + $0xe8] ss:$16 sps:$4 sm:$0xff]  }
 0xf74   : > { %12039 = vmatprep.subr.bf16.mxu1 %v17121_v14  ;;  %v17197_v14 = vld [vmem:[#allocation27 + $0x2e8] ss:$16 sps:$4 sm:$0xff]  }
 0xf76   : > { %11999 = vmatpush1.bf16.msra.mxu0 %v17116_v8  ;;  %v17202_v8 = vld [vmem:[#allocation27 + $0x10c] ss:$16 sps:$4 sm:$0xff]  }
 0xf77   : > { %12040 = vmatpush1.bf16.msra.mxu1 %v17119_v32  ;;  %12000 = vmatprep.subr.bf16.mxu0 %v17124_v63  ;;  %v17205_v32 = vld [vmem:[#allocation27 + $0x30c] ss:$16 sps:$4 sm:$0xff]   ;;  %v17200_v63 = vld [vmem:[#allocation27 + $0x108] ss:$16 sps:$4 sm:$0xff]  }
 0xf78   : > { %12041 = vmatprep.subr.bf16.mxu1 %v17127_v0  ;;  %v17203_v0 = vld [vmem:[#allocation27 + $0x308] ss:$16 sps:$4 sm:$0xff]  }
 0xf7a   : > { %12001 = vmatpush1.bf16.msra.mxu0 %v17122_v1  ;;  %v17208_v1 = vld [vmem:[#allocation27 + $0x12c] ss:$16 sps:$4 sm:$0xff]  }
 0xf7b   : > { %12042 = vmatpush1.bf16.msra.mxu1 %v17125_v2  ;;  %12002 = vmatprep.subr.bf16.mxu0 %v17130_v10  ;;  %v17211_v2 = vld [vmem:[#allocation27 + $0x32c] ss:$16 sps:$4 sm:$0xff]   ;;  %v17206_v10 = vld [vmem:[#allocation27 + $0x128] ss:$16 sps:$4 sm:$0xff]  }
 0xf7c   : > { %12043 = vmatprep.subr.bf16.mxu1 %v17133_v7  ;;  %v17209_v7 = vld [vmem:[#allocation27 + $0x328] ss:$16 sps:$4 sm:$0xff]  }
 0xf7e   : > { %12003 = vmatpush1.bf16.msra.mxu0 %v17128_v31  ;;  %v17214_v31 = vld [vmem:[#allocation27 + $0x14c] ss:$16 sps:$4 sm:$0xff]  }
 0xf7f   : > { %12044 = vmatpush1.bf16.msra.mxu1 %v17131_v52  ;;  %12004 = vmatprep.subr.bf16.mxu0 %v17136_v53  ;;  %v17217_v52 = vld [vmem:[#allocation27 + $0x34c] ss:$16 sps:$4 sm:$0xff]   ;;  %v17212_v53 = vld [vmem:[#allocation27 + $0x148] ss:$16 sps:$4 sm:$0xff]  }
 0xf80   : > { %12045 = vmatprep.subr.bf16.mxu1 %v17139_v17  ;;  %v17215_v17 = vld [vmem:[#allocation27 + $0x348] ss:$16 sps:$4 sm:$0xff]  }
 0xf82   : > { %12005 = vmatpush1.bf16.msra.mxu0 %v17134_v22  ;;  %v17220_v22 = vld [vmem:[#allocation27 + $0x16c] ss:$16 sps:$4 sm:$0xff]  }
 0xf83   : > { %12046 = vmatpush1.bf16.msra.mxu1 %v17137_v5  ;;  %12006 = vmatprep.subr.bf16.mxu0 %v17142_v19  ;;  %v17223_v5 = vld [vmem:[#allocation27 + $0x36c] ss:$16 sps:$4 sm:$0xff]   ;;  %v17218_v19 = vld [vmem:[#allocation27 + $0x168] ss:$16 sps:$4 sm:$0xff]  }
 0xf84   : > { %12047 = vmatprep.subr.bf16.mxu1 %v17145_v34  ;;  %v17221_v34 = vld [vmem:[#allocation27 + $0x368] ss:$16 sps:$4 sm:$0xff]  }
 0xf86   : > { %12007 = vmatpush1.bf16.msra.mxu0 %v17140_v24  ;;  %v17226_v24 = vld [vmem:[#allocation27 + $0x18c] ss:$16 sps:$4 sm:$0xff]  }
 0xf87   : > { %12048 = vmatpush1.bf16.msra.mxu1 %v17143_v25  ;;  %12008 = vmatprep.subr.bf16.mxu0 %v17148_v16  ;;  %v17229_v25 = vld [vmem:[#allocation27 + $0x38c] ss:$16 sps:$4 sm:$0xff]   ;;  %v17224_v16 = vld [vmem:[#allocation27 + $0x188] ss:$16 sps:$4 sm:$0xff]  }
 0xf88   : > { %12049 = vmatprep.subr.bf16.mxu1 %v17151_v61  ;;  %v17227_v61 = vld [vmem:[#allocation27 + $0x388] ss:$16 sps:$4 sm:$0xff]  }
 0xf8a   : > { %12009 = vmatpush1.bf16.msra.mxu0 %v17146_v18  ;;  %v17232_v18 = vld [vmem:[#allocation27 + $0x1ac] ss:$16 sps:$4 sm:$0xff]  }
 0xf8b   : > { %12050 = vmatpush1.bf16.msra.mxu1 %v17149_v33  ;;  %12060 = vmatprep.subr.bf16.mxu0 %v17154_v60  ;;  %v17235_v33 = vld [vmem:[#allocation27 + $0x3ac] ss:$16 sps:$4 sm:$0xff]   ;;  %v17230_v60 = vld [vmem:[#allocation27 + $0x1a8] ss:$16 sps:$4 sm:$0xff]  }
 0xf8c   : > { %12101 = vmatprep.subr.bf16.mxu1 %v17157_v15  ;;  %v17233_v15 = vld [vmem:[#allocation27 + $0x3a8] ss:$16 sps:$4 sm:$0xff]  }
 0xf8d   : > { %12011 = vmatmul.mubr.bf16.vlgmr.msra.gmra.mrb[76].mxu0 %v19437_v26 }
 0xf8e   : > { %12052 = vmatmul.mubr.bf16.vlgmr.msra.gmra.mrb[76].mxu1 %v19441_v39  ;;  %12061 = vmatpush1.bf16.msra.mxu0 %v17152_v37  ;;  %v17238_v37 = vld [vmem:[#allocation27 + $0x1cc] ss:$16 sps:$4 sm:$0xff]  }
 0xf8f   : > { %12092 = vmatprep.mubr.bf16.mxu0 %v19425_v20  ;;  %12102 = vmatpush1.bf16.msra.mxu1 %v17155_v44  ;;  %v17173_v20 = vld [vmem:[#allocation27 + $0x268] ss:$16 sps:$4 sm:$0xff]   ;;  %v17241_v44 = vld [vmem:[#allocation27 + $0x3cc] ss:$16 sps:$4 sm:$0xff]  }
 0xf90   : > { %12133 = vmatprep.mubr.bf16.mxu1 %v19429_v9  ;;  %12062 = vmatprep.subr.bf16.mxu0 %v17160_v38  ;;  %v17176_v9 = vld [vmem:[#allocation27 + $0x88] ss:$16 sps:$4 sm:$0xff]  }
 0xf91   : > { %12103 = vmatprep.subr.bf16.mxu1 %v17163_v59  ;;  %v17236_v38 = vld [vmem:[#allocation27 + $0x1c8] ss:$16 sps:$4 sm:$0xff]  }
 0xf92   : > { %12063 = vmatpush1.bf16.msra.mxu0 %v17158_v55  ;;  %v17239_v59 = vld [vmem:[#allocation27 + $0x3c8] ss:$16 sps:$4 sm:$0xff]   ;;  %v17244_v55 = vld [vmem:[#allocation27 + $0x1ec] ss:$16 sps:$4 sm:$0xff]  }
 0xf93   : > { %12104 = vmatpush1.bf16.msra.mxu1 %v17161_v4  ;;  %12064 = vmatprep.subr.bf16.mxu0 %v17166_v40  ;;  %v17247_v4 = vld [vmem:[#allocation27 + $0x3ec] ss:$16 sps:$4 sm:$0xff]   ;;  %v17242_v40 = vld [vmem:[#allocation27 + $0x1e8] ss:$16 sps:$4 sm:$0xff]  }
 0xf94   : > { %12105 = vmatprep.subr.bf16.mxu1 %v17169_v48  ;;  %v17245_v48 = vld [vmem:[#allocation27 + $0x3e8] ss:$16 sps:$4 sm:$0xff]  }
 0xf96   : > { %12065 = vmatpush1.bf16.msra.mxu0 %v17164_v27  ;;  %v17250_v27 = vld [vmem:[#allocation30 + $0x4] ss:$16 sps:$4 sm:$0xff]  }
 0xf97   : > { %12106 = vmatpush1.bf16.msra.mxu1 %v17167_v30  ;;  %12066 = vmatprep.subr.bf16.mxu0 %v17172_v11  ;;  %v17253_v30 = vld [vmem:[#allocation30 + $0x204] ss:$16 sps:$4 sm:$0xff]   ;;  %v17248_v11 = vld [vmem:[#allocation30] ss:$16 sps:$4 sm:$0xff]  }
 0xf98   : > { %12107 = vmatprep.subr.bf16.mxu1 %v17175_v43  ;;  %v17251_v43 = vld [vmem:[#allocation30 + $0x200] ss:$16 sps:$4 sm:$0xff]  }
 0xf9a   : > { %12067 = vmatpush1.bf16.msra.mxu0 %v17170_v21  ;;  %v17256_v21 = vld [vmem:[#allocation30 + $0x24] ss:$16 sps:$4 sm:$0xff]  }
 0xf9b   : > { %12108 = vmatpush1.bf16.msra.mxu1 %v17173_v20  ;;  %12068 = vmatprep.subr.bf16.mxu0 %v17178_v51  ;;  %v19449_v20 = vpack.c.bf16 %v19419_v29, %v19419_v29  ;;  %v17259_v51 = vld [vmem:[#allocation30 + $0x224] ss:$16 sps:$4 sm:$0xff]  }
 0xf9c   : > { %12109 = vmatprep.subr.bf16.mxu1 %v17181_v23  ;;  %v19454_v23 = vpack.c.bf16 %v19421_v41, %v19421_v41  ;;  %v17265_v29 = vld [vmem:[#allocation30 + $0x244] ss:$16 sps:$4 sm:$0xff]   ;;  %v17263_v41 = vld [vmem:[#allocation30 + $0x240] ss:$16 sps:$4 sm:$0xff]  }
 0xf9e   : > { %12069 = vmatpush1.bf16.msra.mxu0 %v17176_v9  ;;  %v17254_v9 = vld [vmem:[#allocation30 + $0x20] ss:$16 sps:$4 sm:$0xff]  }
 0xf9f   : > { %12110 = vmatpush1.bf16.msra.mxu1 %v17179_v13  ;;  %12070 = vmatprep.subr.bf16.mxu0 %v17184_v46  ;;  %v17257_v13 = vld [vmem:[#allocation30 + $0x220] ss:$16 sps:$4 sm:$0xff]   ;;  %v17262_v46 = vld [vmem:[#allocation30 + $0x44] ss:$16 sps:$4 sm:$0xff]  }
 0xfa0   : > { %12111 = vmatprep.subr.bf16.mxu1 %v17187_v35  ;;  %v17268_v35 = vld [vmem:[#allocation30 + $0x64] ss:$16 sps:$4 sm:$0xff]  }
 0xfa2   : > { %12071 = vmatpush1.bf16.msra.mxu0 %v17182_v12  ;;  %v17266_v12 = vld [vmem:[#allocation30 + $0x60] ss:$16 sps:$4 sm:$0xff]  }
 0xfa3   : > { %12112 = vmatpush1.bf16.msra.mxu1 %v17185_v6  ;;  %12072 = vmatprep.subr.bf16.mxu0 %v17190_v47  ;;  %v17269_v6 = vld [vmem:[#allocation30 + $0x260] ss:$16 sps:$4 sm:$0xff]   ;;  %v17274_v47 = vld [vmem:[#allocation30 + $0x84] ss:$16 sps:$4 sm:$0xff]  }
 0xfa4   : > { %12113 = vmatprep.subr.bf16.mxu1 %v17193_v36  ;;  %v17277_v36 = vld [vmem:[#allocation30 + $0x284] ss:$16 sps:$4 sm:$0xff]  }
 0xfa6   : > { %12073 = vmatpush1.bf16.msra.mxu0 %v17188_v3  ;;  %v17272_v3 = vld [vmem:[#allocation30 + $0x80] ss:$16 sps:$4 sm:$0xff]  }
 0xfa7   : > { %12114 = vmatpush1.bf16.msra.mxu1 %v17191_v54  ;;  %12074 = vmatprep.subr.bf16.mxu0 %v17196_v56  ;;  %v17275_v54 = vld [vmem:[#allocation30 + $0x280] ss:$16 sps:$4 sm:$0xff]   ;;  %v17280_v56 = vld [vmem:[#allocation30 + $0xa4] ss:$16 sps:$4 sm:$0xff]  }
 0xfa8   : > { %12115 = vmatprep.subr.bf16.mxu1 %v17199_v57  ;;  %v17283_v57 = vld [vmem:[#allocation30 + $0x2a4] ss:$16 sps:$4 sm:$0xff]  }
 0xfaa   : > { %12075 = vmatpush1.bf16.msra.mxu0 %v17194_v58  ;;  %v17278_v58 = vld [vmem:[#allocation30 + $0xa0] ss:$16 sps:$4 sm:$0xff]  }
 0xfab   : > { %12116 = vmatpush1.bf16.msra.mxu1 %v17197_v14  ;;  %12076 = vmatprep.subr.bf16.mxu0 %v17202_v8  ;;  %v17281_v14 = vld [vmem:[#allocation30 + $0x2a0] ss:$16 sps:$4 sm:$0xff]   ;;  %v17286_v8 = vld [vmem:[#allocation30 + $0xc4] ss:$16 sps:$4 sm:$0xff]  }
 0xfac   : > { %12117 = vmatprep.subr.bf16.mxu1 %v17205_v32 }
 0xfae   : > { %12077 = vmatpush1.bf16.msra.mxu0 %v17200_v63 }
 0xfaf   : > { %12118 = vmatpush1.bf16.msra.mxu1 %v17203_v0  ;;  %12078 = vmatprep.subr.bf16.mxu0 %v17208_v1  ;;  %v17289_v0 = vld [vmem:[#allocation30 + $0x2c4] ss:$16 sps:$4 sm:$0xff]  }
 0xfb0   : > { %12119 = vmatprep.subr.bf16.mxu1 %v17211_v2 }
 0xfb2   : > { %12079 = vmatpush1.bf16.msra.mxu0 %v17206_v10 }
 0xfb3   : > { %12120 = vmatpush1.bf16.msra.mxu1 %v17209_v7  ;;  %12080 = vmatprep.subr.bf16.mxu0 %v17214_v31 }
 0xfb4   : > { %12121 = vmatprep.subr.bf16.mxu1 %v17217_v52 }
 0xfb6   : > { %12081 = vmatpush1.bf16.msra.mxu0 %v17212_v53  ;;  %v17284_v53 = vld [vmem:[#allocation30 + $0xc0] ss:$16 sps:$4 sm:$0xff]  }
 0xfb7   : > { %12122 = vmatpush1.bf16.msra.mxu1 %v17215_v17  ;;  %12082 = vmatprep.subr.bf16.mxu0 %v17220_v22  ;;  %v17287_v17 = vld [vmem:[#allocation30 + $0x2c0] ss:$16 sps:$4 sm:$0xff]  }
 0xfb8   : > { %12123 = vmatprep.subr.bf16.mxu1 %v17223_v5 }
 0xfba   : > { %12083 = vmatpush1.bf16.msra.mxu0 %v17218_v19  ;;  %v17292_v19 = vld [vmem:[#allocation30 + $0xe4] ss:$16 sps:$4 sm:$0xff]  }
 0xfbb   : > { %12124 = vmatpush1.bf16.msra.mxu1 %v17221_v34  ;;  %12084 = vmatprep.subr.bf16.mxu0 %v17226_v24  ;;  %v17295_v34 = vld [vmem:[#allocation30 + $0x2e4] ss:$16 sps:$4 sm:$0xff]   ;;  %v17290_v24 = vld [vmem:[#allocation30 + $0xe0] ss:$16 sps:$4 sm:$0xff]  }
 0xfbc   : > { %12125 = vmatprep.subr.bf16.mxu1 %v17229_v25  ;;  %v17293_v25 = vld [vmem:[#allocation30 + $0x2e0] ss:$16 sps:$4 sm:$0xff]  }
 0xfbe   : > { %12085 = vmatpush1.bf16.msra.mxu0 %v17224_v16  ;;  %v17298_v16 = vld [vmem:[#allocation30 + $0x104] ss:$16 sps:$4 sm:$0xff]  }
 0xfbf   : > { %12126 = vmatpush1.bf16.msra.mxu1 %v17227_v61  ;;  %12086 = vmatprep.subr.bf16.mxu0 %v17232_v18  ;;  %v17301_v61 = vld [vmem:[#allocation30 + $0x304] ss:$16 sps:$4 sm:$0xff]   ;;  %v17296_v18 = vld [vmem:[#allocation30 + $0x100] ss:$16 sps:$4 sm:$0xff]  }
 0xfc0   : > { %12127 = vmatprep.subr.bf16.mxu1 %v17235_v33  ;;  %v17299_v33 = vld [vmem:[#allocation30 + $0x300] ss:$16 sps:$4 sm:$0xff]  }
 0xfc2   : > { %12087 = vmatpush1.bf16.msra.mxu0 %v17230_v60  ;;  %v17304_v60 = vld [vmem:[#allocation30 + $0x124] ss:$16 sps:$4 sm:$0xff]  }
 0xfc3   : > { %12128 = vmatpush1.bf16.msra.mxu1 %v17233_v15  ;;  %12088 = vmatprep.subr.bf16.mxu0 %v17238_v37  ;;  %v17307_v15 = vld [vmem:[#allocation30 + $0x324] ss:$16 sps:$4 sm:$0xff]   ;;  %v17302_v37 = vld [vmem:[#allocation30 + $0x120] ss:$16 sps:$4 sm:$0xff]  }
 0xfc4   : > { %12129 = vmatprep.subr.bf16.mxu1 %v17241_v44  ;;  %v17305_v44 = vld [vmem:[#allocation30 + $0x320] ss:$16 sps:$4 sm:$0xff]  }
 0xfc6   : > { %12089 = vmatpush1.bf16.msra.mxu0 %v17236_v38  ;;  %v17310_v38 = vld [vmem:[#allocation30 + $0x144] ss:$16 sps:$4 sm:$0xff]  }
 0xfc7   : > { %12130 = vmatpush1.bf16.msra.mxu1 %v17239_v59  ;;  %12090 = vmatprep.subr.bf16.mxu0 %v17244_v55  ;;  %v17313_v59 = vld [vmem:[#allocation30 + $0x344] ss:$16 sps:$4 sm:$0xff]   ;;  %v17308_v55 = vld [vmem:[#allocation30 + $0x140] ss:$16 sps:$4 sm:$0xff]  }
 0xfc8   : > { %12131 = vmatprep.subr.bf16.mxu1 %v17247_v4  ;;  %v17311_v4 = vld [vmem:[#allocation30 + $0x340] ss:$16 sps:$4 sm:$0xff]  }
 0xfca   : > { %12091 = vmatpush1.bf16.msra.mxu0 %v17242_v40  ;;  %v17316_v40 = vld [vmem:[#allocation30 + $0x164] ss:$16 sps:$4 sm:$0xff]  }
 0xfcb   : > { %12132 = vmatpush1.bf16.msra.mxu1 %v17245_v48  ;;  %12914 = vmatprep.subr.bf16.mxu0 %v17250_v27  ;;  %v17319_v48 = vld [vmem:[#allocation30 + $0x364] ss:$16 sps:$4 sm:$0xff]   ;;  %v17314_v27 = vld [vmem:[#allocation30 + $0x160] ss:$16 sps:$4 sm:$0xff]  }
 0xfcc   : > { %12955 = vmatprep.subr.bf16.mxu1 %v17253_v30  ;;  %v17317_v30 = vld [vmem:[#allocation30 + $0x360] ss:$16 sps:$4 sm:$0xff]  }
 0xfcd   : > { %12093 = vmatmul.mubr.bf16.vlgmr.msra.gmra.mrb[80].mxu0 %v19437_v26  ;;  %v17260_v26 = vld [vmem:[#allocation30 + $0x40] ss:$16 sps:$4 sm:$0xff]  }
 0xfce   : > { %12134 = vmatmul.mubr.bf16.vlgmr.msra.gmra.mrb[80].mxu1 %v19441_v39  ;;  %12915 = vmatpush1.bf16.msra.mxu0 %v17248_v11  ;;  %v17271_v39 = vld [vmem:[#allocation30 + $0x264] ss:$16 sps:$4 sm:$0xff]  }
 0xfcf   : > { %12946 = vmatprep.mubr.bf16.mxu0 %v19449_v20  ;;  %12956 = vmatpush1.bf16.msra.mxu1 %v17251_v43  ;;  %v17322_v11 = vld [vmem:[#allocation30 + $0x184] ss:$16 sps:$4 sm:$0xff]  }
 0xfd0   : > { %12987 = vmatprep.mubr.bf16.mxu1 %v19454_v23  ;;  %12916 = vmatprep.subr.bf16.mxu0 %v17256_v21  ;;  %v17325_v43 = vld [vmem:[#allocation30 + $0x384] ss:$16 sps:$4 sm:$0xff]   ;;  %v17320_v21 = vld [vmem:[#allocation30 + $0x180] ss:$16 sps:$4 sm:$0xff]  }
 0xfd1   : > { %12957 = vmatprep.subr.bf16.mxu1 %v17259_v51  ;;  %v17323_v51 = vld [vmem:[#allocation30 + $0x380] ss:$16 sps:$4 sm:$0xff]  }
 0xfd2   : > { %12917 = vmatpush1.bf16.msra.mxu0 %v17254_v9  ;;  %v17328_v9 = vld [vmem:[#allocation30 + $0x1a4] ss:$16 sps:$4 sm:$0xff]  }
 0xfd3   : > { %12958 = vmatpush1.bf16.msra.mxu1 %v17257_v13  ;;  %12918 = vmatprep.subr.bf16.mxu0 %v17262_v46  ;;  %v17331_v13 = vld [vmem:[#allocation30 + $0x3a4] ss:$16 sps:$4 sm:$0xff]   ;;  %v17326_v46 = vld [vmem:[#allocation30 + $0x1a0] ss:$16 sps:$4 sm:$0xff]  }
 0xfd4   : > { %12959 = vmatprep.subr.bf16.mxu1 %v17265_v29  ;;  %v17329_v29 = vld [vmem:[#allocation30 + $0x3a0] ss:$16 sps:$4 sm:$0xff]  }
 0xfd6   : > { %12919 = vmatpush1.bf16.msra.mxu0 %v17260_v26  ;;  %v17334_v26 = vld [vmem:[#allocation30 + $0x1c4] ss:$16 sps:$4 sm:$0xff]  }
 0xfd7   : > { %12960 = vmatpush1.bf16.msra.mxu1 %v17263_v41  ;;  %12920 = vmatprep.subr.bf16.mxu0 %v17268_v35  ;;  %v17337_v41 = vld [vmem:[#allocation30 + $0x3c4] ss:$16 sps:$4 sm:$0xff]   ;;  %v17332_v35 = vld [vmem:[#allocation30 + $0x1c0] ss:$16 sps:$4 sm:$0xff]  }
 0xfd8   : > { %12961 = vmatprep.subr.bf16.mxu1 %v17271_v39  ;;  %v17335_v39 = vld [vmem:[#allocation30 + $0x3c0] ss:$16 sps:$4 sm:$0xff]  }
 0xfda   : > { %12921 = vmatpush1.bf16.msra.mxu0 %v17266_v12  ;;  %v17340_v12 = vld [vmem:[#allocation30 + $0x1e4] ss:$16 sps:$4 sm:$0xff]  }
 0xfdb   : > { %12962 = vmatpush1.bf16.msra.mxu1 %v17269_v6  ;;  %12922 = vmatprep.subr.bf16.mxu0 %v17274_v47  ;;  %v17343_v6 = vld [vmem:[#allocation30 + $0x3e4] ss:$16 sps:$4 sm:$0xff]   ;;  %v17338_v47 = vld [vmem:[#allocation30 + $0x1e0] ss:$16 sps:$4 sm:$0xff]  }
 0xfdc   : > { %12963 = vmatprep.subr.bf16.mxu1 %v17277_v36  ;;  %v17341_v36 = vld [vmem:[#allocation30 + $0x3e0] ss:$16 sps:$4 sm:$0xff]  }
 0xfde   : > { %12923 = vmatpush1.bf16.msra.mxu0 %v17272_v3  ;;  %v17346_v3 = vld [vmem:[#allocation30 + $0xc] ss:$16 sps:$4 sm:$0xff]  }
 0xfdf   : > { %12964 = vmatpush1.bf16.msra.mxu1 %v17275_v54  ;;  %12924 = vmatprep.subr.bf16.mxu0 %v17280_v56  ;;  %v17349_v54 = vld [vmem:[#allocation30 + $0x20c] ss:$16 sps:$4 sm:$0xff]   ;;  %v17344_v56 = vld [vmem:[#allocation30 + $0x8] ss:$16 sps:$4 sm:$0xff]  }
 0xfe0   : > { %12965 = vmatprep.subr.bf16.mxu1 %v17283_v57  ;;  %v11208_v32 = vpop.f32.mrb[68].mxu0  ;;  %v11249_v63 = vpop.f32.mrb[68].mxu1  ;;  %v19465_v57 = vpack.c.bf16 %v19415_v62, %v19415_v62  ;;  %v17353_v62 = vld [vmem:[#allocation30 + $0x228] ss:$16 sps:$4 sm:$0xff]  }
 0xfe1   : > { %v19459_v1 = vadd.f32 %v11249_v63, %v11208_v32  ;;  %v11210_v2 = vpop.f32.mrb[69].mxu0  ;;  %v11251_v10 = vpop.f32.mrb[69].mxu1  ;;  %v17355_v32 = vld [vmem:[#allocation30 + $0x22c] ss:$16 sps:$4 sm:$0xff]   ;;  %v17350_v63 = vld [vmem:[#allocation30 + $0x28] ss:$16 sps:$4 sm:$0xff]  }
 0xfe2   : > { %12925 = vmatpush1.bf16.msra.mxu0 %v17278_v58  ;;  %v19461_v7 = vadd.f32 %v11251_v10, %v11210_v2  ;;  %v11212_v31 = vpop.f32.mrb[70].mxu0  ;;  %v11253_v52 = vpop.f32.mrb[70].mxu1  ;;  %v17347_v58 = vld [vmem:[#allocation30 + $0x208] ss:$16 sps:$4 sm:$0xff]   ;;  %v17361_v2 = vld [vmem:[#allocation30 + $0x24c] ss:$16 sps:$4 sm:$0xff]  }
 0xfe3   : > { %12966 = vmatpush1.bf16.msra.mxu1 %v17281_v14  ;;  %12926 = vmatprep.subr.bf16.mxu0 %v17286_v8  ;;  %v11213_v22 = vpop.f32.mrb[71].mxu0  ;;  %v11254_v5 = vpop.f32.mrb[71].mxu1  ;;  %v19469_v14 = vpack.c.bf16 %v19417_v28, %v19417_v28  ;;  %v17352_v8 = vld [vmem:[#allocation30 + $0x2c] ss:$16 sps:$4 sm:$0xff]   ;;  %v17356_v28 = vld [vmem:[#allocation30 + $0x48] ss:$16 sps:$4 sm:$0xff]  }
 0xfe4   : > { %12967 = vmatprep.subr.bf16.mxu1 %v17289_v0  ;;  %v17358_v0 = vld [vmem:[#allocation30 + $0x4c] ss:$16 sps:$4 sm:$0xff]   ;;  %v17359_v10 = vld [vmem:[#allocation30 + $0x248] ss:$16 sps:$4 sm:$0xff]  }
 0xfe5   : > { %v17364_v31 = vld [vmem:[#allocation30 + $0x6c] ss:$16 sps:$4 sm:$0xff]   ;;  %v17371_v5 = vld [vmem:[#allocation30 + $0x288] ss:$16 sps:$4 sm:$0xff]  }
 0xfe6   : > { %12927 = vmatpush1.bf16.msra.mxu0 %v17284_v53  ;;  %v17367_v52 = vld [vmem:[#allocation30 + $0x26c] ss:$16 sps:$4 sm:$0xff]   ;;  %v17362_v53 = vld [vmem:[#allocation30 + $0x68] ss:$16 sps:$4 sm:$0xff]  }
 0xfe7   : > { %12968 = vmatpush1.bf16.msra.mxu1 %v17287_v17  ;;  %12928 = vmatprep.subr.bf16.mxu0 %v17292_v19  ;;  %v17370_v17 = vld [vmem:[#allocation30 + $0x8c] ss:$16 sps:$4 sm:$0xff]  }
 0xfe8   : > { %12969 = vmatprep.subr.bf16.mxu1 %v17295_v34  ;;  %v17373_v22 = vld [vmem:[#allocation30 + $0x28c] ss:$16 sps:$4 sm:$0xff]  }
 0xfe9   : > { %v17376_v19 = vld [vmem:[#allocation30 + $0xac] ss:$16 sps:$4 sm:$0xff]  }
 0xfea   : > { %12929 = vmatpush1.bf16.msra.mxu0 %v17290_v24  ;;  %v17379_v34 = vld [vmem:[#allocation30 + $0x2ac] ss:$16 sps:$4 sm:$0xff]   ;;  %v17374_v24 = vld [vmem:[#allocation30 + $0xa8] ss:$16 sps:$4 sm:$0xff]  }
 0xfeb   : > { %12970 = vmatpush1.bf16.msra.mxu1 %v17293_v25  ;;  %12930 = vmatprep.subr.bf16.mxu0 %v17298_v16  ;;  %v17377_v25 = vld [vmem:[#allocation30 + $0x2a8] ss:$16 sps:$4 sm:$0xff]   ;;  %v17382_v16 = vld [vmem:[#allocation30 + $0xcc] ss:$16 sps:$4 sm:$0xff]  }
 0xfec   : > { %12971 = vmatprep.subr.bf16.mxu1 %v17301_v61 }
 0xfee   : > { %12931 = vmatpush1.bf16.msra.mxu0 %v17296_v18 }
 0xfef   : > { %12972 = vmatpush1.bf16.msra.mxu1 %v17299_v33  ;;  %12932 = vmatprep.subr.bf16.mxu0 %v17304_v60  ;;  %v17385_v33 = vld [vmem:[#allocation30 + $0x2cc] ss:$16 sps:$4 sm:$0xff]  }
 0xff0   : > { %12973 = vmatprep.subr.bf16.mxu1 %v17307_v15 }
 0xff2   : > { %12933 = vmatpush1.bf16.msra.mxu0 %v17302_v37 }
 0xff3   : > { %12974 = vmatpush1.bf16.msra.mxu1 %v17305_v44  ;;  %12934 = vmatprep.subr.bf16.mxu0 %v17310_v38 }
 0xff4   : > { %12975 = vmatprep.subr.bf16.mxu1 %v17313_v59 }
 0xff6   : > { %12935 = vmatpush1.bf16.msra.mxu0 %v17308_v55  ;;  %v17380_v55 = vld [vmem:[#allocation30 + $0xc8] ss:$16 sps:$4 sm:$0xff]  }
 0xff7   : > { %12976 = vmatpush1.bf16.msra.mxu1 %v17311_v4  ;;  %12936 = vmatprep.subr.bf16.mxu0 %v17316_v40 }
 0xff8   : > { %12977 = vmatprep.subr.bf16.mxu1 %v17319_v48  ;;  %v17383_v48 = vld [vmem:[#allocation30 + $0x2c8] ss:$16 sps:$4 sm:$0xff]  }
 0xffa   : > { %12937 = vmatpush1.bf16.msra.mxu0 %v17314_v27  ;;  %v17388_v27 = vld [vmem:[#allocation30 + $0xec] ss:$16 sps:$4 sm:$0xff]  }
 0xffb   : > { %12978 = vmatpush1.bf16.msra.mxu1 %v17317_v30  ;;  %12938 = vmatprep.subr.bf16.mxu0 %v17322_v11  ;;  %v17391_v30 = vld [vmem:[#allocation30 + $0x2ec] ss:$16 sps:$4 sm:$0xff]   ;;  %v17386_v11 = vld [vmem:[#allocation30 + $0xe8] ss:$16 sps:$4 sm:$0xff]  }
 0xffc   : > { %12979 = vmatprep.subr.bf16.mxu1 %v17325_v43  ;;  %v17389_v43 = vld [vmem:[#allocation30 + $0x2e8] ss:$16 sps:$4 sm:$0xff]  }
 0xffe   : > { %12939 = vmatpush1.bf16.msra.mxu0 %v17320_v21  ;;  %v17394_v21 = vld [vmem:[#allocation30 + $0x10c] ss:$16 sps:$4 sm:$0xff]  }
 0xfff   : > { %12980 = vmatpush1.bf16.msra.mxu1 %v17323_v51  ;;  %12940 = vmatprep.subr.bf16.mxu0 %v17328_v9  ;;  %v17397_v51 = vld [vmem:[#allocation30 + $0x30c] ss:$16 sps:$4 sm:$0xff]   ;;  %v17392_v9 = vld [vmem:[#allocation30 + $0x108] ss:$16 sps:$4 sm:$0xff]  }
0x1000   : > { %12981 = vmatprep.subr.bf16.mxu1 %v17331_v13  ;;  %v17395_v13 = vld [vmem:[#allocation30 + $0x308] ss:$16 sps:$4 sm:$0xff]  }
0x1002   : > { %12941 = vmatpush1.bf16.msra.mxu0 %v17326_v46  ;;  %v17400_v46 = vld [vmem:[#allocation30 + $0x12c] ss:$16 sps:$4 sm:$0xff]  }
0x1003   : > { %12982 = vmatpush1.bf16.msra.mxu1 %v17329_v29  ;;  %12942 = vmatprep.subr.bf16.mxu0 %v17334_v26  ;;  %v17403_v29 = vld [vmem:[#allocation30 + $0x32c] ss:$16 sps:$4 sm:$0xff]   ;;  %v17398_v26 = vld [vmem:[#allocation30 + $0x128] ss:$16 sps:$4 sm:$0xff]  }
0x1004   : > { %12983 = vmatprep.subr.bf16.mxu1 %v17337_v41  ;;  %v17401_v41 = vld [vmem:[#allocation30 + $0x328] ss:$16 sps:$4 sm:$0xff]  }
0x1006   : > { %12943 = vmatpush1.bf16.msra.mxu0 %v17332_v35  ;;  %v17406_v35 = vld [vmem:[#allocation30 + $0x14c] ss:$16 sps:$4 sm:$0xff]  }
0x1007   : > { %12984 = vmatpush1.bf16.msra.mxu1 %v17335_v39  ;;  %12944 = vmatprep.subr.bf16.mxu0 %v17340_v12  ;;  %v17409_v39 = vld [vmem:[#allocation30 + $0x34c] ss:$16 sps:$4 sm:$0xff]   ;;  %v17404_v12 = vld [vmem:[#allocation30 + $0x148] ss:$16 sps:$4 sm:$0xff]  }
0x1008   : > { %12985 = vmatprep.subr.bf16.mxu1 %v17343_v6  ;;  %v17407_v6 = vld [vmem:[#allocation30 + $0x348] ss:$16 sps:$4 sm:$0xff]  }
0x100a   : > { %12945 = vmatpush1.bf16.msra.mxu0 %v17338_v47  ;;  %v17412_v47 = vld [vmem:[#allocation30 + $0x16c] ss:$16 sps:$4 sm:$0xff]  }
0x100b   : > { %12986 = vmatpush1.bf16.msra.mxu1 %v17341_v36  ;;  %12996 = vmatprep.subr.bf16.mxu0 %v17346_v3  ;;  %v17415_v36 = vld [vmem:[#allocation30 + $0x36c] ss:$16 sps:$4 sm:$0xff]   ;;  %v17410_v3 = vld [vmem:[#allocation30 + $0x168] ss:$16 sps:$4 sm:$0xff]  }
0x100c   : > { %13037 = vmatprep.subr.bf16.mxu1 %v17349_v54  ;;  %v17413_v54 = vld [vmem:[#allocation30 + $0x368] ss:$16 sps:$4 sm:$0xff]  }
0x100d   : > { %12947 = vmatmul.mubr.bf16.vlgmr.msra.gmra.mrb[84].mxu0 %v19465_v57 }
0x100e   : > { %12988 = vmatmul.mubr.bf16.vlgmr.msra.gmra.mrb[84].mxu1 %v19469_v14  ;;  %12997 = vmatpush1.bf16.msra.mxu0 %v17344_v56  ;;  %v17418_v56 = vld [vmem:[#allocation30 + $0x18c] ss:$16 sps:$4 sm:$0xff]  }
0x100f   : > { %13028 = vmatprep.mubr.bf16.mxu0 %v19449_v20  ;;  %13038 = vmatpush1.bf16.msra.mxu1 %v17347_v58  ;;  %v17365_v20 = vld [vmem:[#allocation30 + $0x268] ss:$16 sps:$4 sm:$0xff]   ;;  %v17421_v58 = vld [vmem:[#allocation30 + $0x38c] ss:$16 sps:$4 sm:$0xff]  }
0x1010   : > { %13069 = vmatprep.mubr.bf16.mxu1 %v19454_v23  ;;  %12998 = vmatprep.subr.bf16.mxu0 %v17352_v8  ;;  %v17368_v23 = vld [vmem:[#allocation30 + $0x88] ss:$16 sps:$4 sm:$0xff]  }
0x1011   : > { %13039 = vmatprep.subr.bf16.mxu1 %v17355_v32  ;;  %v17416_v8 = vld [vmem:[#allocation30 + $0x188] ss:$16 sps:$4 sm:$0xff]  }
0x1012   : > { %12999 = vmatpush1.bf16.msra.mxu0 %v17350_v63  ;;  %v17419_v32 = vld [vmem:[#allocation30 + $0x388] ss:$16 sps:$4 sm:$0xff]   ;;  %v17424_v63 = vld [vmem:[#allocation30 + $0x1ac] ss:$16 sps:$4 sm:$0xff]  }
0x1013   : > { %13040 = vmatpush1.bf16.msra.mxu1 %v17353_v62  ;;  %13000 = vmatprep.subr.bf16.mxu0 %v17358_v0  ;;  %v17427_v62 = vld [vmem:[#allocation30 + $0x3ac] ss:$16 sps:$4 sm:$0xff]   ;;  %v17422_v0 = vld [vmem:[#allocation30 + $0x1a8] ss:$16 sps:$4 sm:$0xff]  }
0x1014   : > { %13041 = vmatprep.subr.bf16.mxu1 %v17361_v2  ;;  %v17425_v2 = vld [vmem:[#allocation30 + $0x3a8] ss:$16 sps:$4 sm:$0xff]  }
0x1016   : > { %13001 = vmatpush1.bf16.msra.mxu0 %v17356_v28  ;;  %v17430_v28 = vld [vmem:[#allocation30 + $0x1cc] ss:$16 sps:$4 sm:$0xff]  }
0x1017   : > { %13042 = vmatpush1.bf16.msra.mxu1 %v17359_v10  ;;  %13002 = vmatprep.subr.bf16.mxu0 %v17364_v31  ;;  %v17433_v10 = vld [vmem:[#allocation30 + $0x3cc] ss:$16 sps:$4 sm:$0xff]   ;;  %v17428_v31 = vld [vmem:[#allocation30 + $0x1c8] ss:$16 sps:$4 sm:$0xff]  }
0x1018   : > { %13043 = vmatprep.subr.bf16.mxu1 %v17367_v52  ;;  %v17431_v52 = vld [vmem:[#allocation30 + $0x3c8] ss:$16 sps:$4 sm:$0xff]  }
0x101a   : > { %13003 = vmatpush1.bf16.msra.mxu0 %v17362_v53  ;;  %v17436_v53 = vld [vmem:[#allocation30 + $0x1ec] ss:$16 sps:$4 sm:$0xff]  }
0x101b   : > { %13044 = vmatpush1.bf16.msra.mxu1 %v17365_v20  ;;  %13004 = vmatprep.subr.bf16.mxu0 %v17370_v17  ;;  %v17439_v20 = vld [vmem:[#allocation30 + $0x3ec] ss:$16 sps:$4 sm:$0xff]   ;;  %v17434_v17 = vld [vmem:[#allocation30 + $0x1e8] ss:$16 sps:$4 sm:$0xff]  }
0x101c   : > { %13045 = vmatprep.subr.bf16.mxu1 %v17373_v22  ;;  %v17437_v22 = vld [vmem:[#allocation30 + $0x3e8] ss:$16 sps:$4 sm:$0xff]  }
0x101e   : > { %13005 = vmatpush1.bf16.msra.mxu0 %v17368_v23  ;;  %v17440_v23 = vld [vmem:[#allocation33 + $0x40] sm:$0xff]  }
0x101f   : > { %13046 = vmatpush1.bf16.msra.mxu1 %v17371_v5  ;;  %13006 = vmatprep.subr.bf16.mxu0 %v17376_v19  ;;  %v17441_v5 = vld [vmem:[#allocation33] sm:$0xff]   ;;  %v17442_v19 = vld [vmem:[#allocation33 + $0x48] sm:$0xff]  }
0x1020   : > { %v11290_v61 = vpop.f32.mrb[72].mxu0  ;;  %v11331_v18 = vpop.f32.mrb[72].mxu1  ;;  %13047 = vmatprep.subr.bf16.mxu1 %v17379_v34  ;;  %v17443_v34 = vld [vmem:[#allocation33 + $0x8] sm:$0xff]  }
0x1021   : > { %v19475_v60 = vadd.f32 %v11331_v18, %v11290_v61  ;;  %v11292_v15 = vpop.f32.mrb[73].mxu0  ;;  %v11333_v37 = vpop.f32.mrb[73].mxu1  ;;  %v17447_v61 = vld [vmem:[#allocation33 + $0x18] sm:$0xff]   ;;  %v17448_v18 = vld [vmem:[#allocation33 + $0x60] sm:$0xff]  }
0x1022   : > { %v19477_v44 = vadd.f32 %v11333_v37, %v11292_v15  ;;  %v11294_v38 = vpop.f32.mrb[74].mxu0  ;;  %v11335_v59 = vpop.f32.mrb[74].mxu1  ;;  %13007 = vmatpush1.bf16.msra.mxu0 %v17374_v24  ;;  %v17444_v24 = vld [vmem:[#allocation33 + $0x50] sm:$0xff]  }
0x1023   : > { %13048 = vmatpush1.bf16.msra.mxu1 %v17377_v25  ;;  %v11295_v4 = vpop.f32.mrb[75].mxu0  ;;  %v11336_v40 = vpop.f32.mrb[75].mxu1  ;;  %13008 = vmatprep.subr.bf16.mxu0 %v17382_v16  ;;  %v17445_v25 = vld [vmem:[#allocation33 + $0x10] sm:$0xff]   ;;  %v17446_v16 = vld [vmem:[#allocation33 + $0x58] sm:$0xff]   ;;  %v17450_v38 = vld [vmem:[#allocation33 + $0x68] sm:$0xff]  }
0x1024   : > { %13049 = vmatprep.subr.bf16.mxu1 %v17385_v33  ;;  %v17449_v33 = vld [vmem:[#allocation33 + $0x20] sm:$0xff]   ;;  %v17451_v40 = vld [vmem:[#allocation33 + $0x28] sm:$0xff]  }
0x1026   : > { %13009 = vmatpush1.bf16.msra.mxu0 %v17380_v55 }
0x1027   : > { %13050 = vmatpush1.bf16.msra.mxu1 %v17383_v48  ;;  %13010 = vmatprep.subr.bf16.mxu0 %v17388_v27 }
0x1028   : > { %13051 = vmatprep.subr.bf16.mxu1 %v17391_v30 }
0x102a   : > { %13011 = vmatpush1.bf16.msra.mxu0 %v17386_v11 }
0x102b   : > { %13052 = vmatpush1.bf16.msra.mxu1 %v17389_v43  ;;  %13012 = vmatprep.subr.bf16.mxu0 %v17394_v21  ;;  %v17452_v21 = vld [vmem:[#allocation33 + $0x70] sm:$0xff]  }
0x102c   : > { %13053 = vmatprep.subr.bf16.mxu1 %v17397_v51  ;;  %v17453_v51 = vld [vmem:[#allocation33 + $0x30] sm:$0xff]  }
0x102e   : > { %13013 = vmatpush1.bf16.msra.mxu0 %v17392_v9  ;;  %v17455_v9 = vld [vmem:[#allocation33 + $0x38] sm:$0xff]  }
0x102f   : > { %13054 = vmatpush1.bf16.msra.mxu1 %v17395_v13  ;;  %13014 = vmatprep.subr.bf16.mxu0 %v17400_v46  ;;  %v17457_v13 = vld [vmem:[#allocation33 + $0x80] sm:$0xff]   ;;  %v17458_v46 = vld [vmem:[#allocation33 + $0xc8] sm:$0xff]  }
0x1030   : > { %13055 = vmatprep.subr.bf16.mxu1 %v17403_v29  ;;  %v17459_v29 = vld [vmem:[#allocation33 + $0x88] sm:$0xff]  }
0x1032   : > { %13015 = vmatpush1.bf16.msra.mxu0 %v17398_v26  ;;  %v17460_v26 = vld [vmem:[#allocation33 + $0xd0] sm:$0xff]  }
0x1033   : > { %13056 = vmatpush1.bf16.msra.mxu1 %v17401_v41  ;;  %13016 = vmatprep.subr.bf16.mxu0 %v17406_v35  ;;  %v17461_v41 = vld [vmem:[#allocation33 + $0x90] sm:$0xff]   ;;  %v17462_v35 = vld [vmem:[#allocation33 + $0xd8] sm:$0xff]  }
0x1034   : > { %13057 = vmatprep.subr.bf16.mxu1 %v17409_v39  ;;  %v17463_v39 = vld [vmem:[#allocation33 + $0x98] sm:$0xff]  }
0x1036   : > { %13017 = vmatpush1.bf16.msra.mxu0 %v17404_v12  ;;  %v17464_v12 = vld [vmem:[#allocation33 + $0xe0] sm:$0xff]  }
0x1037   : > { %13058 = vmatpush1.bf16.msra.mxu1 %v17407_v6  ;;  %13018 = vmatprep.subr.bf16.mxu0 %v17412_v47  ;;  %v17465_v6 = vld [vmem:[#allocation33 + $0xa0] sm:$0xff]  }
0x1038   : > { %13059 = vmatprep.subr.bf16.mxu1 %v17415_v36 }
0x103a   : > { %13019 = vmatpush1.bf16.msra.mxu0 %v17410_v3 }
0x103b   : > { %13060 = vmatpush1.bf16.msra.mxu1 %v17413_v54  ;;  %13020 = vmatprep.subr.bf16.mxu0 %v17418_v56  ;;  %v17466_v56 = vld [vmem:[#allocation33 + $0xe8] sm:$0xff]  }
0x103c   : > { %13061 = vmatprep.subr.bf16.mxu1 %v17421_v58 }
0x103e   : > { %13021 = vmatpush1.bf16.msra.mxu0 %v17416_v8 }
0x103f   : > { %13062 = vmatpush1.bf16.msra.mxu1 %v17419_v32  ;;  %13022 = vmatprep.subr.bf16.mxu0 %v17424_v63  ;;  %v17467_v63 = vld [vmem:[#allocation33 + $0xa8] sm:$0xff]  }
0x1040   : > { %13063 = vmatprep.subr.bf16.mxu1 %v17427_v62 }
0x1042   : > { %13023 = vmatpush1.bf16.msra.mxu0 %v17422_v0 }
0x1043   : > { %13064 = vmatpush1.bf16.msra.mxu1 %v17425_v2  ;;  %13024 = vmatprep.subr.bf16.mxu0 %v17430_v28 }
0x1044   : > { %13065 = vmatprep.subr.bf16.mxu1 %v17433_v10 }
0x1046   : > { %13025 = vmatpush1.bf16.msra.mxu0 %v17428_v31  ;;  %v17468_v31 = vld [vmem:[#allocation33 + $0xf0] sm:$0xff]  }
0x1047   : > { %13066 = vmatpush1.bf16.msra.mxu1 %v17431_v52  ;;  %13026 = vmatprep.subr.bf16.mxu0 %v17436_v53  ;;  %v17469_v52 = vld [vmem:[#allocation33 + $0xb0] sm:$0xff]   ;;  %v17471_v53 = vld [vmem:[#allocation33 + $0xb8] sm:$0xff]  }
0x1048   : > { %13067 = vmatprep.subr.bf16.mxu1 %v17439_v20  ;;  %v13082_v20 = vld [vmem:[#allocation31] sm:$0xf] }
0x104a   : > { %13027 = vmatpush1.bf16.msra.mxu0 %v17434_v17 }
0x104b   : > { %13068 = vmatpush1.bf16.msra.mxu1 %v17437_v22  ;;  %15309 = vmatprep.subr.bf16.mxu0 %v17440_v23 }
0x104d   : > { %13029 = vmatmul.mubr.bf16.vlgmr.msra.gmra.mrb[88].mxu0 %v19465_v57 }
0x104e   : > { %13070 = vmatmul.mubr.bf16.vlgmr.msra.gmra.mrb[88].mxu1 %v19469_v14  ;;  %15310 = vmatpush3.bf16.msra.mxu0 %v17441_v5  ;;  %v13087_v5 = vrot.slane %v13082_v20, %v19022_v42 }
0x104f   : > { %15311 = vmatprep.subr.bf16.mxu0 %v17442_v19 }
0x1052   : > { %15312 = vmatpush3.bf16.msra.mxu0 %v17443_v34 }
0x1053   : > { %15313 = vmatprep.subr.bf16.mxu0 %v17444_v24 }
0x1056   : > { %15314 = vmatpush3.bf16.msra.mxu0 %v17445_v25  ;;  %v13091_v25 = vrot.slane %v13082_v20, %v19028_v49  ;;  %v13095_v49 = vrot.slane %v13082_v20, %v19025_v45 }
0x1057   : > { %15315 = vmatprep.subr.bf16.mxu0 %v17446_v16 }
0x105a   : > { %15316 = vmatpush3.bf16.msra.mxu0 %v17447_v61 }
0x105b   : > { %15317 = vmatprep.subr.bf16.mxu0 %v17448_v18 }
0x105e   : > { %15318 = vmatpush3.bf16.msra.mxu0 %v17449_v33 }
0x105f   : > { %15319 = vmatprep.subr.bf16.mxu0 %v17450_v38 }
0x1060   : > { %v12012_v15 = vpop.f32.mrb[76].mxu0 }
0x1061   : > { %v12013_v57 = vadd.f32 %v12012_v15, %v19459_v1  ;;  %v12053_v14 = vpop.f32.mrb[76].mxu1  ;;  %v12014_v37 = vpop.f32.mrb[77].mxu0  ;;  %v17454_v1 = vld [vmem:[#allocation33 + $0x78] sm:$0xff]  }
0x1062   : > { %v12015_v59 = vadd.f32 %v12014_v37, %v19461_v7  ;;  %v12055_v55 = vpop.f32.mrb[77].mxu1  ;;  %v12016_v4 = vpop.f32.mrb[78].mxu0  ;;  %15320 = vmatpush3.bf16.msra.mxu0 %v17451_v40  ;;  %v17456_v7 = vld [vmem:[#allocation33 + $0xc0] sm:$0xff]  }
0x1063   : > { %v19483_v48 = vadd.f32 %v12053_v14, %v12013_v57  ;;  %v12057_v27 = vpop.f32.mrb[78].mxu1  ;;  %v12017_v30 = vpop.f32.mrb[79].mxu0  ;;  %15321 = vmatprep.subr.bf16.mxu0 %v17452_v21  ;;  %15331 = vmatprep.subr.bf16.mxu1 %v17456_v7 }
0x1064   : > { %v19485_v11 = vadd.f32 %v12055_v55, %v12015_v59  ;;  %v12058_v43 = vpop.f32.mrb[79].mxu1  ;;  %15332 = vmatpush3.bf16.msra.mxu1 %v17457_v13 }
0x1065   : > { %15333 = vmatprep.subr.bf16.mxu1 %v17458_v46 }
0x1066   : > { %15322 = vmatpush3.bf16.msra.mxu0 %v17453_v51 }
0x1067   : > { %15323 = vmatprep.subr.bf16.mxu0 %v17454_v1 }
0x1068   : > { %15334 = vmatpush3.bf16.msra.mxu1 %v17459_v29 }
0x1069   : > { %15335 = vmatprep.subr.bf16.mxu1 %v17460_v26 }
0x106a   : > { %15324 = vmatpush3.bf16.msra.mxu0 %v17455_v9 }
0x106c   : > { %15336 = vmatpush3.bf16.msra.mxu1 %v17461_v41 }
0x106d   : > { %15337 = vmatprep.subr.bf16.mxu1 %v17462_v35 }
0x1070   : > { %15338 = vmatpush3.bf16.msra.mxu1 %v17463_v39 }
0x1071   : > { %15339 = vmatprep.subr.bf16.mxu1 %v17464_v12 }
0x1074   : > { %15340 = vmatpush3.bf16.msra.mxu1 %v17465_v6 }
0x1075   : > { %15341 = vmatprep.subr.bf16.mxu1 %v17466_v56 }
0x1078   : > { %15342 = vmatpush3.bf16.msra.mxu1 %v17467_v63 }
0x1079   : > { %15343 = vmatprep.subr.bf16.mxu1 %v17468_v31 }
0x107c   : > { %15344 = vmatpush3.bf16.msra.mxu1 %v17469_v52 }
0x10a0   : > { %v12094_v47 = vpop.f32.mrb[80].mxu0 }
0x10a1   : > { %v12095_v36 = vadd.f32 %v12094_v47, %v19475_v60  ;;  %v12135_v3 = vpop.f32.mrb[80].mxu1  ;;  %v12096_v54 = vpop.f32.mrb[81].mxu0  ;;  %v17470_v60 = vld [vmem:[#allocation33 + $0xf8] sm:$0xff]  }
0x10a2   : > { %v12097_v58 = vadd.f32 %v12096_v54, %v19477_v44  ;;  %v12137_v8 = vpop.f32.mrb[81].mxu1  ;;  %v12098_v32 = vpop.f32.mrb[82].mxu0  ;;  %15345 = vmatprep.subr.bf16.mxu1 %v17470_v60 }
0x10a3   : > { %v12136_v62 = vadd.f32 %v12135_v3, %v12095_v36  ;;  %v12139_v0 = vpop.f32.mrb[82].mxu1  ;;  %v12099_v2 = vpop.f32.mrb[83].mxu0  ;;  %15346 = vmatpush3.bf16.msra.mxu1 %v17471_v53 }
0x10a4   : > { %v12138_v28 = vadd.f32 %v12137_v8, %v12097_v58  ;;  %v12140_v10 = vpop.f32.mrb[83].mxu1 }
0x10e0   : > { %v12948_v44 = vpop.f32.mrb[84].mxu0 }
0x10e1   : > { %v12989_v17 = vpop.f32.mrb[84].mxu1  ;;  %v12950_v22 = vpop.f32.mrb[85].mxu0 }
0x10e2   : > { %v12990_v23 = vadd.f32 %v12989_v17, %v12948_v44  ;;  %v12991_v19 = vpop.f32.mrb[85].mxu1  ;;  %v12952_v34 = vpop.f32.mrb[86].mxu0 }
0x10e3   : > { %v12992_v24 = vadd.f32 %v12991_v19, %v12950_v22  ;;  %v12993_v16 = vpop.f32.mrb[86].mxu1  ;;  %v12953_v61 = vpop.f32.mrb[87].mxu0 }
0x10e4   : > { %v13078_v18 = vadd.f32 %v12990_v23, %v19483_v48  ;;  %v12994_v33 = vpop.f32.mrb[87].mxu1 }
0x10e5   : > { %v13079_v15 = vadd.f32 %v12992_v24, %v19485_v11  ;;  %v13099_v11 = vrot.slane %v13082_v20, %v19031_v50 }
0x10e6   : > { %v13104_v57 = vadd.f32 %v13087_v5, %v13078_v18 }
0x10e7   : > { %v13105_v14 = vadd.f32 %v13091_v25, %v13079_v15 }
0x10e8   : > { %v13108_v37 = vmax.f32 %v13104_v57, 0.0 }
0x10e9   : > { %v13109_v38 = vmax.f32 %v13105_v14, 0.0 }
0x10ea   : > { %v13112_v55 = vpack.c.bf16 %v13108_v37, %v13108_v37 }
0x10eb   : > { %v13113_v59 = vpack.c.bf16 %v13109_v38, %v13109_v38 }
0x10ed   : > { %13405 = vmatprep.mubr.bf16.mxu0 %v13113_v59 }
0x10ee   : > { %13406 = vmatmul.mubr.bf16.vlgmr.msra.gmra.mrb[92].mxu0 %v13112_v55 }
0x1120   : > { %v13030_v42 = vpop.f32.mrb[88].mxu0 }
0x1121   : > { %v13071_v4 = vpop.f32.mrb[88].mxu1  ;;  %v13032_v40 = vpop.f32.mrb[89].mxu0 }
0x1122   : > { %v13072_v27 = vadd.f32 %v13071_v4, %v13030_v42  ;;  %v13073_v30 = vpop.f32.mrb[89].mxu1  ;;  %v13034_v43 = vpop.f32.mrb[90].mxu0 }
0x1123   : > { %v13074_v48 = vadd.f32 %v13073_v30, %v13032_v40  ;;  %v13075_v21 = vpop.f32.mrb[90].mxu1  ;;  %v13035_v51 = vpop.f32.mrb[91].mxu0 }
0x1124   : > { %v13080_v1 = vadd.f32 %v13072_v27, %v12136_v62  ;;  %v13076_v9 = vpop.f32.mrb[91].mxu1 }
0x1125   : > { %v13081_v7 = vadd.f32 %v13074_v48, %v12138_v28 }
0x1126   : > { %v13106_v13 = vadd.f32 %v13095_v49, %v13080_v1 }
0x1127   : > { %v13107_v46 = vadd.f32 %v13099_v11, %v13081_v7 }
0x1128   : > { %v13110_v29 = vmax.f32 %v13106_v13, 0.0 }
0x1129   : > { %v13111_v26 = vmax.f32 %v13107_v46, 0.0 }
0x112a   : > { %v13114_v45 = vpack.c.bf16 %v13110_v29, %v13110_v29 }
0x112b   : > { %v13115_v41 = vpack.c.bf16 %v13111_v26, %v13111_v26 }
0x112d   : > { %13445 = vmatprep.mubr.bf16.mxu1 %v13115_v41 }
0x112e   : > { %13446 = vmatmul.mubr.bf16.vlgmr.msra.gmra.mrb[92].mxu1 %v13114_v45 }
0x112f   : > { %18100 = shalt.err (!%p18097_p9)
}
0x1130   : > { %s18101_s12 = scalar_lea.hbm %s19499_s29, 512  ;;  %s18105_s15 = scalar_lea.hbm %s19699_s5, 1024 }
0x1131   : > { %p18102_p0 = scmp.ne.s32.totalorder %s19499_s29, %s18101_s12  ;;  %p18106_p1 = scmp.lt.u32.totalorder %s19499_s29, %s19699_s5 }
0x1132   : > { %p18107_p2 = scmp.lt.u32.totalorder %s18105_s15, %s18101_s12  ;;  %p18109_p6 = scmp.lt.u32.totalorder %s18101_s12, %s19499_s29 }
0x1133   : > { %p18103_p11 = pnand %p18102_p0, %p19700_p5 }
0x1134   : > { %p18108_p4 = por %p18107_p2, %p18106_p1 }
0x1135   : > { %p18104_p12 = pneg %p18103_p11 }
0x1136   : > { %p18110_p7 = por %p18109_p6, %p18108_p4 }
0x1138   : > { %p18111_p13 = pnand %p18110_p7, %p18104_p12 }
0x113a   : > { %18114 = shalt.err (!%p18111_p13)
}
0x113b   : > { %15537 = dma.vmem_to_hbm [thread:$0]  (%p19700_p5), %s13474_s0, 512, %s19499_s29, %s13455_s6   ;;  %v13180_v47 = vld [vmem:[#allocation34] sm:$0x1] }
0x113c   : > { %s15288_s7 = sshll.u32 %s19679_s25, 4  ;;  %s962_s30 = scalar_lea.vmem [#allocation37], %s18926_s9 }
0x113d   : > { %s13486_s21 = sshll.u32 %s962_s30, 4  ;;  %s19701_s0 = sld [smem:[#allocation75_spill]]  ;;  %s19527_s21 = int_to_ptr.vmem [resolvable:$true] %s13486_s21 }
0x113e   : > { %s13460_s12 = scalar_lea.sflag [#allocation38], %s18926_s9  ;;  %s18115_s25 = scalar_lea.vmem %s19527_s21, 16 }
0x113f   : > { %p18116_p8 = scmp.ne.s32.totalorder %s19527_s21, %s18115_s25  ;;  %s18268_s1 = smov [#allocation37]  }
0x1140   : > { %s18119_s2 = sshll.u32 %s18268_s1, 4  ;;  %s18120_s2 = int_to_ptr.vmem [resolvable:$false] %s18119_s2 }
0x1141   : > { %p18117_p10 = pnand %p18116_p8, %p19700_p5  ;;  %s18121_s15 = scalar_lea.vmem %s18120_s2, 32 }
0x1142   : > { %p18122_p9 = scmp.lt.s32.totalorder %s19527_s21, %s18120_s2  ;;  %p18123_p0 = scmp.lt.s32.totalorder %s18121_s15, %s18115_s25 }
0x1143   : > { %s19525_s6 = scalar_lea.hbm %s19701_s0, %s15288_s7  ;;  %p18118_p3 = pneg %p18117_p10 }
0x1144   : > { %p18124_p11 = por %p18123_p0, %p18122_p9 }
0x1146   : > { %p18125_p12 = pnand %p18124_p11, %p18118_p3 }
0x11c1   : > { %v15325_v50 = vpop.f32.mrb[92].mxu0 }
0x11c2   : > { %v15326_v35 = vpop.f32.mrb[93].mxu0 }
0x11c3   : > { %v15327_v39 = vadd.f32 %v15326_v35, %v15325_v50  ;;  %v15328_v12 = vpop.f32.mrb[94].mxu0 }
0x11c4   : > { %v15329_v6 = vpop.f32.mrb[95].mxu0 }
0x11c5   : > { %v13408_v54 = vadd.f32 %v15327_v39, %v13180_v47 }
0x1201   : > { %v15347_v36 = vpop.f32.mrb[92].mxu1 }
0x1202   : > { %v15348_v3 = vpop.f32.mrb[93].mxu1 }
0x1203   : > { %v15349_v56 = vadd.f32 %v15348_v3, %v15347_v36  ;;  %v15350_v58 = vpop.f32.mrb[94].mxu1 }
0x1204   : > { %v15351_v8 = vpop.f32.mrb[95].mxu1 }
0x1205   : > { %v13448_v32 = vadd.f32 %v15349_v56, %v13408_v54 }
0x1207   : > { %13453 = vst [vmem:[%s962_s30] sm:$0x1] %v13448_v32 }
0x1208   : > { %18128 = shalt.err (!%p18125_p12)
}
0x1209   : > { %s18129_s9 = scalar_lea.hbm %s19525_s6, 16  ;;  %s18133_s7 = scalar_lea.hbm %s19701_s0, 32 }
0x120a   : > { %p18130_p1 = scmp.ne.s32.totalorder %s19525_s6, %s18129_s9  ;;  %p18134_p6 = scmp.lt.u32.totalorder %s19525_s6, %s19701_s0 }
0x120b   : > { %p18135_p7 = scmp.lt.u32.totalorder %s18133_s7, %s18129_s9  ;;  %p18137_p8 = scmp.lt.u32.totalorder %s18129_s9, %s19525_s6 }
0x120c   : > { %p18131_p2 = pnand %p18130_p1, %p19700_p5 }
0x120d   : > { %p18136_p13 = por %p18135_p7, %p18134_p6 }
0x120e   : > { %p18132_p4 = pneg %p18131_p2 }
0x120f   : > { %p18138_p10 = por %p18137_p8, %p18136_p13 }
0x1211   : > { %p18139_p3 = pnand %p18138_p10, %p18132_p4 }
0x1213   : > { %18142 = shalt.err (!%p18139_p3)
}
0x1214   : > { %15538 = dma.vmem_to_hbm [thread:$0]  (%p19700_p5), %s19527_s21, 16, %s19525_s6, %s13460_s12  }
0x1215 PF: > { %s19702_s29 = sld [smem:[#allocation54_spill]]  ;;  %s19703_s25 = sld [smem:[#allocation57_spill]] }
0x1216   : > { %p19704_p9 = scmp.ne.s32.totalorder %s19670_s10, 0 }
0x121b   : > { %s13498_s1 = sand.u32 1, %s19702_s29   ;;  %p19705_p0 = scmp.ge.s32.totalorder %s19703_s25, 2 }
0x121c   : > { %s13499_s2 = scalar_lea.sflag [#allocation6], %s13498_s1 }
0x121d   : > { %p15604_p11 = pnand %p19705_p0, %p19704_p9 }
0x121f   : > { %18210 = dma.done.wait (!%p15604_p11), %s13499_s2, 512  }
0x1220   : > { %18212 = vsyncadd (!%p15604_p11), %s13499_s2, 4294966784  ;;  %s13508_s15 = scalar_lea.sflag [#allocation38], %s13498_s1 }
0x1221   : > { %18214 = dma.done.wait (!%p15604_p11), %s13508_s15, 16  }
0x1222   : > { %18216 = vsyncadd (!%p15604_p11), %s13508_s15, 4294967280  ;;  %s19706_s15 = sld [smem:[#allocation55_spill]]  ;;  %s19707_s6 = sld [smem:[#allocation56_spill]] }
0x1223   : > { %p55_p5 = scmp.ge.s32.totalorder %s18817_s26, 4   ;;  %s19708_s25 = smov %s18828_s3 }
0x1225   :  { %57 = sbr.rel (!%p55_p5) target bundleno = 44 (0x2c), region = 247 }
0x122c   :  { %13512 = vsyncpa [#allocation5], 1 }
0x122d   :  { %13514 = vsyncpa [#allocation5 + $0x1], 1 }
0x122e   :  { %13515 = vsyncpa [#allocation8], 1 }
0x122f   :  { %13517 = vsyncpa [#allocation8 + $0x1], 1 }
0x1230   :  { %13518 = vsyncpa [#allocation11], 1 }
0x1231   :  { %13519 = vsyncpa [#allocation14], 1 }
0x1232   :  { %13520 = vsyncpa [#allocation17], 1 }
0x1233   :  { %13521 = vsyncpa [#allocation20], 1 }
0x1234   :  { %13522 = vsyncpa [#allocation23], 1 }
0x1235   :  { %13523 = vsyncpa [#allocation26], 1 }
0x1236   :  { %13524 = vsyncpa [#allocation29], 1 }
0x1237   :  { %13525 = vsyncpa [#allocation32], 1 }
0x1238   :  { %13526 = vsyncpa [#allocation35], 1 }
0x1239   :  { %13527 = vsyncpa [#allocation6], 1 }
0x123a   :  { %13529 = vsyncpa [#allocation6 + $0x1], 1 }
0x123b   :  { %13530 = vsyncpa [#allocation38], 1 }
0x123c   :  { %13532 = vsyncpa [#allocation38 + $0x1], 1 }

</bundles_post_ra>
